<compile_context>
chip_gen: v5e
topology: v5e:2x2
jax: 0.10.0
libtpu: 0.0.40
codegen_flags: <defaults>
</compile_context>

<pallas_src>
import jax
import jax.numpy as jnp
from jax.experimental import pallas as pl
from jax.experimental.pallas import tpu as pltpu


# ---------------------------------------------------------------------------
# Fused attention kernel: one grid step == one tile of 8 batch rows
# ---------------------------------------------------------------------------
def attention_kernel(h_ref, e_ref, m_ref, wh_ref, we_ref, b_ref, v_ref, o_ref):
    """Additive attention scores + masked softmax for one batch tile.

    h_ref : (TB, D)    f32   decoder hidden state
    e_ref : (TB, T, D) f32   encoder outputs
    m_ref : (TB, T)    int32 valid mask (1 = keep, 0 = fill with -1e10)
    wh_ref: (D, A)     bf16  hidden half of attention weight   (pre-transposed)
    we_ref: (D, A)     bf16  e_output half of attention weight (pre-transposed)
    b_ref : (1, A)     f32   attention bias
    v_ref : (1, A)     f32   scoring vector (Linear(A, 1, bias=False) weight)
    o_ref : (TB, T)    f32   softmax(scores) over T
    """
    TB, T, D = e_ref.shape
    A = wh_ref.shape[1]

    # Hidden projection: computed once per batch row (replaces hidden.repeat).
    gh = jnp.dot(h_ref[...].astype(jnp.bfloat16), wh_ref[...],
                 preferred_element_type=jnp.float32) + b_ref[...]        # (TB, A)

    # Encoder-output projection as a plain 2-D MXU matmul on the flattened
    # (TB*T, D) view (T is a multiple of the 8-sublane tile -> free reshape).
    e2 = e_ref[...].reshape(TB * T, D).astype(jnp.bfloat16)
    ge = jnp.dot(e2, we_ref[...], preferred_element_type=jnp.float32)    # (TB*T, A)
    ge = ge.reshape(TB, T, A)

    energy = jnp.tanh(ge + gh[:, None, :])                               # (TB, T, A) f32

    # v-projection as multiply + lane reduce (avoids a (.,1)-shaped matmul
    # result that would need a relayout).
    scores = jnp.sum(energy * v_ref[...][None], axis=-1)                 # (TB, T)

    # masked_fill(mask == False, -1e10)
    valid = m_ref[...] > 0
    scores = jnp.where(valid, scores, jnp.float32(-1e10))

    # Softmax over T (masked entries underflow to exactly 0).
    mx = jnp.max(scores, axis=-1, keepdims=True)
    ex = jnp.exp(scores - mx)
    denom = jnp.sum(ex, axis=-1, keepdims=True)
    o_ref[...] = (ex / denom).astype(o_ref.dtype)


# ---------------------------------------------------------------------------
# Wrapper: pad batch to the 8-sublane granule, tile the batch axis
# ---------------------------------------------------------------------------
def attention_forward(params, hidden, e_output, mask, *, tb=8):
    """hidden: (B, D) f32, e_output: (B, T, D) f32, mask: (B, T) bool -> (B, T)."""
    B, T, D = e_output.shape
    A = params["b_attn"].shape[0]

    # Pad batch so every vreg sublane / MXU row is used; padded rows are fully
    # masked (harmless: uniform softmax, sliced away below).
    b_pad = (-B) % tb
    if b_pad:
        hidden = jnp.pad(hidden, ((0, b_pad), (0, 0)))
        e_output = jnp.pad(e_output, ((0, b_pad), (0, 0), (0, 0)))
        mask = jnp.pad(mask, ((0, b_pad), (0, 0)))
    Bp = B + b_pad

    wh_bf16 = params["w_h_t"].astype(jnp.bfloat16)   # (D, A) MXU-native dtype
    we_bf16 = params["w_e_t"].astype(jnp.bfloat16)   # (D, A)
    bias = params["b_attn"].reshape(1, A).astype(jnp.float32)
    v = params["v_t"].reshape(1, A).astype(jnp.float32)
    mask_i = mask.astype(jnp.int32)

    out = pl.pallas_call(
        attention_kernel,
        out_shape=jax.ShapeDtypeStruct((Bp, T), jnp.float32),
        grid_spec=pltpu.PrefetchScalarGridSpec(
            num_scalar_prefetch=0,
            grid=(Bp // tb,),
            in_specs=[
                pl.BlockSpec((tb, D), lambda i: (i, 0)),        # hidden
                pl.BlockSpec((tb, T, D), lambda i: (i, 0, 0)),  # e_output
                pl.BlockSpec((tb, T), lambda i: (i, 0)),        # mask
                pl.BlockSpec((D, A), lambda i: (0, 0)),         # W_h^T (resident)
                pl.BlockSpec((D, A), lambda i: (0, 0)),         # W_e^T (resident)
                pl.BlockSpec((1, A), lambda i: (0, 0)),         # bias
                pl.BlockSpec((1, A), lambda i: (0, 0)),         # v
            ],
            out_specs=pl.BlockSpec((tb, T), lambda i: (i, 0)),
        ),
        compiler_params=pltpu.CompilerParams(
            dimension_semantics=("parallel",)),   # independent batch tiles
    )(hidden.astype(jnp.float32), e_output.astype(jnp.float32), mask_i,
      wh_bf16, we_bf16, bias, v)

    return out[:B]


# ---------------------------------------------------------------------------
# Pure-JAX reference (matches the PyTorch forward exactly, in f32)
# ---------------------------------------------------------------------------
def attention_ref(params, hidden, e_output, mask):
    B, T, D = e_output.shape
    h_rep = jnp.broadcast_to(hidden[:, None, :], (B, T, D))
    cat = jnp.concatenate([h_rep, e_output], axis=-1)                     # (B, T, 2D)
    w_t = jnp.concatenate([params["w_h_t"], params["w_e_t"]], axis=0)     # (2D, A)
    energy = jnp.tanh(cat @ w_t + params["b_attn"])                       # (B, T, A)
    scores = energy @ params["v_t"]                                       # (B, T)
    scores = jnp.where(mask, scores, -1e10)
    return jax.nn.softmax(scores, axis=1)


# ---------------------------------------------------------------------------
# Deterministic parameter construction (synthetic, not a checkpoint load)
# ---------------------------------------------------------------------------
def init_params(key, d_model):
    A = d_model                       # attention: Linear(2*d_model -> d_model)
    k1, k2, k3, k4 = jax.random.split(key, 4)
    s_attn = 1.0 / jnp.sqrt(2.0 * d_model)
    s_v = 1.0 / jnp.sqrt(float(d_model))

    def u(k, shape, s):
        return jax.random.uniform(k, shape, jnp.float32, -s, s)

    return {
        # nn.Linear(2D, A) weight split into its [hidden | e_output] halves,
        # stored pre-transposed for x @ W^T.
        "w_h_t": u(k1, (d_model, A), s_attn),
        "w_e_t": u(k2, (d_model, A), s_attn),
        "b_attn": u(k3, (A,), s_attn),
        # nn.Linear(A, 1, bias=False) weight as a vector.
        "v_t": u(k4, (A,), s_v),
    }


if __name__ == "__main__":
    D = 1024                          # module hard-codes 1024 (= 2 * enc hidden)
    B, T = 2, 8                       # small batch / sequence

    key = jax.random.PRNGKey(0)
    k_p, k_h, k_e = jax.random.split(key, 3)
    params = init_params(k_p, D)

    hidden = jax.random.normal(k_h, (B, D), jnp.float32)
    e_output = jax.random.normal(k_e, (B, T, D), jnp.float32)
    lengths = jnp.array([T, 5], dtype=jnp.int32)
    mask = jnp.arange(T)[None, :] < lengths[:, None]          # (B, T) bool

    attn = jax.jit(attention_forward)(params, hidden, e_output, mask)
    jax.block_until_ready(attn)

    assert attn.shape == (B, T) and attn.dtype == jnp.float32

    ref = attention_ref(params, hidden, e_output, mask)
    max_err = float(jnp.max(jnp.abs(attn - ref)))
    row_err = float(jnp.max(jnp.abs(jnp.sum(attn, axis=1) - 1.0)))
    assert max_err < 2e-2, f"max abs err vs reference: {max_err}"
    assert row_err < 1e-4, f"softmax rows do not sum to 1: {row_err}"

    print("KERNEL_OK")
</pallas_src>

<mosaic_0001>
module attributes {stable_mosaic.version = 11 : i64} {
  func.func @attention_kernel(%arg0: i32, %arg1: memref<8x1024xf32, #tpu.memory_space<vmem>>, %arg2: memref<8x8x1024xf32, #tpu.memory_space<vmem>>, %arg3: memref<8x8xi32, #tpu.memory_space<vmem>>, %arg4: memref<1024x1024xbf16, #tpu.memory_space<vmem>>, %arg5: memref<1024x1024xbf16, #tpu.memory_space<vmem>>, %arg6: memref<1x1024xf32, #tpu.memory_space<vmem>>, %arg7: memref<1x1024xf32, #tpu.memory_space<vmem>>, %arg8: memref<8x8xf32, #tpu.memory_space<vmem>>) attributes {dimension_semantics = [#tpu.dimension_semantics<parallel>], iteration_bounds = array<i64: 1>, scalar_prefetch = 0 : i64, scratch_operands = 0 : i64, tpu.core_type = #tpu.core_type<tc>, window_params = [{transform_indices = @transform_0, window_bounds = array<i64: 8, 1024>}, {transform_indices = @transform_1, window_bounds = array<i64: 8, 8, 1024>}, {transform_indices = @transform_2, window_bounds = array<i64: 8, 8>}, {pipeline_mode = #tpu.pipeline_mode<synchronous>, transform_indices = @transform_3, window_bounds = array<i64: 1024, 1024>}, {pipeline_mode = #tpu.pipeline_mode<synchronous>, transform_indices = @transform_4, window_bounds = array<i64: 1024, 1024>}, {pipeline_mode = #tpu.pipeline_mode<synchronous>, transform_indices = @transform_5, window_bounds = array<i64: 1, 1024>}, {pipeline_mode = #tpu.pipeline_mode<synchronous>, transform_indices = @transform_6, window_bounds = array<i64: 1, 1024>}, {transform_indices = @transform_7, window_bounds = array<i64: 8, 8>}]} {
    %c0 = arith.constant 0 : index
    %c0_0 = arith.constant 0 : index
    %0 = vector.load %arg1[%c0, %c0_0] : memref<8x1024xf32, #tpu.memory_space<vmem>>, vector<8x1024xf32>
    %1 = arith.truncf %0 : vector<8x1024xf32> to vector<8x1024xbf16>
    %c0_1 = arith.constant 0 : index
    %c0_2 = arith.constant 0 : index
    %2 = vector.load %arg4[%c0_1, %c0_2] : memref<1024x1024xbf16, #tpu.memory_space<vmem>>, vector<1024x1024xbf16>
    %cst = arith.constant dense<0.000000e+00> : vector<8x1024xf32>
    %3 = tpu.matmul %1, %2, %cst {dimension_numbers = #tpu.dot_dimension_numbers<[1], [0], [0], [1], [0, 0, 1, 1], [], []>} : vector<8x1024xbf16>, vector<1024x1024xbf16>, vector<8x1024xf32> -> vector<8x1024xf32>
    %c0_3 = arith.constant 0 : index
    %c0_4 = arith.constant 0 : index
    %4 = vector.load %arg6[%c0_3, %c0_4] : memref<1x1024xf32, #tpu.memory_space<vmem>>, vector<1x1024xf32>
    %5 = vector.broadcast %4 : vector<1x1024xf32> to vector<8x1024xf32>
    %6 = arith.addf %3, %5 : vector<8x1024xf32>
    %c0_5 = arith.constant 0 : index
    %c0_6 = arith.constant 0 : index
    %c0_7 = arith.constant 0 : index
    %7 = vector.load %arg2[%c0_5, %c0_6, %c0_7] : memref<8x8x1024xf32, #tpu.memory_space<vmem>>, vector<8x8x1024xf32>
    %8 = vector.shape_cast %7 : vector<8x8x1024xf32> to vector<64x1024xf32>
    %9 = arith.truncf %8 : vector<64x1024xf32> to vector<64x1024xbf16>
    %c0_8 = arith.constant 0 : index
    %c0_9 = arith.constant 0 : index
    %10 = vector.load %arg5[%c0_8, %c0_9] : memref<1024x1024xbf16, #tpu.memory_space<vmem>>, vector<1024x1024xbf16>
    %cst_10 = arith.constant dense<0.000000e+00> : vector<64x1024xf32>
    %11 = tpu.matmul %9, %10, %cst_10 {dimension_numbers = #tpu.dot_dimension_numbers<[1], [0], [0], [1], [0, 0, 1, 1], [], []>} : vector<64x1024xbf16>, vector<1024x1024xbf16>, vector<64x1024xf32> -> vector<64x1024xf32>
    %12 = vector.shape_cast %11 : vector<64x1024xf32> to vector<8x8x1024xf32>
    %13 = vector.shape_cast %6 : vector<8x1024xf32> to vector<8x1x1024xf32>
    %14 = vector.broadcast %13 : vector<8x1x1024xf32> to vector<8x8x1024xf32>
    %15 = arith.addf %12, %14 : vector<8x8x1024xf32>
    %16 = math.tanh %15 : vector<8x8x1024xf32>
    %c0_11 = arith.constant 0 : index
    %c0_12 = arith.constant 0 : index
    %17 = vector.load %arg7[%c0_11, %c0_12] : memref<1x1024xf32, #tpu.memory_space<vmem>>, vector<1x1024xf32>
    %18 = vector.shape_cast %17 : vector<1x1024xf32> to vector<1x1x1024xf32>
    %19 = vector.broadcast %18 : vector<1x1x1024xf32> to vector<8x8x1024xf32>
    %20 = arith.mulf %16, %19 : vector<8x8x1024xf32>
    %cst_13 = arith.constant dense<0.000000e+00> : vector<8x8xf32>
    %21 = vector.multi_reduction <add>, %20, %cst_13 [2] : vector<8x8x1024xf32> to vector<8x8xf32>
    %c0_14 = arith.constant 0 : index
    %c0_15 = arith.constant 0 : index
    %22 = vector.load %arg3[%c0_14, %c0_15] : memref<8x8xi32, #tpu.memory_space<vmem>>, vector<8x8xi32>
    %c0_i32 = arith.constant 0 : i32
    %23 = vector.broadcast %c0_i32 : i32 to vector<8x8xi32>
    %24 = arith.cmpi sgt, %22, %23 : vector<8x8xi32>
    %cst_16 = arith.constant -1.000000e+10 : f32
    %25 = vector.broadcast %cst_16 : f32 to vector<8x8xf32>
    %26 = arith.select %24, %21, %25 : vector<8x8xi1>, vector<8x8xf32>
    %cst_17 = arith.constant dense<0xFF800000> : vector<8xf32>
    %27 = vector.multi_reduction <maximumf>, %26, %cst_17 [1] : vector<8x8xf32> to vector<8xf32>
    %28 = vector.shape_cast %27 : vector<8xf32> to vector<8x1xf32>
    %29 = vector.broadcast %28 : vector<8x1xf32> to vector<8x8xf32>
    %30 = arith.subf %26, %29 : vector<8x8xf32>
    %31 = math.exp %30 : vector<8x8xf32>
    %cst_18 = arith.constant dense<0.000000e+00> : vector<8xf32>
    %32 = vector.multi_reduction <add>, %31, %cst_18 [1] : vector<8x8xf32> to vector<8xf32>
    %33 = vector.shape_cast %32 : vector<8xf32> to vector<8x1xf32>
    %34 = vector.broadcast %33 : vector<8x1xf32> to vector<8x8xf32>
    %35 = arith.divf %31, %34 : vector<8x8xf32>
    %c0_19 = arith.constant 0 : index
    %c0_20 = arith.constant 0 : index
    %36 = vector.load %arg8[%c0_19, %c0_20] : memref<8x8xf32, #tpu.memory_space<vmem>>, vector<8x8xf32>
    tpu.vector_store %arg8[%c0_19, %c0_20], %35 {strides = array<i32>} : memref<8x8xf32, #tpu.memory_space<vmem>>, vector<8x8xf32>,
    return
  }
  func.func @transform_0(%arg0: i32) -> (i32, i32) {
    %c0_i32 = arith.constant 0 : i32
    %c0_i32_0 = arith.constant 0 : i32
    return %arg0, %c0_i32 : i32, i32
  }
  func.func @transform_1(%arg0: i32) -> (i32, i32, i32) {
    %c0_i32 = arith.constant 0 : i32
    %c0_i32_0 = arith.constant 0 : i32
    %c0_i32_1 = arith.constant 0 : i32
    return %arg0, %c0_i32, %c0_i32_0 : i32, i32, i32
  }
  func.func @transform_2(%arg0: i32) -> (i32, i32) {
    %c0_i32 = arith.constant 0 : i32
    %c0_i32_0 = arith.constant 0 : i32
    return %arg0, %c0_i32 : i32, i32
  }
  func.func @transform_3(%arg0: i32) -> (i32, i32) {
    %c0_i32 = arith.constant 0 : i32
    %c0_i32_0 = arith.constant 0 : i32
    %c0_i32_1 = arith.constant 0 : i32
    return %c0_i32, %c0_i32_0 : i32, i32
  }
  func.func @transform_4(%arg0: i32) -> (i32, i32) {
    %c0_i32 = arith.constant 0 : i32
    %c0_i32_0 = arith.constant 0 : i32
    %c0_i32_1 = arith.constant 0 : i32
    return %c0_i32, %c0_i32_0 : i32, i32
  }
  func.func @transform_5(%arg0: i32) -> (i32, i32) {
    %c0_i32 = arith.constant 0 : i32
    %c0_i32_0 = arith.constant 0 : i32
    %c0_i32_1 = arith.constant 0 : i32
    return %c0_i32, %c0_i32_0 : i32, i32
  }
  func.func @transform_6(%arg0: i32) -> (i32, i32) {
    %c0_i32 = arith.constant 0 : i32
    %c0_i32_0 = arith.constant 0 : i32
    %c0_i32_1 = arith.constant 0 : i32
    return %c0_i32, %c0_i32_0 : i32, i32
  }
  func.func @transform_7(%arg0: i32) -> (i32, i32) {
    %c0_i32 = arith.constant 0 : i32
    %c0_i32_0 = arith.constant 0 : i32
    return %arg0, %c0_i32 : i32, i32
  }
}

</mosaic_0001>

<bundles_post_ra>
// kernel: attention_forward.1
= control target key start
LH: loop header
LB: loop body
LE: loop exit
PB: predicated region body
PF: predicated region fallthrough
CT: control target
= control target key end

     0   :  { %vm22461_vm0 = vcmask 1042434   ;;  %vm9011_vm1 = vcmask 1046534   ;;  %vm9017_vm2 = vcmask 1041409   ;;  %vm9019_vm3 = vcmask 1043459   ;;  %s22446_s3 = inlined_call_operand.vmem [shape: bf16[1024,1024], index: 3, kind: input, shape index: {}]   ;;  %s22447_s0 = inlined_call_operand.vmem [shape: f32[8,1024], index: 0, kind: input, shape index: {}]   ;;  %s22448_s5 = inlined_call_operand.vmem [shape: f32[1,1024], index: 5, kind: input, shape index: {}]   ;;  %s22449_s4 = inlined_call_operand.vmem [shape: bf16[1024,1024], index: 4, kind: input, shape index: {}]   ;;  %s22450_s1 = inlined_call_operand.vmem [shape: f32[8,8,1024], index: 1, kind: input, shape index: {}]   ;;  %s22451_s6 = inlined_call_operand.vmem [shape: f32[1,1024], index: 6, kind: input, shape index: {}]   ;;  %s22452_s2 = inlined_call_operand.vmem [shape: s32[8,8], index: 2, kind: input, shape index: {}]   ;;  %s22453_s7 = inlined_call_operand.vmem [shape: f32[8,8], index: 7, kind: output, shape index: {}]  }
   0x1   :  { %v9782_v0 = vld [vmem:[%s22446_s3 + $0x1c0] sm:$0xf]  ;;  %vm9023_vm4 = vcmask 1045509   ;;  %vm9025_vm5 = vcmask 1046528   ;;  %vm9003_vm6 = vcmask 1040384   ;;  %vm9009_vm7 = vcmask 1044484  }
   0x2   :  { %v13712_v1 = vld [vmem:[%s22446_s3 + $0x1dc] sm:$0xf0]  ;;  %vm9021_vm8 = vcmask 1042433   ;;  %vm9027_vm9 = vcmask 1046533   ;;  %vm9034_vm10 = vcmask 1043458   ;;  %vm9038_vm11 = vcmask 1045504  }
   0x3   :  { %v10038_v2 = vld [vmem:[%s22446_s3 + $0x3c0] sm:$0xf]  ;;  %v9783_v3 = vor.u32 %v13712_v1, %v9782_v0  ;;  %vm22463_vm12 = vcmask 1044483   ;;  %vm9049_vm13 = vcmask 1046529   ;;  %vm22458_vm14 = vcmask 1041408  }
   0x4   :  { %v13776_v4 = vld [vmem:[%s22446_s3 + $0x3dc] sm:$0xf0]  ;;  %vm22462_vm15 = vcmask 1045508  }
   0x5   :  { %v10294_v5 = vld [vmem:[%s22446_s3 + $0x5c0] sm:$0xf]  ;;  %v10039_v7 = vor.u32 %v13776_v4, %v10038_v2  ;;  %3132 = vmatpush.bf16.msra.mxu0 %v9783_v3 }
   0x6   :  { %v13840_v6 = vld [vmem:[%s22446_s3 + $0x5dc] sm:$0xf0] }
   0x7   :  { %v10295_v8 = vor.u32 %v13840_v6, %v10294_v5  ;;  %v10550_v9 = vld [vmem:[%s22446_s3 + $0x7c0] sm:$0xf]  ;;  %3145 = vmatpush.bf16.msra.mxu1 %v10039_v7 }
   0x8   :  { %v13904_v10 = vld [vmem:[%s22446_s3 + $0x7dc] sm:$0xf0] }
   0x9   :  { %v9750_v11 = vld [vmem:[%s22446_s3 + $0x180] sm:$0xf]  ;;  %v10551_v12 = vor.u32 %v13904_v10, %v10550_v9  ;;  %3158 = vmatpush.bf16.msra.mxu2 %v10295_v8 }
   0xa   :  { %v13704_v13 = vld [vmem:[%s22446_s3 + $0x19c] sm:$0xf0] }
   0xb   :  { %v10006_v14 = vld [vmem:[%s22446_s3 + $0x380] sm:$0xf]  ;;  %v9751_v16 = vor.u32 %v13704_v13, %v9750_v11  ;;  %3171 = vmatpush.bf16.msra.mxu3 %v10551_v12 }
   0xc   :  { %v13768_v15 = vld [vmem:[%s22446_s3 + $0x39c] sm:$0xf0] }
   0xd   :  { %v10007_v17 = vor.u32 %v13768_v15, %v10006_v14  ;;  %v10262_v18 = vld [vmem:[%s22446_s3 + $0x580] sm:$0xf]  ;;  %3133 = vmatpush.bf16.msra.mxu0 %v9751_v16 }
   0xe   :  { %v13832_v19 = vld [vmem:[%s22446_s3 + $0x59c] sm:$0xf0] }
   0xf   :  { %v10518_v20 = vld [vmem:[%s22446_s3 + $0x780] sm:$0xf]  ;;  %v10263_v21 = vor.u32 %v13832_v19, %v10262_v18  ;;  %3146 = vmatpush.bf16.msra.mxu1 %v10007_v17 }
  0x10   :  { %v13896_v22 = vld [vmem:[%s22446_s3 + $0x79c] sm:$0xf0] }
  0x11   :  { %v9718_v23 = vld [vmem:[%s22446_s3 + $0x140] sm:$0xf]  ;;  %v10519_v25 = vor.u32 %v13896_v22, %v10518_v20  ;;  %3159 = vmatpush.bf16.msra.mxu2 %v10263_v21 }
  0x12   :  { %v13696_v24 = vld [vmem:[%s22446_s3 + $0x15c] sm:$0xf0] }
  0x13   :  { %v9974_v26 = vld [vmem:[%s22446_s3 + $0x340] sm:$0xf]  ;;  %v9719_v29 = vor.u32 %v13696_v24, %v9718_v23  ;;  %3172 = vmatpush.bf16.msra.mxu3 %v10519_v25 }
  0x14   :  { %v13760_v27 = vld [vmem:[%s22446_s3 + $0x35c] sm:$0xf0] }
  0x15   :  { %v10230_v28 = vld [vmem:[%s22446_s3 + $0x540] sm:$0xf]  ;;  %v9975_v33 = vor.u32 %v13760_v27, %v9974_v26  ;;  %3134 = vmatpush.bf16.msra.mxu0 %v9719_v29 }
  0x16   :  { %v13824_v30 = vld [vmem:[%s22446_s3 + $0x55c] sm:$0xf0] }
  0x17   :  { %v10486_v31 = vld [vmem:[%s22446_s3 + $0x740] sm:$0xf]  ;;  %v10231_v34 = vor.u32 %v13824_v30, %v10230_v28  ;;  %3147 = vmatpush.bf16.msra.mxu1 %v9975_v33 }
  0x18   :  { %v13888_v32 = vld [vmem:[%s22446_s3 + $0x75c] sm:$0xf0] }
  0x19   :  { %v9686_v35 = vld [vmem:[%s22446_s3 + $0x100] sm:$0xf]  ;;  %v10487_v38 = vor.u32 %v13888_v32, %v10486_v31  ;;  %3160 = vmatpush.bf16.msra.mxu2 %v10231_v34 }
  0x1a   :  { %v13688_v36 = vld [vmem:[%s22446_s3 + $0x11c] sm:$0xf0] }
  0x1b   :  { %v9942_v37 = vld [vmem:[%s22446_s3 + $0x300] sm:$0xf]  ;;  %v9687_v44 = vor.u32 %v13688_v36, %v9686_v35  ;;  %3173 = vmatpush.bf16.msra.mxu3 %v10487_v38 }
  0x1c   :  { %v13752_v39 = vld [vmem:[%s22446_s3 + $0x31c] sm:$0xf0] }
  0x1d   :  { %v10198_v40 = vld [vmem:[%s22446_s3 + $0x500] sm:$0xf]  ;;  %v9943_v45 = vor.u32 %v13752_v39, %v9942_v37  ;;  %3135 = vmatpush.bf16.msra.mxu0 %v9687_v44 }
  0x1e   :  { %v13816_v41 = vld [vmem:[%s22446_s3 + $0x51c] sm:$0xf0] }
  0x1f   :  { %v10454_v42 = vld [vmem:[%s22446_s3 + $0x700] sm:$0xf]  ;;  %v10199_v46 = vor.u32 %v13816_v41, %v10198_v40  ;;  %3148 = vmatpush.bf16.msra.mxu1 %v9943_v45 }
  0x20   :  { %v13880_v43 = vld [vmem:[%s22446_s3 + $0x71c] sm:$0xf0] }
  0x21   :  { %v9654_v47 = vld [vmem:[%s22446_s3 + $0xc0] sm:$0xf]  ;;  %v10455_v50 = vor.u32 %v13880_v43, %v10454_v42  ;;  %3161 = vmatpush.bf16.msra.mxu2 %v10199_v46 }
  0x22   :  { %v13680_v48 = vld [vmem:[%s22446_s3 + $0xdc] sm:$0xf0] }
  0x23   :  { %v9910_v49 = vld [vmem:[%s22446_s3 + $0x2c0] sm:$0xf]  ;;  %v9655_v56 = vor.u32 %v13680_v48, %v9654_v47  ;;  %3174 = vmatpush.bf16.msra.mxu3 %v10455_v50 }
  0x24   :  { %v13744_v51 = vld [vmem:[%s22446_s3 + $0x2dc] sm:$0xf0] }
  0x25   :  { %v10166_v52 = vld [vmem:[%s22446_s3 + $0x4c0] sm:$0xf]  ;;  %v9911_v57 = vor.u32 %v13744_v51, %v9910_v49  ;;  %3136 = vmatpush.bf16.msra.mxu0 %v9655_v56 }
  0x26   :  { %v13808_v53 = vld [vmem:[%s22446_s3 + $0x4dc] sm:$0xf0] }
  0x27   :  { %v10422_v54 = vld [vmem:[%s22446_s3 + $0x6c0] sm:$0xf]  ;;  %v10167_v58 = vor.u32 %v13808_v53, %v10166_v52  ;;  %3149 = vmatpush.bf16.msra.mxu1 %v9911_v57 }
  0x28   :  { %v13872_v55 = vld [vmem:[%s22446_s3 + $0x6dc] sm:$0xf0] }
  0x29   :  { %v9622_v59 = vld [vmem:[%s22446_s3 + $0x80] sm:$0xf]  ;;  %v10423_v62 = vor.u32 %v13872_v55, %v10422_v54  ;;  %3162 = vmatpush.bf16.msra.mxu2 %v10167_v58 }
  0x2a   :  { %v13672_v60 = vld [vmem:[%s22446_s3 + $0x9c] sm:$0xf0] }
  0x2b   :  { %v9878_v61 = vld [vmem:[%s22446_s3 + $0x280] sm:$0xf]  ;;  %v9623_v4 = vor.u32 %v13672_v60, %v9622_v59  ;;  %3175 = vmatpush.bf16.msra.mxu3 %v10423_v62 }
  0x2c   :  { %v13736_v63 = vld [vmem:[%s22446_s3 + $0x29c] sm:$0xf0] }
  0x2d   :  { %v10134_v0 = vld [vmem:[%s22446_s3 + $0x480] sm:$0xf]  ;;  %v9879_v5 = vor.u32 %v13736_v63, %v9878_v61  ;;  %3137 = vmatpush.bf16.msra.mxu0 %v9623_v4 }
  0x2e   :  { %v13800_v1 = vld [vmem:[%s22446_s3 + $0x49c] sm:$0xf0] }
  0x2f   :  { %v10390_v2 = vld [vmem:[%s22446_s3 + $0x680] sm:$0xf]  ;;  %v10135_v6 = vor.u32 %v13800_v1, %v10134_v0  ;;  %3150 = vmatpush.bf16.msra.mxu1 %v9879_v5 }
  0x30   :  { %v13864_v3 = vld [vmem:[%s22446_s3 + $0x69c] sm:$0xf0] }
  0x31   :  { %v9590_v7 = vld [vmem:[%s22446_s3 + $0x40] sm:$0xf]  ;;  %v10391_v10 = vor.u32 %v13864_v3, %v10390_v2  ;;  %3163 = vmatpush.bf16.msra.mxu2 %v10135_v6  ;;  %v28_v3 = vld [vmem:[%s22447_s0 + $0x10] sm:$0xff] }
  0x32   :  { %v13664_v8 = vld [vmem:[%s22446_s3 + $0x5c] sm:$0xf0] }
  0x33   :  { %v9846_v9 = vld [vmem:[%s22446_s3 + $0x240] sm:$0xf]  ;;  %v9591_v16 = vor.u32 %v13664_v8, %v9590_v7  ;;  %3176 = vmatpush.bf16.msra.mxu3 %v10391_v10  ;;  %v15133_v8 = vpack.c.bf16 %v28_v3, %v28_v3  ;;  %v29_v10 = vld [vmem:[%s22447_s0 + $0x18] sm:$0xff] }
  0x34   :  { %v13728_v11 = vld [vmem:[%s22446_s3 + $0x25c] sm:$0xf0] }
  0x35   :  { %v10102_v12 = vld [vmem:[%s22446_s3 + $0x440] sm:$0xf]  ;;  %v9847_v19 = vor.u32 %v13728_v11, %v9846_v9  ;;  %3138 = vmatpush.bf16.msra.mxu0 %v9591_v16 }
  0x36   :  { %v13792_v13 = vld [vmem:[%s22446_s3 + $0x45c] sm:$0xf0] }
  0x37   :  { %v10358_v14 = vld [vmem:[%s22446_s3 + $0x640] sm:$0xf]  ;;  %v10103_v20 = vor.u32 %v13792_v13, %v10102_v12  ;;  %3151 = vmatpush.bf16.msra.mxu1 %v9847_v19  ;;  %v27_v19 = vld [vmem:[%s22447_s0 + $0x8] sm:$0xff] }
  0x38   :  { %v13856_v15 = vld [vmem:[%s22446_s3 + $0x65c] sm:$0xf0] }
  0x39   :  { %v9558_v17 = vld [vmem:[%s22446_s3] sm:$0xf]  ;;  %v10359_v24 = vor.u32 %v13856_v15, %v10358_v14  ;;  %3164 = vmatpush.bf16.msra.mxu2 %v10103_v20  ;;  %v15149_v15 = vpack.c.bf16 %v29_v10, %v29_v10  ;;  %v10040_v10 = vld [vmem:[%s22446_s3 + $0x3e0] sm:$0xf0] }
  0x3a   :  { %v13656_v18 = vld [vmem:[%s22446_s3 + $0x1c] sm:$0xf0] }
  0x3b   :  { %v9814_v21 = vld [vmem:[%s22446_s3 + $0x200] sm:$0xf]  ;;  %v9559_v31 = vor.u32 %v13656_v18, %v9558_v17  ;;  %3177 = vmatpush.bf16.msra.mxu3 %v10359_v24 }
  0x3c   :  { %v13720_v22 = vld [vmem:[%s22446_s3 + $0x21c] sm:$0xf0] }
  0x3d   :  { %v10070_v23 = vld [vmem:[%s22446_s3 + $0x400] sm:$0xf]  ;;  %v9815_v35 = vor.u32 %v13720_v22, %v9814_v21  ;;  %3139 = vmatpush.bf16.msra.mxu0 %v9559_v31 }
  0x3e   :  { %v13784_v25 = vld [vmem:[%s22446_s3 + $0x41c] sm:$0xf0] }
  0x3f   :  { %v10326_v26 = vld [vmem:[%s22446_s3 + $0x600] sm:$0xf]  ;;  %v10071_v36 = vor.u32 %v13784_v25, %v10070_v23  ;;  %3152 = vmatpush.bf16.msra.mxu1 %v9815_v35  ;;  %v15172_v25 = vpack.c.bf16 %v27_v19, %v27_v19 }
  0x40   :  { %v13848_v27 = vld [vmem:[%s22446_s3 + $0x61c] sm:$0xf0] }
  0x41   :  { %v10806_v28 = vld [vmem:[%s22446_s3 + $0x9c0] sm:$0xf]  ;;  %v10327_v39 = vor.u32 %v13848_v27, %v10326_v26  ;;  %3165 = vmatpush.bf16.msra.mxu2 %v10071_v36 }
  0x42   :  { %v13968_v29 = vld [vmem:[%s22446_s3 + $0x9dc] sm:$0xf0]  ;;  %3153 = vmatmul.bf16.vlgmr.msra.gmra.mxu1 %v15172_v25 }
  0x43   :  { %v11062_v30 = vld [vmem:[%s22446_s3 + $0xbc0] sm:$0xf]  ;;  %v10807_v40 = vor.u32 %v13968_v29, %v10806_v28  ;;  %3178 = vmatpush.bf16.msra.mxu3 %v10327_v39 }
  0x44   :  { %v14032_v32 = vld [vmem:[%s22446_s3 + $0xbdc] sm:$0xf0]  ;;  %3166 = vmatmul.bf16.vlgmr.msra.gmra.mxu2 %v15133_v8 }
  0x45   :  { %v11318_v33 = vld [vmem:[%s22446_s3 + $0xdc0] sm:$0xf]  ;;  %v11063_v41 = vor.u32 %v14032_v32, %v11062_v30  ;;  %3184 = vmatpush.bf16.msrb.mxu0 %v10807_v40 }
  0x46   :  { %v14096_v34 = vld [vmem:[%s22446_s3 + $0xddc] sm:$0xf0]  ;;  %3179 = vmatmul.bf16.vlgmr.msra.gmra.mxu3 %v15149_v15 }
  0x47   :  { %v11574_v37 = vld [vmem:[%s22446_s3 + $0xfc0] sm:$0xf]  ;;  %v11319_v42 = vor.u32 %v14096_v34, %v11318_v33  ;;  %3197 = vmatpush.bf16.msrb.mxu1 %v11063_v41 }
  0x48   :  { %v14160_v38 = vld [vmem:[%s22446_s3 + $0xfdc] sm:$0xf0] }
  0x49   :  { %v10774_v43 = vld [vmem:[%s22446_s3 + $0x980] sm:$0xf]  ;;  %v11575_v46 = vor.u32 %v14160_v38, %v11574_v37  ;;  %3210 = vmatpush.bf16.msrb.mxu2 %v11319_v42 }
  0x4a   :  { %v13960_v44 = vld [vmem:[%s22446_s3 + $0x99c] sm:$0xf0] }
  0x4b   :  { %v11030_v45 = vld [vmem:[%s22446_s3 + $0xb80] sm:$0xf]  ;;  %v10775_v52 = vor.u32 %v13960_v44, %v10774_v43  ;;  %3223 = vmatpush.bf16.msrb.mxu3 %v11575_v46 }
  0x4c   :  { %v14024_v47 = vld [vmem:[%s22446_s3 + $0xb9c] sm:$0xf0] }
  0x4d   :  { %v11286_v48 = vld [vmem:[%s22446_s3 + $0xd80] sm:$0xf]  ;;  %v11031_v54 = vor.u32 %v14024_v47, %v11030_v45  ;;  %3185 = vmatpush.bf16.msrb.mxu0 %v10775_v52 }
  0x4e   :  { %v14088_v49 = vld [vmem:[%s22446_s3 + $0xd9c] sm:$0xf0] }
  0x4f   :  { %v11542_v50 = vld [vmem:[%s22446_s3 + $0xf80] sm:$0xf]  ;;  %v11287_v55 = vor.u32 %v14088_v49, %v11286_v48  ;;  %3198 = vmatpush.bf16.msrb.mxu1 %v11031_v54 }
  0x50   :  { %v14152_v51 = vld [vmem:[%s22446_s3 + $0xf9c] sm:$0xf0] }
  0x51   :  { %v10742_v53 = vld [vmem:[%s22446_s3 + $0x940] sm:$0xf]  ;;  %v11543_v59 = vor.u32 %v14152_v51, %v11542_v50  ;;  %3211 = vmatpush.bf16.msrb.mxu2 %v11287_v55 }
  0x52   :  { %v13952_v56 = vld [vmem:[%s22446_s3 + $0x95c] sm:$0xf0] }
  0x53   :  { %v10998_v57 = vld [vmem:[%s22446_s3 + $0xb40] sm:$0xf]  ;;  %v10743_v0 = vor.u32 %v13952_v56, %v10742_v53  ;;  %3224 = vmatpush.bf16.msrb.mxu3 %v11543_v59 }
  0x54   :  { %v14016_v58 = vld [vmem:[%s22446_s3 + $0xb5c] sm:$0xf0] }
  0x55   :  { %v11254_v60 = vld [vmem:[%s22446_s3 + $0xd40] sm:$0xf]  ;;  %v10999_v1 = vor.u32 %v14016_v58, %v10998_v57  ;;  %3186 = vmatpush.bf16.msrb.mxu0 %v10743_v0 }
  0x56   :  { %v14080_v61 = vld [vmem:[%s22446_s3 + $0xd5c] sm:$0xf0] }
  0x57   :  { %v11510_v62 = vld [vmem:[%s22446_s3 + $0xf40] sm:$0xf]  ;;  %v11255_v5 = vor.u32 %v14080_v61, %v11254_v60  ;;  %3199 = vmatpush.bf16.msrb.mxu1 %v10999_v1 }
  0x58   :  { %v14144_v63 = vld [vmem:[%s22446_s3 + $0xf5c] sm:$0xf0] }
  0x59   :  { %v10710_v2 = vld [vmem:[%s22446_s3 + $0x900] sm:$0xf]  ;;  %v11511_v11 = vor.u32 %v14144_v63, %v11510_v62  ;;  %3212 = vmatpush.bf16.msrb.mxu2 %v11255_v5  ;;  %v9784_v5 = vld [vmem:[%s22446_s3 + $0x1e0] sm:$0xf0] }
  0x5a   :  { %v26_v4 = vld [vmem:[%s22447_s0] sm:$0xff] }
  0x5b   :  { %v13944_v6 = vld [vmem:[%s22446_s3 + $0x91c] sm:$0xf0]  ;;  %v15135_v9 = vpack.c.bf16 %v26_v4, %v26_v4  ;;  %3225 = vmatpush.bf16.msrb.mxu3 %v11511_v11  ;;  %v13708_v4 = vld [vmem:[%s22446_s3 + $0x1c4] sm:$0xf] }
  0x5c   :  { %v10966_v7 = vld [vmem:[%s22446_s3 + $0xb00] sm:$0xf]  ;;  %v10711_v18 = vor.u32 %v13944_v6, %v10710_v2  ;;  %v13772_v6 = vld [vmem:[%s22446_s3 + $0x3c4] sm:$0xf] }
  0x5d   :  { %v14008_v12 = vld [vmem:[%s22446_s3 + $0xb1c] sm:$0xf0]  ;;  %3140 = vmatmul.bf16.vlgmr.msra.gmra.mxu0 %v15135_v9  ;;  %v13836_v11 = vld [vmem:[%s22446_s3 + $0x5c4] sm:$0xf] }
  0x5e   :  { %v11222_v13 = vld [vmem:[%s22446_s3 + $0xd00] sm:$0xf]  ;;  %v10967_v20 = vor.u32 %v14008_v12, %v10966_v7  ;;  %3187 = vmatpush.bf16.msrb.mxu0 %v10711_v18  ;;  %v10296_v12 = vld [vmem:[%s22446_s3 + $0x5e0] sm:$0xf0]  ;;  %v32_v18 = vld [vmem:[%s22447_s0 + $0x30] sm:$0xff] }
  0x5f   :  { %v14072_v14 = vld [vmem:[%s22446_s3 + $0xd1c] sm:$0xf0] }
  0x60   :  { %v11478_v16 = vld [vmem:[%s22446_s3 + $0xf00] sm:$0xf]  ;;  %v11223_v21 = vor.u32 %v14072_v14, %v11222_v13  ;;  %3200 = vmatpush.bf16.msrb.mxu1 %v10967_v20  ;;  %v9787_v20 = vor.u32 %v13708_v4, %v9784_v5  ;;  %v9656_v4 = vld [vmem:[%s22446_s3 + $0xe0] sm:$0xf0] }
  0x61   :  { %v14136_v17 = vld [vmem:[%s22446_s3 + $0xf1c] sm:$0xf0]  ;;  %v13740_v5 = vld [vmem:[%s22446_s3 + $0x2c4] sm:$0xf] }
  0x62   :  { %v10678_v22 = vld [vmem:[%s22446_s3 + $0x8c0] sm:$0xf]  ;;  %v11479_v26 = vor.u32 %v14136_v17, %v11478_v16  ;;  %3213 = vmatpush.bf16.msrb.mxu2 %v11223_v21  ;;  %v13900_v16 = vld [vmem:[%s22446_s3 + $0x7c4] sm:$0xf] }
  0x63   :  { %v13936_v23 = vld [vmem:[%s22446_s3 + $0x8dc] sm:$0xf0]  ;;  %v10552_v17 = vld [vmem:[%s22446_s3 + $0x7e0] sm:$0xf0] }
  0x64   :  { %v10934_v24 = vld [vmem:[%s22446_s3 + $0xac0] sm:$0xf]  ;;  %v10679_v32 = vor.u32 %v13936_v23, %v10678_v22  ;;  %3226 = vmatpush.bf16.msrb.mxu3 %v11479_v26  ;;  %v13700_v21 = vld [vmem:[%s22446_s3 + $0x184] sm:$0xf]  ;;  %v33_v23 = vld [vmem:[%s22447_s0 + $0x38] sm:$0xff]  ;;  %v10299_v26 = vor.u32 %v13836_v11, %v10296_v12 }
  0x65   :  { %v14000_v27 = vld [vmem:[%s22446_s3 + $0xadc] sm:$0xf0]  ;;  %v10168_v11 = vld [vmem:[%s22446_s3 + $0x4e0] sm:$0xf0] }
  0x66   :  { %v11190_v28 = vld [vmem:[%s22446_s3 + $0xcc0] sm:$0xf]  ;;  %v10935_v33 = vor.u32 %v14000_v27, %v10934_v24  ;;  %3188 = vmatpush.bf16.msrb.mxu0 %v10679_v32  ;;  %v10043_v24 = vor.u32 %v13772_v6, %v10040_v10  ;;  %v9752_v27 = vld [vmem:[%s22446_s3 + $0x1a0] sm:$0xf0] }
  0x67   :  { %v14064_v29 = vld [vmem:[%s22446_s3 + $0xcdc] sm:$0xf0]  ;;  %v13828_v32 = vld [vmem:[%s22446_s3 + $0x584] sm:$0xf] }
  0x68   :  { %v11446_v30 = vld [vmem:[%s22446_s3 + $0xec0] sm:$0xf]  ;;  %v11191_v34 = vor.u32 %v14064_v29, %v11190_v28  ;;  %3201 = vmatpush.bf16.msrb.mxu1 %v10935_v33  ;;  %v13764_v28 = vld [vmem:[%s22446_s3 + $0x384] sm:$0xf]  ;;  %v31_v29 = vld [vmem:[%s22447_s0 + $0x28] sm:$0xff] }
  0x69   :  { %v14128_v31 = vld [vmem:[%s22446_s3 + $0xedc] sm:$0xf0]  ;;  %v10264_v33 = vld [vmem:[%s22446_s3 + $0x5a0] sm:$0xf0] }
  0x6a   :  { %v10646_v35 = vld [vmem:[%s22446_s3 + $0x880] sm:$0xf]  ;;  %v11447_v38 = vor.u32 %v14128_v31, %v11446_v30  ;;  %3214 = vmatpush.bf16.msrb.mxu2 %v11191_v34  ;;  %v10555_v30 = vor.u32 %v13900_v16, %v10552_v17  ;;  %v10008_v31 = vld [vmem:[%s22446_s3 + $0x3a0] sm:$0xf0]  ;;  %v15316_v34 = vpack.c.bf16 %v32_v18, %v32_v18 }
  0x6b   :  { %v13928_v36 = vld [vmem:[%s22446_s3 + $0x89c] sm:$0xf0]  ;;  %v13804_v10 = vld [vmem:[%s22446_s3 + $0x4c4] sm:$0xf] }
  0x6c   :  { %v10902_v37 = vld [vmem:[%s22446_s3 + $0xa80] sm:$0xf]  ;;  %v10647_v44 = vor.u32 %v13928_v36, %v10646_v35  ;;  %3227 = vmatpush.bf16.msrb.mxu3 %v11447_v38  ;;  %v13892_v35 = vld [vmem:[%s22446_s3 + $0x784] sm:$0xf]  ;;  %v15326_v38 = vpack.c.bf16 %v33_v23, %v33_v23  ;;  %v10171_v17 = vor.u32 %v13804_v10, %v10168_v11 }
  0x6d   :  { %v13992_v39 = vld [vmem:[%s22446_s3 + $0xa9c] sm:$0xf0]  ;;  %v10520_v36 = vld [vmem:[%s22446_s3 + $0x7a0] sm:$0xf0] }
  0x6e   :  { %v11158_v40 = vld [vmem:[%s22446_s3 + $0xc80] sm:$0xf]  ;;  %v10903_v45 = vor.u32 %v13992_v39, %v10902_v37  ;;  %3189 = vmatpush.bf16.msrb.mxu0 %v10647_v44  ;;  %v9755_v39 = vor.u32 %v13700_v21, %v9752_v27  ;;  %v9720_v44 = vld [vmem:[%s22446_s3 + $0x160] sm:$0xf0] }
  0x6f   :  { %v14056_v41 = vld [vmem:[%s22446_s3 + $0xc9c] sm:$0xf0]  ;;  %v13868_v12 = vld [vmem:[%s22446_s3 + $0x6c4] sm:$0xf] }
  0x70   :  { %v11414_v42 = vld [vmem:[%s22446_s3 + $0xe80] sm:$0xf]  ;;  %v11159_v46 = vor.u32 %v14056_v41, %v11158_v40  ;;  %3202 = vmatpush.bf16.msrb.mxu1 %v10903_v45  ;;  %v15328_v40 = vpack.c.bf16 %v31_v29, %v31_v29  ;;  %v10011_v41 = vor.u32 %v13764_v28, %v10008_v31  ;;  %v13756_v45 = vld [vmem:[%s22446_s3 + $0x344] sm:$0xf] }
  0x71   :  { %v14120_v43 = vld [vmem:[%s22446_s3 + $0xe9c] sm:$0xf0]  ;;  %v13668_v18 = vld [vmem:[%s22446_s3 + $0x84] sm:$0xf] }
  0x72   :  { %v10614_v47 = vld [vmem:[%s22446_s3 + $0x840] sm:$0xf]  ;;  %v11415_v50 = vor.u32 %v14120_v43, %v11414_v42  ;;  %3215 = vmatpush.bf16.msrb.mxu2 %v11159_v46  ;;  %v10267_v42 = vor.u32 %v13828_v32, %v10264_v33  ;;  %v13692_v43 = vld [vmem:[%s22446_s3 + $0x144] sm:$0xf]  ;;  %v10523_v46 = vor.u32 %v13892_v35, %v10520_v36 }
  0x73   :  { %v13920_v48 = vld [vmem:[%s22446_s3 + $0x85c] sm:$0xf0]  ;;  %v13796_v23 = vld [vmem:[%s22446_s3 + $0x484] sm:$0xf] }
  0x74   :  { %v10870_v49 = vld [vmem:[%s22446_s3 + $0xa40] sm:$0xf]  ;;  %v10615_v56 = vor.u32 %v13920_v48, %v10614_v47  ;;  %3228 = vmatpush.bf16.msrb.mxu3 %v11415_v50  ;;  %v9976_v47 = vld [vmem:[%s22446_s3 + $0x360] sm:$0xf0] }
  0x75   :  { %v13984_v51 = vld [vmem:[%s22446_s3 + $0xa5c] sm:$0xf0]  ;;  %v13820_v48 = vld [vmem:[%s22446_s3 + $0x544] sm:$0xf] }
  0x76   :  { %v11126_v52 = vld [vmem:[%s22446_s3 + $0xc40] sm:$0xf]  ;;  %v10871_v59 = vor.u32 %v13984_v51, %v10870_v49  ;;  %3190 = vmatpush.bf16.msrb.mxu0 %v10615_v56  ;;  %v10232_v49 = vld [vmem:[%s22446_s3 + $0x560] sm:$0xf0] }
  0x77   :  { %v14048_v53 = vld [vmem:[%s22446_s3 + $0xc5c] sm:$0xf0]  ;;  %v13884_v50 = vld [vmem:[%s22446_s3 + $0x744] sm:$0xf] }
  0x78   :  { %v11382_v54 = vld [vmem:[%s22446_s3 + $0xe40] sm:$0xf]  ;;  %v11127_v60 = vor.u32 %v14048_v53, %v11126_v52  ;;  %3203 = vmatpush.bf16.msrb.mxu1 %v10871_v59  ;;  %v10488_v51 = vld [vmem:[%s22446_s3 + $0x760] sm:$0xf0]  ;;  %v9723_v52 = vor.u32 %v13692_v43, %v9720_v44  ;;  %v9979_v53 = vor.u32 %v13756_v45, %v9976_v47 }
  0x79   :  { %v14112_v55 = vld [vmem:[%s22446_s3 + $0xe5c] sm:$0xf0]  ;;  %v9688_v56 = vld [vmem:[%s22446_s3 + $0x120] sm:$0xf0] }
  0x7a   :  { %v10582_v57 = vld [vmem:[%s22446_s3 + $0x800] sm:$0xf]  ;;  %v11383_v0 = vor.u32 %v14112_v55, %v11382_v54  ;;  %3216 = vmatpush.bf16.msrb.mxu2 %v11127_v60  ;;  %v10235_v54 = vor.u32 %v13820_v48, %v10232_v49  ;;  %v13684_v55 = vld [vmem:[%s22446_s3 + $0x104] sm:$0xf] }
  0x7b   :  { %v13912_v58 = vld [vmem:[%s22446_s3 + $0x81c] sm:$0xf0]  ;;  %v9944_v59 = vld [vmem:[%s22446_s3 + $0x320] sm:$0xf0] }
  0x7c   :  { %v10838_v61 = vld [vmem:[%s22446_s3 + $0xa00] sm:$0xf]  ;;  %v10583_v7 = vor.u32 %v13912_v58, %v10582_v57  ;;  %3229 = vmatpush.bf16.msrb.mxu3 %v11383_v0  ;;  %v13748_v57 = vld [vmem:[%s22446_s3 + $0x304] sm:$0xf]  ;;  %v10491_v58 = vor.u32 %v13884_v50, %v10488_v51  ;;  %v9691_v0 = vor.u32 %v13684_v55, %v9688_v56 }
  0x7d   :  { %v13976_v62 = vld [vmem:[%s22446_s3 + $0xa1c] sm:$0xf0]  ;;  %v13812_v60 = vld [vmem:[%s22446_s3 + $0x504] sm:$0xf] }
  0x7e   :  { %v11094_v63 = vld [vmem:[%s22446_s3 + $0xc00] sm:$0xf]  ;;  %v10839_v13 = vor.u32 %v13976_v62, %v10838_v61  ;;  %3191 = vmatpush.bf16.msrb.mxu0 %v10583_v7  ;;  %v10200_v61 = vld [vmem:[%s22446_s3 + $0x520] sm:$0xf0] }
  0x7f   :  { %v14040_v1 = vld [vmem:[%s22446_s3 + $0xc1c] sm:$0xf0]  ;;  %v13876_v62 = vld [vmem:[%s22446_s3 + $0x704] sm:$0xf] }
  0x80   :  { %v11350_v2 = vld [vmem:[%s22446_s3 + $0xe00] sm:$0xf]  ;;  %v11095_v14 = vor.u32 %v14040_v1, %v11094_v63  ;;  %3204 = vmatpush.bf16.msrb.mxu1 %v10839_v13  ;;  %v10456_v63 = vld [vmem:[%s22446_s3 + $0x720] sm:$0xf0]  ;;  %v9947_v1 = vor.u32 %v13748_v57, %v9944_v59 }
  0x81   :  { %v14104_v3 = vld [vmem:[%s22446_s3 + $0xe1c] sm:$0xf0]  ;;  %v10459_v6 = vor.u32 %v13876_v62, %v10456_v63  ;;  %v9912_v7 = vld [vmem:[%s22446_s3 + $0x2e0] sm:$0xf0] }
  0x82   :  { %v11351_v19 = vor.u32 %v14104_v3, %v11350_v2  ;;  %v30_v22 = vld [vmem:[%s22447_s0 + $0x20] sm:$0xff]  ;;  %3217 = vmatpush.bf16.msrb.mxu2 %v11095_v14  ;;  %3236 = vmatpush.bf16.msra.mxu0 %v9787_v20  ;;  %v10203_v2 = vor.u32 %v13812_v60, %v10200_v61  ;;  %v9915_v16 = vor.u32 %v13740_v5, %v9912_v7 }
  0x83   :  { %v15324_v37 = vpack.c.bf16 %v30_v22, %v30_v22  ;;  %3205 = vmatmul.bf16.vlgmr.msrb.gmra.mxu1 %v15328_v40  ;;  %v13676_v3 = vld [vmem:[%s22446_s3 + $0xc4] sm:$0xf] }
  0x84   :  { %3230 = vmatpush.bf16.msrb.mxu3 %v11351_v19  ;;  %3249 = vmatpush.bf16.msra.mxu1 %v10043_v24  ;;  %v10424_v13 = vld [vmem:[%s22446_s3 + $0x6e0] sm:$0xf0]  ;;  %v9659_v14 = vor.u32 %v13676_v3, %v9656_v4 }
  0x85   :  { %3218 = vmatmul.bf16.vlgmr.msrb.gmra.mxu2 %v15316_v34  ;;  %3192 = vmatmul.bf16.vlgmr.msrb.gmra.mxu0 %v15324_v37  ;;  %v9624_v19 = vld [vmem:[%s22446_s3 + $0xa0] sm:$0xf0]  ;;  %v10427_v21 = vor.u32 %v13868_v12, %v10424_v13 }
  0x86   :  { %3262 = vmatpush.bf16.msra.mxu2 %v10299_v26  ;;  %3237 = vmatpush.bf16.msra.mxu0 %v9755_v39  ;;  %v13732_v20 = vld [vmem:[%s22446_s3 + $0x284] sm:$0xf]  ;;  %v9627_v28 = vor.u32 %v13668_v18, %v9624_v19 }
  0x87   :  { %3231 = vmatmul.bf16.vlgmr.msrb.gmra.mxu3 %v15326_v38  ;;  %v9880_v22 = vld [vmem:[%s22446_s3 + $0x2a0] sm:$0xf0] }
  0x88   :  { %3275 = vmatpush.bf16.msra.mxu3 %v10555_v30  ;;  %3250 = vmatpush.bf16.msra.mxu1 %v10011_v41  ;;  %v10136_v24 = vld [vmem:[%s22446_s3 + $0x4a0] sm:$0xf0]  ;;  %v9883_v29 = vor.u32 %v13732_v20, %v9880_v22 }
  0x89   :  { %v13860_v26 = vld [vmem:[%s22446_s3 + $0x684] sm:$0xf]  ;;  %v10139_v30 = vor.u32 %v13796_v23, %v10136_v24 }
  0x8a   :  { %3263 = vmatpush.bf16.msra.mxu2 %v10267_v42  ;;  %3238 = vmatpush.bf16.msra.mxu0 %v9723_v52  ;;  %v10392_v27 = vld [vmem:[%s22446_s3 + $0x6a0] sm:$0xf0] }
  0x8b   :  { %v13660_v31 = vld [vmem:[%s22446_s3 + $0x44] sm:$0xf]  ;;  %v10395_v35 = vor.u32 %v13860_v26, %v10392_v27 }
  0x8c   :  { %3276 = vmatpush.bf16.msra.mxu3 %v10523_v46  ;;  %3251 = vmatpush.bf16.msra.mxu1 %v9979_v53  ;;  %v9592_v32 = vld [vmem:[%s22446_s3 + $0x60] sm:$0xf0] }
  0x8d   :  { %v13724_v33 = vld [vmem:[%s22446_s3 + $0x244] sm:$0xf]  ;;  %v9595_v44 = vor.u32 %v13660_v31, %v9592_v32 }
  0x8e   :  { %3264 = vmatpush.bf16.msra.mxu2 %v10235_v54  ;;  %3239 = vmatpush.bf16.msra.mxu0 %v9691_v0  ;;  %v9848_v36 = vld [vmem:[%s22446_s3 + $0x260] sm:$0xf0] }
  0x8f   :  { %v13788_v39 = vld [vmem:[%s22446_s3 + $0x444] sm:$0xf]  ;;  %v9851_v47 = vor.u32 %v13724_v33, %v9848_v36 }
  0x90   :  { %3277 = vmatpush.bf16.msra.mxu3 %v10491_v58  ;;  %3252 = vmatpush.bf16.msra.mxu1 %v9947_v1  ;;  %v10104_v41 = vld [vmem:[%s22446_s3 + $0x460] sm:$0xf0] }
  0x91   :  { %v13852_v42 = vld [vmem:[%s22446_s3 + $0x644] sm:$0xf]  ;;  %v10107_v48 = vor.u32 %v13788_v39, %v10104_v41 }
  0x92   :  { %3265 = vmatpush.bf16.msra.mxu2 %v10203_v2  ;;  %3240 = vmatpush.bf16.msra.mxu0 %v9659_v14  ;;  %v10360_v43 = vld [vmem:[%s22446_s3 + $0x660] sm:$0xf0] }
  0x93   :  { %v13652_v45 = vld [vmem:[%s22446_s3 + $0x4] sm:$0xf]  ;;  %v10363_v52 = vor.u32 %v13852_v42, %v10360_v43 }
  0x94   :  { %3278 = vmatpush.bf16.msra.mxu3 %v10459_v6  ;;  %3253 = vmatpush.bf16.msra.mxu1 %v9915_v16  ;;  %v9560_v46 = vld [vmem:[%s22446_s3 + $0x20] sm:$0xf0] }
  0x95   :  { %v13716_v49 = vld [vmem:[%s22446_s3 + $0x204] sm:$0xf]  ;;  %v9563_v59 = vor.u32 %v13652_v45, %v9560_v46 }
  0x96   :  { %3266 = vmatpush.bf16.msra.mxu2 %v10171_v17  ;;  %3241 = vmatpush.bf16.msra.mxu0 %v9627_v28  ;;  %v9816_v50 = vld [vmem:[%s22446_s3 + $0x220] sm:$0xf0] }
  0x97   :  { %v13780_v51 = vld [vmem:[%s22446_s3 + $0x404] sm:$0xf]  ;;  %v9819_v63 = vor.u32 %v13716_v49, %v9816_v50 }
  0x98   :  { %3279 = vmatpush.bf16.msra.mxu3 %v10427_v21  ;;  %3254 = vmatpush.bf16.msra.mxu1 %v9883_v29  ;;  %v10072_v53 = vld [vmem:[%s22446_s3 + $0x420] sm:$0xf0] }
  0x99   :  { %v13844_v54 = vld [vmem:[%s22446_s3 + $0x604] sm:$0xf]  ;;  %v10075_v0 = vor.u32 %v13780_v51, %v10072_v53 }
  0x9a   :  { %3267 = vmatpush.bf16.msra.mxu2 %v10139_v30  ;;  %v10328_v55 = vld [vmem:[%s22446_s3 + $0x620] sm:$0xf0]  ;;  %3242 = vmatpush.bf16.msra.mxu0 %v9595_v44 }
  0x9b   :  { %v13964_v56 = vld [vmem:[%s22446_s3 + $0x9c4] sm:$0xf]  ;;  %v10331_v3 = vor.u32 %v13844_v54, %v10328_v55 }
  0x9c   :  { %3280 = vmatpush.bf16.msra.mxu3 %v10395_v35  ;;  %v10808_v57 = vld [vmem:[%s22446_s3 + $0x9e0] sm:$0xf0]  ;;  %3255 = vmatpush.bf16.msra.mxu1 %v9851_v47 }
  0x9d   :  { %v14028_v58 = vld [vmem:[%s22446_s3 + $0xbc4] sm:$0xf]  ;;  %v10811_v4 = vor.u32 %v13964_v56, %v10808_v57 }
  0x9e   :  { %v11064_v60 = vld [vmem:[%s22446_s3 + $0xbe0] sm:$0xf0]  ;;  %3268 = vmatpush.bf16.msra.mxu2 %v10107_v48  ;;  %3243 = vmatpush.bf16.msra.mxu0 %v9563_v59 }
  0x9f   :  { %v14092_v61 = vld [vmem:[%s22446_s3 + $0xdc4] sm:$0xf]  ;;  %v11067_v5 = vor.u32 %v14028_v58, %v11064_v60 }
  0xa0   :  { %v11320_v62 = vld [vmem:[%s22446_s3 + $0xde0] sm:$0xf0]  ;;  %3281 = vmatpush.bf16.msra.mxu3 %v10363_v52  ;;  %3256 = vmatpush.bf16.msra.mxu1 %v9819_v63 }
  0xa1   :  { %v14156_v1 = vld [vmem:[%s22446_s3 + $0xfc4] sm:$0xf]  ;;  %v11323_v6 = vor.u32 %v14092_v61, %v11320_v62  ;;  %3244 = vmatmul.bf16.vlgmr.msra.gmra.mxu0 %v15135_v9 }
  0xa2   :  { %v11576_v2 = vld [vmem:[%s22446_s3 + $0xfe0] sm:$0xf0]  ;;  %3269 = vmatpush.bf16.msra.mxu2 %v10075_v0  ;;  %3288 = vmatpush.bf16.msrb.mxu0 %v10811_v4 }
  0xa3   :  { %v13956_v7 = vld [vmem:[%s22446_s3 + $0x984] sm:$0xf]  ;;  %v11579_v12 = vor.u32 %v14156_v1, %v11576_v2  ;;  %3257 = vmatmul.bf16.vlgmr.msra.gmra.mxu1 %v15172_v25 }
  0xa4   :  { %v10776_v10 = vld [vmem:[%s22446_s3 + $0x9a0] sm:$0xf0]  ;;  %3282 = vmatpush.bf16.msra.mxu3 %v10331_v3  ;;  %3301 = vmatpush.bf16.msrb.mxu1 %v11067_v5 }
  0xa5   :  { %v14020_v11 = vld [vmem:[%s22446_s3 + $0xb84] sm:$0xf]  ;;  %v10779_v19 = vor.u32 %v13956_v7, %v10776_v10  ;;  %3270 = vmatmul.bf16.vlgmr.msra.gmra.mxu2 %v15133_v8 }
  0xa6   :  { %v11032_v13 = vld [vmem:[%s22446_s3 + $0xba0] sm:$0xf0]  ;;  %3314 = vmatpush.bf16.msrb.mxu2 %v11323_v6 }
  0xa7   :  { %v14084_v14 = vld [vmem:[%s22446_s3 + $0xd84] sm:$0xf]  ;;  %v11035_v20 = vor.u32 %v14020_v11, %v11032_v13  ;;  %3283 = vmatmul.bf16.vlgmr.msra.gmra.mxu3 %v15149_v15  ;;  %3289 = vmatpush.bf16.msrb.mxu0 %v10779_v19 }
  0xa8   :  { %v11288_v16 = vld [vmem:[%s22446_s3 + $0xda0] sm:$0xf0]  ;;  %3327 = vmatpush.bf16.msrb.mxu3 %v11579_v12 }
  0xa9   :  { %v14148_v17 = vld [vmem:[%s22446_s3 + $0xf84] sm:$0xf]  ;;  %v11291_v21 = vor.u32 %v14084_v14, %v11288_v16  ;;  %3302 = vmatpush.bf16.msrb.mxu1 %v11035_v20 }
  0xaa   :  { %v11544_v18 = vld [vmem:[%s22446_s3 + $0xfa0] sm:$0xf0] }
  0xab   :  { %v13948_v22 = vld [vmem:[%s22446_s3 + $0x944] sm:$0xf]  ;;  %v11547_v26 = vor.u32 %v14148_v17, %v11544_v18  ;;  %3315 = vmatpush.bf16.msrb.mxu2 %v11291_v21 }
  0xac   :  { %v10744_v23 = vld [vmem:[%s22446_s3 + $0x960] sm:$0xf0] }
  0xad   :  { %v14012_v24 = vld [vmem:[%s22446_s3 + $0xb44] sm:$0xf]  ;;  %v10747_v32 = vor.u32 %v13948_v22, %v10744_v23  ;;  %3328 = vmatpush.bf16.msrb.mxu3 %v11547_v26 }
  0xae   :  { %v11000_v27 = vld [vmem:[%s22446_s3 + $0xb60] sm:$0xf0] }
  0xaf   :  { %v14076_v28 = vld [vmem:[%s22446_s3 + $0xd44] sm:$0xf]  ;;  %v11003_v33 = vor.u32 %v14012_v24, %v11000_v27  ;;  %3290 = vmatpush.bf16.msrb.mxu0 %v10747_v32 }
  0xb0   :  { %v11256_v29 = vld [vmem:[%s22446_s3 + $0xd60] sm:$0xf0] }
  0xb1   :  { %v14140_v30 = vld [vmem:[%s22446_s3 + $0xf44] sm:$0xf]  ;;  %v11259_v35 = vor.u32 %v14076_v28, %v11256_v29  ;;  %3303 = vmatpush.bf16.msrb.mxu1 %v11003_v33 }
  0xb2   :  { %v11512_v31 = vld [vmem:[%s22446_s3 + $0xf60] sm:$0xf0] }
  0xb3   :  { %v13940_v36 = vld [vmem:[%s22446_s3 + $0x904] sm:$0xf]  ;;  %v11515_v42 = vor.u32 %v14140_v30, %v11512_v31  ;;  %3316 = vmatpush.bf16.msrb.mxu2 %v11259_v35 }
  0xb4   :  { %v10712_v39 = vld [vmem:[%s22446_s3 + $0x920] sm:$0xf0] }
  0xb5   :  { %v14004_v41 = vld [vmem:[%s22446_s3 + $0xb04] sm:$0xf]  ;;  %v10715_v48 = vor.u32 %v13940_v36, %v10712_v39  ;;  %3329 = vmatpush.bf16.msrb.mxu3 %v11515_v42  ;;  %v9790_v39 = vld [vmem:[%s22446_s3 + $0x1c8] sm:$0xf] }
  0xb6   :  { %v10968_v43 = vld [vmem:[%s22446_s3 + $0xb20] sm:$0xf0]  ;;  %v10046_v42 = vld [vmem:[%s22446_s3 + $0x3c8] sm:$0xf] }
  0xb7   :  { %v14068_v44 = vld [vmem:[%s22446_s3 + $0xd04] sm:$0xf]  ;;  %v10971_v49 = vor.u32 %v14004_v41, %v10968_v43  ;;  %3291 = vmatpush.bf16.msrb.mxu0 %v10715_v48  ;;  %v13713_v41 = vld [vmem:[%s22446_s3 + $0x1e4] sm:$0xf0] }
  0xb8   :  { %v11224_v45 = vld [vmem:[%s22446_s3 + $0xd20] sm:$0xf0] }
  0xb9   :  { %v14132_v46 = vld [vmem:[%s22446_s3 + $0xf04] sm:$0xf]  ;;  %v11227_v50 = vor.u32 %v14068_v44, %v11224_v45  ;;  %3304 = vmatpush.bf16.msrb.mxu1 %v10971_v49  ;;  %v13777_v44 = vld [vmem:[%s22446_s3 + $0x3e4] sm:$0xf0] }
  0xba   :  { %v11480_v47 = vld [vmem:[%s22446_s3 + $0xf20] sm:$0xf0]  ;;  %v10302_v45 = vld [vmem:[%s22446_s3 + $0x5c8] sm:$0xf] }
  0xbb   :  { %v13932_v51 = vld [vmem:[%s22446_s3 + $0x8c4] sm:$0xf]  ;;  %v11483_v54 = vor.u32 %v14132_v46, %v11480_v47  ;;  %3317 = vmatpush.bf16.msrb.mxu2 %v11227_v50  ;;  %v13841_v46 = vld [vmem:[%s22446_s3 + $0x5e4] sm:$0xf0] }
  0xbc   :  { %v10680_v52 = vld [vmem:[%s22446_s3 + $0x8e0] sm:$0xf0]  ;;  %v10558_v49 = vld [vmem:[%s22446_s3 + $0x7c8] sm:$0xf] }
  0xbd   :  { %v13996_v53 = vld [vmem:[%s22446_s3 + $0xac4] sm:$0xf]  ;;  %v10683_v60 = vor.u32 %v13932_v51, %v10680_v52  ;;  %3330 = vmatpush.bf16.msrb.mxu3 %v11483_v54  ;;  %v13905_v50 = vld [vmem:[%s22446_s3 + $0x7e4] sm:$0xf0]  ;;  %v9791_v52 = vor.u32 %v13713_v41, %v9790_v39  ;;  %v10303_v54 = vor.u32 %v13841_v46, %v10302_v45 }
  0xbe   :  { %v10936_v55 = vld [vmem:[%s22446_s3 + $0xae0] sm:$0xf0]  ;;  %v10174_v39 = vld [vmem:[%s22446_s3 + $0x4c8] sm:$0xf] }
  0xbf   :  { %v14060_v56 = vld [vmem:[%s22446_s3 + $0xcc4] sm:$0xf]  ;;  %v10939_v61 = vor.u32 %v13996_v53, %v10936_v55  ;;  %3292 = vmatpush.bf16.msrb.mxu0 %v10683_v60  ;;  %v10047_v53 = vor.u32 %v13777_v44, %v10046_v42  ;;  %v9758_v55 = vld [vmem:[%s22446_s3 + $0x188] sm:$0xf] }
  0xc0   :  { %v11192_v57 = vld [vmem:[%s22446_s3 + $0xce0] sm:$0xf0]  ;;  %v10270_v60 = vld [vmem:[%s22446_s3 + $0x588] sm:$0xf] }
  0xc1   :  { %v14124_v58 = vld [vmem:[%s22446_s3 + $0xec4] sm:$0xf]  ;;  %v11195_v62 = vor.u32 %v14060_v56, %v11192_v57  ;;  %3305 = vmatpush.bf16.msrb.mxu1 %v10939_v61  ;;  %v13705_v56 = vld [vmem:[%s22446_s3 + $0x1a4] sm:$0xf0] }
  0xc2   :  { %v11448_v59 = vld [vmem:[%s22446_s3 + $0xee0] sm:$0xf0]  ;;  %v10014_v57 = vld [vmem:[%s22446_s3 + $0x388] sm:$0xf] }
  0xc3   :  { %v13924_v63 = vld [vmem:[%s22446_s3 + $0x884] sm:$0xf]  ;;  %v11451_v2 = vor.u32 %v14124_v58, %v11448_v59  ;;  %3318 = vmatpush.bf16.msrb.mxu2 %v11195_v62  ;;  %v10559_v58 = vor.u32 %v13905_v50, %v10558_v49  ;;  %v13769_v59 = vld [vmem:[%s22446_s3 + $0x3a4] sm:$0xf0] }
  0xc4   :  { %v10648_v0 = vld [vmem:[%s22446_s3 + $0x8a0] sm:$0xf0]  ;;  %v13833_v61 = vld [vmem:[%s22446_s3 + $0x5a4] sm:$0xf0] }
  0xc5   :  { %v13988_v1 = vld [vmem:[%s22446_s3 + $0xa84] sm:$0xf]  ;;  %v10651_v10 = vor.u32 %v13924_v63, %v10648_v0  ;;  %3331 = vmatpush.bf16.msrb.mxu3 %v11451_v2  ;;  %v10526_v62 = vld [vmem:[%s22446_s3 + $0x788] sm:$0xf]  ;;  %v9759_v0 = vor.u32 %v13705_v56, %v9758_v55  ;;  %v10271_v2 = vor.u32 %v13833_v61, %v10270_v60 }
  0xc6   :  { %v10904_v3 = vld [vmem:[%s22446_s3 + $0xaa0] sm:$0xf0]  ;;  %v13897_v63 = vld [vmem:[%s22446_s3 + $0x7a4] sm:$0xf0] }
  0xc7   :  { %v14052_v4 = vld [vmem:[%s22446_s3 + $0xc84] sm:$0xf]  ;;  %v10907_v11 = vor.u32 %v13988_v1, %v10904_v3  ;;  %3293 = vmatpush.bf16.msrb.mxu0 %v10651_v10  ;;  %v10015_v1 = vor.u32 %v13769_v59, %v10014_v57  ;;  %v9726_v3 = vld [vmem:[%s22446_s3 + $0x148] sm:$0xf] }
  0xc8   :  { %v11160_v5 = vld [vmem:[%s22446_s3 + $0xca0] sm:$0xf0]  ;;  %v10238_v10 = vld [vmem:[%s22446_s3 + $0x548] sm:$0xf] }
  0xc9   :  { %v14116_v6 = vld [vmem:[%s22446_s3 + $0xe84] sm:$0xf]  ;;  %v11163_v12 = vor.u32 %v14052_v4, %v11160_v5  ;;  %3306 = vmatpush.bf16.msrb.mxu1 %v10907_v11  ;;  %v13697_v4 = vld [vmem:[%s22446_s3 + $0x164] sm:$0xf0] }
  0xca   :  { %v11416_v7 = vld [vmem:[%s22446_s3 + $0xea0] sm:$0xf0]  ;;  %v9982_v5 = vld [vmem:[%s22446_s3 + $0x348] sm:$0xf] }
  0xcb   :  { %v13916_v13 = vld [vmem:[%s22446_s3 + $0x844] sm:$0xf]  ;;  %v11419_v17 = vor.u32 %v14116_v6, %v11416_v7  ;;  %3319 = vmatpush.bf16.msrb.mxu2 %v11163_v12  ;;  %v10527_v6 = vor.u32 %v13897_v63, %v10526_v62  ;;  %v13761_v7 = vld [vmem:[%s22446_s3 + $0x364] sm:$0xf0] }
  0xcc   :  { %v10616_v14 = vld [vmem:[%s22446_s3 + $0x860] sm:$0xf0]  ;;  %v13825_v11 = vld [vmem:[%s22446_s3 + $0x564] sm:$0xf0] }
  0xcd   :  { %v13980_v16 = vld [vmem:[%s22446_s3 + $0xa44] sm:$0xf]  ;;  %v10619_v23 = vor.u32 %v13916_v13, %v10616_v14  ;;  %3332 = vmatpush.bf16.msrb.mxu3 %v11419_v17  ;;  %v10494_v12 = vld [vmem:[%s22446_s3 + $0x748] sm:$0xf]  ;;  %v9727_v14 = vor.u32 %v13697_v4, %v9726_v3  ;;  %v10239_v17 = vor.u32 %v13825_v11, %v10238_v10 }
  0xce   :  { %v10872_v18 = vld [vmem:[%s22446_s3 + $0xa60] sm:$0xf0]  ;;  %v13889_v13 = vld [vmem:[%s22446_s3 + $0x764] sm:$0xf0] }
  0xcf   :  { %v14044_v19 = vld [vmem:[%s22446_s3 + $0xc44] sm:$0xf]  ;;  %v10875_v27 = vor.u32 %v13980_v16, %v10872_v18  ;;  %3294 = vmatpush.bf16.msrb.mxu0 %v10619_v23  ;;  %v9983_v16 = vor.u32 %v13761_v7, %v9982_v5  ;;  %v9694_v18 = vld [vmem:[%s22446_s3 + $0x108] sm:$0xf] }
  0xd0   :  { %v11128_v20 = vld [vmem:[%s22446_s3 + $0xc60] sm:$0xf0]  ;;  %v10206_v23 = vld [vmem:[%s22446_s3 + $0x508] sm:$0xf] }
  0xd1   :  { %v14108_v21 = vld [vmem:[%s22446_s3 + $0xe44] sm:$0xf]  ;;  %v11131_v28 = vor.u32 %v14044_v19, %v11128_v20  ;;  %3307 = vmatpush.bf16.msrb.mxu1 %v10875_v27  ;;  %v13689_v19 = vld [vmem:[%s22446_s3 + $0x124] sm:$0xf0] }
  0xd2   :  { %v11384_v22 = vld [vmem:[%s22446_s3 + $0xe60] sm:$0xf0]  ;;  %v9950_v20 = vld [vmem:[%s22446_s3 + $0x308] sm:$0xf] }
  0xd3   :  { %v13908_v24 = vld [vmem:[%s22446_s3 + $0x804] sm:$0xf]  ;;  %v11387_v32 = vor.u32 %v14108_v21, %v11384_v22  ;;  %3320 = vmatpush.bf16.msrb.mxu2 %v11131_v28  ;;  %v10495_v21 = vor.u32 %v13889_v13, %v10494_v12  ;;  %v13753_v22 = vld [vmem:[%s22446_s3 + $0x324] sm:$0xf0]  ;;  %v9695_v28 = vor.u32 %v13689_v19, %v9694_v18 }
  0xd4   :  { %v10584_v26 = vld [vmem:[%s22446_s3 + $0x820] sm:$0xf0]  ;;  %v13881_v27 = vld [vmem:[%s22446_s3 + $0x724] sm:$0xf0] }
  0xd5   :  { %v13972_v29 = vld [vmem:[%s22446_s3 + $0xa04] sm:$0xf]  ;;  %v10587_v43 = vor.u32 %v13908_v24, %v10584_v26  ;;  %3333 = vmatpush.bf16.msrb.mxu3 %v11387_v32  ;;  %v13817_v24 = vld [vmem:[%s22446_s3 + $0x524] sm:$0xf0] }
  0xd6   :  { %v10840_v30 = vld [vmem:[%s22446_s3 + $0xa20] sm:$0xf0]  ;;  %v10462_v26 = vld [vmem:[%s22446_s3 + $0x708] sm:$0xf] }
  0xd7   :  { %v14036_v31 = vld [vmem:[%s22446_s3 + $0xc04] sm:$0xf]  ;;  %v10843_v47 = vor.u32 %v13972_v29, %v10840_v30  ;;  %3295 = vmatpush.bf16.msrb.mxu0 %v10587_v43  ;;  %v9951_v29 = vor.u32 %v13753_v22, %v9950_v20  ;;  %v10207_v30 = vor.u32 %v13817_v24, %v10206_v23  ;;  %v13681_v32 = vld [vmem:[%s22446_s3 + $0xe4] sm:$0xf0] }
  0xd8   :  { %v11096_v33 = vld [vmem:[%s22446_s3 + $0xc20] sm:$0xf0]  ;;  %v13809_v41 = vld [vmem:[%s22446_s3 + $0x4e4] sm:$0xf0] }
  0xd9   :  { %v14100_v35 = vld [vmem:[%s22446_s3 + $0xe04] sm:$0xf]  ;;  %v11099_v48 = vor.u32 %v14036_v31, %v11096_v33  ;;  %3308 = vmatpush.bf16.msrb.mxu1 %v10843_v47  ;;  %v9662_v31 = vld [vmem:[%s22446_s3 + $0xc8] sm:$0xf]  ;;  %v10175_v46 = vor.u32 %v13809_v41, %v10174_v39 }
  0xda   :  { %v11352_v36 = vld [vmem:[%s22446_s3 + $0xe20] sm:$0xf0]  ;;  %3296 = vmatmul.bf16.vlgmr.msrb.gmra.mxu0 %v15324_v37  ;;  %v9918_v33 = vld [vmem:[%s22446_s3 + $0x2c8] sm:$0xf]  ;;  %v9663_v44 = vor.u32 %v13681_v32, %v9662_v31 }
  0xdb   :  { %v11355_v51 = vor.u32 %v14100_v35, %v11352_v36  ;;  %3321 = vmatpush.bf16.msrb.mxu2 %v11099_v48  ;;  %3340 = vmatpush.bf16.msra.mxu0 %v9791_v52  ;;  %v10463_v35 = vor.u32 %v13881_v27, %v10462_v26  ;;  %v13745_v36 = vld [vmem:[%s22446_s3 + $0x2e4] sm:$0xf0] }
  0xdc   :  { %3309 = vmatmul.bf16.vlgmr.msrb.gmra.mxu1 %v15328_v40  ;;  %v10430_v42 = vld [vmem:[%s22446_s3 + $0x6c8] sm:$0xf]  ;;  %v9919_v45 = vor.u32 %v13745_v36, %v9918_v33 }
  0xdd   :  { %3334 = vmatpush.bf16.msrb.mxu3 %v11355_v51  ;;  %3353 = vmatpush.bf16.msra.mxu1 %v10047_v53  ;;  %v13873_v43 = vld [vmem:[%s22446_s3 + $0x6e4] sm:$0xf0] }
  0xde   :  { %3322 = vmatmul.bf16.vlgmr.msrb.gmra.mxu2 %v15316_v34  ;;  %v9630_v47 = vld [vmem:[%s22446_s3 + $0x88] sm:$0xf]  ;;  %v10431_v50 = vor.u32 %v13873_v43, %v10430_v42 }
  0xdf   :  { %3366 = vmatpush.bf16.msra.mxu2 %v10303_v54  ;;  %3341 = vmatpush.bf16.msra.mxu0 %v9759_v0  ;;  %v13673_v48 = vld [vmem:[%s22446_s3 + $0xa4] sm:$0xf0] }
  0xe0   :  { %3335 = vmatmul.bf16.vlgmr.msrb.gmra.mxu3 %v15326_v38  ;;  %v9886_v49 = vld [vmem:[%s22446_s3 + $0x288] sm:$0xf]  ;;  %v9631_v56 = vor.u32 %v13673_v48, %v9630_v47 }
  0xe1   :  { %3379 = vmatpush.bf16.msra.mxu3 %v10559_v58  ;;  %3354 = vmatpush.bf16.msra.mxu1 %v10015_v1  ;;  %v13737_v51 = vld [vmem:[%s22446_s3 + $0x2a4] sm:$0xf0] }
  0xe2   :  { %v10142_v52 = vld [vmem:[%s22446_s3 + $0x488] sm:$0xf]  ;;  %v9887_v57 = vor.u32 %v13737_v51, %v9886_v49 }
  0xe3   :  { %3367 = vmatpush.bf16.msra.mxu2 %v10271_v2  ;;  %3342 = vmatpush.bf16.msra.mxu0 %v9727_v14  ;;  %v13801_v53 = vld [vmem:[%s22446_s3 + $0x4a4] sm:$0xf0] }
  0xe4   :  { %v10398_v54 = vld [vmem:[%s22446_s3 + $0x688] sm:$0xf]  ;;  %v10143_v58 = vor.u32 %v13801_v53, %v10142_v52 }
  0xe5   :  { %3380 = vmatpush.bf16.msra.mxu3 %v10527_v6  ;;  %3355 = vmatpush.bf16.msra.mxu1 %v9983_v16  ;;  %v13865_v55 = vld [vmem:[%s22446_s3 + $0x6a4] sm:$0xf0] }
  0xe6   :  { %v9598_v59 = vld [vmem:[%s22446_s3 + $0x48] sm:$0xf]  ;;  %v10399_v62 = vor.u32 %v13865_v55, %v10398_v54 }
  0xe7   :  { %3368 = vmatpush.bf16.msra.mxu2 %v10239_v17  ;;  %3343 = vmatpush.bf16.msra.mxu0 %v9695_v28  ;;  %v13665_v60 = vld [vmem:[%s22446_s3 + $0x64] sm:$0xf0] }
  0xe8   :  { %v9854_v61 = vld [vmem:[%s22446_s3 + $0x248] sm:$0xf]  ;;  %v9599_v4 = vor.u32 %v13665_v60, %v9598_v59 }
  0xe9   :  { %3381 = vmatpush.bf16.msra.mxu3 %v10495_v21  ;;  %3356 = vmatpush.bf16.msra.mxu1 %v9951_v29  ;;  %v13729_v63 = vld [vmem:[%s22446_s3 + $0x264] sm:$0xf0] }
  0xea   :  { %v10110_v0 = vld [vmem:[%s22446_s3 + $0x448] sm:$0xf]  ;;  %v9855_v7 = vor.u32 %v13729_v63, %v9854_v61 }
  0xeb   :  { %3369 = vmatpush.bf16.msra.mxu2 %v10207_v30  ;;  %3344 = vmatpush.bf16.msra.mxu0 %v9663_v44  ;;  %v13793_v1 = vld [vmem:[%s22446_s3 + $0x464] sm:$0xf0] }
  0xec   :  { %v10366_v2 = vld [vmem:[%s22446_s3 + $0x648] sm:$0xf]  ;;  %v10111_v10 = vor.u32 %v13793_v1, %v10110_v0 }
  0xed   :  { %3382 = vmatpush.bf16.msra.mxu3 %v10463_v35  ;;  %3357 = vmatpush.bf16.msra.mxu1 %v9919_v45  ;;  %v13857_v3 = vld [vmem:[%s22446_s3 + $0x664] sm:$0xf0] }
  0xee   :  { %v9566_v5 = vld [vmem:[%s22446_s3 + $0x8] sm:$0xf]  ;;  %v10367_v14 = vor.u32 %v13857_v3, %v10366_v2 }
  0xef   :  { %3370 = vmatpush.bf16.msra.mxu2 %v10175_v46  ;;  %3345 = vmatpush.bf16.msra.mxu0 %v9631_v56  ;;  %v13657_v6 = vld [vmem:[%s22446_s3 + $0x24] sm:$0xf0] }
  0xf0   :  { %v9822_v11 = vld [vmem:[%s22446_s3 + $0x208] sm:$0xf]  ;;  %v9567_v22 = vor.u32 %v13657_v6, %v9566_v5  ;;  %v15967_v6 = vld [vmem:[%s22448_s5] sm:$0xff] }
  0xf1   :  { %3383 = vmatpush.bf16.msra.mxu3 %v10431_v50  ;;  %3358 = vmatpush.bf16.msra.mxu1 %v9887_v57  ;;  %v13721_v12 = vld [vmem:[%s22446_s3 + $0x224] sm:$0xf0] }
  0xf2   :  { %v10078_v13 = vld [vmem:[%s22446_s3 + $0x408] sm:$0xf]  ;;  %v9823_v27 = vor.u32 %v13721_v12, %v9822_v11 }
  0xf3   :  { %3371 = vmatpush.bf16.msra.mxu2 %v10143_v58  ;;  %v13785_v16 = vld [vmem:[%s22446_s3 + $0x424] sm:$0xf0]  ;;  %3346 = vmatpush.bf16.msra.mxu0 %v9599_v4 }
  0xf4   :  { %v10334_v17 = vld [vmem:[%s22446_s3 + $0x608] sm:$0xf]  ;;  %v10079_v28 = vor.u32 %v13785_v16, %v10078_v13 }
  0xf5   :  { %3384 = vmatpush.bf16.msra.mxu3 %v10399_v62  ;;  %v13849_v18 = vld [vmem:[%s22446_s3 + $0x624] sm:$0xf0]  ;;  %3359 = vmatpush.bf16.msra.mxu1 %v9855_v7 }
  0xf6   :  { %v10814_v19 = vld [vmem:[%s22446_s3 + $0x9c8] sm:$0xf]  ;;  %v10335_v31 = vor.u32 %v13849_v18, %v10334_v17  ;;  %v556_v18 = vperm.slane %v15967_v6, 0 }
  0xf7   :  { %v13969_v20 = vld [vmem:[%s22446_s3 + $0x9e4] sm:$0xf0]  ;;  %3372 = vmatpush.bf16.msra.mxu2 %v10111_v10  ;;  %3347 = vmatpush.bf16.msra.mxu0 %v9567_v22 }
  0xf8   :  { %v11070_v21 = vld [vmem:[%s22446_s3 + $0xbc8] sm:$0xf]  ;;  %v10815_v32 = vor.u32 %v13969_v20, %v10814_v19 }
  0xf9   :  { %v14033_v23 = vld [vmem:[%s22446_s3 + $0xbe4] sm:$0xf0]  ;;  %3385 = vmatpush.bf16.msra.mxu3 %v10367_v14  ;;  %3360 = vmatpush.bf16.msra.mxu1 %v9823_v27  ;;  %v3141_v27 = vpop.f32.mrf.mxu0 }
  0xfa   :  { %v11326_v24 = vld [vmem:[%s22446_s3 + $0xdc8] sm:$0xf]  ;;  %v11071_v33 = vor.u32 %v14033_v23, %v11070_v21  ;;  %3348 = vmatmul.bf16.vlgmr.msra.gmra.mxu0 %v15135_v9 }
  0xfb   :  { %v14097_v26 = vld [vmem:[%s22446_s3 + $0xde4] sm:$0xf0]  ;;  %3373 = vmatpush.bf16.msra.mxu2 %v10079_v28  ;;  %3392 = vmatpush.bf16.msrb.mxu0 %v10815_v32 }
  0xfc   :  { %v11582_v29 = vld [vmem:[%s22446_s3 + $0xfc8] sm:$0xf]  ;;  %v11327_v35 = vor.u32 %v14097_v26, %v11326_v24  ;;  %3361 = vmatmul.bf16.vlgmr.msra.gmra.mxu1 %v15172_v25 }
  0xfd   :  { %v14161_v30 = vld [vmem:[%s22446_s3 + $0xfe4] sm:$0xf0]  ;;  %3386 = vmatpush.bf16.msra.mxu3 %v10335_v31  ;;  %3405 = vmatpush.bf16.msrb.mxu1 %v11071_v33  ;;  %v3142_v33 = vadd.f32 %v3141_v27, %v556_v18  ;;  %v10560_v27 = vld [vmem:[%s22446_s3 + $0x7e8] sm:$0xf0] }
  0xfe   :  { %v10782_v36 = vld [vmem:[%s22446_s3 + $0x988] sm:$0xf]  ;;  %v11583_v42 = vor.u32 %v14161_v30, %v11582_v29  ;;  %3374 = vmatmul.bf16.vlgmr.msra.gmra.mxu2 %v15133_v8 }
  0xff   :  { %v13961_v39 = vld [vmem:[%s22446_s3 + $0x9a4] sm:$0xf0]  ;;  %3418 = vmatpush.bf16.msrb.mxu2 %v11327_v35 }
 0x100   :  { %v11038_v41 = vld [vmem:[%s22446_s3 + $0xb88] sm:$0xf]  ;;  %v10783_v48 = vor.u32 %v13961_v39, %v10782_v36  ;;  %3387 = vmatmul.bf16.vlgmr.msra.gmra.mxu3 %v15149_v15 }
 0x101   :  { %v14025_v43 = vld [vmem:[%s22446_s3 + $0xba4] sm:$0xf0]  ;;  %3431 = vmatpush.bf16.msrb.mxu3 %v11583_v42 }
 0x102   :  { %v11294_v44 = vld [vmem:[%s22446_s3 + $0xd88] sm:$0xf]  ;;  %v11039_v49 = vor.u32 %v14025_v43, %v11038_v41  ;;  %3393 = vmatpush.bf16.msrb.mxu0 %v10783_v48 }
 0x103   :  { %v14089_v45 = vld [vmem:[%s22446_s3 + $0xda4] sm:$0xf0] }
 0x104   :  { %v11550_v46 = vld [vmem:[%s22446_s3 + $0xf88] sm:$0xf]  ;;  %v11295_v50 = vor.u32 %v14089_v45, %v11294_v44  ;;  %3406 = vmatpush.bf16.msrb.mxu1 %v11039_v49  ;;  %v3154_v45 = vpop.f32.mrf.mxu1 }
 0x105   :  { %v14153_v47 = vld [vmem:[%s22446_s3 + $0xfa4] sm:$0xf0] }
 0x106   :  { %v10750_v51 = vld [vmem:[%s22446_s3 + $0x948] sm:$0xf]  ;;  %v11551_v54 = vor.u32 %v14153_v47, %v11550_v46  ;;  %3419 = vmatpush.bf16.msrb.mxu2 %v11295_v50 }
 0x107   :  { %v13953_v52 = vld [vmem:[%s22446_s3 + $0x964] sm:$0xf0] }
 0x108   :  { %v11006_v53 = vld [vmem:[%s22446_s3 + $0xb48] sm:$0xf]  ;;  %v10751_v60 = vor.u32 %v13953_v52, %v10750_v51  ;;  %3432 = vmatpush.bf16.msrb.mxu3 %v11551_v54  ;;  %v3155_v51 = vadd.f32 %v3154_v45, %v3142_v33  ;;  %v13701_v33 = vld [vmem:[%s22446_s3 + $0x18c] sm:$0xf] }
 0x109   :  { %v14017_v55 = vld [vmem:[%s22446_s3 + $0xb64] sm:$0xf0]  ;;  %v13893_v45 = vld [vmem:[%s22446_s3 + $0x78c] sm:$0xf] }
 0x10a   :  { %v11262_v56 = vld [vmem:[%s22446_s3 + $0xd48] sm:$0xf]  ;;  %v11007_v62 = vor.u32 %v14017_v55, %v11006_v53  ;;  %3394 = vmatpush.bf16.msrb.mxu0 %v10751_v60  ;;  %v3180_v60 = vpop.f32.mrf.mxu3 }
 0x10b   :  { %v14081_v57 = vld [vmem:[%s22446_s3 + $0xd64] sm:$0xf0] }
 0x10c   :  { %v11518_v58 = vld [vmem:[%s22446_s3 + $0xf48] sm:$0xf]  ;;  %v11263_v63 = vor.u32 %v14081_v57, %v11262_v56  ;;  %3407 = vmatpush.bf16.msrb.mxu1 %v11007_v62  ;;  %v3167_v56 = vpop.f32.mrf.mxu2 }
 0x10d   :  { %v14145_v59 = vld [vmem:[%s22446_s3 + $0xf64] sm:$0xf0] }
 0x10e   :  { %v10718_v61 = vld [vmem:[%s22446_s3 + $0x908] sm:$0xf]  ;;  %v11519_v3 = vor.u32 %v14145_v59, %v11518_v58  ;;  %3420 = vmatpush.bf16.msrb.mxu2 %v11263_v63  ;;  %v3168_v59 = vadd.f32 %v3167_v56, %v3155_v51  ;;  %v9728_v51 = vld [vmem:[%s22446_s3 + $0x168] sm:$0xf0] }
 0x10f   :  { %v13945_v0 = vld [vmem:[%s22446_s3 + $0x924] sm:$0xf0]  ;;  %v10240_v56 = vld [vmem:[%s22446_s3 + $0x568] sm:$0xf0] }
 0x110   :  { %v10974_v1 = vld [vmem:[%s22446_s3 + $0xb08] sm:$0xf]  ;;  %v10719_v11 = vor.u32 %v13945_v0, %v10718_v61  ;;  %3433 = vmatpush.bf16.msrb.mxu3 %v11519_v3  ;;  %v3143_v0 = vpop.f32.mrf.mxu0 }
 0x111   :  { %v14009_v2 = vld [vmem:[%s22446_s3 + $0xb24] sm:$0xf0]  ;;  %v13749_v0 = vld [vmem:[%s22446_s3 + $0x30c] sm:$0xf] }
 0x112   :  { %v11230_v4 = vld [vmem:[%s22446_s3 + $0xd08] sm:$0xf]  ;;  %v10975_v13 = vor.u32 %v14009_v2, %v10974_v1  ;;  %3395 = vmatpush.bf16.msrb.mxu0 %v10719_v11 }
 0x113   :  { %v14073_v5 = vld [vmem:[%s22446_s3 + $0xd24] sm:$0xf0] }
 0x114   :  { %v11486_v7 = vld [vmem:[%s22446_s3 + $0xf08] sm:$0xf]  ;;  %v11231_v14 = vor.u32 %v14073_v5, %v11230_v4  ;;  %3408 = vmatpush.bf16.msrb.mxu1 %v10975_v13 }
 0x115   :  { %v14137_v10 = vld [vmem:[%s22446_s3 + $0xf24] sm:$0xf0] }
 0x116   :  { %v10686_v12 = vld [vmem:[%s22446_s3 + $0x8c8] sm:$0xf]  ;;  %v11487_v19 = vor.u32 %v14137_v10, %v11486_v7  ;;  %3421 = vmatpush.bf16.msrb.mxu2 %v11231_v14  ;;  %v16063_v7 = vadd.f32 %v3180_v60, %v3168_v59  ;;  %v13709_v14 = vld [vmem:[%s22446_s3 + $0x1cc] sm:$0xf] }
 0x117   :  { %v13937_v16 = vld [vmem:[%s22446_s3 + $0x8e4] sm:$0xf0] }
 0x118   :  { %v10942_v17 = vld [vmem:[%s22446_s3 + $0xac8] sm:$0xf]  ;;  %v10687_v26 = vor.u32 %v13937_v16, %v10686_v12  ;;  %3434 = vmatpush.bf16.msrb.mxu3 %v11487_v19  ;;  %v9792_v16 = vld [vmem:[%s22446_s3 + $0x1e8] sm:$0xf0] }
 0x119   :  { %v14001_v20 = vld [vmem:[%s22446_s3 + $0xae4] sm:$0xf0]  ;;  %v10048_v19 = vld [vmem:[%s22446_s3 + $0x3e8] sm:$0xf0] }
 0x11a   :  { %v11198_v21 = vld [vmem:[%s22446_s3 + $0xcc8] sm:$0xf]  ;;  %v10943_v28 = vor.u32 %v14001_v20, %v10942_v17  ;;  %3396 = vmatpush.bf16.msrb.mxu0 %v10687_v26  ;;  %v13773_v17 = vld [vmem:[%s22446_s3 + $0x3cc] sm:$0xf] }
 0x11b   :  { %v14065_v22 = vld [vmem:[%s22446_s3 + $0xce4] sm:$0xf0]  ;;  %v13837_v20 = vld [vmem:[%s22446_s3 + $0x5cc] sm:$0xf] }
 0x11c   :  { %v11454_v23 = vld [vmem:[%s22446_s3 + $0xec8] sm:$0xf]  ;;  %v11199_v29 = vor.u32 %v14065_v22, %v11198_v21  ;;  %3409 = vmatpush.bf16.msrb.mxu1 %v10943_v28  ;;  %v10304_v21 = vld [vmem:[%s22446_s3 + $0x5e8] sm:$0xf0]  ;;  %v3156_v22 = vpop.f32.mrf.mxu1 }
 0x11d   :  { %v14129_v24 = vld [vmem:[%s22446_s3 + $0xee4] sm:$0xf0]  ;;  %v13901_v26 = vld [vmem:[%s22446_s3 + $0x7cc] sm:$0xf] }
 0x11e   :  { %v10654_v30 = vld [vmem:[%s22446_s3 + $0x888] sm:$0xf]  ;;  %v11455_v35 = vor.u32 %v14129_v24, %v11454_v23  ;;  %3422 = vmatpush.bf16.msrb.mxu2 %v11199_v29  ;;  %v9795_v29 = vor.u32 %v13709_v14, %v9792_v16  ;;  %v13677_v16 = vld [vmem:[%s22446_s3 + $0xcc] sm:$0xf] }
 0x11f   :  { %v13929_v31 = vld [vmem:[%s22446_s3 + $0x8a4] sm:$0xf0]  ;;  %v9920_v22 = vld [vmem:[%s22446_s3 + $0x2e8] sm:$0xf0] }
 0x120   :  { %v10910_v32 = vld [vmem:[%s22446_s3 + $0xa88] sm:$0xf]  ;;  %v10655_v44 = vor.u32 %v13929_v31, %v10654_v30  ;;  %3435 = vmatpush.bf16.msrb.mxu3 %v11455_v35  ;;  %v3169_v30 = vpop.f32.mrf.mxu2  ;;  %v10051_v31 = vor.u32 %v13773_v17, %v10048_v19  ;;  %v9760_v35 = vld [vmem:[%s22446_s3 + $0x1a8] sm:$0xf0] }
 0x121   :  { %v13993_v36 = vld [vmem:[%s22446_s3 + $0xaa4] sm:$0xf0]  ;;  %v9664_v17 = vld [vmem:[%s22446_s3 + $0xe8] sm:$0xf0] }
 0x122   :  { %v11166_v39 = vld [vmem:[%s22446_s3 + $0xc88] sm:$0xf]  ;;  %v10911_v46 = vor.u32 %v13993_v36, %v10910_v32  ;;  %3397 = vmatpush.bf16.msrb.mxu0 %v10655_v44  ;;  %v10307_v32 = vor.u32 %v13837_v20, %v10304_v21  ;;  %v13765_v36 = vld [vmem:[%s22446_s3 + $0x38c] sm:$0xf] }
 0x123   :  { %v14057_v41 = vld [vmem:[%s22446_s3 + $0xca4] sm:$0xf0]  ;;  %v10272_v44 = vld [vmem:[%s22446_s3 + $0x5a8] sm:$0xf0] }
 0x124   :  { %v11422_v42 = vld [vmem:[%s22446_s3 + $0xe88] sm:$0xf]  ;;  %v11167_v47 = vor.u32 %v14057_v41, %v11166_v39  ;;  %3410 = vmatpush.bf16.msrb.mxu1 %v10911_v46  ;;  %v3182_v39 = vpop.f32.mrf.mxu3  ;;  %v10563_v41 = vor.u32 %v13901_v26, %v10560_v27  ;;  %v10528_v46 = vld [vmem:[%s22446_s3 + $0x7a8] sm:$0xf0]  ;;  %v3206_v20 = vpop.f32.mrf.mxu1 }
 0x125   :  { %v14121_v43 = vld [vmem:[%s22446_s3 + $0xea4] sm:$0xf0]  ;;  %v13869_v26 = vld [vmem:[%s22446_s3 + $0x6cc] sm:$0xf] }
 0x126   :  { %v10622_v48 = vld [vmem:[%s22446_s3 + $0x848] sm:$0xf]  ;;  %v11423_v52 = vor.u32 %v14121_v43, %v11422_v42  ;;  %3423 = vmatpush.bf16.msrb.mxu2 %v11167_v47  ;;  %v10016_v42 = vld [vmem:[%s22446_s3 + $0x3a8] sm:$0xf0]  ;;  %v9763_v47 = vor.u32 %v13701_v33, %v9760_v35 }
 0x127   :  { %v13921_v49 = vld [vmem:[%s22446_s3 + $0x864] sm:$0xf0]  ;;  %v13829_v43 = vld [vmem:[%s22446_s3 + $0x58c] sm:$0xf] }
 0x128   :  { %v10878_v50 = vld [vmem:[%s22446_s3 + $0xa48] sm:$0xf]  ;;  %v10623_v61 = vor.u32 %v13921_v49, %v10622_v48  ;;  %3436 = vmatpush.bf16.msrb.mxu3 %v11423_v52  ;;  %v10019_v48 = vor.u32 %v13765_v36, %v10016_v42  ;;  %v10275_v49 = vor.u32 %v13829_v43, %v10272_v44  ;;  %v13757_v52 = vld [vmem:[%s22446_s3 + $0x34c] sm:$0xf]  ;;  %v3219_v35 = vpop.f32.mrf.mxu2 }
 0x129   :  { %v13985_v53 = vld [vmem:[%s22446_s3 + $0xa64] sm:$0xf0]  ;;  %v13733_v33 = vld [vmem:[%s22446_s3 + $0x28c] sm:$0xf] }
 0x12a   :  { %v11134_v54 = vld [vmem:[%s22446_s3 + $0xc48] sm:$0xf]  ;;  %v10879_v1 = vor.u32 %v13985_v53, %v10878_v50  ;;  %3398 = vmatpush.bf16.msrb.mxu0 %v10623_v61  ;;  %v13693_v50 = vld [vmem:[%s22446_s3 + $0x14c] sm:$0xf]  ;;  %v10531_v53 = vor.u32 %v13893_v45, %v10528_v46 }
 0x12b   :  { %v14049_v55 = vld [vmem:[%s22446_s3 + $0xc64] sm:$0xf0]  ;;  %v9731_v59 = vor.u32 %v13693_v50, %v9728_v51  ;;  %v9888_v39 = vld [vmem:[%s22446_s3 + $0x2a8] sm:$0xf0] }
 0x12c   :  { %v11390_v57 = vld [vmem:[%s22446_s3 + $0xe48] sm:$0xf]  ;;  %v11135_v2 = vor.u32 %v14049_v55, %v11134_v54  ;;  %3411 = vmatpush.bf16.msrb.mxu1 %v10879_v1  ;;  %v9984_v54 = vld [vmem:[%s22446_s3 + $0x368] sm:$0xf0]  ;;  %v3232_v44 = vpop.f32.mrf.mxu3  ;;  %v9891_v50 = vor.u32 %v13733_v33, %v9888_v39 }
 0x12d   :  { %v14113_v58 = vld [vmem:[%s22446_s3 + $0xe64] sm:$0xf0]  ;;  %v13821_v55 = vld [vmem:[%s22446_s3 + $0x54c] sm:$0xf]  ;;  %v9987_v60 = vor.u32 %v13757_v52, %v9984_v54 }
 0x12e   :  { %v10590_v62 = vld [vmem:[%s22446_s3 + $0x808] sm:$0xf]  ;;  %v11391_v10 = vor.u32 %v14113_v58, %v11390_v57  ;;  %3424 = vmatpush.bf16.msrb.mxu2 %v11135_v2  ;;  %v13885_v57 = vld [vmem:[%s22446_s3 + $0x74c] sm:$0xf]  ;;  %v10243_v61 = vor.u32 %v13821_v55, %v10240_v56  ;;  %v3208_v55 = vpop.f32.mrf.mxu1 }
 0x12f   :  { %v13913_v63 = vld [vmem:[%s22446_s3 + $0x824] sm:$0xf0]  ;;  %v10496_v58 = vld [vmem:[%s22446_s3 + $0x768] sm:$0xf0] }
 0x130   :  { %v10846_v3 = vld [vmem:[%s22446_s3 + $0xa08] sm:$0xf]  ;;  %v10591_v18 = vor.u32 %v13913_v63, %v10590_v62  ;;  %3437 = vmatpush.bf16.msrb.mxu3 %v11391_v10  ;;  %v13685_v62 = vld [vmem:[%s22446_s3 + $0x10c] sm:$0xf]  ;;  %v10499_v1 = vor.u32 %v13885_v57, %v10496_v58 }
 0x131   :  { %v13977_v4 = vld [vmem:[%s22446_s3 + $0xa24] sm:$0xf0]  ;;  %v9696_v63 = vld [vmem:[%s22446_s3 + $0x128] sm:$0xf0] }
 0x132   :  { %v11102_v5 = vld [vmem:[%s22446_s3 + $0xc08] sm:$0xf]  ;;  %v10847_v23 = vor.u32 %v13977_v4, %v10846_v3  ;;  %3399 = vmatpush.bf16.msrb.mxu0 %v10591_v18  ;;  %v9952_v2 = vld [vmem:[%s22446_s3 + $0x328] sm:$0xf0] }
 0x133   :  { %v14041_v11 = vld [vmem:[%s22446_s3 + $0xc24] sm:$0xf0]  ;;  %v13813_v3 = vld [vmem:[%s22446_s3 + $0x50c] sm:$0xf] }
 0x134   :  { %v11358_v12 = vld [vmem:[%s22446_s3 + $0xe08] sm:$0xf]  ;;  %v11103_v24 = vor.u32 %v14041_v11, %v11102_v5  ;;  %3412 = vmatpush.bf16.msrb.mxu1 %v10847_v23  ;;  %v10208_v4 = vld [vmem:[%s22446_s3 + $0x528] sm:$0xf0]  ;;  %v9699_v11 = vor.u32 %v13685_v62, %v9696_v63 }
 0x135   :  { %v14105_v13 = vld [vmem:[%s22446_s3 + $0xe24] sm:$0xf0]  ;;  %3400 = vmatmul.bf16.vlgmr.msrb.gmra.mxu0 %v15324_v37  ;;  %v13877_v5 = vld [vmem:[%s22446_s3 + $0x70c] sm:$0xf]  ;;  %v10211_v14 = vor.u32 %v13813_v3, %v10208_v4 }
 0x136   :  { %v11359_v28 = vor.u32 %v14105_v13, %v11358_v12  ;;  %3425 = vmatpush.bf16.msrb.mxu2 %v11103_v24  ;;  %3444 = vmatpush.bf16.msra.mxu0 %v9795_v29  ;;  %v10464_v10 = vld [vmem:[%s22446_s3 + $0x728] sm:$0xf0]  ;;  %v3193_v12 = vpop.f32.mrf.mxu0  ;;  %v9955_v13 = vor.u32 %v13749_v0, %v9952_v2 }
 0x137   :  { %3413 = vmatmul.bf16.vlgmr.msrb.gmra.mxu1 %v15328_v40  ;;  %v13741_v18 = vld [vmem:[%s22446_s3 + $0x2cc] sm:$0xf]  ;;  %v3194_v19 = vadd.f32 %v3193_v12, %v16063_v7  ;;  %v10467_v21 = vor.u32 %v13877_v5, %v10464_v10  ;;  %v3221_v10 = vpop.f32.mrf.mxu2 }
 0x138   :  { %3438 = vmatpush.bf16.msrb.mxu3 %v11359_v28  ;;  %3457 = vmatpush.bf16.msra.mxu1 %v10051_v31  ;;  %v13805_v23 = vld [vmem:[%s22446_s3 + $0x4cc] sm:$0xf]  ;;  %v9667_v28 = vor.u32 %v13677_v16, %v9664_v17  ;;  %v9923_v29 = vor.u32 %v13741_v18, %v9920_v22  ;;  %v3234_v16 = vpop.f32.mrf.mxu3 }
 0x139   :  { %3426 = vmatmul.bf16.vlgmr.msrb.gmra.mxu2 %v15316_v34  ;;  %v10176_v24 = vld [vmem:[%s22446_s3 + $0x4e8] sm:$0xf0]  ;;  %v3207_v27 = vadd.f32 %v3206_v20, %v3194_v19 }
 0x13a   :  { %3470 = vmatpush.bf16.msra.mxu2 %v10307_v32  ;;  %3445 = vmatpush.bf16.msra.mxu0 %v9763_v47  ;;  %v10432_v7 = vld [vmem:[%s22446_s3 + $0x6e8] sm:$0xf0]  ;;  %v10179_v30 = vor.u32 %v13805_v23, %v10176_v24 }
 0x13b   :  { %3439 = vmatmul.bf16.vlgmr.msrb.gmra.mxu3 %v15326_v38  ;;  %v13669_v31 = vld [vmem:[%s22446_s3 + $0x8c] sm:$0xf]  ;;  %v10435_v36 = vor.u32 %v13869_v26, %v10432_v7  ;;  %v3220_v43 = vadd.f32 %v3219_v35, %v3207_v27 }
 0x13c   :  { %3483 = vmatpush.bf16.msra.mxu3 %v10563_v41  ;;  %3458 = vmatpush.bf16.msra.mxu1 %v10019_v48  ;;  %v9632_v32 = vld [vmem:[%s22446_s3 + $0xa8] sm:$0xf0] }
 0x13d   :  { %v13797_v41 = vld [vmem:[%s22446_s3 + $0x48c] sm:$0xf]  ;;  %v9635_v47 = vor.u32 %v13669_v31, %v9632_v32  ;;  %v16223_v48 = vadd.f32 %v3232_v44, %v3220_v43 }
 0x13e   :  { %3471 = vmatpush.bf16.msra.mxu2 %v10275_v49  ;;  %3446 = vmatpush.bf16.msra.mxu0 %v9731_v59  ;;  %v10144_v42 = vld [vmem:[%s22446_s3 + $0x4a8] sm:$0xf0]  ;;  %v3195_v49 = vpop.f32.mrf.mxu0 }
 0x13f   :  { %v13861_v45 = vld [vmem:[%s22446_s3 + $0x68c] sm:$0xf]  ;;  %v10147_v51 = vor.u32 %v13797_v41, %v10144_v42 }
 0x140   :  { %3484 = vmatpush.bf16.msra.mxu3 %v10531_v53  ;;  %3459 = vmatpush.bf16.msra.mxu1 %v9987_v60  ;;  %v10400_v46 = vld [vmem:[%s22446_s3 + $0x6a8] sm:$0xf0] }
 0x141   :  { %v13661_v52 = vld [vmem:[%s22446_s3 + $0x4c] sm:$0xf]  ;;  %v10403_v56 = vor.u32 %v13861_v45, %v10400_v46 }
 0x142   :  { %3472 = vmatpush.bf16.msra.mxu2 %v10243_v61  ;;  %3447 = vmatpush.bf16.msra.mxu0 %v9699_v11  ;;  %v9600_v53 = vld [vmem:[%s22446_s3 + $0x68] sm:$0xf0] }
 0x143   :  { %v13725_v54 = vld [vmem:[%s22446_s3 + $0x24c] sm:$0xf]  ;;  %v9603_v62 = vor.u32 %v13661_v52, %v9600_v53 }
 0x144   :  { %3485 = vmatpush.bf16.msra.mxu3 %v10499_v1  ;;  %3460 = vmatpush.bf16.msra.mxu1 %v9955_v13  ;;  %v9856_v57 = vld [vmem:[%s22446_s3 + $0x268] sm:$0xf0] }
 0x145   :  { %v13789_v58 = vld [vmem:[%s22446_s3 + $0x44c] sm:$0xf]  ;;  %v9859_v1 = vor.u32 %v13725_v54, %v9856_v57 }
 0x146   :  { %3473 = vmatpush.bf16.msra.mxu2 %v10211_v14  ;;  %3448 = vmatpush.bf16.msra.mxu0 %v9667_v28  ;;  %v10112_v59 = vld [vmem:[%s22446_s3 + $0x468] sm:$0xf0] }
 0x147   :  { %v13853_v60 = vld [vmem:[%s22446_s3 + $0x64c] sm:$0xf]  ;;  %v10115_v2 = vor.u32 %v13789_v58, %v10112_v59 }
 0x148   :  { %3486 = vmatpush.bf16.msra.mxu3 %v10467_v21  ;;  %3461 = vmatpush.bf16.msra.mxu1 %v9923_v29  ;;  %v10368_v61 = vld [vmem:[%s22446_s3 + $0x668] sm:$0xf0] }
 0x149   :  { %v13653_v63 = vld [vmem:[%s22446_s3 + $0xc] sm:$0xf]  ;;  %v10371_v11 = vor.u32 %v13853_v60, %v10368_v61 }
 0x14a   :  { %3474 = vmatpush.bf16.msra.mxu2 %v10179_v30  ;;  %3449 = vmatpush.bf16.msra.mxu0 %v9635_v47  ;;  %v9568_v0 = vld [vmem:[%s22446_s3 + $0x28] sm:$0xf0] }
 0x14b   :  { %v13717_v3 = vld [vmem:[%s22446_s3 + $0x20c] sm:$0xf]  ;;  %v9571_v20 = vor.u32 %v13653_v63, %v9568_v0  ;;  %v557_v0 = vperm.slane %v15967_v6, 1 }
 0x14c   :  { %3487 = vmatpush.bf16.msra.mxu3 %v10435_v36  ;;  %3462 = vmatpush.bf16.msra.mxu1 %v9891_v50  ;;  %v9824_v4 = vld [vmem:[%s22446_s3 + $0x228] sm:$0xf0] }
 0x14d   :  { %v13781_v5 = vld [vmem:[%s22446_s3 + $0x40c] sm:$0xf]  ;;  %v9827_v24 = vor.u32 %v13717_v3, %v9824_v4 }
 0x14e   :  { %3475 = vmatpush.bf16.msra.mxu2 %v10147_v51  ;;  %v10080_v12 = vld [vmem:[%s22446_s3 + $0x428] sm:$0xf0]  ;;  %3450 = vmatpush.bf16.msra.mxu0 %v9603_v62 }
 0x14f   :  { %v13845_v13 = vld [vmem:[%s22446_s3 + $0x60c] sm:$0xf]  ;;  %v10083_v26 = vor.u32 %v13781_v5, %v10080_v12 }
 0x150   :  { %3488 = vmatpush.bf16.msra.mxu3 %v10403_v56  ;;  %v10336_v14 = vld [vmem:[%s22446_s3 + $0x628] sm:$0xf0]  ;;  %3463 = vmatpush.bf16.msra.mxu1 %v9859_v1 }
 0x151   :  { %v13965_v17 = vld [vmem:[%s22446_s3 + $0x9cc] sm:$0xf]  ;;  %v10339_v28 = vor.u32 %v13845_v13, %v10336_v14 }
 0x152   :  { %v10816_v18 = vld [vmem:[%s22446_s3 + $0x9e8] sm:$0xf0]  ;;  %3476 = vmatpush.bf16.msra.mxu2 %v10115_v2  ;;  %3451 = vmatpush.bf16.msra.mxu0 %v9571_v20 }
 0x153   :  { %v14029_v19 = vld [vmem:[%s22446_s3 + $0xbcc] sm:$0xf]  ;;  %v10819_v29 = vor.u32 %v13965_v17, %v10816_v18 }
 0x154   :  { %v11072_v21 = vld [vmem:[%s22446_s3 + $0xbe8] sm:$0xf0]  ;;  %3489 = vmatpush.bf16.msra.mxu3 %v10371_v11  ;;  %3464 = vmatpush.bf16.msra.mxu1 %v9827_v24  ;;  %v3245_v11 = vpop.f32.mrf.mxu0 }
 0x155   :  { %v14093_v22 = vld [vmem:[%s22446_s3 + $0xdcc] sm:$0xf]  ;;  %v11075_v30 = vor.u32 %v14029_v19, %v11072_v21  ;;  %3452 = vmatmul.bf16.vlgmr.msra.gmra.mxu0 %v15135_v9  ;;  %v3246_v18 = vadd.f32 %v3245_v11, %v557_v0  ;;  %v3258_v19 = vpop.f32.mrf.mxu1 }
 0x156   :  { %v11328_v23 = vld [vmem:[%s22446_s3 + $0xde8] sm:$0xf0]  ;;  %3477 = vmatpush.bf16.msra.mxu2 %v10083_v26  ;;  %3496 = vmatpush.bf16.msrb.mxu0 %v10819_v29 }
 0x157   :  { %v14157_v7 = vld [vmem:[%s22446_s3 + $0xfcc] sm:$0xf]  ;;  %v11331_v31 = vor.u32 %v14093_v22, %v11328_v23  ;;  %3465 = vmatmul.bf16.vlgmr.msra.gmra.mxu1 %v15172_v25 }
 0x158   :  { %v11584_v27 = vld [vmem:[%s22446_s3 + $0xfe8] sm:$0xf0]  ;;  %3490 = vmatpush.bf16.msra.mxu3 %v10339_v28  ;;  %3509 = vmatpush.bf16.msrb.mxu1 %v11075_v30 }
 0x159   :  { %v13957_v32 = vld [vmem:[%s22446_s3 + $0x98c] sm:$0xf]  ;;  %v11587_v36 = vor.u32 %v14157_v7, %v11584_v27  ;;  %3478 = vmatmul.bf16.vlgmr.msra.gmra.mxu2 %v15133_v8  ;;  %v3259_v7 = vadd.f32 %v3258_v19, %v3246_v18  ;;  %v10054_v18 = vld [vmem:[%s22446_s3 + $0x3d0] sm:$0xf] }
 0x15a   :  { %v10784_v33 = vld [vmem:[%s22446_s3 + $0x9a8] sm:$0xf0]  ;;  %3522 = vmatpush.bf16.msrb.mxu2 %v11331_v31 }
 0x15b   :  { %v14021_v35 = vld [vmem:[%s22446_s3 + $0xb8c] sm:$0xf]  ;;  %v10787_v45 = vor.u32 %v13957_v32, %v10784_v33  ;;  %3491 = vmatmul.bf16.vlgmr.msra.gmra.mxu3 %v15149_v15  ;;  %v3271_v33 = vpop.f32.mrf.mxu2 }
 0x15c   :  { %v11040_v39 = vld [vmem:[%s22446_s3 + $0xba8] sm:$0xf0]  ;;  %3535 = vmatpush.bf16.msrb.mxu3 %v11587_v36 }
 0x15d   :  { %v14085_v41 = vld [vmem:[%s22446_s3 + $0xd8c] sm:$0xf]  ;;  %v11043_v46 = vor.u32 %v14021_v35, %v11040_v39  ;;  %3497 = vmatpush.bf16.msrb.mxu0 %v10787_v45 }
 0x15e   :  { %v11296_v42 = vld [vmem:[%s22446_s3 + $0xda8] sm:$0xf0] }
 0x15f   :  { %v14149_v43 = vld [vmem:[%s22446_s3 + $0xf8c] sm:$0xf]  ;;  %v11299_v47 = vor.u32 %v14085_v41, %v11296_v42  ;;  %3510 = vmatpush.bf16.msrb.mxu1 %v11043_v46  ;;  %v3272_v42 = vadd.f32 %v3271_v33, %v3259_v7  ;;  %v13906_v7 = vld [vmem:[%s22446_s3 + $0x7ec] sm:$0xf0] }
 0x160   :  { %v11552_v44 = vld [vmem:[%s22446_s3 + $0xfa8] sm:$0xf0]  ;;  %v10022_v33 = vld [vmem:[%s22446_s3 + $0x390] sm:$0xf] }
 0x161   :  { %v13949_v49 = vld [vmem:[%s22446_s3 + $0x94c] sm:$0xf]  ;;  %v11555_v52 = vor.u32 %v14149_v43, %v11552_v44  ;;  %3523 = vmatpush.bf16.msrb.mxu2 %v11299_v47  ;;  %v3284_v43 = vpop.f32.mrf.mxu3 }
 0x162   :  { %v10752_v50 = vld [vmem:[%s22446_s3 + $0x968] sm:$0xf0]  ;;  %v16422_v47 = vadd.f32 %v3284_v43, %v3272_v42  ;;  %v10534_v42 = vld [vmem:[%s22446_s3 + $0x790] sm:$0xf] }
 0x163   :  { %v14013_v51 = vld [vmem:[%s22446_s3 + $0xb4c] sm:$0xf]  ;;  %v10755_v58 = vor.u32 %v13949_v49, %v10752_v50  ;;  %3536 = vmatpush.bf16.msrb.mxu3 %v11555_v52  ;;  %v3247_v49 = vpop.f32.mrf.mxu0  ;;  %v13898_v43 = vld [vmem:[%s22446_s3 + $0x7ac] sm:$0xf0] }
 0x164   :  { %v11008_v53 = vld [vmem:[%s22446_s3 + $0xb68] sm:$0xf0]  ;;  %v9734_v49 = vld [vmem:[%s22446_s3 + $0x150] sm:$0xf] }
 0x165   :  { %v14077_v54 = vld [vmem:[%s22446_s3 + $0xd4c] sm:$0xf]  ;;  %v11011_v60 = vor.u32 %v14013_v51, %v11008_v53  ;;  %3498 = vmatpush.bf16.msrb.mxu0 %v10755_v58 }
 0x166   :  { %v11264_v55 = vld [vmem:[%s22446_s3 + $0xd68] sm:$0xf0] }
 0x167   :  { %v14141_v56 = vld [vmem:[%s22446_s3 + $0xf4c] sm:$0xf]  ;;  %v11267_v61 = vor.u32 %v14077_v54, %v11264_v55  ;;  %3511 = vmatpush.bf16.msrb.mxu1 %v11011_v60  ;;  %v3260_v55 = vpop.f32.mrf.mxu1 }
 0x168   :  { %v11520_v57 = vld [vmem:[%s22446_s3 + $0xf68] sm:$0xf0]  ;;  %v13826_v55 = vld [vmem:[%s22446_s3 + $0x56c] sm:$0xf0] }
 0x169   :  { %v13941_v59 = vld [vmem:[%s22446_s3 + $0x90c] sm:$0xf]  ;;  %v11523_v1 = vor.u32 %v14141_v56, %v11520_v57  ;;  %3524 = vmatpush.bf16.msrb.mxu2 %v11267_v61 }
 0x16a   :  { %v10720_v62 = vld [vmem:[%s22446_s3 + $0x928] sm:$0xf0] }
 0x16b   :  { %v14005_v63 = vld [vmem:[%s22446_s3 + $0xb0c] sm:$0xf]  ;;  %v10723_v10 = vor.u32 %v13941_v59, %v10720_v62  ;;  %3537 = vmatpush.bf16.msrb.mxu3 %v11523_v1 }
 0x16c   :  { %v10976_v2 = vld [vmem:[%s22446_s3 + $0xb28] sm:$0xf0] }
 0x16d   :  { %v14069_v3 = vld [vmem:[%s22446_s3 + $0xd0c] sm:$0xf]  ;;  %v10979_v12 = vor.u32 %v14005_v63, %v10976_v2  ;;  %3499 = vmatpush.bf16.msrb.mxu0 %v10723_v10 }
 0x16e   :  { %v11232_v4 = vld [vmem:[%s22446_s3 + $0xd28] sm:$0xf0] }
 0x16f   :  { %v14133_v5 = vld [vmem:[%s22446_s3 + $0xf0c] sm:$0xf]  ;;  %v11235_v13 = vor.u32 %v14069_v3, %v11232_v4  ;;  %3512 = vmatpush.bf16.msrb.mxu1 %v10979_v12 }
 0x170   :  { %v11488_v6 = vld [vmem:[%s22446_s3 + $0xf28] sm:$0xf0] }
 0x171   :  { %v13933_v14 = vld [vmem:[%s22446_s3 + $0x8cc] sm:$0xf]  ;;  %v11491_v20 = vor.u32 %v14133_v5, %v11488_v6  ;;  %3525 = vmatpush.bf16.msrb.mxu2 %v11235_v13  ;;  %v3273_v6 = vpop.f32.mrf.mxu2 }
 0x172   :  { %v10688_v16 = vld [vmem:[%s22446_s3 + $0x8e8] sm:$0xf0] }
 0x173   :  { %v13997_v17 = vld [vmem:[%s22446_s3 + $0xacc] sm:$0xf]  ;;  %v10691_v27 = vor.u32 %v13933_v14, %v10688_v16  ;;  %3538 = vmatpush.bf16.msrb.mxu3 %v11491_v20  ;;  %v3286_v14 = vpop.f32.mrf.mxu3  ;;  %v9798_v16 = vld [vmem:[%s22446_s3 + $0x1d0] sm:$0xf] }
 0x174   :  { %v10944_v21 = vld [vmem:[%s22446_s3 + $0xae8] sm:$0xf0]  ;;  %v13778_v20 = vld [vmem:[%s22446_s3 + $0x3ec] sm:$0xf0]  ;;  %v3310_v14 = vpop.f32.mrf.mxu1 }
 0x175   :  { %v14061_v22 = vld [vmem:[%s22446_s3 + $0xccc] sm:$0xf]  ;;  %v10947_v28 = vor.u32 %v13997_v17, %v10944_v21  ;;  %3500 = vmatpush.bf16.msrb.mxu0 %v10691_v27  ;;  %v13714_v17 = vld [vmem:[%s22446_s3 + $0x1ec] sm:$0xf0] }
 0x176   :  { %v11200_v23 = vld [vmem:[%s22446_s3 + $0xce8] sm:$0xf0]  ;;  %v10310_v21 = vld [vmem:[%s22446_s3 + $0x5d0] sm:$0xf] }
 0x177   :  { %v14125_v24 = vld [vmem:[%s22446_s3 + $0xecc] sm:$0xf]  ;;  %v11203_v29 = vor.u32 %v14061_v22, %v11200_v23  ;;  %3513 = vmatpush.bf16.msrb.mxu1 %v10947_v28  ;;  %v13842_v22 = vld [vmem:[%s22446_s3 + $0x5ec] sm:$0xf0]  ;;  %v9799_v28 = vor.u32 %v13714_v17, %v9798_v16 }
 0x178   :  { %v11456_v26 = vld [vmem:[%s22446_s3 + $0xee8] sm:$0xf0]  ;;  %v9670_v16 = vld [vmem:[%s22446_s3 + $0xd0] sm:$0xf] }
 0x179   :  { %v13925_v30 = vld [vmem:[%s22446_s3 + $0x88c] sm:$0xf]  ;;  %v11459_v35 = vor.u32 %v14125_v24, %v11456_v26  ;;  %3526 = vmatpush.bf16.msrb.mxu2 %v11203_v29  ;;  %v10566_v26 = vld [vmem:[%s22446_s3 + $0x7d0] sm:$0xf]  ;;  %v10055_v29 = vor.u32 %v13778_v20, %v10054_v18 }
 0x17a   :  { %v10656_v31 = vld [vmem:[%s22446_s3 + $0x8a8] sm:$0xf0]  ;;  %v13682_v17 = vld [vmem:[%s22446_s3 + $0xec] sm:$0xf0] }
 0x17b   :  { %v13989_v32 = vld [vmem:[%s22446_s3 + $0xa8c] sm:$0xf]  ;;  %v10659_v46 = vor.u32 %v13925_v30, %v10656_v31  ;;  %3539 = vmatpush.bf16.msrb.mxu3 %v11459_v35  ;;  %v10311_v30 = vor.u32 %v13842_v22, %v10310_v21  ;;  %v9766_v31 = vld [vmem:[%s22446_s3 + $0x190] sm:$0xf]  ;;  %v10567_v35 = vor.u32 %v13906_v7, %v10566_v26  ;;  %v9671_v26 = vor.u32 %v13682_v17, %v9670_v16 }
 0x17c   :  { %v10912_v36 = vld [vmem:[%s22446_s3 + $0xaa8] sm:$0xf0]  ;;  %v9926_v18 = vld [vmem:[%s22446_s3 + $0x2d0] sm:$0xf] }
 0x17d   :  { %v14053_v39 = vld [vmem:[%s22446_s3 + $0xc8c] sm:$0xf]  ;;  %v10915_v50 = vor.u32 %v13989_v32, %v10912_v36  ;;  %3501 = vmatpush.bf16.msrb.mxu0 %v10659_v46  ;;  %v13706_v32 = vld [vmem:[%s22446_s3 + $0x1ac] sm:$0xf0] }
 0x17e   :  { %v11168_v41 = vld [vmem:[%s22446_s3 + $0xca8] sm:$0xf0]  ;;  %v13770_v36 = vld [vmem:[%s22446_s3 + $0x3ac] sm:$0xf0] }
 0x17f   :  { %v14117_v44 = vld [vmem:[%s22446_s3 + $0xe8c] sm:$0xf]  ;;  %v11171_v51 = vor.u32 %v14053_v39, %v11168_v41  ;;  %3514 = vmatpush.bf16.msrb.mxu1 %v10915_v50  ;;  %v10278_v39 = vld [vmem:[%s22446_s3 + $0x590] sm:$0xf] }
 0x180   :  { %v11424_v45 = vld [vmem:[%s22446_s3 + $0xea8] sm:$0xf0]  ;;  %v13834_v41 = vld [vmem:[%s22446_s3 + $0x5ac] sm:$0xf0] }
 0x181   :  { %v13917_v52 = vld [vmem:[%s22446_s3 + $0x84c] sm:$0xf]  ;;  %v11427_v56 = vor.u32 %v14117_v44, %v11424_v45  ;;  %3527 = vmatpush.bf16.msrb.mxu2 %v11171_v51  ;;  %v9767_v44 = vor.u32 %v13706_v32, %v9766_v31  ;;  %v10023_v45 = vor.u32 %v13770_v36, %v10022_v33  ;;  %v10279_v46 = vor.u32 %v13834_v41, %v10278_v39  ;;  %v13698_v50 = vld [vmem:[%s22446_s3 + $0x16c] sm:$0xf0] }
 0x182   :  { %v10624_v53 = vld [vmem:[%s22446_s3 + $0x868] sm:$0xf0]  ;;  %v9990_v51 = vld [vmem:[%s22446_s3 + $0x350] sm:$0xf] }
 0x183   :  { %v13981_v54 = vld [vmem:[%s22446_s3 + $0xa4c] sm:$0xf]  ;;  %v10627_v62 = vor.u32 %v13917_v52, %v10624_v53  ;;  %3540 = vmatpush.bf16.msrb.mxu3 %v11427_v56  ;;  %v10535_v52 = vor.u32 %v13898_v43, %v10534_v42  ;;  %v13762_v53 = vld [vmem:[%s22446_s3 + $0x36c] sm:$0xf0] }
 0x184   :  { %v10880_v57 = vld [vmem:[%s22446_s3 + $0xa68] sm:$0xf0]  ;;  %v10502_v56 = vld [vmem:[%s22446_s3 + $0x750] sm:$0xf] }
 0x185   :  { %v14045_v58 = vld [vmem:[%s22446_s3 + $0xc4c] sm:$0xf]  ;;  %v10883_v1 = vor.u32 %v13981_v54, %v10880_v57  ;;  %3502 = vmatpush.bf16.msrb.mxu0 %v10627_v62  ;;  %v10246_v54 = vld [vmem:[%s22446_s3 + $0x550] sm:$0xf] }
 0x186   :  { %v11136_v59 = vld [vmem:[%s22446_s3 + $0xc68] sm:$0xf0]  ;;  %v13890_v57 = vld [vmem:[%s22446_s3 + $0x76c] sm:$0xf0] }
 0x187   :  { %v14109_v60 = vld [vmem:[%s22446_s3 + $0xe4c] sm:$0xf]  ;;  %v11139_v2 = vor.u32 %v14045_v58, %v11136_v59  ;;  %3515 = vmatpush.bf16.msrb.mxu1 %v10883_v1  ;;  %v9735_v58 = vor.u32 %v13698_v50, %v9734_v49  ;;  %v9991_v59 = vor.u32 %v13762_v53, %v9990_v51  ;;  %v13690_v62 = vld [vmem:[%s22446_s3 + $0x12c] sm:$0xf0] }
 0x188   :  { %v11392_v61 = vld [vmem:[%s22446_s3 + $0xe68] sm:$0xf0]  ;;  %v13754_v1 = vld [vmem:[%s22446_s3 + $0x32c] sm:$0xf0] }
 0x189   :  { %v13909_v63 = vld [vmem:[%s22446_s3 + $0x80c] sm:$0xf]  ;;  %v11395_v10 = vor.u32 %v14109_v60, %v11392_v61  ;;  %3528 = vmatpush.bf16.msrb.mxu2 %v11139_v2  ;;  %v10247_v60 = vor.u32 %v13826_v55, %v10246_v54  ;;  %v9702_v61 = vld [vmem:[%s22446_s3 + $0x110] sm:$0xf]  ;;  %v3312_v55 = vpop.f32.mrf.mxu1 }
 0x18a   :  { %v10592_v0 = vld [vmem:[%s22446_s3 + $0x828] sm:$0xf0]  ;;  %v10214_v2 = vld [vmem:[%s22446_s3 + $0x510] sm:$0xf]  ;;  %v9703_v6 = vor.u32 %v13690_v62, %v9702_v61 }
 0x18b   :  { %v13973_v3 = vld [vmem:[%s22446_s3 + $0xa0c] sm:$0xf]  ;;  %v10595_v19 = vor.u32 %v13909_v63, %v10592_v0  ;;  %3541 = vmatpush.bf16.msrb.mxu3 %v11395_v10  ;;  %v9958_v63 = vld [vmem:[%s22446_s3 + $0x310] sm:$0xf]  ;;  %v10503_v0 = vor.u32 %v13890_v57, %v10502_v56  ;;  %v3297_v10 = vpop.f32.mrf.mxu0 }
 0x18c   :  { %v10848_v4 = vld [vmem:[%s22446_s3 + $0xa28] sm:$0xf0]  ;;  %v13746_v20 = vld [vmem:[%s22446_s3 + $0x2ec] sm:$0xf0] }
 0x18d   :  { %v14037_v5 = vld [vmem:[%s22446_s3 + $0xc0c] sm:$0xf]  ;;  %v10851_v23 = vor.u32 %v13973_v3, %v10848_v4  ;;  %3503 = vmatpush.bf16.msrb.mxu0 %v10595_v19  ;;  %v13818_v3 = vld [vmem:[%s22446_s3 + $0x52c] sm:$0xf0]  ;;  %v9927_v7 = vor.u32 %v13746_v20, %v9926_v18 }
 0x18e   :  { %v11104_v11 = vld [vmem:[%s22446_s3 + $0xc28] sm:$0xf0]  ;;  %v10470_v4 = vld [vmem:[%s22446_s3 + $0x710] sm:$0xf] }
 0x18f   :  { %v14101_v12 = vld [vmem:[%s22446_s3 + $0xe0c] sm:$0xf]  ;;  %v11107_v24 = vor.u32 %v14037_v5, %v11104_v11  ;;  %3516 = vmatpush.bf16.msrb.mxu1 %v10851_v23  ;;  %v13882_v5 = vld [vmem:[%s22446_s3 + $0x72c] sm:$0xf0]  ;;  %v9959_v11 = vor.u32 %v13754_v1, %v9958_v63 }
 0x190   :  { %v11360_v13 = vld [vmem:[%s22446_s3 + $0xe28] sm:$0xf0]  ;;  %3504 = vmatmul.bf16.vlgmr.msrb.gmra.mxu0 %v15324_v37  ;;  %v10471_v19 = vor.u32 %v13882_v5, %v10470_v4  ;;  %v13810_v21 = vld [vmem:[%s22446_s3 + $0x4ec] sm:$0xf0] }
 0x191   :  { %v11363_v27 = vor.u32 %v14101_v12, %v11360_v13  ;;  %3529 = vmatpush.bf16.msrb.mxu2 %v11107_v24  ;;  %3548 = vmatpush.bf16.msra.mxu0 %v9799_v28  ;;  %v10215_v12 = vor.u32 %v13818_v3, %v10214_v2  ;;  %v3298_v13 = vadd.f32 %v3297_v10, %v16422_v47  ;;  %v10182_v47 = vld [vmem:[%s22446_s3 + $0x4d0] sm:$0xf]  ;;  %v3323_v28 = vpop.f32.mrf.mxu2 }
 0x192   :  { %3517 = vmatmul.bf16.vlgmr.msrb.gmra.mxu1 %v15328_v40  ;;  %v10438_v23 = vld [vmem:[%s22446_s3 + $0x6d0] sm:$0xf] }
 0x193   :  { %3542 = vmatpush.bf16.msrb.mxu3 %v11363_v27  ;;  %3561 = vmatpush.bf16.msra.mxu1 %v10055_v29  ;;  %v3311_v22 = vadd.f32 %v3310_v14, %v3298_v13  ;;  %v13874_v24 = vld [vmem:[%s22446_s3 + $0x6ec] sm:$0xf0]  ;;  %v10183_v27 = vor.u32 %v13810_v21, %v10182_v47 }
 0x194   :  { %3530 = vmatmul.bf16.vlgmr.msrb.gmra.mxu2 %v15316_v34  ;;  %v9638_v29 = vld [vmem:[%s22446_s3 + $0x90] sm:$0xf]  ;;  %v10439_v32 = vor.u32 %v13874_v24, %v10438_v23 }
 0x195   :  { %3574 = vmatpush.bf16.msra.mxu2 %v10311_v30  ;;  %3549 = vmatpush.bf16.msra.mxu0 %v9767_v44  ;;  %v13674_v30 = vld [vmem:[%s22446_s3 + $0xac] sm:$0xf0]  ;;  %v3324_v33 = vadd.f32 %v3323_v28, %v3311_v22 }
 0x196   :  { %3543 = vmatmul.bf16.vlgmr.msrb.gmra.mxu3 %v15326_v38  ;;  %v9894_v31 = vld [vmem:[%s22446_s3 + $0x290] sm:$0xf] }
 0x197   :  { %3587 = vmatpush.bf16.msra.mxu3 %v10567_v35  ;;  %3562 = vmatpush.bf16.msra.mxu1 %v10023_v45  ;;  %v3336_v35 = vpop.f32.mrf.mxu3  ;;  %v13738_v36 = vld [vmem:[%s22446_s3 + $0x2ac] sm:$0xf0] }
 0x198   :  { %v10150_v39 = vld [vmem:[%s22446_s3 + $0x490] sm:$0xf]  ;;  %v3337_v45 = vadd.f32 %v3336_v35, %v3324_v33  ;;  %v9895_v53 = vor.u32 %v13738_v36, %v9894_v31 }
 0x199   :  { %3575 = vmatpush.bf16.msra.mxu2 %v10279_v46  ;;  %3550 = vmatpush.bf16.msra.mxu0 %v9735_v58  ;;  %v13802_v41 = vld [vmem:[%s22446_s3 + $0x4ac] sm:$0xf0]  ;;  %v9639_v46 = vor.u32 %v13674_v30, %v9638_v29  ;;  %v3325_v16 = vpop.f32.mrf.mxu2 }
 0x19a   :  { %v10406_v42 = vld [vmem:[%s22446_s3 + $0x690] sm:$0xf]  ;;  %v10151_v54 = vor.u32 %v13802_v41, %v10150_v39  ;;  %v8996_v56 = vrot.slane %v3337_v45, 7  ;;  %v16789_v16 = vld [vmem:[%s22448_s5] sm:$0xff] }
 0x19b   :  { %3588 = vmatpush.bf16.msra.mxu3 %v10535_v52  ;;  %3563 = vmatpush.bf16.msra.mxu1 %v9991_v59  ;;  %v13866_v43 = vld [vmem:[%s22446_s3 + $0x6ac] sm:$0xf0]  ;;  %v3299_v52 = vpop.f32.mrf.mxu0 }
 0x19c   :  { %v9606_v44 = vld [vmem:[%s22446_s3 + $0x50] sm:$0xf]  ;;  %v10407_v57 = vor.u32 %v13866_v43, %v10406_v42  ;;  %v16651_v1 = vsel %vm22461_vm0, %v16223_v48, %v8996_v56  ;;  %v16655_v2 = vsel %vm9019_vm3, %v16223_v48, %v8996_v56  ;;  %v16659_v3 = vsel %vm9023_vm4, %v16223_v48, %v8996_v56 }
 0x19d   :  { %3576 = vmatpush.bf16.msra.mxu2 %v10247_v60  ;;  %3551 = vmatpush.bf16.msra.mxu0 %v9703_v6  ;;  %v13666_v49 = vld [vmem:[%s22446_s3 + $0x6c] sm:$0xf0]  ;;  %v16669_v6 = vsel %vm9011_vm1, %v16223_v48, %v8996_v56  ;;  %v16673_v10 = vsel %vm9025_vm5, %v8996_v56, %v16223_v48  ;;  %v16695_v21 = vsel %vm9003_vm6, %v16223_v48, %v8996_v56 }
 0x19e   :  { %v9862_v50 = vld [vmem:[%s22446_s3 + $0x250] sm:$0xf]  ;;  %v9607_v60 = vor.u32 %v13666_v49, %v9606_v44  ;;  %v16699_v22 = vsel %vm9009_vm7, %v16223_v48, %v8996_v56 }
 0x19f   :  { %3589 = vmatpush.bf16.msra.mxu3 %v10503_v0  ;;  %3564 = vmatpush.bf16.msra.mxu1 %v9959_v11  ;;  %v13730_v51 = vld [vmem:[%s22446_s3 + $0x26c] sm:$0xf0]  ;;  %v16647_v0 = vsel %vm9017_vm2, %v16223_v48, %v8996_v56  ;;  %v3338_v47 = vpop.f32.mrf.mxu3 }
 0x1a0   :  { %v10118_v58 = vld [vmem:[%s22446_s3 + $0x450] sm:$0xf]  ;;  %v9863_v61 = vor.u32 %v13730_v51, %v9862_v50 }
 0x1a1   :  { %3577 = vmatpush.bf16.msra.mxu2 %v10215_v12  ;;  %3552 = vmatpush.bf16.msra.mxu0 %v9671_v26  ;;  %v13794_v59 = vld [vmem:[%s22446_s3 + $0x46c] sm:$0xf0] }
 0x1a2   :  { %v10374_v62 = vld [vmem:[%s22446_s3 + $0x650] sm:$0xf]  ;;  %v10119_v11 = vor.u32 %v13794_v59, %v10118_v58 }
 0x1a3   :  { %3590 = vmatpush.bf16.msra.mxu3 %v10471_v19  ;;  %3565 = vmatpush.bf16.msra.mxu1 %v9927_v7  ;;  %v13858_v63 = vld [vmem:[%s22446_s3 + $0x66c] sm:$0xf0] }
 0x1a4   :  { %v9574_v4 = vld [vmem:[%s22446_s3 + $0x10] sm:$0xf]  ;;  %v10375_v17 = vor.u32 %v13858_v63, %v10374_v62 }
 0x1a5   :  { %3578 = vmatpush.bf16.msra.mxu2 %v10183_v27  ;;  %3553 = vmatpush.bf16.msra.mxu0 %v9639_v46  ;;  %v13658_v5 = vld [vmem:[%s22446_s3 + $0x2c] sm:$0xf0] }
 0x1a6   :  { %v9830_v12 = vld [vmem:[%s22446_s3 + $0x210] sm:$0xf]  ;;  %v9575_v7 = vor.u32 %v13658_v5, %v9574_v4 }
 0x1a7   :  { %3591 = vmatpush.bf16.msra.mxu3 %v10439_v32  ;;  %3566 = vmatpush.bf16.msra.mxu1 %v9895_v53  ;;  %v13722_v13 = vld [vmem:[%s22446_s3 + $0x22c] sm:$0xf0] }
 0x1a8   :  { %v10086_v14 = vld [vmem:[%s22446_s3 + $0x410] sm:$0xf]  ;;  %v9831_v29 = vor.u32 %v13722_v13, %v9830_v12 }
 0x1a9   :  { %3579 = vmatpush.bf16.msra.mxu2 %v10151_v54  ;;  %v13786_v18 = vld [vmem:[%s22446_s3 + $0x42c] sm:$0xf0]  ;;  %3554 = vmatpush.bf16.msra.mxu0 %v9607_v60 }
 0x1aa   :  { %v10342_v19 = vld [vmem:[%s22446_s3 + $0x610] sm:$0xf]  ;;  %v10087_v30 = vor.u32 %v13786_v18, %v10086_v14 }
 0x1ab   :  { %3592 = vmatpush.bf16.msra.mxu3 %v10407_v57  ;;  %v13850_v20 = vld [vmem:[%s22446_s3 + $0x62c] sm:$0xf0]  ;;  %3567 = vmatpush.bf16.msra.mxu1 %v9863_v61 }
 0x1ac   :  { %v10822_v23 = vld [vmem:[%s22446_s3 + $0x9d0] sm:$0xf]  ;;  %v10343_v33 = vor.u32 %v13850_v20, %v10342_v19 }
 0x1ad   :  { %v13970_v24 = vld [vmem:[%s22446_s3 + $0x9ec] sm:$0xf0]  ;;  %3580 = vmatpush.bf16.msra.mxu2 %v10119_v11  ;;  %3555 = vmatpush.bf16.msra.mxu0 %v9575_v7  ;;  %v3349_v7 = vpop.f32.mrf.mxu0 }
 0x1ae   :  { %v11078_v26 = vld [vmem:[%s22446_s3 + $0xbd0] sm:$0xf]  ;;  %v10823_v35 = vor.u32 %v13970_v24, %v10822_v23 }
 0x1af   :  { %v14034_v27 = vld [vmem:[%s22446_s3 + $0xbec] sm:$0xf0]  ;;  %3593 = vmatpush.bf16.msra.mxu3 %v10375_v17  ;;  %3568 = vmatpush.bf16.msra.mxu1 %v9831_v29  ;;  %v558_v17 = vperm.slane %v16789_v16, 2 }
 0x1b0   :  { %v11334_v48 = vld [vmem:[%s22446_s3 + $0xdd0] sm:$0xf]  ;;  %v11079_v36 = vor.u32 %v14034_v27, %v11078_v26  ;;  %3556 = vmatmul.bf16.vlgmr.msra.gmra.mxu0 %v15135_v9 }
 0x1b1   :  { %v14098_v28 = vld [vmem:[%s22446_s3 + $0xdec] sm:$0xf0]  ;;  %3581 = vmatpush.bf16.msra.mxu2 %v10087_v30  ;;  %3600 = vmatpush.bf16.msrb.mxu0 %v10823_v35 }
 0x1b2   :  { %v11590_v31 = vld [vmem:[%s22446_s3 + $0xfd0] sm:$0xf]  ;;  %v11335_v39 = vor.u32 %v14098_v28, %v11334_v48  ;;  %3569 = vmatmul.bf16.vlgmr.msra.gmra.mxu1 %v15172_v25 }
 0x1b3   :  { %v14162_v32 = vld [vmem:[%s22446_s3 + $0xfec] sm:$0xf0]  ;;  %3594 = vmatpush.bf16.msra.mxu3 %v10343_v33  ;;  %3613 = vmatpush.bf16.msrb.mxu1 %v11079_v36 }
 0x1b4   :  { %v10790_v41 = vld [vmem:[%s22446_s3 + $0x990] sm:$0xf]  ;;  %v11591_v44 = vor.u32 %v14162_v32, %v11590_v31  ;;  %3582 = vmatmul.bf16.vlgmr.msra.gmra.mxu2 %v15133_v8  ;;  %v3350_v31 = vadd.f32 %v3349_v7, %v558_v17  ;;  %v3362_v32 = vpop.f32.mrf.mxu1 }
 0x1b5   :  { %v13962_v42 = vld [vmem:[%s22446_s3 + $0x9ac] sm:$0xf0]  ;;  %3626 = vmatpush.bf16.msrb.mxu2 %v11335_v39 }
 0x1b6   :  { %v11046_v43 = vld [vmem:[%s22446_s3 + $0xb90] sm:$0xf]  ;;  %v10791_v52 = vor.u32 %v13962_v42, %v10790_v41  ;;  %3595 = vmatmul.bf16.vlgmr.msra.gmra.mxu3 %v15149_v15 }
 0x1b7   :  { %v14026_v45 = vld [vmem:[%s22446_s3 + $0xbac] sm:$0xf0]  ;;  %3639 = vmatpush.bf16.msrb.mxu3 %v11591_v44 }
 0x1b8   :  { %v11302_v46 = vld [vmem:[%s22446_s3 + $0xd90] sm:$0xf]  ;;  %v11047_v53 = vor.u32 %v14026_v45, %v11046_v43  ;;  %3601 = vmatpush.bf16.msrb.mxu0 %v10791_v52  ;;  %v3363_v43 = vadd.f32 %v3362_v32, %v3350_v31  ;;  %v3375_v52 = vpop.f32.mrf.mxu2 }
 0x1b9   :  { %v14090_v49 = vld [vmem:[%s22446_s3 + $0xdac] sm:$0xf0] }
 0x1ba   :  { %v11558_v50 = vld [vmem:[%s22446_s3 + $0xf90] sm:$0xf]  ;;  %v11303_v54 = vor.u32 %v14090_v49, %v11302_v46  ;;  %3614 = vmatpush.bf16.msrb.mxu1 %v11047_v53 }
 0x1bb   :  { %v14154_v51 = vld [vmem:[%s22446_s3 + $0xfac] sm:$0xf0] }
 0x1bc   :  { %v10758_v55 = vld [vmem:[%s22446_s3 + $0x950] sm:$0xf]  ;;  %v11559_v58 = vor.u32 %v14154_v51, %v11558_v50  ;;  %3627 = vmatpush.bf16.msrb.mxu2 %v11303_v54 }
 0x1bd   :  { %v13954_v56 = vld [vmem:[%s22446_s3 + $0x96c] sm:$0xf0] }
 0x1be   :  { %v11014_v57 = vld [vmem:[%s22446_s3 + $0xb50] sm:$0xf]  ;;  %v10759_v4 = vor.u32 %v13954_v56, %v10758_v55  ;;  %3640 = vmatpush.bf16.msrb.mxu3 %v11559_v58  ;;  %v3388_v58 = vpop.f32.mrf.mxu3 }
 0x1bf   :  { %v14018_v59 = vld [vmem:[%s22446_s3 + $0xb6c] sm:$0xf0] }
 0x1c0   :  { %v11270_v60 = vld [vmem:[%s22446_s3 + $0xd50] sm:$0xf]  ;;  %v11015_v11 = vor.u32 %v14018_v59, %v11014_v57  ;;  %3602 = vmatpush.bf16.msrb.mxu0 %v10759_v4  ;;  %v3376_v57 = vadd.f32 %v3375_v52, %v3363_v43  ;;  %v3377_v31 = vpop.f32.mrf.mxu2  ;;  %v13774_v43 = vld [vmem:[%s22446_s3 + $0x3d4] sm:$0xf] }
 0x1c1   :  { %v14082_v61 = vld [vmem:[%s22446_s3 + $0xd6c] sm:$0xf0]  ;;  %v13902_v52 = vld [vmem:[%s22446_s3 + $0x7d4] sm:$0xf] }
 0x1c2   :  { %v11526_v62 = vld [vmem:[%s22446_s3 + $0xf50] sm:$0xf]  ;;  %v11271_v12 = vor.u32 %v14082_v61, %v11270_v60  ;;  %3615 = vmatpush.bf16.msrb.mxu1 %v11015_v11  ;;  %v9704_v31 = vld [vmem:[%s22446_s3 + $0x130] sm:$0xf0] }
 0x1c3   :  { %v14146_v63 = vld [vmem:[%s22446_s3 + $0xf6c] sm:$0xf0] }
 0x1c4   :  { %v10726_v5 = vld [vmem:[%s22446_s3 + $0x910] sm:$0xf]  ;;  %v11527_v18 = vor.u32 %v14146_v63, %v11526_v62  ;;  %3628 = vmatpush.bf16.msrb.mxu2 %v11271_v12  ;;  %v16855_v62 = vadd.f32 %v3388_v58, %v3376_v57  ;;  %v3351_v63 = vpop.f32.mrf.mxu0  ;;  %v13702_v58 = vld [vmem:[%s22446_s3 + $0x194] sm:$0xf] }
 0x1c5   :  { %v13946_v13 = vld [vmem:[%s22446_s3 + $0x92c] sm:$0xf0]  ;;  %v10024_v63 = vld [vmem:[%s22446_s3 + $0x3b0] sm:$0xf0] }
 0x1c6   :  { %v10982_v14 = vld [vmem:[%s22446_s3 + $0xb10] sm:$0xf]  ;;  %v10727_v26 = vor.u32 %v13946_v13, %v10726_v5  ;;  %3641 = vmatpush.bf16.msrb.mxu3 %v11527_v18 }
 0x1c7   :  { %v14010_v19 = vld [vmem:[%s22446_s3 + $0xb2c] sm:$0xf0] }
 0x1c8   :  { %v11238_v20 = vld [vmem:[%s22446_s3 + $0xd10] sm:$0xf]  ;;  %v10983_v27 = vor.u32 %v14010_v19, %v10982_v14  ;;  %3603 = vmatpush.bf16.msrb.mxu0 %v10727_v26  ;;  %v3364_v14 = vpop.f32.mrf.mxu1 }
 0x1c9   :  { %v14074_v47 = vld [vmem:[%s22446_s3 + $0xd2c] sm:$0xf0] }
 0x1ca   :  { %v11494_v23 = vld [vmem:[%s22446_s3 + $0xf10] sm:$0xf]  ;;  %v11239_v48 = vor.u32 %v14074_v47, %v11238_v20  ;;  %3616 = vmatpush.bf16.msrb.mxu1 %v10983_v27 }
 0x1cb   :  { %v14138_v24 = vld [vmem:[%s22446_s3 + $0xf2c] sm:$0xf0] }
 0x1cc   :  { %v10694_v28 = vld [vmem:[%s22446_s3 + $0x8d0] sm:$0xf]  ;;  %v11495_v33 = vor.u32 %v14138_v24, %v11494_v23  ;;  %3629 = vmatpush.bf16.msrb.mxu2 %v11239_v48 }
 0x1cd   :  { %v13938_v29 = vld [vmem:[%s22446_s3 + $0x8ec] sm:$0xf0] }
 0x1ce   :  { %v10950_v30 = vld [vmem:[%s22446_s3 + $0xad0] sm:$0xf]  ;;  %v10695_v44 = vor.u32 %v13938_v29, %v10694_v28  ;;  %3642 = vmatpush.bf16.msrb.mxu3 %v11495_v33 }
 0x1cf   :  { %v14002_v35 = vld [vmem:[%s22446_s3 + $0xaec] sm:$0xf0] }
 0x1d0   :  { %v11206_v36 = vld [vmem:[%s22446_s3 + $0xcd0] sm:$0xf]  ;;  %v10951_v45 = vor.u32 %v14002_v35, %v10950_v30  ;;  %3604 = vmatpush.bf16.msrb.mxu0 %v10695_v44 }
 0x1d1   :  { %v14066_v39 = vld [vmem:[%s22446_s3 + $0xcec] sm:$0xf0] }
 0x1d2   :  { %v11462_v41 = vld [vmem:[%s22446_s3 + $0xed0] sm:$0xf]  ;;  %v11207_v46 = vor.u32 %v14066_v39, %v11206_v36  ;;  %3617 = vmatpush.bf16.msrb.mxu1 %v10951_v45  ;;  %v3390_v39 = vpop.f32.mrf.mxu3  ;;  %v10056_v45 = vld [vmem:[%s22446_s3 + $0x3f0] sm:$0xf0] }
 0x1d3   :  { %v14130_v42 = vld [vmem:[%s22446_s3 + $0xeec] sm:$0xf0]  ;;  %v10216_v39 = vld [vmem:[%s22446_s3 + $0x530] sm:$0xf0] }
 0x1d4   :  { %v10662_v49 = vld [vmem:[%s22446_s3 + $0x890] sm:$0xf]  ;;  %v11463_v53 = vor.u32 %v14130_v42, %v11462_v41  ;;  %3630 = vmatpush.bf16.msrb.mxu2 %v11207_v46  ;;  %v13710_v41 = vld [vmem:[%s22446_s3 + $0x1d4] sm:$0xf] }
 0x1d5   :  { %v13930_v50 = vld [vmem:[%s22446_s3 + $0x8ac] sm:$0xf0]  ;;  %v9800_v42 = vld [vmem:[%s22446_s3 + $0x1f0] sm:$0xf0] }
 0x1d6   :  { %v10918_v51 = vld [vmem:[%s22446_s3 + $0xa90] sm:$0xf]  ;;  %v10663_v61 = vor.u32 %v13930_v50, %v10662_v49  ;;  %3643 = vmatpush.bf16.msrb.mxu3 %v11463_v53  ;;  %v13838_v46 = vld [vmem:[%s22446_s3 + $0x5d4] sm:$0xf] }
 0x1d7   :  { %v13994_v54 = vld [vmem:[%s22446_s3 + $0xaac] sm:$0xf0]  ;;  %v10312_v49 = vld [vmem:[%s22446_s3 + $0x5f0] sm:$0xf0] }
 0x1d8   :  { %v11174_v55 = vld [vmem:[%s22446_s3 + $0xc90] sm:$0xf]  ;;  %v10919_v4 = vor.u32 %v13994_v54, %v10918_v51  ;;  %3605 = vmatpush.bf16.msrb.mxu0 %v10663_v61  ;;  %v10568_v53 = vld [vmem:[%s22446_s3 + $0x7f0] sm:$0xf0]  ;;  %v10315_v57 = vor.u32 %v13838_v46, %v10312_v49 }
 0x1d9   :  { %v14058_v56 = vld [vmem:[%s22446_s3 + $0xcac] sm:$0xf0]  ;;  %v10571_v61 = vor.u32 %v13902_v52, %v10568_v53  ;;  %v13678_v49 = vld [vmem:[%s22446_s3 + $0xd4] sm:$0xf]  ;;  %v3414_v53 = vpop.f32.mrf.mxu1 }
 0x1da   :  { %v11430_v59 = vld [vmem:[%s22446_s3 + $0xe90] sm:$0xf]  ;;  %v11175_v5 = vor.u32 %v14058_v56, %v11174_v55  ;;  %3618 = vmatpush.bf16.msrb.mxu1 %v10919_v4  ;;  %v9803_v55 = vor.u32 %v13710_v41, %v9800_v42  ;;  %v10059_v56 = vor.u32 %v13774_v43, %v10056_v45  ;;  %v13830_v4 = vld [vmem:[%s22446_s3 + $0x594] sm:$0xf] }
 0x1db   :  { %v14122_v60 = vld [vmem:[%s22446_s3 + $0xeac] sm:$0xf0]  ;;  %v13878_v41 = vld [vmem:[%s22446_s3 + $0x714] sm:$0xf] }
 0x1dc   :  { %v10630_v11 = vld [vmem:[%s22446_s3 + $0x850] sm:$0xf]  ;;  %v11431_v17 = vor.u32 %v14122_v60, %v11430_v59  ;;  %3631 = vmatpush.bf16.msrb.mxu2 %v11175_v5  ;;  %v9768_v59 = vld [vmem:[%s22446_s3 + $0x1b0] sm:$0xf0] }
 0x1dd   :  { %v13922_v12 = vld [vmem:[%s22446_s3 + $0x86c] sm:$0xf0]  ;;  %v13766_v60 = vld [vmem:[%s22446_s3 + $0x394] sm:$0xf] }
 0x1de   :  { %v10886_v13 = vld [vmem:[%s22446_s3 + $0xa50] sm:$0xf]  ;;  %v10631_v24 = vor.u32 %v13922_v12, %v10630_v11  ;;  %3644 = vmatpush.bf16.msrb.mxu3 %v11431_v17  ;;  %v10280_v5 = vld [vmem:[%s22446_s3 + $0x5b0] sm:$0xf0]  ;;  %v10027_v14 = vor.u32 %v13766_v60, %v10024_v63 }
 0x1df   :  { %v13986_v18 = vld [vmem:[%s22446_s3 + $0xa6c] sm:$0xf0]  ;;  %v13894_v11 = vld [vmem:[%s22446_s3 + $0x794] sm:$0xf]  ;;  %v10283_v17 = vor.u32 %v13830_v4, %v10280_v5 }
 0x1e0   :  { %v11142_v19 = vld [vmem:[%s22446_s3 + $0xc50] sm:$0xf]  ;;  %v10887_v27 = vor.u32 %v13986_v18, %v10886_v13  ;;  %3606 = vmatpush.bf16.msrb.mxu0 %v10631_v24  ;;  %v10536_v12 = vld [vmem:[%s22446_s3 + $0x7b0] sm:$0xf0]  ;;  %v9771_v13 = vor.u32 %v13702_v58, %v9768_v59 }
 0x1e1   :  { %v14050_v20 = vld [vmem:[%s22446_s3 + $0xc6c] sm:$0xf0]  ;;  %v13694_v18 = vld [vmem:[%s22446_s3 + $0x154] sm:$0xf] }
 0x1e2   :  { %v11398_v47 = vld [vmem:[%s22446_s3 + $0xe50] sm:$0xf]  ;;  %v11143_v48 = vor.u32 %v14050_v20, %v11142_v19  ;;  %3619 = vmatpush.bf16.msrb.mxu1 %v10887_v27  ;;  %v9736_v19 = vld [vmem:[%s22446_s3 + $0x170] sm:$0xf0] }
 0x1e3   :  { %v14114_v23 = vld [vmem:[%s22446_s3 + $0xe6c] sm:$0xf0]  ;;  %v13758_v20 = vld [vmem:[%s22446_s3 + $0x354] sm:$0xf] }
 0x1e4   :  { %v10598_v26 = vld [vmem:[%s22446_s3 + $0x810] sm:$0xf]  ;;  %v11399_v32 = vor.u32 %v14114_v23, %v11398_v47  ;;  %3632 = vmatpush.bf16.msrb.mxu2 %v11143_v48  ;;  %v10539_v47 = vor.u32 %v13894_v11, %v10536_v12  ;;  %v9992_v23 = vld [vmem:[%s22446_s3 + $0x370] sm:$0xf0]  ;;  %v9739_v48 = vor.u32 %v13694_v18, %v9736_v19  ;;  %v3427_v12 = vpop.f32.mrf.mxu2 }
 0x1e5   :  { %v13914_v7 = vld [vmem:[%s22446_s3 + $0x82c] sm:$0xf0]  ;;  %v13822_v24 = vld [vmem:[%s22446_s3 + $0x554] sm:$0xf] }
 0x1e6   :  { %v10854_v28 = vld [vmem:[%s22446_s3 + $0xa10] sm:$0xf]  ;;  %v10599_v44 = vor.u32 %v13914_v7, %v10598_v26  ;;  %3645 = vmatpush.bf16.msrb.mxu3 %v11399_v32  ;;  %v10248_v26 = vld [vmem:[%s22446_s3 + $0x570] sm:$0xf0] }
 0x1e7   :  { %v13978_v29 = vld [vmem:[%s22446_s3 + $0xa2c] sm:$0xf0]  ;;  %v13886_v7 = vld [vmem:[%s22446_s3 + $0x754] sm:$0xf] }
 0x1e8   :  { %v11110_v30 = vld [vmem:[%s22446_s3 + $0xc10] sm:$0xf]  ;;  %v10855_v50 = vor.u32 %v13978_v29, %v10854_v28  ;;  %3607 = vmatpush.bf16.msrb.mxu0 %v10599_v44  ;;  %v10504_v27 = vld [vmem:[%s22446_s3 + $0x770] sm:$0xf0]  ;;  %v9995_v28 = vor.u32 %v13758_v20, %v9992_v23  ;;  %v10251_v29 = vor.u32 %v13822_v24, %v10248_v26  ;;  %v3401_v44 = vpop.f32.mrf.mxu0  ;;  %v3440_v20 = vpop.f32.mrf.mxu3 }
 0x1e9   :  { %v14042_v33 = vld [vmem:[%s22446_s3 + $0xc2c] sm:$0xf0]  ;;  %v13750_v32 = vld [vmem:[%s22446_s3 + $0x314] sm:$0xf]  ;;  %v3402_v52 = vadd.f32 %v3401_v44, %v16855_v62 }
 0x1ea   :  { %v11366_v35 = vld [vmem:[%s22446_s3 + $0xe10] sm:$0xf]  ;;  %v11111_v51 = vor.u32 %v14042_v33, %v11110_v30  ;;  %3620 = vmatpush.bf16.msrb.mxu1 %v10855_v50  ;;  %v13686_v30 = vld [vmem:[%s22446_s3 + $0x114] sm:$0xf]  ;;  %v10507_v33 = vor.u32 %v13886_v7, %v10504_v27 }
 0x1eb   :  { %v14106_v36 = vld [vmem:[%s22446_s3 + $0xe2c] sm:$0xf0]  ;;  %3608 = vmatmul.bf16.vlgmr.msrb.gmra.mxu0 %v15324_v37  ;;  %v10472_v42 = vld [vmem:[%s22446_s3 + $0x730] sm:$0xf0]  ;;  %v9707_v43 = vor.u32 %v13686_v30, %v9704_v31  ;;  %v3415_v59 = vadd.f32 %v3414_v53, %v3402_v52  ;;  %v3416_v31 = vpop.f32.mrf.mxu1 }
 0x1ec   :  { %v11367_v54 = vor.u32 %v14106_v36, %v11366_v35  ;;  %3633 = vmatpush.bf16.msrb.mxu2 %v11111_v51  ;;  %3652 = vmatpush.bf16.msra.mxu0 %v9803_v55  ;;  %v9960_v35 = vld [vmem:[%s22446_s3 + $0x330] sm:$0xf0]  ;;  %v3429_v52 = vpop.f32.mrf.mxu2 }
 0x1ed   :  { %3621 = vmatmul.bf16.vlgmr.msrb.gmra.mxu1 %v15328_v40  ;;  %v13814_v36 = vld [vmem:[%s22446_s3 + $0x514] sm:$0xf]  ;;  %v9963_v45 = vor.u32 %v13750_v32, %v9960_v35  ;;  %v3428_v19 = vadd.f32 %v3427_v12, %v3415_v59 }
 0x1ee   :  { %3646 = vmatpush.bf16.msrb.mxu3 %v11367_v54  ;;  %3665 = vmatpush.bf16.msra.mxu1 %v10059_v56  ;;  %v10219_v46 = vor.u32 %v13814_v36, %v10216_v39  ;;  %v9672_v50 = vld [vmem:[%s22446_s3 + $0xf0] sm:$0xf0]  ;;  %v10475_v54 = vor.u32 %v13878_v41, %v10472_v42 }
 0x1ef   :  { %3634 = vmatmul.bf16.vlgmr.msrb.gmra.mxu2 %v15316_v34  ;;  %v13742_v51 = vld [vmem:[%s22446_s3 + $0x2d4] sm:$0xf]  ;;  %v9675_v60 = vor.u32 %v13678_v49, %v9672_v50  ;;  %v17054_v26 = vadd.f32 %v3440_v20, %v3428_v19 }
 0x1f0   :  { %3678 = vmatpush.bf16.msra.mxu2 %v10315_v57  ;;  %3653 = vmatpush.bf16.msra.mxu0 %v9771_v13  ;;  %v9928_v55 = vld [vmem:[%s22446_s3 + $0x2f0] sm:$0xf0]  ;;  %v3403_v7 = vpop.f32.mrf.mxu0 }
 0x1f1   :  { %3647 = vmatmul.bf16.vlgmr.msrb.gmra.mxu3 %v15326_v38  ;;  %v13806_v56 = vld [vmem:[%s22446_s3 + $0x4d4] sm:$0xf] }
 0x1f2   :  { %3691 = vmatpush.bf16.msra.mxu3 %v10571_v61  ;;  %3666 = vmatpush.bf16.msra.mxu1 %v10027_v14  ;;  %v10184_v57 = vld [vmem:[%s22446_s3 + $0x4f0] sm:$0xf0]  ;;  %v9931_v61 = vor.u32 %v13742_v51, %v9928_v55 }
 0x1f3   :  { %v13870_v58 = vld [vmem:[%s22446_s3 + $0x6d4] sm:$0xf]  ;;  %v10187_v63 = vor.u32 %v13806_v56, %v10184_v57  ;;  %v3442_v57 = vpop.f32.mrf.mxu3 }
 0x1f4   :  { %3679 = vmatpush.bf16.msra.mxu2 %v10283_v17  ;;  %3654 = vmatpush.bf16.msra.mxu0 %v9739_v48  ;;  %v10440_v62 = vld [vmem:[%s22446_s3 + $0x6f0] sm:$0xf0] }
 0x1f5   :  { %v13670_v4 = vld [vmem:[%s22446_s3 + $0x94] sm:$0xf]  ;;  %v10443_v13 = vor.u32 %v13870_v58, %v10440_v62 }
 0x1f6   :  { %3692 = vmatpush.bf16.msra.mxu3 %v10539_v47  ;;  %3667 = vmatpush.bf16.msra.mxu1 %v9995_v28  ;;  %v9640_v5 = vld [vmem:[%s22446_s3 + $0xb0] sm:$0xf0] }
 0x1f7   :  { %v13734_v11 = vld [vmem:[%s22446_s3 + $0x294] sm:$0xf]  ;;  %v9643_v24 = vor.u32 %v13670_v4, %v9640_v5 }
 0x1f8   :  { %3680 = vmatpush.bf16.msra.mxu2 %v10251_v29  ;;  %3655 = vmatpush.bf16.msra.mxu0 %v9707_v43  ;;  %v9896_v14 = vld [vmem:[%s22446_s3 + $0x2b0] sm:$0xf0] }
 0x1f9   :  { %v13798_v17 = vld [vmem:[%s22446_s3 + $0x494] sm:$0xf]  ;;  %v9899_v27 = vor.u32 %v13734_v11, %v9896_v14 }
 0x1fa   :  { %3693 = vmatpush.bf16.msra.mxu3 %v10507_v33  ;;  %3668 = vmatpush.bf16.msra.mxu1 %v9963_v45  ;;  %v10152_v18 = vld [vmem:[%s22446_s3 + $0x4b0] sm:$0xf0] }
 0x1fb   :  { %v13862_v47 = vld [vmem:[%s22446_s3 + $0x694] sm:$0xf]  ;;  %v10155_v48 = vor.u32 %v13798_v17, %v10152_v18 }
 0x1fc   :  { %3681 = vmatpush.bf16.msra.mxu2 %v10219_v46  ;;  %v10408_v23 = vld [vmem:[%s22446_s3 + $0x6b0] sm:$0xf0]  ;;  %3656 = vmatpush.bf16.msra.mxu0 %v9675_v60 }
 0x1fd   :  { %v13662_v28 = vld [vmem:[%s22446_s3 + $0x54] sm:$0xf]  ;;  %v10411_v32 = vor.u32 %v13862_v47, %v10408_v23 }
 0x1fe   :  { %3694 = vmatpush.bf16.msra.mxu3 %v10475_v54  ;;  %3669 = vmatpush.bf16.msra.mxu1 %v9931_v61  ;;  %v9608_v29 = vld [vmem:[%s22446_s3 + $0x70] sm:$0xf0] }
 0x1ff   :  { %v13726_v30 = vld [vmem:[%s22446_s3 + $0x254] sm:$0xf]  ;;  %v9611_v42 = vor.u32 %v13662_v28, %v9608_v29 }
 0x200   :  { %3682 = vmatpush.bf16.msra.mxu2 %v10187_v63  ;;  %v9864_v33 = vld [vmem:[%s22446_s3 + $0x270] sm:$0xf0]  ;;  %3657 = vmatpush.bf16.msra.mxu0 %v9643_v24 }
 0x201   :  { %v13790_v35 = vld [vmem:[%s22446_s3 + $0x454] sm:$0xf]  ;;  %v9867_v45 = vor.u32 %v13726_v30, %v9864_v33 }
 0x202   :  { %3695 = vmatpush.bf16.msra.mxu3 %v10443_v13  ;;  %v10120_v36 = vld [vmem:[%s22446_s3 + $0x470] sm:$0xf0]  ;;  %3670 = vmatpush.bf16.msra.mxu1 %v9899_v27 }
 0x203   :  { %v13854_v39 = vld [vmem:[%s22446_s3 + $0x654] sm:$0xf]  ;;  %v10123_v46 = vor.u32 %v13790_v35, %v10120_v36 }
 0x204   :  { %v10376_v41 = vld [vmem:[%s22446_s3 + $0x670] sm:$0xf0]  ;;  %3683 = vmatpush.bf16.msra.mxu2 %v10155_v48  ;;  %3658 = vmatpush.bf16.msra.mxu0 %v9611_v42 }
 0x205   :  { %v13654_v43 = vld [vmem:[%s22446_s3 + $0x14] sm:$0xf]  ;;  %v10379_v53 = vor.u32 %v13854_v39, %v10376_v41 }
 0x206   :  { %v9576_v44 = vld [vmem:[%s22446_s3 + $0x30] sm:$0xf0]  ;;  %3696 = vmatpush.bf16.msra.mxu3 %v10411_v32  ;;  %3671 = vmatpush.bf16.msra.mxu1 %v9867_v45 }
 0x207   :  { %v13718_v49 = vld [vmem:[%s22446_s3 + $0x214] sm:$0xf]  ;;  %v9579_v60 = vor.u32 %v13654_v43, %v9576_v44 }
 0x208   :  { %v9832_v50 = vld [vmem:[%s22446_s3 + $0x230] sm:$0xf0]  ;;  %3684 = vmatpush.bf16.msra.mxu2 %v10123_v46 }
 0x209   :  { %v13782_v51 = vld [vmem:[%s22446_s3 + $0x414] sm:$0xf]  ;;  %v9835_v5 = vor.u32 %v13718_v49, %v9832_v50  ;;  %3659 = vmatpush.bf16.msra.mxu0 %v9579_v60  ;;  %v3453_v60 = vpop.f32.mrf.mxu0 }
 0x20a   :  { %v10088_v54 = vld [vmem:[%s22446_s3 + $0x430] sm:$0xf0]  ;;  %3697 = vmatpush.bf16.msra.mxu3 %v10379_v53 }
 0x20b   :  { %v13846_v55 = vld [vmem:[%s22446_s3 + $0x614] sm:$0xf]  ;;  %v10091_v11 = vor.u32 %v13782_v51, %v10088_v54  ;;  %3672 = vmatpush.bf16.msra.mxu1 %v9835_v5  ;;  %v559_v54 = vperm.slane %v16789_v16, 3 }
 0x20c   :  { %v10344_v56 = vld [vmem:[%s22446_s3 + $0x630] sm:$0xf0]  ;;  %3660 = vmatmul.bf16.vlgmr.msra.gmra.mxu0 %v15135_v9 }
 0x20d   :  { %v13966_v58 = vld [vmem:[%s22446_s3 + $0x9d4] sm:$0xf]  ;;  %v10347_v14 = vor.u32 %v13846_v55, %v10344_v56  ;;  %3685 = vmatpush.bf16.msra.mxu2 %v10091_v11 }
 0x20e   :  { %v10824_v62 = vld [vmem:[%s22446_s3 + $0x9f0] sm:$0xf0]  ;;  %3673 = vmatmul.bf16.vlgmr.msra.gmra.mxu1 %v15172_v25 }
 0x20f   :  { %v14030_v59 = vld [vmem:[%s22446_s3 + $0xbd4] sm:$0xf]  ;;  %v10827_v17 = vor.u32 %v13966_v58, %v10824_v62  ;;  %3698 = vmatpush.bf16.msra.mxu3 %v10347_v14 }
 0x210   :  { %v11080_v61 = vld [vmem:[%s22446_s3 + $0xbf0] sm:$0xf0]  ;;  %3686 = vmatmul.bf16.vlgmr.msra.gmra.mxu2 %v15133_v8 }
 0x211   :  { %v14094_v63 = vld [vmem:[%s22446_s3 + $0xdd4] sm:$0xf]  ;;  %v11083_v18 = vor.u32 %v14030_v59, %v11080_v61  ;;  %3704 = vmatpush.bf16.msrb.mxu0 %v10827_v17 }
 0x212   :  { %v11336_v4 = vld [vmem:[%s22446_s3 + $0xdf0] sm:$0xf0]  ;;  %3699 = vmatmul.bf16.vlgmr.msra.gmra.mxu3 %v15149_v15 }
 0x213   :  { %v14158_v12 = vld [vmem:[%s22446_s3 + $0xfd4] sm:$0xf]  ;;  %v11339_v19 = vor.u32 %v14094_v63, %v11336_v4  ;;  %3717 = vmatpush.bf16.msrb.mxu1 %v11083_v18 }
 0x214   :  { %v11592_v13 = vld [vmem:[%s22446_s3 + $0xff0] sm:$0xf0] }
 0x215   :  { %v13958_v20 = vld [vmem:[%s22446_s3 + $0x994] sm:$0xf]  ;;  %v11595_v24 = vor.u32 %v14158_v12, %v11592_v13  ;;  %3730 = vmatpush.bf16.msrb.mxu2 %v11339_v19  ;;  %v3454_v12 = vadd.f32 %v3453_v60, %v559_v54  ;;  %v3466_v13 = vpop.f32.mrf.mxu1 }
 0x216   :  { %v10792_v47 = vld [vmem:[%s22446_s3 + $0x9b0] sm:$0xf0] }
 0x217   :  { %v14022_v23 = vld [vmem:[%s22446_s3 + $0xb94] sm:$0xf]  ;;  %v10795_v30 = vor.u32 %v13958_v20, %v10792_v47  ;;  %3743 = vmatpush.bf16.msrb.mxu3 %v11595_v24 }
 0x218   :  { %v11048_v7 = vld [vmem:[%s22446_s3 + $0xbb0] sm:$0xf0] }
 0x219   :  { %v14086_v27 = vld [vmem:[%s22446_s3 + $0xd94] sm:$0xf]  ;;  %v11051_v31 = vor.u32 %v14022_v23, %v11048_v7  ;;  %3705 = vmatpush.bf16.msrb.mxu0 %v10795_v30  ;;  %v3467_v23 = vadd.f32 %v3466_v13, %v3454_v12  ;;  %v3479_v30 = vpop.f32.mrf.mxu2 }
 0x21a   :  { %v11304_v48 = vld [vmem:[%s22446_s3 + $0xdb0] sm:$0xf0] }
 0x21b   :  { %v14150_v28 = vld [vmem:[%s22446_s3 + $0xf94] sm:$0xf]  ;;  %v11307_v32 = vor.u32 %v14086_v27, %v11304_v48  ;;  %3718 = vmatpush.bf16.msrb.mxu1 %v11051_v31 }
 0x21c   :  { %v11560_v29 = vld [vmem:[%s22446_s3 + $0xfb0] sm:$0xf0] }
 0x21d   :  { %v13950_v33 = vld [vmem:[%s22446_s3 + $0x954] sm:$0xf]  ;;  %v11563_v39 = vor.u32 %v14150_v28, %v11560_v29  ;;  %3731 = vmatpush.bf16.msrb.mxu2 %v11307_v32 }
 0x21e   :  { %v10760_v35 = vld [vmem:[%s22446_s3 + $0x970] sm:$0xf0] }
 0x21f   :  { %v14014_v36 = vld [vmem:[%s22446_s3 + $0xb54] sm:$0xf]  ;;  %v10763_v46 = vor.u32 %v13950_v33, %v10760_v35  ;;  %3744 = vmatpush.bf16.msrb.mxu3 %v11563_v39  ;;  %v3492_v39 = vpop.f32.mrf.mxu3 }
 0x220   :  { %v11016_v41 = vld [vmem:[%s22446_s3 + $0xb70] sm:$0xf0] }
 0x221   :  { %v14078_v42 = vld [vmem:[%s22446_s3 + $0xd54] sm:$0xf]  ;;  %v11019_v50 = vor.u32 %v14014_v36, %v11016_v41  ;;  %3706 = vmatpush.bf16.msrb.mxu0 %v10763_v46  ;;  %v3480_v36 = vadd.f32 %v3479_v30, %v3467_v23  ;;  %v3481_v12 = vpop.f32.mrf.mxu2  ;;  %v10062_v23 = vld [vmem:[%s22446_s3 + $0x3d8] sm:$0xf] }
 0x222   :  { %v11272_v43 = vld [vmem:[%s22446_s3 + $0xd70] sm:$0xf0]  ;;  %v10574_v30 = vld [vmem:[%s22446_s3 + $0x7d8] sm:$0xf] }
 0x223   :  { %v14142_v44 = vld [vmem:[%s22446_s3 + $0xf54] sm:$0xf]  ;;  %v11275_v51 = vor.u32 %v14078_v42, %v11272_v43  ;;  %3719 = vmatpush.bf16.msrb.mxu1 %v11019_v50  ;;  %v13691_v12 = vld [vmem:[%s22446_s3 + $0x134] sm:$0xf0] }
 0x224   :  { %v11528_v45 = vld [vmem:[%s22446_s3 + $0xf70] sm:$0xf0] }
 0x225   :  { %v13942_v49 = vld [vmem:[%s22446_s3 + $0x914] sm:$0xf]  ;;  %v11531_v55 = vor.u32 %v14142_v44, %v11528_v45  ;;  %3732 = vmatpush.bf16.msrb.mxu2 %v11275_v51  ;;  %v17253_v44 = vadd.f32 %v3492_v39, %v3480_v36  ;;  %v3455_v45 = vpop.f32.mrf.mxu0  ;;  %v9774_v39 = vld [vmem:[%s22446_s3 + $0x198] sm:$0xf] }
 0x226   :  { %v10728_v52 = vld [vmem:[%s22446_s3 + $0x930] sm:$0xf0]  ;;  %v13771_v45 = vld [vmem:[%s22446_s3 + $0x3b4] sm:$0xf0] }
 0x227   :  { %v14006_v53 = vld [vmem:[%s22446_s3 + $0xb14] sm:$0xf]  ;;  %v10731_v59 = vor.u32 %v13942_v49, %v10728_v52  ;;  %3745 = vmatpush.bf16.msrb.mxu3 %v11531_v55 }
 0x228   :  { %v10984_v56 = vld [vmem:[%s22446_s3 + $0xb30] sm:$0xf0] }
 0x229   :  { %v14070_v57 = vld [vmem:[%s22446_s3 + $0xd14] sm:$0xf]  ;;  %v10987_v61 = vor.u32 %v14006_v53, %v10984_v56  ;;  %3707 = vmatpush.bf16.msrb.mxu0 %v10731_v59  ;;  %v3468_v53 = vpop.f32.mrf.mxu1 }
 0x22a   :  { %v11240_v58 = vld [vmem:[%s22446_s3 + $0xd30] sm:$0xf0] }
 0x22b   :  { %v14134_v62 = vld [vmem:[%s22446_s3 + $0xf14] sm:$0xf]  ;;  %v11243_v63 = vor.u32 %v14070_v57, %v11240_v58  ;;  %3720 = vmatpush.bf16.msrb.mxu1 %v10987_v61 }
 0x22c   :  { %v11496_v16 = vld [vmem:[%s22446_s3 + $0xf30] sm:$0xf0] }
 0x22d   :  { %v13934_v4 = vld [vmem:[%s22446_s3 + $0x8d4] sm:$0xf]  ;;  %v11499_v14 = vor.u32 %v14134_v62, %v11496_v16  ;;  %3733 = vmatpush.bf16.msrb.mxu2 %v11243_v63 }
 0x22e   :  { %v10696_v5 = vld [vmem:[%s22446_s3 + $0x8f0] sm:$0xf0] }
 0x22f   :  { %v13998_v11 = vld [vmem:[%s22446_s3 + $0xad4] sm:$0xf]  ;;  %v10699_v24 = vor.u32 %v13934_v4, %v10696_v5  ;;  %3746 = vmatpush.bf16.msrb.mxu3 %v11499_v14 }
 0x230   :  { %v10952_v17 = vld [vmem:[%s22446_s3 + $0xaf0] sm:$0xf0] }
 0x231   :  { %v14062_v18 = vld [vmem:[%s22446_s3 + $0xcd4] sm:$0xf]  ;;  %v10955_v7 = vor.u32 %v13998_v11, %v10952_v17  ;;  %3708 = vmatpush.bf16.msrb.mxu0 %v10699_v24 }
 0x232   :  { %v11208_v19 = vld [vmem:[%s22446_s3 + $0xcf0] sm:$0xf0] }
 0x233   :  { %v14126_v20 = vld [vmem:[%s22446_s3 + $0xed4] sm:$0xf]  ;;  %v11211_v27 = vor.u32 %v14062_v18, %v11208_v19  ;;  %3721 = vmatpush.bf16.msrb.mxu1 %v10955_v7  ;;  %v3494_v19 = vpop.f32.mrf.mxu3  ;;  %v13779_v7 = vld [vmem:[%s22446_s3 + $0x3f4] sm:$0xf0] }
 0x234   :  { %v11464_v47 = vld [vmem:[%s22446_s3 + $0xef0] sm:$0xf0]  ;;  %v13819_v19 = vld [vmem:[%s22446_s3 + $0x534] sm:$0xf0] }
 0x235   :  { %v13926_v48 = vld [vmem:[%s22446_s3 + $0x894] sm:$0xf]  ;;  %v11467_v31 = vor.u32 %v14126_v20, %v11464_v47  ;;  %3734 = vmatpush.bf16.msrb.mxu2 %v11211_v27  ;;  %v9806_v20 = vld [vmem:[%s22446_s3 + $0x1d8] sm:$0xf] }
 0x236   :  { %v10664_v28 = vld [vmem:[%s22446_s3 + $0x8b0] sm:$0xf0]  ;;  %v13715_v47 = vld [vmem:[%s22446_s3 + $0x1f4] sm:$0xf0] }
 0x237   :  { %v13990_v29 = vld [vmem:[%s22446_s3 + $0xa94] sm:$0xf]  ;;  %v10667_v43 = vor.u32 %v13926_v48, %v10664_v28  ;;  %3747 = vmatpush.bf16.msrb.mxu3 %v11467_v31  ;;  %v10318_v27 = vld [vmem:[%s22446_s3 + $0x5d8] sm:$0xf] }
 0x238   :  { %v10920_v32 = vld [vmem:[%s22446_s3 + $0xab0] sm:$0xf0]  ;;  %v13843_v48 = vld [vmem:[%s22446_s3 + $0x5f4] sm:$0xf0] }
 0x239   :  { %v14054_v33 = vld [vmem:[%s22446_s3 + $0xc94] sm:$0xf]  ;;  %v10923_v46 = vor.u32 %v13990_v29, %v10920_v32  ;;  %3709 = vmatpush.bf16.msrb.mxu0 %v10667_v43  ;;  %v13907_v31 = vld [vmem:[%s22446_s3 + $0x7f4] sm:$0xf0]  ;;  %v10319_v36 = vor.u32 %v13843_v48, %v10318_v27 }
 0x23a   :  { %v11176_v35 = vld [vmem:[%s22446_s3 + $0xcb0] sm:$0xf0]  ;;  %v10575_v43 = vor.u32 %v13907_v31, %v10574_v30  ;;  %v9678_v30 = vld [vmem:[%s22446_s3 + $0xd8] sm:$0xf] }
 0x23b   :  { %v14118_v41 = vld [vmem:[%s22446_s3 + $0xe94] sm:$0xf]  ;;  %v11179_v49 = vor.u32 %v14054_v33, %v11176_v35  ;;  %3722 = vmatpush.bf16.msrb.mxu1 %v10923_v46  ;;  %v9807_v33 = vor.u32 %v13715_v47, %v9806_v20  ;;  %v10063_v35 = vor.u32 %v13779_v7, %v10062_v23  ;;  %v10286_v46 = vld [vmem:[%s22446_s3 + $0x598] sm:$0xf]  ;;  %v17404_v23 = vrot.slane %v17054_v26, 6  ;;  %v3505_v7 = vpop.f32.mrf.mxu0 }
 0x23c   :  { %v11432_v42 = vld [vmem:[%s22446_s3 + $0xeb0] sm:$0xf0]  ;;  %v10478_v20 = vld [vmem:[%s22446_s3 + $0x718] sm:$0xf] }
 0x23d   :  { %v13918_v50 = vld [vmem:[%s22446_s3 + $0x854] sm:$0xf]  ;;  %v11435_v54 = vor.u32 %v14118_v41, %v11432_v42  ;;  %3735 = vmatpush.bf16.msrb.mxu2 %v11179_v49  ;;  %v13707_v41 = vld [vmem:[%s22446_s3 + $0x1b4] sm:$0xf0] }
 0x23e   :  { %v10632_v51 = vld [vmem:[%s22446_s3 + $0x870] sm:$0xf0]  ;;  %v10030_v42 = vld [vmem:[%s22446_s3 + $0x398] sm:$0xf] }
 0x23f   :  { %v13982_v52 = vld [vmem:[%s22446_s3 + $0xa54] sm:$0xf]  ;;  %v10635_v16 = vor.u32 %v13918_v50, %v10632_v51  ;;  %3748 = vmatpush.bf16.msrb.mxu3 %v11435_v54  ;;  %v13835_v49 = vld [vmem:[%s22446_s3 + $0x5b4] sm:$0xf0]  ;;  %v10031_v53 = vor.u32 %v13771_v45, %v10030_v42 }
 0x240   :  { %v10888_v55 = vld [vmem:[%s22446_s3 + $0xa70] sm:$0xf0]  ;;  %v10542_v50 = vld [vmem:[%s22446_s3 + $0x798] sm:$0xf]  ;;  %v10287_v54 = vor.u32 %v13835_v49, %v10286_v46 }
 0x241   :  { %v14046_v56 = vld [vmem:[%s22446_s3 + $0xc54] sm:$0xf]  ;;  %v10891_v61 = vor.u32 %v13982_v52, %v10888_v55  ;;  %3710 = vmatpush.bf16.msrb.mxu0 %v10635_v16  ;;  %v13899_v51 = vld [vmem:[%s22446_s3 + $0x7b4] sm:$0xf0]  ;;  %v9775_v52 = vor.u32 %v13707_v41, %v9774_v39 }
 0x242   :  { %v11144_v57 = vld [vmem:[%s22446_s3 + $0xc70] sm:$0xf0]  ;;  %v9742_v55 = vld [vmem:[%s22446_s3 + $0x158] sm:$0xf] }
 0x243   :  { %v14110_v58 = vld [vmem:[%s22446_s3 + $0xe54] sm:$0xf]  ;;  %v11147_v63 = vor.u32 %v14046_v56, %v11144_v57  ;;  %3723 = vmatpush.bf16.msrb.mxu1 %v10891_v61  ;;  %v13699_v56 = vld [vmem:[%s22446_s3 + $0x174] sm:$0xf0] }
 0x244   :  { %v11400_v62 = vld [vmem:[%s22446_s3 + $0xe70] sm:$0xf0]  ;;  %v9998_v57 = vld [vmem:[%s22446_s3 + $0x358] sm:$0xf] }
 0x245   :  { %v13910_v59 = vld [vmem:[%s22446_s3 + $0x814] sm:$0xf]  ;;  %v11403_v13 = vor.u32 %v14110_v58, %v11400_v62  ;;  %3736 = vmatpush.bf16.msrb.mxu2 %v11147_v63  ;;  %v10543_v58 = vor.u32 %v13899_v51, %v10542_v50  ;;  %v13763_v62 = vld [vmem:[%s22446_s3 + $0x374] sm:$0xf0]  ;;  %v9743_v63 = vor.u32 %v13699_v56, %v9742_v55 }
 0x246   :  { %v10600_v60 = vld [vmem:[%s22446_s3 + $0x830] sm:$0xf0]  ;;  %v10254_v16 = vld [vmem:[%s22446_s3 + $0x558] sm:$0xf] }
 0x247   :  { %v13974_v4 = vld [vmem:[%s22446_s3 + $0xa14] sm:$0xf]  ;;  %v10603_v24 = vor.u32 %v13910_v59, %v10600_v60  ;;  %3749 = vmatpush.bf16.msrb.mxu3 %v11403_v13  ;;  %v13827_v59 = vld [vmem:[%s22446_s3 + $0x574] sm:$0xf0] }
 0x248   :  { %v10856_v5 = vld [vmem:[%s22446_s3 + $0xa30] sm:$0xf0]  ;;  %v10510_v60 = vld [vmem:[%s22446_s3 + $0x758] sm:$0xf] }
 0x249   :  { %v14038_v11 = vld [vmem:[%s22446_s3 + $0xc14] sm:$0xf]  ;;  %v10859_v28 = vor.u32 %v13974_v4, %v10856_v5  ;;  %3711 = vmatpush.bf16.msrb.mxu0 %v10603_v24  ;;  %v13891_v61 = vld [vmem:[%s22446_s3 + $0x774] sm:$0xf0]  ;;  %v9999_v4 = vor.u32 %v13763_v62, %v9998_v57  ;;  %v10255_v5 = vor.u32 %v13827_v59, %v10254_v16 }
 0x24a   :  { %v11112_v14 = vld [vmem:[%s22446_s3 + $0xc30] sm:$0xf0]  ;;  %v9966_v13 = vld [vmem:[%s22446_s3 + $0x318] sm:$0xf] }
 0x24b   :  { %v14102_v17 = vld [vmem:[%s22446_s3 + $0xe14] sm:$0xf]  ;;  %v11115_v29 = vor.u32 %v14038_v11, %v11112_v14  ;;  %3724 = vmatpush.bf16.msrb.mxu1 %v10859_v28  ;;  %v9710_v11 = vld [vmem:[%s22446_s3 + $0x118] sm:$0xf]  ;;  %v10511_v14 = vor.u32 %v13891_v61, %v10510_v60  ;;  %v3506_v28 = vadd.f32 %v3505_v7, %v17253_v44 }
 0x24c   :  { %v11368_v18 = vld [vmem:[%s22446_s3 + $0xe30] sm:$0xf0]  ;;  %3712 = vmatmul.bf16.vlgmr.msrb.gmra.mxu0 %v15324_v37  ;;  %v13883_v47 = vld [vmem:[%s22446_s3 + $0x734] sm:$0xf0]  ;;  %v9711_v24 = vor.u32 %v13691_v12, %v9710_v11 }
 0x24d   :  { %v11371_v32 = vor.u32 %v14102_v17, %v11368_v18  ;;  %3737 = vmatpush.bf16.msrb.mxu2 %v11115_v29  ;;  %3756 = vmatpush.bf16.msra.mxu0 %v9807_v33  ;;  %v13755_v17 = vld [vmem:[%s22446_s3 + $0x334] sm:$0xf0]  ;;  %v3518_v29 = vpop.f32.mrf.mxu1 }
 0x24e   :  { %3725 = vmatmul.bf16.vlgmr.msrb.gmra.mxu1 %v15328_v40  ;;  %v10222_v18 = vld [vmem:[%s22446_s3 + $0x518] sm:$0xf]  ;;  %v9967_v27 = vor.u32 %v13755_v17, %v9966_v13 }
 0x24f   :  { %3750 = vmatpush.bf16.msrb.mxu3 %v11371_v32  ;;  %3769 = vmatpush.bf16.msra.mxu1 %v10063_v35  ;;  %v10223_v48 = vor.u32 %v13819_v19, %v10222_v18  ;;  %v13683_v31 = vld [vmem:[%s22446_s3 + $0xf4] sm:$0xf0]  ;;  %v10479_v32 = vor.u32 %v13883_v47, %v10478_v20 }
 0x250   :  { %3738 = vmatmul.bf16.vlgmr.msrb.gmra.mxu2 %v15316_v34  ;;  %v9934_v26 = vld [vmem:[%s22446_s3 + $0x2d8] sm:$0xf] }
 0x251   :  { %3782 = vmatpush.bf16.msra.mxu2 %v10319_v36  ;;  %3757 = vmatpush.bf16.msra.mxu0 %v9775_v52  ;;  %v13747_v33 = vld [vmem:[%s22446_s3 + $0x2f4] sm:$0xf0]  ;;  %v3519_v36 = vadd.f32 %v3518_v29, %v3506_v28  ;;  %v3531_v52 = vpop.f32.mrf.mxu2 }
 0x252   :  { %3751 = vmatmul.bf16.vlgmr.msrb.gmra.mxu3 %v15326_v38  ;;  %v10190_v44 = vld [vmem:[%s22446_s3 + $0x4d8] sm:$0xf]  ;;  %v9935_v50 = vor.u32 %v13747_v33, %v9934_v26 }
 0x253   :  { %3795 = vmatpush.bf16.msra.mxu3 %v10575_v43  ;;  %3770 = vmatpush.bf16.msra.mxu1 %v10031_v53  ;;  %v13811_v35 = vld [vmem:[%s22446_s3 + $0x4f4] sm:$0xf0]  ;;  %v9679_v43 = vor.u32 %v13683_v31, %v9678_v30  ;;  %v3532_v57 = vadd.f32 %v3531_v52, %v3519_v36 }
 0x254   :  { %v10446_v39 = vld [vmem:[%s22446_s3 + $0x6d8] sm:$0xf]  ;;  %v10191_v51 = vor.u32 %v13811_v35, %v10190_v44 }
 0x255   :  { %3783 = vmatpush.bf16.msra.mxu2 %v10287_v54  ;;  %3758 = vmatpush.bf16.msra.mxu0 %v9743_v63  ;;  %v13875_v41 = vld [vmem:[%s22446_s3 + $0x6f4] sm:$0xf0]  ;;  %v3520_v18 = vpop.f32.mrf.mxu1 }
 0x256   :  { %v9646_v42 = vld [vmem:[%s22446_s3 + $0x98] sm:$0xf]  ;;  %v10447_v56 = vor.u32 %v13875_v41, %v10446_v39 }
 0x257   :  { %3796 = vmatpush.bf16.msra.mxu3 %v10543_v58  ;;  %3771 = vmatpush.bf16.msra.mxu1 %v9999_v4  ;;  %v13675_v45 = vld [vmem:[%s22446_s3 + $0xb4] sm:$0xf0]  ;;  %v3544_v58 = vpop.f32.mrf.mxu3 }
 0x258   :  { %v9902_v46 = vld [vmem:[%s22446_s3 + $0x298] sm:$0xf]  ;;  %v3545_v4 = vadd.f32 %v3544_v58, %v3532_v57 }
 0x259   :  { %3784 = vmatpush.bf16.msra.mxu2 %v10255_v5  ;;  %3759 = vmatpush.bf16.msra.mxu0 %v9711_v24  ;;  %v13739_v49 = vld [vmem:[%s22446_s3 + $0x2b4] sm:$0xf0]  ;;  %v9647_v5 = vor.u32 %v13675_v45, %v9646_v42  ;;  %v3533_v42 = vpop.f32.mrf.mxu2 }
 0x25a   :  { %v10158_v53 = vld [vmem:[%s22446_s3 + $0x498] sm:$0xf]  ;;  %v9903_v17 = vor.u32 %v13739_v49, %v9902_v46  ;;  %v8998_v19 = vrot.slane %v3545_v4, 5 }
 0x25b   :  { %3797 = vmatpush.bf16.msra.mxu3 %v10511_v14  ;;  %3772 = vmatpush.bf16.msra.mxu1 %v9967_v27  ;;  %v13803_v54 = vld [vmem:[%s22446_s3 + $0x4b4] sm:$0xf0]  ;;  %v3507_v14 = vpop.f32.mrf.mxu0 }
 0x25c   :  { %v10414_v55 = vld [vmem:[%s22446_s3 + $0x698] sm:$0xf]  ;;  %v10159_v20 = vor.u32 %v13803_v54, %v10158_v53  ;;  %v9020_v28 = vsel %vm9019_vm3, %v17404_v23, %v8998_v19  ;;  %v9033_v29 = vsel %vm9009_vm7, %v17404_v23, %v8998_v19  ;;  %v9044_v30 = vsel %vm9023_vm4, %v17404_v23, %v8998_v19 }
 0x25d   :  { %3785 = vmatpush.bf16.msra.mxu2 %v10223_v48  ;;  %v13867_v62 = vld [vmem:[%s22446_s3 + $0x6b4] sm:$0xf0]  ;;  %3760 = vmatpush.bf16.msra.mxu0 %v9679_v43  ;;  %v9063_v31 = vsel %vm9025_vm5, %v8998_v19, %v17404_v23  ;;  %v17516_v44 = vsel %vm9021_vm8, %v16647_v0, %v9020_v28  ;;  %v17520_v35 = vsel %vm9034_vm10, %v16651_v1, %v9033_v29 }
 0x25e   :  { %v9614_v16 = vld [vmem:[%s22446_s3 + $0x58] sm:$0xf]  ;;  %v10415_v47 = vor.u32 %v13867_v62, %v10414_v55  ;;  %v17524_v36 = vsel %vm22463_vm12, %v16655_v2, %v9044_v30  ;;  %v17528_v39 = vsel %vm9027_vm9, %v16659_v3, %v9063_v31  ;;  %v9071_v2 = vsel %vm9003_vm6, %v17404_v23, %v8998_v19 }
 0x25f   :  { %3798 = vmatpush.bf16.msra.mxu3 %v10479_v32  ;;  %v13667_v59 = vld [vmem:[%s22446_s3 + $0x74] sm:$0xf0]  ;;  %3773 = vmatpush.bf16.msra.mxu1 %v9935_v50  ;;  %v9079_v3 = vsel %vm9017_vm2, %v17404_v23, %v8998_v19  ;;  %v3546_v46 = vpop.f32.mrf.mxu3  ;;  %v17551_v49 = vsel %vm9038_vm11, %v9071_v2, %v16669_v6  ;;  %v9055_v57 = vsel %vm9011_vm1, %v17404_v23, %v8998_v19  ;;  %vm9040_vm12 = vcmask 1045506  }
 0x260   :  { %v17464_v60 = vld [vmem:[%s22446_s3 + $0x258] sm:$0xf]  ;;  %v9615_v24 = vor.u32 %v13667_v59, %v9614_v16  ;;  %v17555_v50 = vsel %vm9049_vm13, %v9079_v3, %v16673_v10  ;;  %v17657_v3 = vld [vmem:[%s22448_s5] sm:$0xff] }
 0x261   :  { %v17469_v61 = vld [vmem:[%s22446_s3 + $0x274] sm:$0xf0]  ;;  %3786 = vmatpush.bf16.msra.mxu2 %v10191_v51  ;;  %3761 = vmatpush.bf16.msra.mxu0 %v9647_v5 }
 0x262   :  { %v17474_v63 = vld [vmem:[%s22446_s3 + $0x458] sm:$0xf]  ;;  %v9871_v7 = vor.u32 %v17469_v61, %v17464_v60  ;;  %v17591_v61 = vsel %vm22462_vm15, %v16699_v22, %v9055_v57  ;;  %vm9015_vm15 = vcmask 1043456  }
 0x263   :  { %v17479_v11 = vld [vmem:[%s22446_s3 + $0x474] sm:$0xf0]  ;;  %3799 = vmatpush.bf16.msra.mxu3 %v10447_v56  ;;  %3774 = vmatpush.bf16.msra.mxu1 %v9903_v17  ;;  %v9006_v56 = vsel %vm22461_vm0, %v17404_v23, %v8998_v19 }
 0x264   :  { %v17484_v12 = vld [vmem:[%s22446_s3 + $0x658] sm:$0xf]  ;;  %v10127_v27 = vor.u32 %v17479_v11, %v17474_v63  ;;  %v17587_v60 = vsel %vm22458_vm14, %v16695_v21, %v9006_v56  ;;  %v3557_v56 = vpop.f32.mrf.mxu0  ;;  %vm9029_vm14 = vcmask 1044481  }
 0x265   :  { %v17489_v13 = vld [vmem:[%s22446_s3 + $0x674] sm:$0xf0]  ;;  %3787 = vmatpush.bf16.msra.mxu2 %v10159_v20  ;;  %3762 = vmatpush.bf16.msra.mxu0 %v9615_v24 }
 0x266   :  { %v10383_v48 = vor.u32 %v17489_v13, %v17484_v12  ;;  %v9582_v26 = vld [vmem:[%s22446_s3 + $0x18] sm:$0xf] }
 0x267   :  { %v13659_v32 = vld [vmem:[%s22446_s3 + $0x34] sm:$0xf0]  ;;  %3800 = vmatpush.bf16.msra.mxu3 %v10415_v47  ;;  %3775 = vmatpush.bf16.msra.mxu1 %v9871_v7 }
 0x268   :  { %v9838_v33 = vld [vmem:[%s22446_s3 + $0x218] sm:$0xf]  ;;  %v9583_v54 = vor.u32 %v13659_v32, %v9582_v26 }
 0x269   :  { %v13723_v41 = vld [vmem:[%s22446_s3 + $0x234] sm:$0xf0]  ;;  %3788 = vmatpush.bf16.msra.mxu2 %v10127_v27 }
 0x26a   :  { %v10094_v0 = vld [vmem:[%s22446_s3 + $0x418] sm:$0xf]  ;;  %v9839_v58 = vor.u32 %v13723_v41, %v9838_v33  ;;  %3763 = vmatpush.bf16.msra.mxu0 %v9583_v54 }
 0x26b   :  { %v13787_v1 = vld [vmem:[%s22446_s3 + $0x434] sm:$0xf0]  ;;  %3801 = vmatpush.bf16.msra.mxu3 %v10383_v48 }
 0x26c   :  { %v10830_v43 = vld [vmem:[%s22446_s3 + $0x9d8] sm:$0xf]  ;;  %v10095_v23 = vor.u32 %v13787_v1, %v10094_v0  ;;  %3776 = vmatpush.bf16.msra.mxu1 %v9839_v58 }
 0x26d   :  { %v13971_v45 = vld [vmem:[%s22446_s3 + $0x9f4] sm:$0xf0]  ;;  %3764 = vmatmul.bf16.vlgmr.msra.gmra.mxu0 %v15135_v9 }
 0x26e   :  { %v10350_v51 = vld [vmem:[%s22446_s3 + $0x618] sm:$0xf]  ;;  %v10831_v62 = vor.u32 %v13971_v45, %v10830_v43  ;;  %3789 = vmatpush.bf16.msra.mxu2 %v10095_v23  ;;  %v560_v43 = vperm.slane %v17657_v3, 4 }
 0x26f   :  { %v13851_v52 = vld [vmem:[%s22446_s3 + $0x634] sm:$0xf0]  ;;  %3777 = vmatmul.bf16.vlgmr.msra.gmra.mxu1 %v15172_v25 }
 0x270   :  { %v11086_v53 = vld [vmem:[%s22446_s3 + $0xbd8] sm:$0xf]  ;;  %v10351_v63 = vor.u32 %v13851_v52, %v10350_v51  ;;  %3808 = vmatpush.bf16.msrb.mxu0 %v10831_v62 }
 0x271   :  { %v14035_v6 = vld [vmem:[%s22446_s3 + $0xbf4] sm:$0xf0]  ;;  %3790 = vmatmul.bf16.vlgmr.msra.gmra.mxu2 %v15133_v8 }
 0x272   :  { %v11342_v10 = vld [vmem:[%s22446_s3 + $0xdd8] sm:$0xf]  ;;  %v11087_v11 = vor.u32 %v14035_v6, %v11086_v53  ;;  %3802 = vmatpush.bf16.msra.mxu3 %v10351_v63 }
 0x273   :  { %v14099_v55 = vld [vmem:[%s22446_s3 + $0xdf4] sm:$0xf0] }
 0x274   :  { %v11598_v16 = vld [vmem:[%s22446_s3 + $0xfd8] sm:$0xf]  ;;  %v11343_v12 = vor.u32 %v14099_v55, %v11342_v10  ;;  %3821 = vmatpush.bf16.msrb.mxu1 %v11087_v11 }
 0x275   :  { %v14163_v59 = vld [vmem:[%s22446_s3 + $0xff4] sm:$0xf0]  ;;  %3803 = vmatmul.bf16.vlgmr.msra.gmra.mxu3 %v15149_v15 }
 0x276   :  { %v10798_v4 = vld [vmem:[%s22446_s3 + $0x998] sm:$0xf]  ;;  %v11599_v22 = vor.u32 %v14163_v59, %v11598_v16  ;;  %3834 = vmatpush.bf16.msrb.mxu2 %v11343_v12  ;;  %v3558_v16 = vadd.f32 %v3557_v56, %v560_v43  ;;  %v3570_v59 = vpop.f32.mrf.mxu1 }
 0x277   :  { %v13963_v5 = vld [vmem:[%s22446_s3 + $0x9b4] sm:$0xf0] }
 0x278   :  { %v11054_v21 = vld [vmem:[%s22446_s3 + $0xb98] sm:$0xf]  ;;  %v10799_v18 = vor.u32 %v13963_v5, %v10798_v4  ;;  %3847 = vmatpush.bf16.msrb.mxu3 %v11599_v22  ;;  %v3571_v22 = vadd.f32 %v3570_v59, %v3558_v16  ;;  %v13711_v16 = vld [vmem:[%s22446_s3 + $0x1dc] sm:$0xf] }
 0x279   :  { %v14027_v13 = vld [vmem:[%s22446_s3 + $0xbb4] sm:$0xf0]  ;;  %v9808_v59 = vld [vmem:[%s22446_s3 + $0x1f8] sm:$0xf0] }
 0x27a   :  { %v11310_v14 = vld [vmem:[%s22446_s3 + $0xd98] sm:$0xf]  ;;  %v11055_v7 = vor.u32 %v14027_v13, %v11054_v21  ;;  %3809 = vmatpush.bf16.msrb.mxu0 %v10799_v18 }
 0x27b   :  { %v14091_v17 = vld [vmem:[%s22446_s3 + $0xdb4] sm:$0xf0] }
 0x27c   :  { %v11566_v19 = vld [vmem:[%s22446_s3 + $0xf98] sm:$0xf]  ;;  %v11311_v27 = vor.u32 %v14091_v17, %v11310_v14  ;;  %3822 = vmatpush.bf16.msrb.mxu1 %v11055_v7 }
 0x27d   :  { %v14155_v20 = vld [vmem:[%s22446_s3 + $0xfb4] sm:$0xf0] }
 0x27e   :  { %v10766_v47 = vld [vmem:[%s22446_s3 + $0x958] sm:$0xf]  ;;  %v11567_v28 = vor.u32 %v14155_v20, %v11566_v19  ;;  %3835 = vmatpush.bf16.msrb.mxu2 %v11311_v27  ;;  %v3583_v20 = vpop.f32.mrf.mxu2 }
 0x27f   :  { %v13955_v24 = vld [vmem:[%s22446_s3 + $0x974] sm:$0xf0] }
 0x280   :  { %v11022_v48 = vld [vmem:[%s22446_s3 + $0xb58] sm:$0xf]  ;;  %v10767_v26 = vor.u32 %v13955_v24, %v10766_v47  ;;  %3848 = vmatpush.bf16.msrb.mxu3 %v11567_v28  ;;  %v3596_v28 = vpop.f32.mrf.mxu3 }
 0x281   :  { %v14019_v29 = vld [vmem:[%s22446_s3 + $0xb74] sm:$0xf0] }
 0x282   :  { %v11278_v30 = vld [vmem:[%s22446_s3 + $0xd58] sm:$0xf]  ;;  %v11023_v1 = vor.u32 %v14019_v29, %v11022_v48  ;;  %3810 = vmatpush.bf16.msrb.mxu0 %v10767_v26  ;;  %v3584_v48 = vadd.f32 %v3583_v20, %v3571_v22  ;;  %v13775_v22 = vld [vmem:[%s22446_s3 + $0x3dc] sm:$0xf] }
 0x283   :  { %v14083_v31 = vld [vmem:[%s22446_s3 + $0xd74] sm:$0xf0]  ;;  %v10576_v20 = vld [vmem:[%s22446_s3 + $0x7f8] sm:$0xf0] }
 0x284   :  { %v11534_v32 = vld [vmem:[%s22446_s3 + $0xf58] sm:$0xf]  ;;  %v11279_v42 = vor.u32 %v14083_v31, %v11278_v30  ;;  %3823 = vmatpush.bf16.msrb.mxu1 %v11023_v1 }
 0x285   :  { %v14147_v33 = vld [vmem:[%s22446_s3 + $0xf74] sm:$0xf0] }
 0x286   :  { %v10734_v41 = vld [vmem:[%s22446_s3 + $0x918] sm:$0xf]  ;;  %v11535_v45 = vor.u32 %v14147_v33, %v11534_v32  ;;  %3836 = vmatpush.bf16.msrb.mxu2 %v11279_v42  ;;  %v17729_v33 = vadd.f32 %v3596_v28, %v3584_v48 }
 0x287   :  { %v13947_v0 = vld [vmem:[%s22446_s3 + $0x934] sm:$0xf0] }
 0x288   :  { %v10990_v2 = vld [vmem:[%s22446_s3 + $0xb18] sm:$0xf]  ;;  %v10735_v53 = vor.u32 %v13947_v0, %v10734_v41  ;;  %3849 = vmatpush.bf16.msrb.mxu3 %v11535_v45  ;;  %v3559_v41 = vpop.f32.mrf.mxu0 }
 0x289   :  { %v14011_v46 = vld [vmem:[%s22446_s3 + $0xb34] sm:$0xf0] }
 0x28a   :  { %v11246_v51 = vld [vmem:[%s22446_s3 + $0xd18] sm:$0xf]  ;;  %v10991_v57 = vor.u32 %v14011_v46, %v10990_v2  ;;  %3811 = vmatpush.bf16.msrb.mxu0 %v10735_v53  ;;  %v3572_v2 = vpop.f32.mrf.mxu1 }
 0x28b   :  { %v14075_v52 = vld [vmem:[%s22446_s3 + $0xd34] sm:$0xf0]  ;;  %v13695_v2 = vld [vmem:[%s22446_s3 + $0x15c] sm:$0xf] }
 0x28c   :  { %v11502_v54 = vld [vmem:[%s22446_s3 + $0xf18] sm:$0xf]  ;;  %v11247_v58 = vor.u32 %v14075_v52, %v11246_v51  ;;  %3824 = vmatpush.bf16.msrb.mxu1 %v10991_v57 }
 0x28d   :  { %v14139_v6 = vld [vmem:[%s22446_s3 + $0xf34] sm:$0xf0] }
 0x28e   :  { %v10702_v10 = vld [vmem:[%s22446_s3 + $0x8d8] sm:$0xf]  ;;  %v11503_v23 = vor.u32 %v14139_v6, %v11502_v54  ;;  %3837 = vmatpush.bf16.msrb.mxu2 %v11247_v58 }
 0x28f   :  { %v13939_v55 = vld [vmem:[%s22446_s3 + $0x8f4] sm:$0xf0] }
 0x290   :  { %v10958_v62 = vld [vmem:[%s22446_s3 + $0xad8] sm:$0xf]  ;;  %v10703_v11 = vor.u32 %v13939_v55, %v10702_v10  ;;  %3850 = vmatpush.bf16.msrb.mxu3 %v11503_v23  ;;  %v3585_v23 = vpop.f32.mrf.mxu2 }
 0x291   :  { %v14003_v63 = vld [vmem:[%s22446_s3 + $0xaf4] sm:$0xf0]  ;;  %v13751_v23 = vld [vmem:[%s22446_s3 + $0x31c] sm:$0xf] }
 0x292   :  { %v11214_v4 = vld [vmem:[%s22446_s3 + $0xcd8] sm:$0xf]  ;;  %v10959_v17 = vor.u32 %v14003_v63, %v10958_v62  ;;  %3812 = vmatpush.bf16.msrb.mxu0 %v10703_v11 }
 0x293   :  { %v14067_v5 = vld [vmem:[%s22446_s3 + $0xcf4] sm:$0xf0] }
 0x294   :  { %v11470_v12 = vld [vmem:[%s22446_s3 + $0xed8] sm:$0xf]  ;;  %v11215_v18 = vor.u32 %v14067_v5, %v11214_v4  ;;  %3825 = vmatpush.bf16.msrb.mxu1 %v10959_v17  ;;  %v9811_v17 = vor.u32 %v13711_v16, %v9808_v59 }
 0x295   :  { %v14131_v21 = vld [vmem:[%s22446_s3 + $0xef4] sm:$0xf0] }
 0x296   :  { %v10670_v13 = vld [vmem:[%s22446_s3 + $0x898] sm:$0xf]  ;;  %v11471_v47 = vor.u32 %v14131_v21, %v11470_v12  ;;  %3838 = vmatpush.bf16.msrb.mxu2 %v11215_v18  ;;  %v3598_v12 = vpop.f32.mrf.mxu3  ;;  %v10320_v18 = vld [vmem:[%s22446_s3 + $0x5f8] sm:$0xf0] }
 0x297   :  { %v13931_v14 = vld [vmem:[%s22446_s3 + $0x8b4] sm:$0xf0]  ;;  %v13879_v12 = vld [vmem:[%s22446_s3 + $0x71c] sm:$0xf] }
 0x298   :  { %v10926_v19 = vld [vmem:[%s22446_s3 + $0xa98] sm:$0xf]  ;;  %v10671_v29 = vor.u32 %v13931_v14, %v10670_v13  ;;  %3851 = vmatpush.bf16.msrb.mxu3 %v11471_v47  ;;  %v10064_v13 = vld [vmem:[%s22446_s3 + $0x3f8] sm:$0xf0] }
 0x299   :  { %v13995_v24 = vld [vmem:[%s22446_s3 + $0xab4] sm:$0xf0]  ;;  %v13839_v14 = vld [vmem:[%s22446_s3 + $0x5dc] sm:$0xf]  ;;  %v10067_v28 = vor.u32 %v13775_v22, %v10064_v13 }
 0x29a   :  { %v11182_v7 = vld [vmem:[%s22446_s3 + $0xc98] sm:$0xf]  ;;  %v10927_v0 = vor.u32 %v13995_v24, %v10926_v19  ;;  %3813 = vmatpush.bf16.msrb.mxu0 %v10671_v29  ;;  %v13903_v19 = vld [vmem:[%s22446_s3 + $0x7dc] sm:$0xf]  ;;  %v10323_v29 = vor.u32 %v13839_v14, %v10320_v18 }
 0x29b   :  { %v14059_v27 = vld [vmem:[%s22446_s3 + $0xcb4] sm:$0xf0]  ;;  %v13679_v22 = vld [vmem:[%s22446_s3 + $0xdc] sm:$0xf] }
 0x29c   :  { %v11438_v30 = vld [vmem:[%s22446_s3 + $0xe98] sm:$0xf]  ;;  %v11183_v1 = vor.u32 %v14059_v27, %v11182_v7  ;;  %3826 = vmatpush.bf16.msrb.mxu1 %v10927_v0  ;;  %v13703_v7 = vld [vmem:[%s22446_s3 + $0x19c] sm:$0xf] }
 0x29d   :  { %v14123_v31 = vld [vmem:[%s22446_s3 + $0xeb4] sm:$0xf0]  ;;  %v9776_v27 = vld [vmem:[%s22446_s3 + $0x1b8] sm:$0xf0] }
 0x29e   :  { %v10638_v26 = vld [vmem:[%s22446_s3 + $0x858] sm:$0xf]  ;;  %v11439_v43 = vor.u32 %v14123_v31, %v11438_v30  ;;  %3839 = vmatpush.bf16.msrb.mxu2 %v11183_v1  ;;  %v10579_v30 = vor.u32 %v13903_v19, %v10576_v20  ;;  %v13767_v31 = vld [vmem:[%s22446_s3 + $0x39c] sm:$0xf]  ;;  %v9779_v41 = vor.u32 %v13703_v7, %v9776_v27  ;;  %v3622_v27 = vpop.f32.mrf.mxu1 }
 0x29f   :  { %v13923_v32 = vld [vmem:[%s22446_s3 + $0x874] sm:$0xf0]  ;;  %v10288_v0 = vld [vmem:[%s22446_s3 + $0x5b8] sm:$0xf0] }
 0x2a0   :  { %v10894_v42 = vld [vmem:[%s22446_s3 + $0xa58] sm:$0xf]  ;;  %v10639_v52 = vor.u32 %v13923_v32, %v10638_v26  ;;  %3852 = vmatpush.bf16.msrb.mxu3 %v11439_v43  ;;  %v10032_v26 = vld [vmem:[%s22446_s3 + $0x3b8] sm:$0xf0] }
 0x2a1   :  { %v13987_v45 = vld [vmem:[%s22446_s3 + $0xa74] sm:$0xf0]  ;;  %v13831_v32 = vld [vmem:[%s22446_s3 + $0x59c] sm:$0xf] }
 0x2a2   :  { %v11150_v46 = vld [vmem:[%s22446_s3 + $0xc58] sm:$0xf]  ;;  %v10895_v57 = vor.u32 %v13987_v45, %v10894_v42  ;;  %3814 = vmatpush.bf16.msrb.mxu0 %v10639_v52  ;;  %v13895_v1 = vld [vmem:[%s22446_s3 + $0x79c] sm:$0xf]  ;;  %v10035_v45 = vor.u32 %v13767_v31, %v10032_v26 }
 0x2a3   :  { %v14051_v51 = vld [vmem:[%s22446_s3 + $0xc74] sm:$0xf0]  ;;  %v10544_v42 = vld [vmem:[%s22446_s3 + $0x7b8] sm:$0xf0] }
 0x2a4   :  { %v11406_v53 = vld [vmem:[%s22446_s3 + $0xe58] sm:$0xf]  ;;  %v11151_v58 = vor.u32 %v14051_v51, %v11150_v46  ;;  %3827 = vmatpush.bf16.msrb.mxu1 %v10895_v57  ;;  %v9744_v43 = vld [vmem:[%s22446_s3 + $0x178] sm:$0xf0]  ;;  %v10291_v46 = vor.u32 %v13831_v32, %v10288_v0  ;;  %v10547_v51 = vor.u32 %v13895_v1, %v10544_v42 }
 0x2a5   :  { %v14115_v54 = vld [vmem:[%s22446_s3 + $0xe74] sm:$0xf0]  ;;  %v13759_v52 = vld [vmem:[%s22446_s3 + $0x35c] sm:$0xf] }
 0x2a6   :  { %v10606_v6 = vld [vmem:[%s22446_s3 + $0x818] sm:$0xf]  ;;  %v11407_v63 = vor.u32 %v14115_v54, %v11406_v53  ;;  %3840 = vmatpush.bf16.msrb.mxu2 %v11151_v58  ;;  %v10000_v53 = vld [vmem:[%s22446_s3 + $0x378] sm:$0xf0] }
 0x2a7   :  { %v13915_v10 = vld [vmem:[%s22446_s3 + $0x834] sm:$0xf0]  ;;  %v13823_v54 = vld [vmem:[%s22446_s3 + $0x55c] sm:$0xf] }
 0x2a8   :  { %v10862_v55 = vld [vmem:[%s22446_s3 + $0xa18] sm:$0xf]  ;;  %v10607_v21 = vor.u32 %v13915_v10, %v10606_v6  ;;  %3853 = vmatpush.bf16.msrb.mxu3 %v11407_v63  ;;  %v9747_v6 = vor.u32 %v13695_v2, %v9744_v43  ;;  %v10256_v10 = vld [vmem:[%s22446_s3 + $0x578] sm:$0xf0]  ;;  %v3635_v43 = vpop.f32.mrf.mxu2 }
 0x2a9   :  { %v13979_v56 = vld [vmem:[%s22446_s3 + $0xa34] sm:$0xf0]  ;;  %v13687_v57 = vld [vmem:[%s22446_s3 + $0x11c] sm:$0xf]  ;;  %v10259_v16 = vor.u32 %v13823_v54, %v10256_v10  ;;  %v3648_v54 = vpop.f32.mrf.mxu3 }
 0x2aa   :  { %v11118_v62 = vld [vmem:[%s22446_s3 + $0xc18] sm:$0xf]  ;;  %v10863_v47 = vor.u32 %v13979_v56, %v10862_v55  ;;  %3815 = vmatpush.bf16.msrb.mxu0 %v10607_v21  ;;  %v13887_v55 = vld [vmem:[%s22446_s3 + $0x75c] sm:$0xf] }
 0x2ab   :  { %v14043_v4 = vld [vmem:[%s22446_s3 + $0xc34] sm:$0xf0]  ;;  %v10512_v56 = vld [vmem:[%s22446_s3 + $0x778] sm:$0xf0] }
 0x2ac   :  { %v11374_v5 = vld [vmem:[%s22446_s3 + $0xe18] sm:$0xf]  ;;  %v11119_v24 = vor.u32 %v14043_v4, %v11118_v62  ;;  %3828 = vmatpush.bf16.msrb.mxu1 %v10863_v47  ;;  %v9712_v58 = vld [vmem:[%s22446_s3 + $0x138] sm:$0xf0]  ;;  %v10003_v62 = vor.u32 %v13759_v52, %v10000_v53  ;;  %v10515_v59 = vor.u32 %v13887_v55, %v10512_v56 }
 0x2ad   :  { %v14107_v11 = vld [vmem:[%s22446_s3 + $0xe34] sm:$0xf0]  ;;  %3816 = vmatmul.bf16.vlgmr.msrb.gmra.mxu0 %v15324_v37  ;;  %v9968_v63 = vld [vmem:[%s22446_s3 + $0x338] sm:$0xf0] }
 0x2ae   :  { %v11375_v48 = vor.u32 %v14107_v11, %v11374_v5  ;;  %3860 = vmatpush.bf16.msra.mxu0 %v9811_v17  ;;  %3841 = vmatpush.bf16.msrb.mxu2 %v11119_v24  ;;  %v13815_v4 = vld [vmem:[%s22446_s3 + $0x51c] sm:$0xf]  ;;  %v9715_v5 = vor.u32 %v13687_v57, %v9712_v58  ;;  %v9971_v14 = vor.u32 %v13751_v23, %v9968_v63  ;;  %v3609_v17 = vpop.f32.mrf.mxu0  ;;  %v3624_v63 = vpop.f32.mrf.mxu1 }
 0x2af   :  { %3829 = vmatmul.bf16.vlgmr.msrb.gmra.mxu1 %v15328_v40  ;;  %v10224_v11 = vld [vmem:[%s22446_s3 + $0x538] sm:$0xf0]  ;;  %v3610_v7 = vadd.f32 %v3609_v17, %v17729_v33 }
 0x2b0   :  { %3854 = vmatpush.bf16.msrb.mxu3 %v11375_v48  ;;  %3873 = vmatpush.bf16.msra.mxu1 %v10067_v28  ;;  %v10480_v21 = vld [vmem:[%s22446_s3 + $0x738] sm:$0xf0]  ;;  %v10227_v18 = vor.u32 %v13815_v4, %v10224_v11 }
 0x2b1   :  { %3842 = vmatmul.bf16.vlgmr.msrb.gmra.mxu2 %v15316_v34  ;;  %v9680_v13 = vld [vmem:[%s22446_s3 + $0xf8] sm:$0xf0]  ;;  %v10483_v19 = vor.u32 %v13879_v12, %v10480_v21  ;;  %v3623_v26 = vadd.f32 %v3622_v27, %v3610_v7 }
 0x2b2   :  { %3886 = vmatpush.bf16.msra.mxu2 %v10323_v29  ;;  %3861 = vmatpush.bf16.msra.mxu0 %v9779_v41  ;;  %v13743_v20 = vld [vmem:[%s22446_s3 + $0x2dc] sm:$0xf]  ;;  %v9683_v48 = vor.u32 %v13679_v22, %v9680_v13 }
 0x2b3   :  { %3855 = vmatmul.bf16.vlgmr.msrb.gmra.mxu3 %v15326_v38  ;;  %v9936_v47 = vld [vmem:[%s22446_s3 + $0x2f8] sm:$0xf0]  ;;  %v3636_v53 = vadd.f32 %v3635_v43, %v3623_v26 }
 0x2b4   :  { %3899 = vmatpush.bf16.msra.mxu3 %v10579_v30  ;;  %3874 = vmatpush.bf16.msra.mxu1 %v10035_v45  ;;  %v13807_v24 = vld [vmem:[%s22446_s3 + $0x4dc] sm:$0xf]  ;;  %v9939_v32 = vor.u32 %v13743_v20, %v9936_v47 }
 0x2b5   :  { %v10192_v28 = vld [vmem:[%s22446_s3 + $0x4f8] sm:$0xf0]  ;;  %v17928_v56 = vadd.f32 %v3648_v54, %v3636_v53 }
 0x2b6   :  { %3887 = vmatpush.bf16.msra.mxu2 %v10291_v46  ;;  %3862 = vmatpush.bf16.msra.mxu0 %v9747_v6  ;;  %v13871_v29 = vld [vmem:[%s22446_s3 + $0x6dc] sm:$0xf]  ;;  %v10195_v41 = vor.u32 %v13807_v24, %v10192_v28  ;;  %v3611_v57 = vpop.f32.mrf.mxu0 }
 0x2b7   :  { %v10448_v30 = vld [vmem:[%s22446_s3 + $0x6f8] sm:$0xf0] }
 0x2b8   :  { %3900 = vmatpush.bf16.msra.mxu3 %v10547_v51  ;;  %3875 = vmatpush.bf16.msra.mxu1 %v10003_v62  ;;  %v13671_v31 = vld [vmem:[%s22446_s3 + $0x9c] sm:$0xf]  ;;  %v10451_v0 = vor.u32 %v13871_v29, %v10448_v30 }
 0x2b9   :  { %v9648_v33 = vld [vmem:[%s22446_s3 + $0xb8] sm:$0xf0] }
 0x2ba   :  { %3888 = vmatpush.bf16.msra.mxu2 %v10259_v16  ;;  %3863 = vmatpush.bf16.msra.mxu0 %v9715_v5  ;;  %v13735_v1 = vld [vmem:[%s22446_s3 + $0x29c] sm:$0xf]  ;;  %v9651_v45 = vor.u32 %v13671_v31, %v9648_v33  ;;  %v3650_v33 = vpop.f32.mrf.mxu3 }
 0x2bb   :  { %v9904_v42 = vld [vmem:[%s22446_s3 + $0x2b8] sm:$0xf0] }
 0x2bc   :  { %3901 = vmatpush.bf16.msra.mxu3 %v10515_v59  ;;  %3876 = vmatpush.bf16.msra.mxu1 %v9971_v14  ;;  %v13799_v2 = vld [vmem:[%s22446_s3 + $0x49c] sm:$0xf]  ;;  %v9907_v55 = vor.u32 %v13735_v1, %v9904_v42 }
 0x2bd   :  { %v10160_v46 = vld [vmem:[%s22446_s3 + $0x4b8] sm:$0xf0] }
 0x2be   :  { %3889 = vmatpush.bf16.msra.mxu2 %v10227_v18  ;;  %3864 = vmatpush.bf16.msra.mxu0 %v9683_v48  ;;  %v13863_v51 = vld [vmem:[%s22446_s3 + $0x69c] sm:$0xf]  ;;  %v10163_v58 = vor.u32 %v13799_v2, %v10160_v46  ;;  %v3637_v48 = vpop.f32.mrf.mxu2 }
 0x2bf   :  { %v10416_v52 = vld [vmem:[%s22446_s3 + $0x6b8] sm:$0xf0] }
 0x2c0   :  { %3902 = vmatpush.bf16.msra.mxu3 %v10483_v19  ;;  %v13663_v6 = vld [vmem:[%s22446_s3 + $0x5c] sm:$0xf]  ;;  %3877 = vmatpush.bf16.msra.mxu1 %v9939_v32  ;;  %v10419_v62 = vor.u32 %v13863_v51, %v10416_v52 }
 0x2c1   :  { %v9616_v10 = vld [vmem:[%s22446_s3 + $0x78] sm:$0xf0] }
 0x2c2   :  { %3890 = vmatpush.bf16.msra.mxu2 %v10195_v41  ;;  %v13727_v16 = vld [vmem:[%s22446_s3 + $0x25c] sm:$0xf]  ;;  %3865 = vmatpush.bf16.msra.mxu0 %v9651_v45  ;;  %v9619_v4 = vor.u32 %v13663_v6, %v9616_v10 }
 0x2c3   :  { %v9872_v59 = vld [vmem:[%s22446_s3 + $0x278] sm:$0xf0] }
 0x2c4   :  { %3903 = vmatpush.bf16.msra.mxu3 %v10451_v0  ;;  %v13791_v23 = vld [vmem:[%s22446_s3 + $0x45c] sm:$0xf]  ;;  %3878 = vmatpush.bf16.msra.mxu1 %v9907_v55  ;;  %v9875_v14 = vor.u32 %v13727_v16, %v9872_v59 }
 0x2c5   :  { %v10128_v5 = vld [vmem:[%s22446_s3 + $0x478] sm:$0xf0] }
 0x2c6   :  { %v13855_v11 = vld [vmem:[%s22446_s3 + $0x65c] sm:$0xf]  ;;  %3891 = vmatpush.bf16.msra.mxu2 %v10163_v58  ;;  %v10131_v20 = vor.u32 %v13791_v23, %v10128_v5  ;;  %3866 = vmatpush.bf16.msra.mxu0 %v9619_v4 }
 0x2c7   :  { %v10384_v12 = vld [vmem:[%s22446_s3 + $0x678] sm:$0xf0] }
 0x2c8   :  { %v13655_v21 = vld [vmem:[%s22446_s3 + $0x1c] sm:$0xf]  ;;  %3904 = vmatpush.bf16.msra.mxu3 %v10419_v62  ;;  %v10387_v47 = vor.u32 %v13855_v11, %v10384_v12  ;;  %3879 = vmatpush.bf16.msra.mxu1 %v9875_v14 }
 0x2c9   :  { %v9584_v22 = vld [vmem:[%s22446_s3 + $0x38] sm:$0xf0] }
 0x2ca   :  { %v13719_v13 = vld [vmem:[%s22446_s3 + $0x21c] sm:$0xf]  ;;  %v9587_v28 = vor.u32 %v13655_v21, %v9584_v22  ;;  %3892 = vmatpush.bf16.msra.mxu2 %v10131_v20 }
 0x2cb   :  { %v9840_v17 = vld [vmem:[%s22446_s3 + $0x238] sm:$0xf0] }
 0x2cc   :  { %v13967_v18 = vld [vmem:[%s22446_s3 + $0x9dc] sm:$0xf]  ;;  %v9843_v1 = vor.u32 %v13719_v13, %v9840_v17  ;;  %3905 = vmatpush.bf16.msra.mxu3 %v10387_v47  ;;  %3867 = vmatpush.bf16.msra.mxu0 %v9587_v28 }
 0x2cd   :  { %v10832_v19 = vld [vmem:[%s22446_s3 + $0x9f8] sm:$0xf0] }
 0x2ce   :  { %v13783_v24 = vld [vmem:[%s22446_s3 + $0x41c] sm:$0xf]  ;;  %v10835_v26 = vor.u32 %v13967_v18, %v10832_v19  ;;  %3880 = vmatpush.bf16.msra.mxu1 %v9843_v1 }
 0x2cf   :  { %v10096_v7 = vld [vmem:[%s22446_s3 + $0x438] sm:$0xf0]  ;;  %3868 = vmatmul.bf16.vlgmr.msra.gmra.mxu0 %v15135_v9 }
 0x2d0   :  { %v13847_v27 = vld [vmem:[%s22446_s3 + $0x61c] sm:$0xf]  ;;  %v10099_v45 = vor.u32 %v13783_v24, %v10096_v7  ;;  %3912 = vmatpush.bf16.msrb.mxu0 %v10835_v26  ;;  %v3661_v26 = vpop.f32.mrf.mxu0 }
 0x2d1   :  { %v10352_v29 = vld [vmem:[%s22446_s3 + $0x638] sm:$0xf0]  ;;  %3881 = vmatmul.bf16.vlgmr.msra.gmra.mxu1 %v15172_v25 }
 0x2d2   :  { %v14031_v30 = vld [vmem:[%s22446_s3 + $0xbdc] sm:$0xf]  ;;  %v10355_v46 = vor.u32 %v13847_v27, %v10352_v29  ;;  %3893 = vmatpush.bf16.msra.mxu2 %v10099_v45  ;;  %v561_v27 = vperm.slane %v17657_v3, 5 }
 0x2d3   :  { %v11088_v31 = vld [vmem:[%s22446_s3 + $0xbf8] sm:$0xf0] }
 0x2d4   :  { %v14095_v32 = vld [vmem:[%s22446_s3 + $0xddc] sm:$0xf]  ;;  %v11091_v51 = vor.u32 %v14031_v30, %v11088_v31  ;;  %3906 = vmatpush.bf16.msra.mxu3 %v10355_v46 }
 0x2d5   :  { %v11344_v41 = vld [vmem:[%s22446_s3 + $0xdf8] sm:$0xf0]  ;;  %3894 = vmatmul.bf16.vlgmr.msra.gmra.mxu2 %v15133_v8 }
 0x2d6   :  { %v14159_v0 = vld [vmem:[%s22446_s3 + $0xfdc] sm:$0xf]  ;;  %v11347_v52 = vor.u32 %v14095_v32, %v11344_v41  ;;  %3925 = vmatpush.bf16.msrb.mxu1 %v11091_v51 }
 0x2d7   :  { %v11600_v42 = vld [vmem:[%s22446_s3 + $0xff8] sm:$0xf0]  ;;  %3907 = vmatmul.bf16.vlgmr.msra.gmra.mxu3 %v15149_v15 }
 0x2d8   :  { %v13959_v2 = vld [vmem:[%s22446_s3 + $0x99c] sm:$0xf]  ;;  %v11603_v6 = vor.u32 %v14159_v0, %v11600_v42  ;;  %3938 = vmatpush.bf16.msrb.mxu2 %v11347_v52 }
 0x2d9   :  { %v10800_v43 = vld [vmem:[%s22446_s3 + $0x9b8] sm:$0xf0] }
 0x2da   :  { %v14023_v53 = vld [vmem:[%s22446_s3 + $0xb9c] sm:$0xf]  ;;  %v10803_v10 = vor.u32 %v13959_v2, %v10800_v43  ;;  %3951 = vmatpush.bf16.msrb.mxu3 %v11603_v6  ;;  %v3662_v2 = vadd.f32 %v3661_v26, %v561_v27  ;;  %v3674_v43 = vpop.f32.mrf.mxu1  ;;  %v14224_v27 = vld [vmem:[%s22449_s4 + $0x1dc] sm:$0xf0] }
 0x2db   :  { %v11056_v54 = vld [vmem:[%s22446_s3 + $0xbb8] sm:$0xf0] }
 0x2dc   :  { %v14087_v55 = vld [vmem:[%s22446_s3 + $0xd9c] sm:$0xf]  ;;  %v11059_v23 = vor.u32 %v14023_v53, %v11056_v54  ;;  %3913 = vmatpush.bf16.msrb.mxu0 %v10803_v10  ;;  %v3675_v52 = vadd.f32 %v3674_v43, %v3662_v2  ;;  %v14288_v2 = vld [vmem:[%s22449_s4 + $0x3dc] sm:$0xf0] }
 0x2dd   :  { %v11312_v57 = vld [vmem:[%s22446_s3 + $0xdb8] sm:$0xf0]  ;;  %v12342_v43 = vld [vmem:[%s22449_s4 + $0x5c0] sm:$0xf] }
 0x2de   :  { %v14151_v58 = vld [vmem:[%s22446_s3 + $0xf9c] sm:$0xf]  ;;  %v11315_v63 = vor.u32 %v14087_v55, %v11312_v57  ;;  %3926 = vmatpush.bf16.msrb.mxu1 %v11059_v23 }
 0x2df   :  { %v11568_v62 = vld [vmem:[%s22446_s3 + $0xfb8] sm:$0xf0] }
 0x2e0   :  { %v13951_v16 = vld [vmem:[%s22446_s3 + $0x95c] sm:$0xf]  ;;  %v11571_v11 = vor.u32 %v14151_v58, %v11568_v62  ;;  %3939 = vmatpush.bf16.msrb.mxu2 %v11315_v63 }
 0x2e1   :  { %v10768_v59 = vld [vmem:[%s22446_s3 + $0x978] sm:$0xf0] }
 0x2e2   :  { %v14015_v4 = vld [vmem:[%s22446_s3 + $0xb5c] sm:$0xf]  ;;  %v10771_v12 = vor.u32 %v13951_v16, %v10768_v59  ;;  %3952 = vmatpush.bf16.msrb.mxu3 %v11571_v11  ;;  %v3687_v59 = vpop.f32.mrf.mxu2  ;;  %v3700_v11 = vpop.f32.mrf.mxu3 }
 0x2e3   :  { %v11024_v5 = vld [vmem:[%s22446_s3 + $0xb78] sm:$0xf0] }
 0x2e4   :  { %v14079_v21 = vld [vmem:[%s22446_s3 + $0xd5c] sm:$0xf]  ;;  %v11027_v19 = vor.u32 %v14015_v4, %v11024_v5  ;;  %3914 = vmatpush.bf16.msrb.mxu0 %v10771_v12  ;;  %v3688_v5 = vadd.f32 %v3687_v59, %v3675_v52  ;;  %v14416_v52 = vld [vmem:[%s22449_s4 + $0x7dc] sm:$0xf0] }
 0x2e5   :  { %v11280_v22 = vld [vmem:[%s22446_s3 + $0xd78] sm:$0xf0]  ;;  %v14280_v59 = vld [vmem:[%s22449_s4 + $0x39c] sm:$0xf0] }
 0x2e6   :  { %v14143_v13 = vld [vmem:[%s22446_s3 + $0xf5c] sm:$0xf]  ;;  %v11283_v20 = vor.u32 %v14079_v21, %v11280_v22  ;;  %3927 = vmatpush.bf16.msrb.mxu1 %v11027_v19 }
 0x2e7   :  { %v11536_v14 = vld [vmem:[%s22446_s3 + $0xf78] sm:$0xf0] }
 0x2e8   :  { %v13943_v17 = vld [vmem:[%s22446_s3 + $0x91c] sm:$0xf]  ;;  %v11539_v9 = vor.u32 %v14143_v13, %v11536_v14  ;;  %3940 = vmatpush.bf16.msrb.mxu2 %v11283_v20  ;;  %v18133_v14 = vadd.f32 %v3700_v11, %v3688_v5  ;;  %v14408_v5 = vld [vmem:[%s22449_s4 + $0x79c] sm:$0xf0] }
 0x2e9   :  { %v10736_v18 = vld [vmem:[%s22446_s3 + $0x938] sm:$0xf0] }
 0x2ea   :  { %v14007_v47 = vld [vmem:[%s22446_s3 + $0xb1c] sm:$0xf]  ;;  %v10739_v15 = vor.u32 %v13943_v17, %v10736_v18  ;;  %3953 = vmatpush.bf16.msrb.mxu3 %v11539_v9  ;;  %v3663_v17 = vpop.f32.mrf.mxu0 }
 0x2eb   :  { %v10992_v24 = vld [vmem:[%s22446_s3 + $0xb38] sm:$0xf0] }
 0x2ec   :  { %v14071_v8 = vld [vmem:[%s22446_s3 + $0xd1c] sm:$0xf]  ;;  %v10995_v30 = vor.u32 %v14007_v47, %v10992_v24  ;;  %3915 = vmatpush.bf16.msrb.mxu0 %v10739_v15 }
 0x2ed   :  { %v11248_v25 = vld [vmem:[%s22446_s3 + $0xd38] sm:$0xf0] }
 0x2ee   :  { %v14135_v7 = vld [vmem:[%s22446_s3 + $0xf1c] sm:$0xf]  ;;  %v11251_v31 = vor.u32 %v14071_v8, %v11248_v25  ;;  %3928 = vmatpush.bf16.msrb.mxu1 %v10995_v30  ;;  %v3676_v8 = vpop.f32.mrf.mxu1 }
 0x2ef   :  { %v11504_v48 = vld [vmem:[%s22446_s3 + $0xf38] sm:$0xf0]  ;;  %v14400_v8 = vld [vmem:[%s22449_s4 + $0x75c] sm:$0xf0] }
 0x2f0   :  { %v13935_v28 = vld [vmem:[%s22446_s3 + $0x8dc] sm:$0xf]  ;;  %v11507_v32 = vor.u32 %v14135_v7, %v11504_v48  ;;  %3941 = vmatpush.bf16.msrb.mxu2 %v11251_v31  ;;  %v11830_v7 = vld [vmem:[%s22449_s4 + $0x1c0] sm:$0xf] }
 0x2f1   :  { %v10704_v29 = vld [vmem:[%s22446_s3 + $0x8f8] sm:$0xf0] }
 0x2f2   :  { %v13999_v3 = vld [vmem:[%s22446_s3 + $0xadc] sm:$0xf]  ;;  %v10707_v41 = vor.u32 %v13935_v28, %v10704_v29  ;;  %3954 = vmatpush.bf16.msrb.mxu3 %v11507_v32 }
 0x2f3   :  { %v10960_v33 = vld [vmem:[%s22446_s3 + $0xaf8] sm:$0xf0] }
 0x2f4   :  { %v14063_v0 = vld [vmem:[%s22446_s3 + $0xcdc] sm:$0xf]  ;;  %v10963_v53 = vor.u32 %v13999_v3, %v10960_v33  ;;  %3916 = vmatpush.bf16.msrb.mxu0 %v10707_v41 }
 0x2f5   :  { %v11216_v1 = vld [vmem:[%s22446_s3 + $0xcf8] sm:$0xf0] }
 0x2f6   :  { %v14127_v42 = vld [vmem:[%s22446_s3 + $0xedc] sm:$0xf]  ;;  %v11219_v54 = vor.u32 %v14063_v0, %v11216_v1  ;;  %3929 = vmatpush.bf16.msrb.mxu1 %v10963_v53  ;;  %v3689_v0 = vpop.f32.mrf.mxu2  ;;  %v11831_v1 = vor.u32 %v14224_v27, %v11830_v7  ;;  %v14264_v27 = vld [vmem:[%s22449_s4 + $0x31c] sm:$0xf0] }
 0x2f7   :  { %v11472_v45 = vld [vmem:[%s22446_s3 + $0xef8] sm:$0xf0]  ;;  %v11958_v0 = vld [vmem:[%s22449_s4 + $0x2c0] sm:$0xf] }
 0x2f8   :  { %v13927_v46 = vld [vmem:[%s22446_s3 + $0x89c] sm:$0xf]  ;;  %v11475_v55 = vor.u32 %v14127_v42, %v11472_v45  ;;  %3942 = vmatpush.bf16.msrb.mxu2 %v11219_v54  ;;  %v12086_v42 = vld [vmem:[%s22449_s4 + $0x3c0] sm:$0xf]  ;;  %v3702_v45 = vpop.f32.mrf.mxu3 }
 0x2f9   :  { %v10672_v51 = vld [vmem:[%s22446_s3 + $0x8b8] sm:$0xf0]  ;;  %v14320_v45 = vld [vmem:[%s22449_s4 + $0x4dc] sm:$0xf0] }
 0x2fa   :  { %v13991_v6 = vld [vmem:[%s22446_s3 + $0xa9c] sm:$0xf]  ;;  %v10675_v57 = vor.u32 %v13927_v46, %v10672_v51  ;;  %3955 = vmatpush.bf16.msrb.mxu3 %v11475_v55  ;;  %v14352_v46 = vld [vmem:[%s22449_s4 + $0x5dc] sm:$0xf0] }
 0x2fb   :  { %v10928_v10 = vld [vmem:[%s22446_s3 + $0xab8] sm:$0xf0]  ;;  %v12598_v51 = vld [vmem:[%s22449_s4 + $0x7c0] sm:$0xf] }
 0x2fc   :  { %v14055_v58 = vld [vmem:[%s22446_s3 + $0xc9c] sm:$0xf]  ;;  %v10931_v12 = vor.u32 %v13991_v6, %v10928_v10  ;;  %3917 = vmatpush.bf16.msrb.mxu0 %v10675_v57  ;;  %v12087_v10 = vor.u32 %v14288_v2, %v12086_v42  ;;  %v11798_v55 = vld [vmem:[%s22449_s4 + $0x180] sm:$0xf] }
 0x2fd   :  { %v11184_v62 = vld [vmem:[%s22446_s3 + $0xcb8] sm:$0xf0]  ;;  %v14216_v57 = vld [vmem:[%s22449_s4 + $0x19c] sm:$0xf0] }
 0x2fe   :  { %v14119_v16 = vld [vmem:[%s22446_s3 + $0xe9c] sm:$0xf]  ;;  %v11187_v21 = vor.u32 %v14055_v58, %v11184_v62  ;;  %3930 = vmatpush.bf16.msrb.mxu1 %v10931_v12  ;;  %v12343_v58 = vor.u32 %v14352_v46, %v12342_v43  ;;  %v12599_v62 = vor.u32 %v14416_v52, %v12598_v51  ;;  %v11799_v11 = vor.u32 %v14216_v57, %v11798_v55  ;;  %v12214_v42 = vld [vmem:[%s22449_s4 + $0x4c0] sm:$0xf]  ;;  %v3726_v43 = vpop.f32.mrf.mxu1 }
 0x2ff   :  { %v11440_v23 = vld [vmem:[%s22446_s3 + $0xeb8] sm:$0xf0]  ;;  %v12470_v46 = vld [vmem:[%s22449_s4 + $0x6c0] sm:$0xf] }
 0x300   :  { %v13919_v63 = vld [vmem:[%s22446_s3 + $0x85c] sm:$0xf]  ;;  %v11443_v18 = vor.u32 %v14119_v16, %v11440_v23  ;;  %3943 = vmatpush.bf16.msrb.mxu2 %v11187_v21  ;;  %v12054_v16 = vld [vmem:[%s22449_s4 + $0x380] sm:$0xf] }
 0x301   :  { %v10640_v4 = vld [vmem:[%s22446_s3 + $0x878] sm:$0xf0]  ;;  %v12310_v23 = vld [vmem:[%s22449_s4 + $0x580] sm:$0xf]  ;;  %v12055_v12 = vor.u32 %v14280_v59, %v12054_v16 }
 0x302   :  { %v13983_v22 = vld [vmem:[%s22446_s3 + $0xa5c] sm:$0xf]  ;;  %v10643_v19 = vor.u32 %v13919_v63, %v10640_v4  ;;  %3956 = vmatpush.bf16.msrb.mxu3 %v11443_v18  ;;  %v14344_v63 = vld [vmem:[%s22449_s4 + $0x59c] sm:$0xf0] }
 0x303   :  { %v10896_v13 = vld [vmem:[%s22446_s3 + $0xa78] sm:$0xf0]  ;;  %v12566_v4 = vld [vmem:[%s22449_s4 + $0x780] sm:$0xf] }
 0x304   :  { %v14047_v20 = vld [vmem:[%s22446_s3 + $0xc5c] sm:$0xf]  ;;  %v10899_v48 = vor.u32 %v13983_v22, %v10896_v13  ;;  %3918 = vmatpush.bf16.msrb.mxu0 %v10643_v19  ;;  %v11766_v21 = vld [vmem:[%s22449_s4 + $0x140] sm:$0xf]  ;;  %v12311_v13 = vor.u32 %v14344_v63, %v12310_v23  ;;  %v12567_v17 = vor.u32 %v14408_v5, %v12566_v4  ;;  %v3752_v63 = vpop.f32.mrf.mxu3 }
 0x305   :  { %v11152_v47 = vld [vmem:[%s22446_s3 + $0xc78] sm:$0xf0]  ;;  %v14208_v22 = vld [vmem:[%s22449_s4 + $0x15c] sm:$0xf0] }
 0x306   :  { %v14111_v24 = vld [vmem:[%s22446_s3 + $0xe5c] sm:$0xf]  ;;  %v11155_v28 = vor.u32 %v14047_v20, %v11152_v47  ;;  %3931 = vmatpush.bf16.msrb.mxu1 %v10899_v48  ;;  %v12022_v18 = vld [vmem:[%s22449_s4 + $0x340] sm:$0xf] }
 0x307   :  { %v11408_v9 = vld [vmem:[%s22446_s3 + $0xe78] sm:$0xf0]  ;;  %v14272_v19 = vld [vmem:[%s22449_s4 + $0x35c] sm:$0xf0] }
 0x308   :  { %v13911_v15 = vld [vmem:[%s22446_s3 + $0x81c] sm:$0xf]  ;;  %v11411_v3 = vor.u32 %v14111_v24, %v11408_v9  ;;  %3944 = vmatpush.bf16.msrb.mxu2 %v11155_v28  ;;  %v12278_v20 = vld [vmem:[%s22449_s4 + $0x540] sm:$0xf]  ;;  %v11767_v9 = vor.u32 %v14208_v22, %v11766_v21 }
 0x309   :  { %v10608_v25 = vld [vmem:[%s22446_s3 + $0x838] sm:$0xf0]  ;;  %v14336_v47 = vld [vmem:[%s22449_s4 + $0x55c] sm:$0xf0] }
 0x30a   :  { %v13975_v29 = vld [vmem:[%s22446_s3 + $0xa1c] sm:$0xf]  ;;  %v10611_v33 = vor.u32 %v13911_v15, %v10608_v25  ;;  %3957 = vmatpush.bf16.msrb.mxu3 %v11411_v3  ;;  %v12534_v24 = vld [vmem:[%s22449_s4 + $0x740] sm:$0xf]  ;;  %v12279_v25 = vor.u32 %v14336_v47, %v12278_v20 }
 0x30b   :  { %v10864_v30 = vld [vmem:[%s22446_s3 + $0xa38] sm:$0xf0]  ;;  %v14200_v15 = vld [vmem:[%s22449_s4 + $0x11c] sm:$0xf0]  ;;  %v12535_v7 = vor.u32 %v14400_v8, %v12534_v24 }
 0x30c   :  { %v14039_v31 = vld [vmem:[%s22446_s3 + $0xc1c] sm:$0xf]  ;;  %v10867_v53 = vor.u32 %v13975_v29, %v10864_v30  ;;  %3919 = vmatpush.bf16.msrb.mxu0 %v10611_v33  ;;  %v12246_v48 = vld [vmem:[%s22449_s4 + $0x500] sm:$0xf] }
 0x30d   :  { %v11120_v26 = vld [vmem:[%s22446_s3 + $0xc38] sm:$0xf0]  ;;  %v14328_v28 = vld [vmem:[%s22449_s4 + $0x51c] sm:$0xf0] }
 0x30e   :  { %v14103_v32 = vld [vmem:[%s22446_s3 + $0xe1c] sm:$0xf]  ;;  %v11123_v54 = vor.u32 %v14039_v31, %v11120_v26  ;;  %3932 = vmatpush.bf16.msrb.mxu1 %v10867_v53  ;;  %v12502_v29 = vld [vmem:[%s22449_s4 + $0x700] sm:$0xf]  ;;  %v12247_v26 = vor.u32 %v14328_v28, %v12246_v48 }
 0x30f   :  { %v11376_v41 = vld [vmem:[%s22446_s3 + $0xe38] sm:$0xf0]  ;;  %3920 = vmatmul.bf16.vlgmr.msrb.gmra.mxu0 %v15324_v37  ;;  %v11734_v37 = vld [vmem:[%s22449_s4 + $0x100] sm:$0xf] }
 0x310   :  { %v11379_v6 = vor.u32 %v14103_v32, %v11376_v41  ;;  %7132 = vmatpush.bf16.msra.mxu0 %v11831_v1  ;;  %3945 = vmatpush.bf16.msrb.mxu2 %v11123_v54  ;;  %v14392_v30 = vld [vmem:[%s22449_s4 + $0x71c] sm:$0xf0]  ;;  %v11735_v31 = vor.u32 %v14200_v15, %v11734_v37  ;;  %v3713_v41 = vpop.f32.mrf.mxu0  ;;  %v3728_v15 = vpop.f32.mrf.mxu1 }
 0x311   :  { %3933 = vmatmul.bf16.vlgmr.msrb.gmra.mxu1 %v15328_v40  ;;  %v11702_v40 = vld [vmem:[%s22449_s4 + $0xc0] sm:$0xf]  ;;  %v12503_v32 = vor.u32 %v14392_v30, %v12502_v29  ;;  %v3714_v2 = vadd.f32 %v3713_v41, %v18133_v14 }
 0x312   :  { %3958 = vmatpush.bf16.msrb.mxu3 %v11379_v6  ;;  %7161 = vmatpush.bf16.msra.mxu1 %v12087_v10  ;;  %v14192_v33 = vld [vmem:[%s22449_s4 + $0xdc] sm:$0xf0]  ;;  %v12215_v10 = vor.u32 %v14320_v45, %v12214_v42 }
 0x313   :  { %3946 = vmatmul.bf16.vlgmr.msrb.gmra.mxu2 %v15316_v34  ;;  %v12023_v34 = vor.u32 %v14272_v19, %v12022_v18  ;;  %v14256_v1 = vld [vmem:[%s22449_s4 + $0x2dc] sm:$0xf0]  ;;  %v11703_v52 = vor.u32 %v14192_v33, %v11702_v40  ;;  %v3727_v53 = vadd.f32 %v3726_v43, %v3714_v2 }
 0x314   :  { %7190 = vmatpush.bf16.msra.mxu2 %v12343_v58  ;;  %7133 = vmatpush.bf16.msra.mxu0 %v11799_v11  ;;  %v14384_v51 = vld [vmem:[%s22449_s4 + $0x6dc] sm:$0xf0]  ;;  %v11959_v54 = vor.u32 %v14256_v1, %v11958_v0 }
 0x315   :  { %3959 = vmatmul.bf16.vlgmr.msrb.gmra.mxu3 %v15326_v38  ;;  %v11990_v38 = vld [vmem:[%s22449_s4 + $0x300] sm:$0xf]  ;;  %v12471_v55 = vor.u32 %v14384_v51, %v12470_v46 }
 0x316   :  { %7219 = vmatpush.bf16.msra.mxu3 %v12599_v62  ;;  %7162 = vmatpush.bf16.msra.mxu1 %v12055_v12  ;;  %v11991_v3 = vor.u32 %v14264_v27, %v11990_v38  ;;  %v11670_v14 = vld [vmem:[%s22449_s4 + $0x80] sm:$0xf]  ;;  %v3739_v62 = vpop.f32.mrf.mxu2 }
 0x317   :  { %v14184_v6 = vld [vmem:[%s22449_s4 + $0x9c] sm:$0xf0]  ;;  %v3740_v23 = vadd.f32 %v3739_v62, %v3727_v53 }
 0x318   :  { %7191 = vmatpush.bf16.msra.mxu2 %v12311_v13  ;;  %7134 = vmatpush.bf16.msra.mxu0 %v11767_v9  ;;  %v11926_v57 = vld [vmem:[%s22449_s4 + $0x280] sm:$0xf]  ;;  %v11671_v4 = vor.u32 %v14184_v6, %v11670_v14  ;;  %v3715_v24 = vpop.f32.mrf.mxu0  ;;  %v3965_v14 = vld [vmem:[%s22450_s1 + $0x8] sm:$0xff] }
 0x319   :  { %v14248_v58 = vld [vmem:[%s22449_s4 + $0x29c] sm:$0xf0]  ;;  %v3973_v6 = vld [vmem:[%s22450_s1 + $0x48] sm:$0xff] }
 0x31a   :  { %7220 = vmatpush.bf16.msra.mxu3 %v12567_v17  ;;  %7163 = vmatpush.bf16.msra.mxu1 %v12023_v34  ;;  %v12182_v16 = vld [vmem:[%s22449_s4 + $0x480] sm:$0xf]  ;;  %v11927_v12 = vor.u32 %v14248_v58, %v11926_v57  ;;  %v3753_v17 = vadd.f32 %v3752_v63, %v3740_v23 }
 0x31b   :  { %v14312_v59 = vld [vmem:[%s22449_s4 + $0x49c] sm:$0xf0] }
 0x31c   :  { %7192 = vmatpush.bf16.msra.mxu2 %v12279_v25  ;;  %7135 = vmatpush.bf16.msra.mxu0 %v11735_v31  ;;  %v12438_v5 = vld [vmem:[%s22449_s4 + $0x680] sm:$0xf]  ;;  %v12183_v18 = vor.u32 %v14312_v59, %v12182_v16  ;;  %v8999_v25 = vrot.slane %v17928_v56, 4  ;;  %v3974_v16 = vld [vmem:[%s22450_s1 + $0x50] sm:$0xff] }
 0x31d   :  { %v14376_v11 = vld [vmem:[%s22449_s4 + $0x69c] sm:$0xf0] }
 0x31e   :  { %7221 = vmatpush.bf16.msra.mxu3 %v12535_v7  ;;  %7164 = vmatpush.bf16.msra.mxu1 %v11991_v3  ;;  %v11638_v21 = vld [vmem:[%s22449_s4 + $0x40] sm:$0xf]  ;;  %v12439_v8 = vor.u32 %v14376_v11, %v12438_v5  ;;  %v9000_v7 = vrot.slane %v3753_v17, 3  ;;  %v3741_v53 = vpop.f32.mrf.mxu2  ;;  %v3967_v5 = vld [vmem:[%s22450_s1 + $0x18] sm:$0xff] }
 0x31f   :  { %v14176_v22 = vld [vmem:[%s22449_s4 + $0x5c] sm:$0xf0]  ;;  %v3975_v17 = vld [vmem:[%s22450_s1 + $0x58] sm:$0xff] }
 0x320   :  { %7193 = vmatpush.bf16.msra.mxu2 %v12247_v26  ;;  %7136 = vmatpush.bf16.msra.mxu0 %v11703_v52  ;;  %v11894_v13 = vld [vmem:[%s22449_s4 + $0x240] sm:$0xf]  ;;  %v11639_v38 = vor.u32 %v14176_v22, %v11638_v21  ;;  %v18364_v3 = vsel %vm9023_vm4, %v8999_v25, %v9000_v7  ;;  %v18367_v40 = vsel %vm9011_vm1, %v8999_v25, %v9000_v7 }
 0x321   :  { %v14240_v19 = vld [vmem:[%s22449_s4 + $0x25c] sm:$0xf0]  ;;  %v18370_v33 = vsel %vm9025_vm5, %v9000_v7, %v8999_v25  ;;  %v18373_v26 = vsel %vm9017_vm2, %v8999_v25, %v9000_v7  ;;  %v18391_v2 = vsel %vm22461_vm0, %v8999_v25, %v9000_v7  ;;  %v18394_v43 = vsel %vm9019_vm3, %v8999_v25, %v9000_v7 }
 0x322   :  { %7222 = vmatpush.bf16.msra.mxu3 %v12503_v32  ;;  %7165 = vmatpush.bf16.msra.mxu1 %v11959_v54  ;;  %v12150_v20 = vld [vmem:[%s22449_s4 + $0x440] sm:$0xf]  ;;  %v11895_v28 = vor.u32 %v14240_v19, %v11894_v13  ;;  %v18415_v57 = vsel %vm9009_vm7, %v8999_v25, %v9000_v7  ;;  %v18418_v58 = vsel %vm9003_vm6, %v8999_v25, %v9000_v7  ;;  %vm9051_vm0 = vcmask 1046531  }
 0x323   :  { %v14304_v47 = vld [vmem:[%s22449_s4 + $0x45c] sm:$0xf0]  ;;  %v18465_v25 = vpack.c.bf16 %v3975_v17, %v3967_v5 }
 0x324   :  { %7194 = vmatpush.bf16.msra.mxu2 %v12215_v10  ;;  %v12406_v9 = vld [vmem:[%s22449_s4 + $0x640] sm:$0xf]  ;;  %7137 = vmatpush.bf16.msra.mxu0 %v11671_v4  ;;  %v12151_v29 = vor.u32 %v14304_v47, %v12150_v20  ;;  %v3966_v10 = vld [vmem:[%s22450_s1 + $0x10] sm:$0xff]  ;;  %v18449_v20 = vpack.c.bf16 %v3973_v6, %v3965_v14 }
 0x325   :  { %v14368_v34 = vld [vmem:[%s22449_s4 + $0x65c] sm:$0xf0] }
 0x326   :  { %7223 = vmatpush.bf16.msra.mxu3 %v12471_v55  ;;  %v11606_v37 = vld [vmem:[%s22449_s4] sm:$0xf]  ;;  %7166 = vmatpush.bf16.msra.mxu1 %v11927_v12  ;;  %v12407_v45 = vor.u32 %v14368_v34, %v12406_v9  ;;  %v3754_v55 = vpop.f32.mrf.mxu3  ;;  %v18457_v9 = vpack.c.bf16 %v3974_v16, %v3966_v10 }
 0x327   :  { %v14168_v27 = vld [vmem:[%s22449_s4 + $0x1c] sm:$0xf0] }
 0x328   :  { %v11862_v48 = vld [vmem:[%s22449_s4 + $0x200] sm:$0xf]  ;;  %7195 = vmatpush.bf16.msra.mxu2 %v12183_v18  ;;  %7138 = vmatpush.bf16.msra.mxu0 %v11639_v38  ;;  %v11607_v54 = vor.u32 %v14168_v27, %v11606_v37 }
 0x329   :  { %v14232_v30 = vld [vmem:[%s22449_s4 + $0x21c] sm:$0xf0] }
 0x32a   :  { %v12118_v56 = vld [vmem:[%s22449_s4 + $0x400] sm:$0xf]  ;;  %7224 = vmatpush.bf16.msra.mxu3 %v12439_v8  ;;  %7167 = vmatpush.bf16.msra.mxu1 %v11895_v28  ;;  %v11863_v62 = vor.u32 %v14232_v30, %v11862_v48 }
 0x32b   :  { %v14296_v31 = vld [vmem:[%s22449_s4 + $0x41c] sm:$0xf0] }
 0x32c   :  { %v12374_v32 = vld [vmem:[%s22449_s4 + $0x600] sm:$0xf]  ;;  %7196 = vmatpush.bf16.msra.mxu2 %v12151_v29  ;;  %v12119_v4 = vor.u32 %v14296_v31, %v12118_v56  ;;  %7139 = vmatpush.bf16.msra.mxu0 %v11607_v54 }
 0x32d   :  { %v14360_v41 = vld [vmem:[%s22449_s4 + $0x61c] sm:$0xf0] }
 0x32e   :  { %v3964_v0 = vld [vmem:[%s22450_s1] sm:$0xff]  ;;  %7225 = vmatpush.bf16.msra.mxu3 %v12407_v45  ;;  %v12375_v22 = vor.u32 %v14360_v41, %v12374_v32  ;;  %7168 = vmatpush.bf16.msra.mxu1 %v11863_v62 }
 0x32f   :  { %v12854_v1 = vld [vmem:[%s22449_s4 + $0x9c0] sm:$0xf] }
 0x330   :  { %v14480_v42 = vld [vmem:[%s22449_s4 + $0x9dc] sm:$0xf0]  ;;  %7197 = vmatpush.bf16.msra.mxu2 %v12119_v4 }
 0x331   :  { %v3972_v46 = vld [vmem:[%s22450_s1 + $0x40] sm:$0xff]  ;;  %v12855_v63 = vor.u32 %v14480_v42, %v12854_v1  ;;  %7169 = vmatmul.bf16.vlgmr.msra.gmra.mxu1 %v18449_v20 }
 0x332   :  { %v13110_v51 = vld [vmem:[%s22449_s4 + $0xbc0] sm:$0xf]  ;;  %v18438_v13 = vpack.c.bf16 %v3972_v46, %v3964_v0  ;;  %7226 = vmatpush.bf16.msra.mxu3 %v12375_v22  ;;  %v3765_v22 = vpop.f32.mrf.mxu0 }
 0x333   :  { %v14544_v52 = vld [vmem:[%s22449_s4 + $0xbdc] sm:$0xf0]  ;;  %7248 = vmatpush.bf16.msrb.mxu0 %v12855_v63  ;;  %7198 = vmatmul.bf16.vlgmr.msra.gmra.mxu2 %v18457_v9 }
 0x334   :  { %v13366_v59 = vld [vmem:[%s22449_s4 + $0xdc0] sm:$0xf]  ;;  %v13111_v21 = vor.u32 %v14544_v52, %v13110_v51  ;;  %7140 = vmatmul.bf16.vlgmr.msra.gmra.mxu0 %v18438_v13 }
 0x335   :  { %v14608_v23 = vld [vmem:[%s22449_s4 + $0xddc] sm:$0xf0]  ;;  %7227 = vmatmul.bf16.vlgmr.msra.gmra.mxu3 %v18465_v25 }
 0x336   :  { %v13622_v11 = vld [vmem:[%s22449_s4 + $0xfc0] sm:$0xf]  ;;  %v13367_v47 = vor.u32 %v14608_v23, %v13366_v59  ;;  %7277 = vmatpush.bf16.msrb.mxu1 %v13111_v21 }
 0x337   :  { %v14672_v12 = vld [vmem:[%s22449_s4 + $0xfdc] sm:$0xf0] }
 0x338   :  { %v12822_v18 = vld [vmem:[%s22449_s4 + $0x980] sm:$0xf]  ;;  %v13623_v34 = vor.u32 %v14672_v12, %v13622_v11  ;;  %7306 = vmatpush.bf16.msrb.mxu2 %v13367_v47  ;;  %v3981_v11 = vld [vmem:[%s22450_s1 + $0x88] sm:$0xff] }
 0x339   :  { %v14472_v19 = vld [vmem:[%s22449_s4 + $0x99c] sm:$0xf0]  ;;  %v3989_v12 = vld [vmem:[%s22450_s1 + $0xc8] sm:$0xff] }
 0x33a   :  { %v13078_v24 = vld [vmem:[%s22449_s4 + $0xb80] sm:$0xf]  ;;  %v12823_v7 = vor.u32 %v14472_v19, %v12822_v18  ;;  %7335 = vmatpush.bf16.msrb.mxu3 %v13623_v34  ;;  %v3982_v19 = vld [vmem:[%s22450_s1 + $0x90] sm:$0xff] }
 0x33b   :  { %v14536_v8 = vld [vmem:[%s22449_s4 + $0xb9c] sm:$0xf0] }
 0x33c   :  { %v13334_v37 = vld [vmem:[%s22449_s4 + $0xd80] sm:$0xf]  ;;  %v13079_v48 = vor.u32 %v14536_v8, %v13078_v24  ;;  %7249 = vmatpush.bf16.msrb.mxu0 %v12823_v7  ;;  %v3778_v7 = vpop.f32.mrf.mxu1 }
 0x33d   :  { %v14600_v15 = vld [vmem:[%s22449_s4 + $0xd9c] sm:$0xf0] }
 0x33e   :  { %v13590_v38 = vld [vmem:[%s22449_s4 + $0xf80] sm:$0xf]  ;;  %v13335_v30 = vor.u32 %v14600_v15, %v13334_v37  ;;  %7278 = vmatpush.bf16.msrb.mxu1 %v13079_v48  ;;  %v3990_v37 = vld [vmem:[%s22450_s1 + $0xd0] sm:$0xff]  ;;  %v3983_v48 = vld [vmem:[%s22450_s1 + $0x98] sm:$0xff] }
 0x33f   :  { %v14664_v27 = vld [vmem:[%s22449_s4 + $0xf9c] sm:$0xf0] }
 0x340   :  { %v12790_v28 = vld [vmem:[%s22449_s4 + $0x940] sm:$0xf]  ;;  %v13591_v32 = vor.u32 %v14664_v27, %v13590_v38  ;;  %7307 = vmatpush.bf16.msrb.mxu2 %v13335_v30 }
 0x341   :  { %v14464_v29 = vld [vmem:[%s22449_s4 + $0x95c] sm:$0xf0] }
 0x342   :  { %v13046_v56 = vld [vmem:[%s22449_s4 + $0xb40] sm:$0xf]  ;;  %v12791_v1 = vor.u32 %v14464_v29, %v12790_v28  ;;  %7336 = vmatpush.bf16.msrb.mxu3 %v13591_v32  ;;  %v3991_v32 = vld [vmem:[%s22450_s1 + $0xd8] sm:$0xff] }
 0x343   :  { %v14528_v31 = vld [vmem:[%s22449_s4 + $0xb5c] sm:$0xf0] }
 0x344   :  { %v13302_v41 = vld [vmem:[%s22449_s4 + $0xd40] sm:$0xf]  ;;  %v13047_v46 = vor.u32 %v14528_v31, %v13046_v56  ;;  %7250 = vmatpush.bf16.msrb.mxu0 %v12791_v1 }
 0x345   :  { %v14592_v0 = vld [vmem:[%s22449_s4 + $0xd5c] sm:$0xf0] }
 0x346   :  { %v13558_v42 = vld [vmem:[%s22449_s4 + $0xf40] sm:$0xf]  ;;  %v13303_v53 = vor.u32 %v14592_v0, %v13302_v41  ;;  %7279 = vmatpush.bf16.msrb.mxu1 %v13047_v46 }
 0x347   :  { %v14656_v45 = vld [vmem:[%s22449_s4 + $0xf5c] sm:$0xf0] }
 0x348   :  { %v12758_v51 = vld [vmem:[%s22449_s4 + $0x900] sm:$0xf]  ;;  %v13559_v55 = vor.u32 %v14656_v45, %v13558_v42  ;;  %7308 = vmatpush.bf16.msrb.mxu2 %v13303_v53  ;;  %v18587_v42 = vpack.c.bf16 %v3989_v12, %v3981_v11 }
 0x349   :  { %v14456_v52 = vld [vmem:[%s22449_s4 + $0x91c] sm:$0xf0] }
 0x34a   :  { %v13014_v54 = vld [vmem:[%s22449_s4 + $0xb00] sm:$0xf]  ;;  %v12759_v63 = vor.u32 %v14456_v52, %v12758_v51  ;;  %7337 = vmatpush.bf16.msrb.mxu3 %v13559_v55  ;;  %22499 = vst [vmem:[#allocation3_spill] sm:$0xff] %v18587_v42  ;;  %v18595_v52 = vpack.c.bf16 %v3990_v37, %v3982_v19  ;;  %v3791_v55 = vpop.f32.mrf.mxu2  ;;  %7174 = vmatmul.bf16.gmra.mxu1 %v18587_v42 }
 0x34b   :  { %v14520_v14 = vld [vmem:[%s22449_s4 + $0xb1c] sm:$0xf0] }
 0x34c   :  { %v18516_v6 = vld [vmem:[%s22448_s5] sm:$0xff]  ;;  %v13015_v21 = vor.u32 %v14520_v14, %v13014_v54  ;;  %7251 = vmatpush.bf16.msrb.mxu0 %v12759_v63  ;;  %22500 = vst [vmem:[#allocation4_spill] sm:$0xff] %v18595_v52  ;;  %v3804_v63 = vpop.f32.mrf.mxu3  ;;  %7203 = vmatmul.bf16.gmra.mxu2 %v18595_v52 }
 0x34d   :  { %v562_v10 = vperm.slane %v18516_v6, 6  ;;  %v13270_v62 = vld [vmem:[%s22449_s4 + $0xd00] sm:$0xf] }
 0x34e   :  { %v14584_v16 = vld [vmem:[%s22449_s4 + $0xd1c] sm:$0xf0]  ;;  %7280 = vmatpush.bf16.msrb.mxu1 %v13015_v21  ;;  %v3780_v21 = vpop.f32.mrf.mxu1 }
 0x34f   :  { %v3980_v59 = vld [vmem:[%s22450_s1 + $0x80] sm:$0xff]  ;;  %v13271_v47 = vor.u32 %v14584_v16, %v13270_v62  ;;  %v3766_v24 = vadd.f32 %v3765_v22, %v562_v10  ;;  %v18603_v10 = vpack.c.bf16 %v3991_v32, %v3983_v48 }
 0x350   :  { %v3988_v23 = vld [vmem:[%s22450_s1 + $0xc0] sm:$0xff] }
 0x351   :  { %v13526_v4 = vld [vmem:[%s22449_s4 + $0xf00] sm:$0xf]  ;;  %v3779_v28 = vadd.f32 %v3778_v7, %v3766_v24  ;;  %v18576_v31 = vpack.c.bf16 %v3988_v23, %v3980_v59  ;;  %7309 = vmatpush.bf16.msrb.mxu2 %v13271_v47  ;;  %22501 = vst [vmem:[#allocation5_spill] sm:$0xff] %v18603_v10  ;;  %7232 = vmatmul.bf16.gmra.mxu3 %v18603_v10 }
 0x352   :  { %v14648_v5 = vld [vmem:[%s22449_s4 + $0xf1c] sm:$0xf0] }
 0x353   :  { %v12726_v17 = vld [vmem:[%s22449_s4 + $0x8c0] sm:$0xf]  ;;  %v13527_v15 = vor.u32 %v14648_v5, %v13526_v4  ;;  %22498 = vst [vmem:[#allocation2_spill] sm:$0xff] %v18576_v31  ;;  %7145 = vmatmul.bf16.gmra.mxu0 %v18576_v31  ;;  %v3792_v23 = vadd.f32 %v3791_v55, %v3779_v28  ;;  %v3767_v4 = vpop.f32.mrf.mxu0  ;;  %v3997_v55 = vld [vmem:[%s22450_s1 + $0x108] sm:$0xff] }
 0x354   :  { %v14448_v18 = vld [vmem:[%s22449_s4 + $0x8dc] sm:$0xf0]  ;;  %v3999_v4 = vld [vmem:[%s22450_s1 + $0x118] sm:$0xff] }
 0x355   :  { %v12982_v8 = vld [vmem:[%s22449_s4 + $0xac0] sm:$0xf]  ;;  %v12727_v29 = vor.u32 %v14448_v18, %v12726_v17  ;;  %7338 = vmatpush.bf16.msrb.mxu3 %v13527_v15  ;;  %v18614_v12 = vadd.f32 %v3804_v63, %v3792_v23  ;;  %v4006_v23 = vld [vmem:[%s22450_s1 + $0x150] sm:$0xff] }
 0x356   :  { %v14512_v34 = vld [vmem:[%s22449_s4 + $0xadc] sm:$0xf0] }
 0x357   :  { %v13238_v38 = vld [vmem:[%s22449_s4 + $0xcc0] sm:$0xf]  ;;  %v12983_v41 = vor.u32 %v14512_v34, %v12982_v8  ;;  %7252 = vmatpush.bf16.msrb.mxu0 %v12727_v29 }
 0x358   :  { %v14576_v27 = vld [vmem:[%s22449_s4 + $0xcdc] sm:$0xf0] }
 0x359   :  { %v13494_v30 = vld [vmem:[%s22449_s4 + $0xec0] sm:$0xf]  ;;  %v13239_v45 = vor.u32 %v14576_v27, %v13238_v38  ;;  %7281 = vmatpush.bf16.msrb.mxu1 %v12983_v41 }
 0x35a   :  { %v14640_v56 = vld [vmem:[%s22449_s4 + $0xedc] sm:$0xf0] }
 0x35b   :  { %v12694_v0 = vld [vmem:[%s22449_s4 + $0x880] sm:$0xf]  ;;  %v13495_v53 = vor.u32 %v14640_v56, %v13494_v30  ;;  %7310 = vmatpush.bf16.msrb.mxu2 %v13239_v45  ;;  %v3793_v56 = vpop.f32.mrf.mxu2  ;;  %v3806_v45 = vpop.f32.mrf.mxu3 }
 0x35c   :  { %v14440_v1 = vld [vmem:[%s22449_s4 + $0x89c] sm:$0xf0]  ;;  %v3817_v56 = vpop.f32.mrf.mxu0  ;;  %v14276_v45 = vld [vmem:[%s22449_s4 + $0x384] sm:$0xf] }
 0x35d   :  { %v12950_v46 = vld [vmem:[%s22449_s4 + $0xa80] sm:$0xf]  ;;  %v12695_v62 = vor.u32 %v14440_v1, %v12694_v0  ;;  %7339 = vmatpush.bf16.msrb.mxu3 %v13495_v53 }
 0x35e   :  { %v14504_v51 = vld [vmem:[%s22449_s4 + $0xa9c] sm:$0xf0] }
 0x35f   :  { %v13206_v54 = vld [vmem:[%s22449_s4 + $0xc80] sm:$0xf]  ;;  %v12951_v5 = vor.u32 %v14504_v51, %v12950_v46  ;;  %7253 = vmatpush.bf16.msrb.mxu0 %v12695_v62  ;;  %v4005_v62 = vld [vmem:[%s22450_s1 + $0x148] sm:$0xff] }
 0x360   :  { %v14568_v14 = vld [vmem:[%s22449_s4 + $0xc9c] sm:$0xf0] }
 0x361   :  { %v13462_v16 = vld [vmem:[%s22449_s4 + $0xe80] sm:$0xf]  ;;  %v13207_v11 = vor.u32 %v14568_v14, %v13206_v54  ;;  %7282 = vmatpush.bf16.msrb.mxu1 %v12951_v5  ;;  %v4007_v5 = vld [vmem:[%s22450_s1 + $0x158] sm:$0xff] }
 0x362   :  { %v14632_v59 = vld [vmem:[%s22449_s4 + $0xe9c] sm:$0xf0] }
 0x363   :  { %v13463_v22 = vor.u32 %v14632_v59, %v13462_v16  ;;  %v13174_v17 = vld [vmem:[%s22449_s4 + $0xc40] sm:$0xf]  ;;  %7311 = vmatpush.bf16.msrb.mxu2 %v13207_v11  ;;  %v3998_v59 = vld [vmem:[%s22450_s1 + $0x110] sm:$0xff]  ;;  %v18691_v11 = vpack.c.bf16 %v4005_v62, %v3997_v55  ;;  %v3830_v62 = vpop.f32.mrf.mxu1 }
 0x364   :  { %v14560_v18 = vld [vmem:[%s22449_s4 + $0xc5c] sm:$0xf0]  ;;  %v18693_v21 = vpack.c.bf16 %v4006_v23, %v3998_v59  ;;  %v4014_v23 = vld [vmem:[%s22450_s1 + $0x190] sm:$0xff] }
 0x365   :  { %v12662_v19 = vld [vmem:[%s22449_s4 + $0x840] sm:$0xf]  ;;  %v13175_v34 = vor.u32 %v14560_v18, %v13174_v17  ;;  %7340 = vmatpush.bf16.msrb.mxu3 %v13463_v22  ;;  %22503 = vst [vmem:[#allocation7_spill] sm:$0xff] %v18691_v11  ;;  %v18695_v22 = vpack.c.bf16 %v4007_v5, %v3999_v4  ;;  %7179 = vmatmul.bf16.gmra.mxu1 %v18691_v11  ;;  %v14348_v17 = vld [vmem:[%s22449_s4 + $0x5c4] sm:$0xf]  ;;  %v4022_v4 = vld [vmem:[%s22450_s1 + $0x1d0] sm:$0xff] }
 0x366   :  { %v14432_v47 = vld [vmem:[%s22449_s4 + $0x85c] sm:$0xf0]  ;;  %22504 = vst [vmem:[#allocation8_spill] sm:$0xff] %v18693_v21  ;;  %7208 = vmatmul.bf16.gmra.mxu2 %v18693_v21  ;;  %v12344_v18 = vld [vmem:[%s22449_s4 + $0x5e0] sm:$0xf0] }
 0x367   :  { %v13430_v24 = vld [vmem:[%s22449_s4 + $0xe40] sm:$0xf]  ;;  %v12663_v37 = vor.u32 %v14432_v47, %v12662_v19  ;;  %7312 = vmatpush.bf16.msrb.mxu2 %v13175_v34  ;;  %22505 = vst [vmem:[#allocation9_spill] sm:$0xff] %v18695_v22  ;;  %7237 = vmatmul.bf16.gmra.mxu3 %v18695_v22  ;;  %v14220_v19 = vld [vmem:[%s22449_s4 + $0x1c4] sm:$0xf]  ;;  %v12347_v47 = vor.u32 %v14348_v17, %v12344_v18  ;;  %v4015_v17 = vld [vmem:[%s22450_s1 + $0x198] sm:$0xff] }
 0x368   :  { %v14624_v8 = vld [vmem:[%s22449_s4 + $0xe5c] sm:$0xf0]  ;;  %v12600_v34 = vld [vmem:[%s22449_s4 + $0x7e0] sm:$0xf0]  ;;  %v4023_v18 = vld [vmem:[%s22450_s1 + $0x1d8] sm:$0xff] }
 0x369   :  { %v12918_v15 = vld [vmem:[%s22449_s4 + $0xa40] sm:$0xf]  ;;  %v13431_v27 = vor.u32 %v14624_v8, %v13430_v24  ;;  %7254 = vmatpush.bf16.msrb.mxu0 %v12663_v37  ;;  %v11832_v24 = vld [vmem:[%s22449_s4 + $0x1e0] sm:$0xf0] }
 0x36a   :  { %v14496_v7 = vld [vmem:[%s22449_s4 + $0xa5c] sm:$0xf0]  ;;  %v14412_v8 = vld [vmem:[%s22449_s4 + $0x7c4] sm:$0xf]  ;;  %v11835_v37 = vor.u32 %v14220_v19, %v11832_v24  ;;  %v3843_v19 = vpop.f32.mrf.mxu2 }
 0x36b   :  { %v13142_v38 = vld [vmem:[%s22449_s4 + $0xc00] sm:$0xf]  ;;  %v12919_v48 = vor.u32 %v14496_v7, %v12918_v15  ;;  %7341 = vmatpush.bf16.msrb.mxu3 %v13431_v27  ;;  %v12603_v15 = vor.u32 %v14412_v8, %v12600_v34  ;;  %v14284_v7 = vld [vmem:[%s22449_s4 + $0x3c4] sm:$0xf]  ;;  %v3856_v8 = vpop.f32.mrf.mxu3  ;;  %v18778_v34 = vpack.c.bf16 %v4022_v4, %v4014_v23 }
 0x36c   :  { %v14552_v28 = vld [vmem:[%s22449_s4 + $0xc1c] sm:$0xf0]  ;;  %v14340_v27 = vld [vmem:[%s22449_s4 + $0x584] sm:$0xf] }
 0x36d   :  { %v12630_v29 = vld [vmem:[%s22449_s4 + $0x800] sm:$0xf]  ;;  %7283 = vmatpush.bf16.msrb.mxu1 %v12919_v48  ;;  %v13143_v54 = vor.u32 %v14552_v28, %v13142_v38  ;;  %v12088_v38 = vld [vmem:[%s22449_s4 + $0x3e0] sm:$0xf0]  ;;  %22508 = vst [vmem:[#allocation12_spill] sm:$0xff] %v18778_v34 }
 0x36e   :  { %v14424_v30 = vld [vmem:[%s22449_s4 + $0x81c] sm:$0xf0]  ;;  %v12091_v48 = vor.u32 %v14284_v7, %v12088_v38  ;;  %v12312_v28 = vld [vmem:[%s22449_s4 + $0x5a0] sm:$0xf0]  ;;  %v3819_v7 = vpop.f32.mrf.mxu0  ;;  %v3832_v38 = vpop.f32.mrf.mxu1 }
 0x36f   :  { %v12631_v32 = vor.u32 %v14424_v30, %v12630_v29  ;;  %v13398_v41 = vld [vmem:[%s22449_s4 + $0xe00] sm:$0xf]  ;;  %7313 = vmatpush.bf16.msrb.mxu2 %v13143_v54  ;;  %v14212_v29 = vld [vmem:[%s22449_s4 + $0x184] sm:$0xf]  ;;  %v3969_v7 = vld [vmem:[%s22450_s1 + $0x28] sm:$0xff] }
 0x370   :  { %v14616_v0 = vld [vmem:[%s22449_s4 + $0xe1c] sm:$0xf0]  ;;  %v11800_v30 = vld [vmem:[%s22449_s4 + $0x1a0] sm:$0xf0]  ;;  %v3977_v38 = vld [vmem:[%s22450_s1 + $0x68] sm:$0xff] }
 0x371   :  { %v12886_v1 = vld [vmem:[%s22449_s4 + $0xa00] sm:$0xf]  ;;  %v13399_v16 = vor.u32 %v14616_v0, %v13398_v41  ;;  %7255 = vmatpush.bf16.msrb.mxu0 %v12631_v32  ;;  %v12315_v32 = vor.u32 %v14340_v27, %v12312_v28  ;;  %v11803_v41 = vor.u32 %v14212_v29, %v11800_v30  ;;  %v14404_v0 = vld [vmem:[%s22449_s4 + $0x784] sm:$0xf] }
 0x372   :  { %v14488_v46 = vld [vmem:[%s22449_s4 + $0xa1c] sm:$0xf0]  ;;  %v14332_v27 = vld [vmem:[%s22449_s4 + $0x544] sm:$0xf]  ;;  %v3845_v28 = vpop.f32.mrf.mxu2 }
 0x373   :  { %v3996_v51 = vld [vmem:[%s22450_s1 + $0x100] sm:$0xff]  ;;  %v12887_v14 = vor.u32 %v14488_v46, %v12886_v1  ;;  %7342 = vmatpush.bf16.msrb.mxu3 %v13399_v16  ;;  %7422 = vmatpush.bf16.msra.mxu2 %v12347_v47  ;;  %v3818_v46 = vadd.f32 %v3817_v56, %v18614_v12  ;;  %v4013_v12 = vld [vmem:[%s22450_s1 + $0x188] sm:$0xff] }
 0x374   :  { %v4004_v53 = vld [vmem:[%s22450_s1 + $0x140] sm:$0xff]  ;;  %v4021_v16 = vld [vmem:[%s22450_s1 + $0x1c8] sm:$0xff] }
 0x375   :  { %v18683_v63 = vpack.c.bf16 %v4004_v53, %v3996_v51  ;;  %7284 = vmatpush.bf16.msrb.mxu1 %v12887_v14  ;;  %7364 = vmatpush.bf16.msra.mxu0 %v11835_v37  ;;  %v12568_v1 = vld [vmem:[%s22449_s4 + $0x7a0] sm:$0xf0]  ;;  %v3831_v59 = vadd.f32 %v3830_v62, %v3818_v46  ;;  %v18776_v47 = vpack.c.bf16 %v4021_v16, %v4013_v12 }
 0x376   :  { %v12571_v51 = vor.u32 %v14404_v0, %v12568_v1  ;;  %v12056_v53 = vld [vmem:[%s22449_s4 + $0x3a0] sm:$0xf0]  ;;  %v18780_v37 = vpack.c.bf16 %v4023_v18, %v4015_v17  ;;  %7213 = vmatmul.bf16.gmra.mxu2 %v18778_v34 }
 0x377   :  { %22502 = vst [vmem:[#allocation6_spill] sm:$0xff] %v18683_v63  ;;  %7150 = vmatmul.bf16.gmra.mxu0 %v18683_v63  ;;  %7451 = vmatpush.bf16.msra.mxu3 %v12603_v15  ;;  %v4012_v54 = vld [vmem:[%s22450_s1 + $0x180] sm:$0xff]  ;;  %v12059_v55 = vor.u32 %v14276_v45, %v12056_v53  ;;  %v3844_v24 = vadd.f32 %v3843_v19, %v3831_v59 }
 0x378   :  { %v4020_v14 = vld [vmem:[%s22450_s1 + $0x1c0] sm:$0xff]  ;;  %7423 = vmatpush.bf16.msra.mxu2 %v12315_v32  ;;  %22507 = vst [vmem:[#allocation11_spill] sm:$0xff] %v18776_v47  ;;  %7184 = vmatmul.bf16.gmra.mxu1 %v18776_v47 }
 0x379   :  { %7393 = vmatpush.bf16.msra.mxu1 %v12091_v48  ;;  %7365 = vmatpush.bf16.msra.mxu0 %v11803_v41  ;;  %v18768_v5 = vpack.c.bf16 %v4020_v14, %v4012_v54  ;;  %22509 = vst [vmem:[#allocation13_spill] sm:$0xff] %v18780_v37  ;;  %v18782_v15 = vadd.f32 %v3856_v8, %v3844_v24  ;;  %v12280_v48 = vld [vmem:[%s22449_s4 + $0x560] sm:$0xf0]  ;;  %v3858_v41 = vpop.f32.mrf.mxu3 }
 0x37a   :  { %7242 = vmatmul.bf16.gmra.mxu3 %v18780_v37  ;;  %v12283_v29 = vor.u32 %v14332_v27, %v12280_v48  ;;  %v14204_v30 = vld [vmem:[%s22449_s4 + $0x144] sm:$0xf]  ;;  %v3970_v27 = vld [vmem:[%s22450_s1 + $0x30] sm:$0xff] }
 0x37b   :  { %7452 = vmatpush.bf16.msra.mxu3 %v12571_v51  ;;  %22506 = vst [vmem:[#allocation10_spill] sm:$0xff] %v18768_v5  ;;  %v11768_v56 = vld [vmem:[%s22449_s4 + $0x160] sm:$0xf0]  ;;  %v3978_v48 = vld [vmem:[%s22450_s1 + $0x70] sm:$0xff] }
 0x37c   :  { %v14396_v32 = vld [vmem:[%s22449_s4 + $0x744] sm:$0xf]  ;;  %v11771_v0 = vor.u32 %v14204_v30, %v11768_v56  ;;  %7424 = vmatpush.bf16.msra.mxu2 %v12283_v29  ;;  %v3971_v29 = vld [vmem:[%s22450_s1 + $0x38] sm:$0xff]  ;;  %v18862_v56 = vpack.c.bf16 %v3977_v38, %v3969_v7  ;;  %v3895_v7 = vpop.f32.mrf.mxu2  ;;  %v3986_v38 = vld [vmem:[%s22450_s1 + $0xb0] sm:$0xff] }
 0x37d   :  { %7394 = vmatpush.bf16.msra.mxu1 %v12059_v55  ;;  %v12536_v1 = vld [vmem:[%s22449_s4 + $0x760] sm:$0xf0]  ;;  %v3979_v30 = vld [vmem:[%s22450_s1 + $0x78] sm:$0xff] }
 0x37e   :  { %v14268_v45 = vld [vmem:[%s22449_s4 + $0x344] sm:$0xf]  ;;  %v12539_v51 = vor.u32 %v14396_v32, %v12536_v1  ;;  %7366 = vmatpush.bf16.msra.mxu0 %v11771_v0  ;;  %v18864_v32 = vpack.c.bf16 %v3978_v48, %v3970_v27  ;;  %v18866_v41 = vpack.c.bf16 %v3979_v30, %v3971_v29  ;;  %v563_v0 = vperm.slane %v18516_v6, 7  ;;  %v3994_v27 = vld [vmem:[%s22450_s1 + $0xf0] sm:$0xff] }
 0x37f   :  { %v12024_v46 = vld [vmem:[%s22449_s4 + $0x360] sm:$0xf0] }
 0x380   :  { %v12027_v53 = vor.u32 %v14268_v45, %v12024_v46  ;;  %v14324_v54 = vld [vmem:[%s22449_s4 + $0x504] sm:$0xf]  ;;  %7453 = vmatpush.bf16.msra.mxu3 %v12539_v51  ;;  %22510 = vst [vmem:[#allocation14_spill] sm:$0xff] %v18866_v41  ;;  %v3869_v51 = vpop.f32.mrf.mxu0 }
 0x381   :  { %v12248_v14 = vld [vmem:[%s22449_s4 + $0x520] sm:$0xf0]  ;;  %v3908_v29 = vpop.f32.mrf.mxu3 }
 0x382   :  { %v14196_v55 = vld [vmem:[%s22449_s4 + $0x104] sm:$0xf]  ;;  %v12251_v62 = vor.u32 %v14324_v54, %v12248_v14  ;;  %7395 = vmatpush.bf16.msra.mxu1 %v12027_v53 }
 0x383   :  { %v11736_v12 = vld [vmem:[%s22449_s4 + $0x120] sm:$0xf0] }
 0x384   :  { %v14388_v16 = vld [vmem:[%s22449_s4 + $0x704] sm:$0xf]  ;;  %v11739_v23 = vor.u32 %v14196_v55, %v11736_v12  ;;  %7425 = vmatpush.bf16.msra.mxu2 %v12251_v62  ;;  %v3870_v55 = vadd.f32 %v3869_v51, %v563_v0  ;;  %v3882_v62 = vpop.f32.mrf.mxu1  ;;  %v3987_v0 = vld [vmem:[%s22450_s1 + $0xb8] sm:$0xff] }
 0x385   :  { %v12504_v59 = vld [vmem:[%s22449_s4 + $0x720] sm:$0xf0] }
 0x386   :  { %v12507_v4 = vor.u32 %v14388_v16, %v12504_v59  ;;  %v14260_v17 = vld [vmem:[%s22449_s4 + $0x304] sm:$0xf]  ;;  %7367 = vmatpush.bf16.msra.mxu0 %v11739_v23  ;;  %7314 = vmatmul.bf16.vlgmr.msrb.gmra.mxu2 %v18864_v32 }
 0x387   :  { %7155 = vmatmul.bf16.gmra.mxu0 %v18768_v5  ;;  %v11992_v18 = vld [vmem:[%s22449_s4 + $0x320] sm:$0xf0] }
 0x388   :  { %v3968_v19 = vld [vmem:[%s22450_s1 + $0x20] sm:$0xff]  ;;  %v11995_v8 = vor.u32 %v14260_v17, %v11992_v18  ;;  %7454 = vmatpush.bf16.msra.mxu3 %v12507_v4  ;;  %7285 = vmatmul.bf16.vlgmr.msrb.gmra.mxu1 %v18862_v56  ;;  %v3883_v4 = vadd.f32 %v3882_v62, %v3870_v55 }
 0x389   :  { %v3976_v24 = vld [vmem:[%s22450_s1 + $0x60] sm:$0xff]  ;;  %v3910_v55 = vpop.f32.mrf.mxu3 }
 0x38a   :  { %v18854_v28 = vpack.c.bf16 %v3976_v24, %v3968_v19  ;;  %7396 = vmatpush.bf16.msra.mxu1 %v11995_v8  ;;  %7343 = vmatmul.bf16.vlgmr.msrb.gmra.mxu3 %v18866_v41  ;;  %v14316_v1 = vld [vmem:[%s22449_s4 + $0x4c4] sm:$0xf]  ;;  %v3985_v24 = vld [vmem:[%s22450_s1 + $0xa8] sm:$0xff]  ;;  %v3896_v48 = vadd.f32 %v3895_v7, %v3883_v4 }
 0x38b   :  { %v12216_v45 = vld [vmem:[%s22449_s4 + $0x4e0] sm:$0xf0]  ;;  %v3993_v8 = vld [vmem:[%s22450_s1 + $0xe8] sm:$0xff] }
 0x38c   :  { %v14188_v46 = vld [vmem:[%s22449_s4 + $0xc4] sm:$0xf]  ;;  %v12219_v53 = vor.u32 %v14316_v1, %v12216_v45  ;;  %v3995_v1 = vld [vmem:[%s22450_s1 + $0xf8] sm:$0xff]  ;;  %v3871_v45 = vpop.f32.mrf.mxu0  ;;  %v18925_v51 = vadd.f32 %v3908_v29, %v3896_v48  ;;  %v4009_v55 = vld [vmem:[%s22450_s1 + $0x168] sm:$0xff] }
 0x38d   :  { %v11704_v6 = vld [vmem:[%s22449_s4 + $0xe0] sm:$0xf0] }
 0x38e   :  { %v14380_v54 = vld [vmem:[%s22449_s4 + $0x6c4] sm:$0xf]  ;;  %v11707_v12 = vor.u32 %v14188_v46, %v11704_v6  ;;  %7426 = vmatpush.bf16.msra.mxu2 %v12219_v53  ;;  %v18923_v46 = vpack.c.bf16 %v3993_v8, %v3985_v24  ;;  %v3884_v53 = vpop.f32.mrf.mxu1  ;;  %v18927_v6 = vpack.c.bf16 %v3994_v27, %v3986_v38 }
 0x38f   :  { %v12472_v14 = vld [vmem:[%s22449_s4 + $0x6e0] sm:$0xf0] }
 0x390   :  { %v12475_v16 = vor.u32 %v14380_v54, %v12472_v14  ;;  %v14252_v59 = vld [vmem:[%s22449_s4 + $0x2c4] sm:$0xf]  ;;  %7368 = vmatpush.bf16.msra.mxu0 %v11707_v12  ;;  %v18929_v54 = vpack.c.bf16 %v3995_v1, %v3987_v0  ;;  %v3897_v14 = vpop.f32.mrf.mxu2 }
 0x391   :  { %v11960_v23 = vld [vmem:[%s22449_s4 + $0x2e0] sm:$0xf0]  ;;  %v4001_v14 = vld [vmem:[%s22450_s1 + $0x128] sm:$0xff] }
 0x392   :  { %7455 = vmatpush.bf16.msra.mxu3 %v12475_v16  ;;  %v11963_v17 = vor.u32 %v14252_v59, %v11960_v23  ;;  %v3984_v18 = vld [vmem:[%s22450_s1 + $0xa0] sm:$0xff]  ;;  %22511 = vst [vmem:[#allocation15_spill] sm:$0xff] %v18929_v54 }
 0x393   :  { %v3992_v19 = vld [vmem:[%s22450_s1 + $0xe0] sm:$0xff] }
 0x394   :  { %7397 = vmatpush.bf16.msra.mxu1 %v11963_v17  ;;  %v18915_v30 = vpack.c.bf16 %v3992_v19, %v3984_v18  ;;  %v14308_v62 = vld [vmem:[%s22449_s4 + $0x484] sm:$0xf] }
 0x395   :  { %v12184_v12 = vld [vmem:[%s22449_s4 + $0x4a0] sm:$0xf0] }
 0x396   :  { %7319 = vmatmul.bf16.gmra.mxu2 %v18927_v6  ;;  %v14180_v16 = vld [vmem:[%s22449_s4 + $0x84] sm:$0xf]  ;;  %v12187_v59 = vor.u32 %v14308_v62, %v12184_v12 }
 0x397   :  { %7256 = vmatmul.bf16.vlgmr.msrb.gmra.mxu0 %v18854_v28  ;;  %v11672_v23 = vld [vmem:[%s22449_s4 + $0xa0] sm:$0xf0] }
 0x398   :  { %7290 = vmatmul.bf16.gmra.mxu1 %v18923_v46  ;;  %v14372_v4 = vld [vmem:[%s22449_s4 + $0x684] sm:$0xf]  ;;  %v11675_v18 = vor.u32 %v14180_v16, %v11672_v23  ;;  %7427 = vmatpush.bf16.msra.mxu2 %v12187_v59  ;;  %v4002_v23 = vld [vmem:[%s22450_s1 + $0x130] sm:$0xff] }
 0x399   :  { %v12440_v17 = vld [vmem:[%s22449_s4 + $0x6a0] sm:$0xf0] }
 0x39a   :  { %7348 = vmatmul.bf16.gmra.mxu3 %v18929_v54  ;;  %v12443_v19 = vor.u32 %v14372_v4, %v12440_v17  ;;  %v14244_v24 = vld [vmem:[%s22449_s4 + $0x284] sm:$0xf]  ;;  %7369 = vmatpush.bf16.msra.mxu0 %v11675_v18 }
 0x39b   :  { %v11928_v8 = vld [vmem:[%s22449_s4 + $0x2a0] sm:$0xf0] }
 0x39c   :  { %v11931_v7 = vor.u32 %v14244_v24, %v11928_v8  ;;  %v14300_v38 = vld [vmem:[%s22449_s4 + $0x444] sm:$0xf]  ;;  %7456 = vmatpush.bf16.msra.mxu3 %v12443_v19 }
 0x39d   :  { %v12152_v27 = vld [vmem:[%s22449_s4 + $0x460] sm:$0xf0] }
 0x39e   :  { %v4000_v48 = vld [vmem:[%s22450_s1 + $0x120] sm:$0xff]  ;;  %v12155_v0 = vor.u32 %v14300_v38, %v12152_v27  ;;  %7398 = vmatpush.bf16.msra.mxu1 %v11931_v7 }
 0x39f   :  { %v4008_v29 = vld [vmem:[%s22450_s1 + $0x160] sm:$0xff] }
 0x3a0   :  { %v14172_v1 = vld [vmem:[%s22449_s4 + $0x44] sm:$0xf]  ;;  %7428 = vmatpush.bf16.msra.mxu2 %v12155_v0 }
 0x3a1   :  { %v11640_v45 = vld [vmem:[%s22449_s4 + $0x60] sm:$0xf0] }
 0x3a2   :  { %v14364_v53 = vld [vmem:[%s22449_s4 + $0x644] sm:$0xf]  ;;  %v11643_v62 = vor.u32 %v14172_v1, %v11640_v45  ;;  %v4010_v1 = vld [vmem:[%s22450_s1 + $0x170] sm:$0xff] }
 0x3a3   :  { %v12408_v12 = vld [vmem:[%s22449_s4 + $0x660] sm:$0xf0] }
 0x3a4   :  { %v14236_v16 = vld [vmem:[%s22449_s4 + $0x244] sm:$0xf]  ;;  %v12411_v4 = vor.u32 %v14364_v53, %v12408_v12  ;;  %7370 = vmatpush.bf16.msra.mxu0 %v11643_v62  ;;  %v4011_v62 = vld [vmem:[%s22450_s1 + $0x178] sm:$0xff] }
 0x3a5   :  { %v11896_v59 = vld [vmem:[%s22449_s4 + $0x260] sm:$0xf0] }
 0x3a6   :  { %v11899_v17 = vor.u32 %v14236_v16, %v11896_v59  ;;  %v14292_v18 = vld [vmem:[%s22449_s4 + $0x404] sm:$0xf]  ;;  %7457 = vmatpush.bf16.msra.mxu3 %v12411_v4  ;;  %v19025_v16 = vpack.c.bf16 %v4008_v29, %v4000_v48  ;;  %v4003_v59 = vld [vmem:[%s22450_s1 + $0x138] sm:$0xff]  ;;  %v3921_v48 = vpop.f32.mrf.mxu0 }
 0x3a7   :  { %7261 = vmatmul.bf16.gmra.mxu0 %v18915_v30  ;;  %v12120_v19 = vld [vmem:[%s22449_s4 + $0x420] sm:$0xf0]  ;;  %v3922_v29 = vadd.f32 %v3921_v48, %v18925_v51  ;;  %v4025_v48 = vld [vmem:[%s22450_s1 + $0x1e8] sm:$0xff] }
 0x3a8   :  { %v14164_v24 = vld [vmem:[%s22449_s4 + $0x4] sm:$0xf]  ;;  %v12123_v8 = vor.u32 %v14292_v18, %v12120_v19  ;;  %7399 = vmatpush.bf16.msra.mxu1 %v11899_v17  ;;  %v19033_v18 = vpack.c.bf16 %v4009_v55, %v4001_v14  ;;  %v19035_v19 = vpack.c.bf16 %v4010_v1, %v4002_v23 }
 0x3a9   :  { %v11608_v7 = vld [vmem:[%s22449_s4 + $0x20] sm:$0xf0] }
 0x3aa   :  { %v14356_v38 = vld [vmem:[%s22449_s4 + $0x604] sm:$0xf]  ;;  %v11611_v0 = vor.u32 %v14164_v24, %v11608_v7  ;;  %22512 = vst [vmem:[#allocation16_spill] sm:$0xff] %v19033_v18  ;;  %7429 = vmatpush.bf16.msra.mxu2 %v12123_v8  ;;  %v19037_v24 = vpack.c.bf16 %v4011_v62, %v4003_v59  ;;  %7295 = vmatmul.bf16.gmra.mxu1 %v19033_v18  ;;  %v3960_v62 = vpop.f32.mrf.mxu3 }
 0x3ab   :  { %v12376_v27 = vld [vmem:[%s22449_s4 + $0x620] sm:$0xf0]  ;;  %22513 = vst [vmem:[#allocation17_spill] sm:$0xff] %v19035_v19  ;;  %7324 = vmatmul.bf16.gmra.mxu2 %v19035_v19  ;;  %v9001_v19 = vrot.slane %v18782_v15, 2 }
 0x3ac   :  { %v12379_v45 = vor.u32 %v14356_v38, %v12376_v27  ;;  %v14228_v53 = vld [vmem:[%s22449_s4 + $0x204] sm:$0xf]  ;;  %22514 = vst [vmem:[#allocation18_spill] sm:$0xff] %v19037_v24  ;;  %7371 = vmatpush.bf16.msra.mxu0 %v11611_v0  ;;  %7353 = vmatmul.bf16.gmra.mxu3 %v19037_v24  ;;  %v3934_v38 = vpop.f32.mrf.mxu1 }
 0x3ad   :  { %v11864_v12 = vld [vmem:[%s22449_s4 + $0x220] sm:$0xf0]  ;;  %v3935_v0 = vadd.f32 %v3934_v38, %v3922_v29  ;;  %v4018_v29 = vld [vmem:[%s22450_s1 + $0x1b0] sm:$0xff] }
 0x3ae   :  { %v11867_v4 = vor.u32 %v14228_v53, %v11864_v12  ;;  %7458 = vmatpush.bf16.msra.mxu3 %v12379_v45  ;;  %v14604_v14 = vld [vmem:[%s22449_s4 + $0xdc4] sm:$0xf]  ;;  %v3947_v45 = vpop.f32.mrf.mxu2 }
 0x3af   :  { %v13368_v55 = vld [vmem:[%s22449_s4 + $0xde0] sm:$0xf0]  ;;  %v3948_v59 = vadd.f32 %v3947_v45, %v3935_v0  ;;  %v4027_v45 = vld [vmem:[%s22450_s1 + $0x1f8] sm:$0xff] }
 0x3b0   :  { %7400 = vmatpush.bf16.msra.mxu1 %v11867_v4  ;;  %v14476_v23 = vld [vmem:[%s22449_s4 + $0x9c4] sm:$0xf]  ;;  %v13371_v17 = vor.u32 %v14604_v14, %v13368_v55  ;;  %v4017_v4 = vld [vmem:[%s22450_s1 + $0x1a8] sm:$0xff]  ;;  %v4026_v14 = vld [vmem:[%s22450_s1 + $0x1f0] sm:$0xff] }
 0x3b1   :  { %v12856_v8 = vld [vmem:[%s22449_s4 + $0x9e0] sm:$0xf0]  ;;  %v4019_v55 = vld [vmem:[%s22450_s1 + $0x1b8] sm:$0xff]  ;;  %v3961_v0 = vadd.f32 %v3960_v62, %v3948_v59 }
 0x3b2   :  { %v14668_v51 = vld [vmem:[%s22449_s4 + $0xfc4] sm:$0xf]  ;;  %v12859_v27 = vor.u32 %v14476_v23, %v12856_v8  ;;  %7538 = vmatpush.bf16.msrb.mxu2 %v13371_v17 }
 0x3b3   :  { %v13624_v7 = vld [vmem:[%s22449_s4 + $0xfe0] sm:$0xf0]  ;;  %v9002_v59 = vrot.slane %v3961_v0, 1 }
 0x3b4   :  { %v13627_v1 = vor.u32 %v14668_v51, %v13624_v7  ;;  %v4016_v53 = vld [vmem:[%s22450_s1 + $0x1a0] sm:$0xff]  ;;  %7480 = vmatpush.bf16.msrb.mxu0 %v12859_v27  ;;  %v3923_v51 = vpop.f32.mrf.mxu0 }
 0x3b5   :  { %v4024_v12 = vld [vmem:[%s22450_s1 + $0x1e0] sm:$0xff]  ;;  %v9026_v15 = vsel %vm9025_vm5, %v9002_v59, %v9001_v19  ;;  %v9048_v0 = vsel %vm9017_vm2, %v9001_v19, %v9002_v59  ;;  %vm22516_vm5 = vcmask 1044483  }
 0x3b6   :  { %7567 = vmatpush.bf16.msrb.mxu3 %v13627_v1  ;;  %v14540_v23 = vld [vmem:[%s22449_s4 + $0xbc4] sm:$0xf]  ;;  %v19111_v62 = vpack.c.bf16 %v4024_v12, %v4016_v53  ;;  %v9066_v53 = vsel %vm9019_vm3, %v9001_v19, %v9002_v59 }
 0x3b7   :  { %7266 = vmatmul.bf16.gmra.mxu0 %v19025_v16  ;;  %v13112_v17 = vld [vmem:[%s22449_s4 + $0xbe0] sm:$0xf0] }
 0x3b8   :  { %v14596_v8 = vld [vmem:[%s22449_s4 + $0xd84] sm:$0xf]  ;;  %v13115_v7 = vor.u32 %v14540_v23, %v13112_v17 }
 0x3b9   :  { %v13336_v38 = vld [vmem:[%s22449_s4 + $0xda0] sm:$0xf0] }
 0x3ba   :  { %v14468_v27 = vld [vmem:[%s22449_s4 + $0x984] sm:$0xf]  ;;  %v13339_v24 = vor.u32 %v14596_v8, %v13336_v38  ;;  %7509 = vmatpush.bf16.msrb.mxu1 %v13115_v7  ;;  %v19113_v8 = vpack.c.bf16 %v4025_v48, %v4017_v4  ;;  %v19115_v38 = vpack.c.bf16 %v4026_v14, %v4018_v29  ;;  %v9037_v7 = vsel %vm9003_vm6, %v9001_v19, %v9002_v59  ;;  %v3949_v48 = vpop.f32.mrf.mxu2 }
 0x3bb   :  { %v12824_v1 = vld [vmem:[%s22449_s4 + $0x9a0] sm:$0xf0]  ;;  %v9039_v12 = vsel %vm9038_vm11, %v9037_v7, %v18367_v40  ;;  %v9050_v4 = vsel %vm9049_vm13, %v9048_v0, %v18370_v33  ;;  %v9074_v40 = vsel %vm9009_vm7, %v9001_v19, %v9002_v59  ;;  %v3962_v33 = vpop.f32.mrf.mxu3  ;;  %vm22517_vm6 = vcmask 1045508  }
 0x3bc   :  { %v12827_v51 = vor.u32 %v14468_v27, %v12824_v1  ;;  %v14660_v23 = vld [vmem:[%s22449_s4 + $0xf84] sm:$0xf]  ;;  %7539 = vmatpush.bf16.msrb.mxu2 %v13339_v24  ;;  %v19117_v27 = vpack.c.bf16 %v4027_v45, %v4019_v55  ;;  %v3936_v1 = vpop.f32.mrf.mxu1  ;;  %v9028_v24 = vsel %vm9027_vm9, %v18364_v3, %v9026_v15  ;;  %v19137_v14 = vsel %vm9051_vm0, %v17524_v36, %v9050_v4 }
 0x3bd   :  { %v13592_v17 = vld [vmem:[%s22449_s4 + $0xfa0] sm:$0xf0]  ;;  %v19133_v29 = vsel %vm9029_vm14, %v17516_v44, %v9028_v24  ;;  %v9075_v36 = vsel %vm9034_vm10, %v18391_v2, %v9074_v40  ;;  %v9082_v55 = vsel %vm9023_vm4, %v9001_v19, %v9002_v59  ;;  %7300 = vmatmul.bf16.gmra.mxu1 %v19113_v8  ;;  %v9012_v45 = vsel %vm9011_vm1, %v9001_v19, %v9002_v59 }
 0x3be   :  { %v13595_v18 = vor.u32 %v14660_v23, %v13592_v17  ;;  %7481 = vmatpush.bf16.msrb.mxu0 %v12827_v51  ;;  %22515 = vst [vmem:[#allocation19_spill] sm:$0xff] %v19117_v27  ;;  %v13080_v44 = vld [vmem:[%s22449_s4 + $0xba0] sm:$0xf0]  ;;  %v9083_v51 = vsel %vm22516_vm5, %v18394_v43, %v9082_v55  ;;  %7329 = vmatmul.bf16.gmra.mxu2 %v19115_v38  ;;  %vm9522_vm10 = vcmask 1047559  }
 0x3bf   :  { %v9014_v23 = vsel %vm22517_vm6, %v18415_v57, %v9012_v45  ;;  %v19164_v2 = vsel %vm9051_vm0, %v9083_v51, %v17555_v50  ;;  %7358 = vmatmul.bf16.gmra.mxu3 %v19117_v27  ;;  %v14588_v1 = vld [vmem:[%s22449_s4 + $0xd44] sm:$0xf]  ;;  %vm22520_vm0 = vcmask 1041408  }
 0x3c0   :  { %7568 = vmatpush.bf16.msrb.mxu3 %v13595_v18  ;;  %v9067_v18 = vsel %vm9021_vm8, %v18373_v26, %v9066_v53  ;;  %v14532_v26 = vld [vmem:[%s22449_s4 + $0xb84] sm:$0xf]  ;;  %vm22518_vm8 = vcmask 1042434   ;;  %v19201_v53 = vsel %vm9040_vm12, %v9075_v36, %v17551_v49 }
 0x3c1   :  { %v19141_v3 = vsel %vm9029_vm14, %v9067_v18, %v17528_v39  ;;  %v13083_v39 = vor.u32 %v14532_v26, %v13080_v44  ;;  %v9058_v17 = vsel %vm22518_vm8, %v9001_v19, %v9002_v59  ;;  %v13304_v43 = vld [vmem:[%s22449_s4 + $0xd60] sm:$0xf0]  ;;  %v19178_v19 = vsel %vm9015_vm15, %v17587_v60, %v9014_v23  ;;  %vm22580_vm9 = vmmov %vm22518_vm8 }
 0x3c2   :  { %v14460_v57 = vld [vmem:[%s22449_s4 + $0x944] sm:$0xf]  ;;  %22519 = vst [vmem:[#allocation20_spill] sm:$0xff] %v19178_v19  ;;  %v9059_v50 = vsel %vm22520_vm0, %v18418_v58, %v9058_v17  ;;  %v13307_v59 = vor.u32 %v14588_v1, %v13304_v43  ;;  %v19197_v58 = vsel %vm9040_vm12, %v17520_v35, %v9039_v12 }
 0x3c3   :  { %7510 = vmatpush.bf16.msrb.mxu1 %v13083_v39  ;;  %v12792_v15 = vld [vmem:[%s22449_s4 + $0x960] sm:$0xf0]  ;;  %v19193_v60 = vsel %vm9015_vm15, %v9059_v50, %v17591_v61  ;;  %v7141_v39 = vpop.f32.mrf.mxu0 }
 0x3c4   :  { %v14652_v7 = vld [vmem:[%s22449_s4 + $0xf44] sm:$0xf]  ;;  %v12795_v24 = vor.u32 %v14460_v57, %v12792_v15  ;;  %7540 = vmatpush.bf16.msrb.mxu2 %v13307_v59  ;;  %v7170_v45 = vpop.f32.mrf.mxu1 }
 0x3c5   :  { %v13560_v0 = vld [vmem:[%s22449_s4 + $0xf60] sm:$0xf0]  ;;  %v7171_v51 = vadd.f32 %v7170_v45, %v7141_v39 }
 0x3c6   :  { %v13563_v4 = vor.u32 %v14652_v7, %v13560_v0  ;;  %7482 = vmatpush.bf16.msrb.mxu0 %v12795_v24  ;;  %v14524_v18 = vld [vmem:[%s22449_s4 + $0xb44] sm:$0xf]  ;;  %v7199_v24 = vpop.f32.mrf.mxu2 }
 0x3c7   :  { %7271 = vmatmul.bf16.gmra.mxu0 %v19111_v62  ;;  %v13048_v61 = vld [vmem:[%s22449_s4 + $0xb60] sm:$0xf0] }
 0x3c8   :  { %7569 = vmatpush.bf16.msrb.mxu3 %v13563_v4  ;;  %v14580_v35 = vld [vmem:[%s22449_s4 + $0xd04] sm:$0xf]  ;;  %v13051_v12 = vor.u32 %v14524_v18, %v13048_v61 }
 0x3c9   :  { %v13272_v49 = vld [vmem:[%s22449_s4 + $0xd20] sm:$0xf0] }
 0x3ca   :  { %v14452_v48 = vld [vmem:[%s22449_s4 + $0x904] sm:$0xf]  ;;  %v13275_v33 = vor.u32 %v14580_v35, %v13272_v49  ;;  %7511 = vmatpush.bf16.msrb.mxu1 %v13051_v12  ;;  %v7200_v35 = vadd.f32 %v7199_v24, %v7171_v51  ;;  %v7228_v12 = vpop.f32.mrf.mxu3 }
 0x3cb   :  { %v12760_v40 = vld [vmem:[%s22449_s4 + $0x920] sm:$0xf0]  ;;  %v7143_v4 = vpop.f32.mrf.mxu0 }
 0x3cc   :  { %v12763_v26 = vor.u32 %v14452_v48, %v12760_v40  ;;  %v14644_v44 = vld [vmem:[%s22449_s4 + $0xf04] sm:$0xf]  ;;  %7541 = vmatpush.bf16.msrb.mxu2 %v13275_v33  ;;  %v7172_v49 = vpop.f32.mrf.mxu1  ;;  %v19255_v40 = vadd.f32 %v7228_v12, %v7200_v35 }
 0x3cd   :  { %v13528_v36 = vld [vmem:[%s22449_s4 + $0xf20] sm:$0xf0]  ;;  %7401 = vmatmul.bf16.vlgmr.msra.gmra.mxu1 %v18449_v20  ;;  %v7173_v48 = vadd.f32 %v7172_v49, %v7143_v4 }
 0x3ce   :  { %v13531_v55 = vor.u32 %v14644_v44, %v13528_v36  ;;  %7483 = vmatpush.bf16.msrb.mxu0 %v12763_v26  ;;  %v14516_v23 = vld [vmem:[%s22449_s4 + $0xb04] sm:$0xf]  ;;  %7430 = vmatmul.bf16.vlgmr.msra.gmra.mxu2 %v18457_v9 }
 0x3cf   :  { %v13016_v17 = vld [vmem:[%s22449_s4 + $0xb20] sm:$0xf0]  ;;  %7459 = vmatmul.bf16.vlgmr.msra.gmra.mxu3 %v18465_v25 }
 0x3d0   :  { %7570 = vmatpush.bf16.msrb.mxu3 %v13531_v55  ;;  %v13019_v1 = vor.u32 %v14516_v23, %v13016_v17  ;;  %v14572_v43 = vld [vmem:[%s22449_s4 + $0xcc4] sm:$0xf] }
 0x3d1   :  { %v13240_v57 = vld [vmem:[%s22449_s4 + $0xce0] sm:$0xf0] }
 0x3d2   :  { %7512 = vmatpush.bf16.msrb.mxu1 %v13019_v1  ;;  %v14444_v50 = vld [vmem:[%s22449_s4 + $0x8c4] sm:$0xf]  ;;  %v13243_v59 = vor.u32 %v14572_v43, %v13240_v57  ;;  %v7201_v57 = vpop.f32.mrf.mxu2 }
 0x3d3   :  { %v12728_v15 = vld [vmem:[%s22449_s4 + $0x8e0] sm:$0xf0] }
 0x3d4   :  { %v14636_v7 = vld [vmem:[%s22449_s4 + $0xec4] sm:$0xf]  ;;  %v12731_v18 = vor.u32 %v14444_v50, %v12728_v15  ;;  %7542 = vmatpush.bf16.msrb.mxu2 %v13243_v59  ;;  %v7146_v50 = vpop.f32.mrf.mxu0  ;;  %v7202_v59 = vadd.f32 %v7201_v57, %v7173_v48  ;;  %v7230_v15 = vpop.f32.mrf.mxu3 }
 0x3d5   :  { %v13496_v0 = vld [vmem:[%s22449_s4 + $0xee0] sm:$0xf0] }
 0x3d6   :  { %v13499_v61 = vor.u32 %v14636_v7, %v13496_v0  ;;  %7484 = vmatpush.bf16.msrb.mxu0 %v12731_v18  ;;  %v14508_v33 = vld [vmem:[%s22449_s4 + $0xac4] sm:$0xf]  ;;  %v7175_v7 = vpop.f32.mrf.mxu1  ;;  %v19281_v24 = vadd.f32 %v7230_v15, %v7202_v59 }
 0x3d7   :  { %7372 = vmatmul.bf16.vlgmr.msra.gmra.mxu0 %v18438_v13  ;;  %v12984_v26 = vld [vmem:[%s22449_s4 + $0xae0] sm:$0xf0]  ;;  %v7176_v0 = vadd.f32 %v7175_v7, %v7146_v50 }
 0x3d8   :  { %7571 = vmatpush.bf16.msrb.mxu3 %v13499_v61  ;;  %v14564_v44 = vld [vmem:[%s22449_s4 + $0xc84] sm:$0xf]  ;;  %v12987_v36 = vor.u32 %v14508_v33, %v12984_v26 }
 0x3d9   :  { %v13208_v55 = vld [vmem:[%s22449_s4 + $0xca0] sm:$0xf0] }
 0x3da   :  { %v14436_v39 = vld [vmem:[%s22449_s4 + $0x884] sm:$0xf]  ;;  %v13211_v51 = vor.u32 %v14564_v44, %v13208_v55  ;;  %7513 = vmatpush.bf16.msrb.mxu1 %v12987_v36  ;;  %v7204_v36 = vpop.f32.mrf.mxu2 }
 0x3db   :  { %v12696_v45 = vld [vmem:[%s22449_s4 + $0x8a0] sm:$0xf0] }
 0x3dc   :  { %v12699_v23 = vor.u32 %v14436_v39, %v12696_v45  ;;  %v14628_v17 = vld [vmem:[%s22449_s4 + $0xe84] sm:$0xf]  ;;  %7543 = vmatpush.bf16.msrb.mxu2 %v13211_v51  ;;  %v7148_v55 = vpop.f32.mrf.mxu0  ;;  %v7205_v51 = vadd.f32 %v7204_v36, %v7176_v0 }
 0x3dd   :  { %v13464_v1 = vld [vmem:[%s22449_s4 + $0xea0] sm:$0xf0]  ;;  %7406 = vmatmul.bf16.gmra.mxu1 %v18587_v42 }
 0x3de   :  { %v13467_v43 = vor.u32 %v14628_v17, %v13464_v1  ;;  %7485 = vmatpush.bf16.msrb.mxu0 %v12699_v23  ;;  %v14500_v4 = vld [vmem:[%s22449_s4 + $0xa84] sm:$0xf]  ;;  %7435 = vmatmul.bf16.gmra.mxu2 %v18595_v52  ;;  %v7233_v23 = vpop.f32.mrf.mxu3  ;;  %v7177_v17 = vpop.f32.mrf.mxu1 }
 0x3df   :  { %v12952_v18 = vld [vmem:[%s22449_s4 + $0xaa0] sm:$0xf0]  ;;  %7464 = vmatmul.bf16.gmra.mxu3 %v18603_v10  ;;  %v7178_v1 = vadd.f32 %v7177_v17, %v7148_v55  ;;  %v12350_v17 = vld [vmem:[%s22449_s4 + $0x5c8] sm:$0xf] }
 0x3e0   :  { %7572 = vmatpush.bf16.msrb.mxu3 %v13467_v43  ;;  %v12955_v61 = vor.u32 %v14500_v4, %v12952_v18  ;;  %v14556_v35 = vld [vmem:[%s22449_s4 + $0xc44] sm:$0xf]  ;;  %v19311_v43 = vadd.f32 %v7233_v23, %v7205_v51 }
 0x3e1   :  { %v13176_v12 = vld [vmem:[%s22449_s4 + $0xc60] sm:$0xf0] }
 0x3e2   :  { %7514 = vmatpush.bf16.msrb.mxu1 %v12955_v61  ;;  %v14428_v49 = vld [vmem:[%s22449_s4 + $0x844] sm:$0xf]  ;;  %v13179_v48 = vor.u32 %v14556_v35, %v13176_v12 }
 0x3e3   :  { %v12664_v33 = vld [vmem:[%s22449_s4 + $0x860] sm:$0xf0] }
 0x3e4   :  { %v14620_v26 = vld [vmem:[%s22449_s4 + $0xe44] sm:$0xf]  ;;  %v12667_v39 = vor.u32 %v14428_v49, %v12664_v33  ;;  %7544 = vmatpush.bf16.msrb.mxu2 %v13179_v48  ;;  %v7206_v48 = vpop.f32.mrf.mxu2 }
 0x3e5   :  { %v13432_v44 = vld [vmem:[%s22449_s4 + $0xe60] sm:$0xf0] }
 0x3e6   :  { %v13435_v45 = vor.u32 %v14620_v26, %v13432_v44  ;;  %7486 = vmatpush.bf16.msrb.mxu0 %v12667_v39  ;;  %v14492_v57 = vld [vmem:[%s22449_s4 + $0xa44] sm:$0xf]  ;;  %v7207_v26 = vadd.f32 %v7206_v48, %v7178_v1  ;;  %v7235_v44 = vpop.f32.mrf.mxu3  ;;  %v7180_v36 = vpop.f32.mrf.mxu1  ;;  %v14353_v1 = vld [vmem:[%s22449_s4 + $0x5e4] sm:$0xf0] }
 0x3e7   :  { %7377 = vmatmul.bf16.gmra.mxu0 %v18576_v31  ;;  %v12920_v50 = vld [vmem:[%s22449_s4 + $0xa60] sm:$0xf0] }
 0x3e8   :  { %7573 = vmatpush.bf16.msrb.mxu3 %v13435_v45  ;;  %v14548_v59 = vld [vmem:[%s22449_s4 + $0xc04] sm:$0xf]  ;;  %v12923_v15 = vor.u32 %v14492_v57, %v12920_v50  ;;  %v19343_v23 = vadd.f32 %v7235_v44, %v7207_v26  ;;  %v11838_v57 = vld [vmem:[%s22449_s4 + $0x1c8] sm:$0xf]  ;;  %v12351_v50 = vor.u32 %v14353_v1, %v12350_v17 }
 0x3e9   :  { %v13144_v7 = vld [vmem:[%s22449_s4 + $0xc20] sm:$0xf0]  ;;  %v14289_v1 = vld [vmem:[%s22449_s4 + $0x3e4] sm:$0xf0] }
 0x3ea   :  { %v14420_v0 = vld [vmem:[%s22449_s4 + $0x804] sm:$0xf]  ;;  %v13147_v18 = vor.u32 %v14548_v59, %v13144_v7  ;;  %7515 = vmatpush.bf16.msrb.mxu1 %v12923_v15  ;;  %v14225_v59 = vld [vmem:[%s22449_s4 + $0x1e4] sm:$0xf0] }
 0x3eb   :  { %v12632_v4 = vld [vmem:[%s22449_s4 + $0x820] sm:$0xf0]  ;;  %v12606_v15 = vld [vmem:[%s22449_s4 + $0x7c8] sm:$0xf] }
 0x3ec   :  { %v12635_v61 = vor.u32 %v14420_v0, %v12632_v4  ;;  %v14612_v35 = vld [vmem:[%s22449_s4 + $0xe04] sm:$0xf]  ;;  %7545 = vmatpush.bf16.msrb.mxu2 %v13147_v18  ;;  %v14417_v7 = vld [vmem:[%s22449_s4 + $0x7e4] sm:$0xf0]  ;;  %v7209_v0 = vpop.f32.mrf.mxu2  ;;  %v11839_v18 = vor.u32 %v14225_v59, %v11838_v57 }
 0x3ed   :  { %v13400_v12 = vld [vmem:[%s22449_s4 + $0xe20] sm:$0xf0]  ;;  %7411 = vmatmul.bf16.gmra.mxu1 %v18691_v11  ;;  %v12318_v57 = vld [vmem:[%s22449_s4 + $0x588] sm:$0xf] }
 0x3ee   :  { %v13403_v49 = vor.u32 %v14612_v35, %v13400_v12  ;;  %7487 = vmatpush.bf16.msrb.mxu0 %v12635_v61  ;;  %v14484_v55 = vld [vmem:[%s22449_s4 + $0xa04] sm:$0xf]  ;;  %7440 = vmatmul.bf16.gmra.mxu2 %v18693_v21  ;;  %v12607_v61 = vor.u32 %v14417_v7, %v12606_v15  ;;  %v7238_v12 = vpop.f32.mrf.mxu3  ;;  %v14345_v59 = vld [vmem:[%s22449_s4 + $0x5a4] sm:$0xf0] }
 0x3ef   :  { %v12888_v39 = vld [vmem:[%s22449_s4 + $0xa20] sm:$0xf0]  ;;  %7469 = vmatmul.bf16.gmra.mxu3 %v18695_v22  ;;  %v11806_v15 = vld [vmem:[%s22449_s4 + $0x188] sm:$0xf] }
 0x3f0   :  { %7574 = vmatpush.bf16.msrb.mxu3 %v13403_v49  ;;  %v12891_v51 = vor.u32 %v14484_v55, %v12888_v39  ;;  %v7182_v49 = vpop.f32.mrf.mxu1  ;;  %7654 = vmatpush.bf16.msra.mxu2 %v12351_v50  ;;  %v14217_v7 = vld [vmem:[%s22449_s4 + $0x1a4] sm:$0xf0] }
 0x3f2   :  { %7516 = vmatpush.bf16.msrb.mxu1 %v12891_v51  ;;  %7596 = vmatpush.bf16.msra.mxu0 %v11839_v18  ;;  %v12319_v18 = vor.u32 %v14345_v59, %v12318_v57  ;;  %v14337_v57 = vld [vmem:[%s22449_s4 + $0x564] sm:$0xf0] }
 0x3f3   :  { %v14209_v59 = vld [vmem:[%s22449_s4 + $0x164] sm:$0xf0] }
 0x3f4   :  { %v7151_v33 = vpop.f32.mrf.mxu0  ;;  %7683 = vmatpush.bf16.msra.mxu3 %v12607_v61  ;;  %v7211_v26 = vpop.f32.mrf.mxu2  ;;  %v11807_v61 = vor.u32 %v14217_v7, %v11806_v15  ;;  %7655 = vmatpush.bf16.msra.mxu2 %v12319_v18  ;;  %v12542_v18 = vld [vmem:[%s22449_s4 + $0x748] sm:$0xf] }
 0x3f5   :  { %v7181_v45 = vadd.f32 %v7180_v36, %v7151_v33 }
 0x3f6   :  { %v7240_v55 = vpop.f32.mrf.mxu3  ;;  %7597 = vmatpush.bf16.msra.mxu0 %v11807_v61  ;;  %v14401_v61 = vld [vmem:[%s22449_s4 + $0x764] sm:$0xf0] }
 0x3f7   :  { %7382 = vmatmul.bf16.gmra.mxu0 %v18683_v63  ;;  %v7210_v35 = vadd.f32 %v7209_v0, %v7181_v45  ;;  %v12094_v45 = vld [vmem:[%s22449_s4 + $0x3c8] sm:$0xf] }
 0x3f8   :  { %v7185_v39 = vpop.f32.mrf.mxu1  ;;  %v12095_v50 = vor.u32 %v14289_v1, %v12094_v45  ;;  %v14281_v45 = vld [vmem:[%s22449_s4 + $0x3a4] sm:$0xf0] }
 0x3f9   :  { %v19367_v33 = vadd.f32 %v7238_v12, %v7210_v35  ;;  %v12574_v35 = vld [vmem:[%s22449_s4 + $0x788] sm:$0xf] }
 0x3fa   :  { %v14409_v12 = vld [vmem:[%s22449_s4 + $0x7a4] sm:$0xf0]  ;;  %7625 = vmatpush.bf16.msra.mxu1 %v12095_v50 }
 0x3fb   :  { %v11774_v50 = vld [vmem:[%s22449_s4 + $0x148] sm:$0xf] }
 0x3fc   :  { %v7153_v4 = vpop.f32.mrf.mxu0  ;;  %v7214_v0 = vpop.f32.mrf.mxu2 }
 0x3fd   :  { %v7183_v48 = vadd.f32 %v7182_v49, %v7153_v4  ;;  %7416 = vmatmul.bf16.gmra.mxu1 %v18776_v47 }
 0x3fe   :  { %7445 = vmatmul.bf16.gmra.mxu2 %v18778_v34 }
 0x3ff   :  { %v7212_v36 = vadd.f32 %v7211_v26, %v7183_v48  ;;  %7474 = vmatmul.bf16.gmra.mxu3 %v18780_v37  ;;  %v7243_v48 = vpop.f32.mrf.mxu3 }
 0x400   :  { %v7187_v26 = vpop.f32.mrf.mxu1 }
 0x401   :  { %v19369_v17 = vadd.f32 %v7240_v55, %v7212_v36 }
 0x404   :  { %v7156_v44 = vpop.f32.mrf.mxu0  ;;  %v7216_v15 = vpop.f32.mrf.mxu2 }
 0x405   :  { %v7186_v51 = vadd.f32 %v7185_v39, %v7156_v44  ;;  %v12575_v44 = vor.u32 %v14409_v12, %v12574_v35  ;;  %v12062_v39 = vld [vmem:[%s22449_s4 + $0x388] sm:$0xf] }
 0x406   :  { %v12063_v1 = vor.u32 %v14281_v45, %v12062_v39  ;;  %v12254_v45 = vld [vmem:[%s22449_s4 + $0x508] sm:$0xf] }
 0x407   :  { %7387 = vmatmul.bf16.gmra.mxu0 %v18768_v5  ;;  %v7215_v49 = vadd.f32 %v7214_v0, %v7186_v51  ;;  %7684 = vmatpush.bf16.msra.mxu3 %v12575_v44  ;;  %v12286_v51 = vld [vmem:[%s22449_s4 + $0x548] sm:$0xf]  ;;  %v7245_v12 = vpop.f32.mrf.mxu3 }
 0x408   :  { %v12287_v0 = vor.u32 %v14337_v57, %v12286_v51  ;;  %7626 = vmatpush.bf16.msra.mxu1 %v12063_v1  ;;  %v14329_v1 = vld [vmem:[%s22449_s4 + $0x524] sm:$0xf0] }
 0x409   :  { %v19399_v55 = vadd.f32 %v7243_v48, %v7215_v49  ;;  %v7286_v48 = vpop.f32.mrf.mxu1  ;;  %v11742_v57 = vld [vmem:[%s22449_s4 + $0x108] sm:$0xf] }
 0x40a   :  { %7656 = vmatpush.bf16.msra.mxu2 %v12287_v0 }
 0x40c   :  { %v7158_v4 = vpop.f32.mrf.mxu0 }
 0x40d   :  { %v7188_v36 = vadd.f32 %v7187_v26, %v7158_v4  ;;  %v11775_v4 = vor.u32 %v14209_v59, %v11774_v50  ;;  %v12543_v26 = vor.u32 %v14401_v61, %v12542_v18  ;;  %7517 = vmatmul.bf16.vlgmr.msrb.gmra.mxu1 %v18862_v56  ;;  %v14201_v50 = vld [vmem:[%s22449_s4 + $0x124] sm:$0xf0]  ;;  %v7315_v59 = vpop.f32.mrf.mxu2 }
 0x40e   :  { %7546 = vmatmul.bf16.vlgmr.msrb.gmra.mxu2 %v18864_v32  ;;  %v11743_v0 = vor.u32 %v14201_v50, %v11742_v57  ;;  %v14393_v18 = vld [vmem:[%s22449_s4 + $0x724] sm:$0xf0] }
 0x40f   :  { %v7217_v35 = vadd.f32 %v7216_v15, %v7188_v36  ;;  %7598 = vmatpush.bf16.msra.mxu0 %v11775_v4  ;;  %7685 = vmatpush.bf16.msra.mxu3 %v12543_v26  ;;  %v14273_v36 = vld [vmem:[%s22449_s4 + $0x364] sm:$0xf0] }
 0x410   :  { %7575 = vmatmul.bf16.vlgmr.msrb.gmra.mxu3 %v18866_v41  ;;  %v12510_v4 = vld [vmem:[%s22449_s4 + $0x708] sm:$0xf] }
 0x411   :  { %v19426_v44 = vadd.f32 %v7245_v12, %v7217_v35  ;;  %v7344_v35 = vpop.f32.mrf.mxu3  ;;  %v14321_v50 = vld [vmem:[%s22449_s4 + $0x4e4] sm:$0xf0] }
 0x413   :  { %7599 = vmatpush.bf16.msra.mxu0 %v11743_v0 }
 0x414   :  { %v7257_v7 = vpop.f32.mrf.mxu0 }
 0x415   :  { %v7258_v49 = vadd.f32 %v7257_v7, %v19255_v40  ;;  %v12030_v40 = vld [vmem:[%s22449_s4 + $0x348] sm:$0xf]  ;;  %v12255_v7 = vor.u32 %v14329_v1, %v12254_v45  ;;  %v19461_v1 = vrot.slane %v19133_v29, 1 }
 0x416   :  { %v12031_v51 = vor.u32 %v14273_v36, %v12030_v40  ;;  %v9086_v40 = vperm.slane %v19178_v19, 0  ;;  %v11710_v29 = vld [vmem:[%s22449_s4 + $0xc8] sm:$0xf] }
 0x417   :  { %v7287_v39 = vadd.f32 %v7286_v48, %v7258_v49  ;;  %7488 = vmatmul.bf16.vlgmr.msrb.gmra.mxu0 %v18854_v28  ;;  %v7288_v49 = vpop.f32.mrf.mxu1  ;;  %v12511_v48 = vor.u32 %v14393_v18, %v12510_v4  ;;  %7657 = vmatpush.bf16.msra.mxu2 %v12255_v7  ;;  %v12478_v18 = vld [vmem:[%s22449_s4 + $0x6c8] sm:$0xf] }
 0x418   :  { %7627 = vmatpush.bf16.msra.mxu1 %v12031_v51  ;;  %v12222_v51 = vld [vmem:[%s22449_s4 + $0x4c8] sm:$0xf] }
 0x419   :  { %v7316_v61 = vadd.f32 %v7315_v59, %v7287_v39  ;;  %7686 = vmatpush.bf16.msra.mxu3 %v12511_v48  ;;  %v11998_v39 = vld [vmem:[%s22449_s4 + $0x308] sm:$0xf]  ;;  %v12223_v0 = vor.u32 %v14321_v50, %v12222_v51 }
 0x41a   :  { %v14193_v59 = vld [vmem:[%s22449_s4 + $0xe4] sm:$0xf0] }
 0x41b   :  { %v7345_v26 = vadd.f32 %v7344_v35, %v7316_v61  ;;  %v11711_v4 = vor.u32 %v14193_v59, %v11710_v29  ;;  %v14385_v61 = vld [vmem:[%s22449_s4 + $0x6e4] sm:$0xf0]  ;;  %7658 = vmatpush.bf16.msra.mxu2 %v12223_v0 }
 0x41c   :  { %v7259_v15 = vpop.f32.mrf.mxu0  ;;  %v12190_v50 = vld [vmem:[%s22449_s4 + $0x488] sm:$0xf] }
 0x41d   :  { %v7260_v12 = vadd.f32 %v7259_v15, %v19281_v24  ;;  %v19458_v45 = vadd.f32 %v9086_v40, %v7345_v26  ;;  %v14265_v24 = vld [vmem:[%s22449_s4 + $0x324] sm:$0xf0]  ;;  %v7317_v15 = vpop.f32.mrf.mxu2  ;;  %v12479_v26 = vor.u32 %v14385_v61, %v12478_v18  ;;  %7600 = vmatpush.bf16.msra.mxu0 %v11711_v4  ;;  %7522 = vmatmul.bf16.gmra.mxu1 %v18923_v46 }
 0x41e   :  { %v11999_v57 = vor.u32 %v14265_v24, %v11998_v39  ;;  %v9094_v39 = vperm.slane %v19461_v1, 0  ;;  %7551 = vmatmul.bf16.gmra.mxu2 %v18927_v6  ;;  %v11678_v59 = vld [vmem:[%s22449_s4 + $0x88] sm:$0xf] }
 0x41f   :  { %v7289_v36 = vadd.f32 %v7288_v49, %v7260_v12  ;;  %v7346_v12 = vpop.f32.mrf.mxu3  ;;  %v7291_v48 = vpop.f32.mrf.mxu1  ;;  %7687 = vmatpush.bf16.msra.mxu3 %v12479_v26  ;;  %v12446_v61 = vld [vmem:[%s22449_s4 + $0x688] sm:$0xf]  ;;  %14676 = vtanh.f32 %v19458_v45  ;;  %v14317_v45 = vld [vmem:[%s22449_s4 + $0x4cc] sm:$0xf] }
 0x420   :  { %7628 = vmatpush.bf16.msra.mxu1 %v11999_v57  ;;  %7580 = vmatmul.bf16.gmra.mxu3 %v18929_v54  ;;  %v14257_v57 = vld [vmem:[%s22449_s4 + $0x2e4] sm:$0xf0] }
 0x421   :  { %v7318_v35 = vadd.f32 %v7317_v15, %v7289_v36  ;;  %v11966_v36 = vld [vmem:[%s22449_s4 + $0x2c8] sm:$0xf] }
 0x422   :  { %v11967_v29 = vor.u32 %v14257_v57, %v11966_v36  ;;  %v14185_v15 = vld [vmem:[%s22449_s4 + $0xa4] sm:$0xf0] }
 0x423   :  { %v7347_v40 = vadd.f32 %v7346_v12, %v7318_v35  ;;  %v11679_v18 = vor.u32 %v14185_v15, %v11678_v59  ;;  %v14377_v35 = vld [vmem:[%s22449_s4 + $0x6a4] sm:$0xf0] }
 0x424   :  { %v7262_v7 = vpop.f32.mrf.mxu0  ;;  %7629 = vmatpush.bf16.msra.mxu1 %v11967_v29  ;;  %v12158_v29 = vld [vmem:[%s22449_s4 + $0x448] sm:$0xf] }
 0x425   :  { %v7263_v49 = vadd.f32 %v7262_v7, %v19311_v43  ;;  %v19491_v51 = vadd.f32 %v9094_v39, %v7347_v40  ;;  %v19495_v43 = vrot.slane %v19197_v58, 2  ;;  %v14313_v58 = vld [vmem:[%s22449_s4 + $0x4a4] sm:$0xf0]  ;;  %v7320_v7 = vpop.f32.mrf.mxu2  ;;  %v12447_v40 = vor.u32 %v14377_v35, %v12446_v61  ;;  %7601 = vmatpush.bf16.msra.mxu0 %v11679_v18 }
 0x426   :  { %v12191_v4 = vor.u32 %v14313_v58, %v12190_v50  ;;  %v19527_v58 = vrot.slane %v19137_v14, 3  ;;  %v14305_v15 = vld [vmem:[%s22449_s4 + $0x464] sm:$0xf0] }
 0x427   :  { %v7292_v24 = vadd.f32 %v7291_v48, %v7263_v49  ;;  %7493 = vmatmul.bf16.gmra.mxu0 %v18915_v30  ;;  %v7349_v49 = vpop.f32.mrf.mxu3  ;;  %v7293_v26 = vpop.f32.mrf.mxu1  ;;  %v9102_v36 = vperm.slane %v19495_v43, 0  ;;  %7688 = vmatpush.bf16.msra.mxu3 %v12447_v40  ;;  %v11646_v14 = vld [vmem:[%s22449_s4 + $0x48] sm:$0xf]  ;;  %v12159_v18 = vor.u32 %v14305_v15, %v12158_v29  ;;  %v19564_v15 = vrot.slane %v19193_v60, 4 }
 0x428   :  { %7659 = vmatpush.bf16.msra.mxu2 %v12191_v4  ;;  %v12414_v35 = vld [vmem:[%s22449_s4 + $0x648] sm:$0xf]  ;;  %v9110_v29 = vperm.slane %v19527_v58, 0 }
 0x429   :  { %v7321_v12 = vadd.f32 %v7320_v7, %v7292_v24  ;;  %v11934_v24 = vld [vmem:[%s22449_s4 + $0x288] sm:$0xf] }
 0x42a   :  { %v14177_v7 = vld [vmem:[%s22449_s4 + $0x64] sm:$0xf0] }
 0x42b   :  { %v7350_v39 = vadd.f32 %v7349_v49, %v7321_v12  ;;  %v11647_v61 = vor.u32 %v14177_v7, %v11646_v14  ;;  %v14369_v12 = vld [vmem:[%s22449_s4 + $0x664] sm:$0xf0]  ;;  %v22522_v7 = vld [vmem:[#allocation17_spill] sm:$0xff] }
 0x42c   :  { %v7264_v0 = vpop.f32.mrf.mxu0  ;;  %7660 = vmatpush.bf16.msra.mxu2 %v12159_v18  ;;  %v14297_v18 = vld [vmem:[%s22449_s4 + $0x424] sm:$0xf0] }
 0x42d   :  { %v7265_v48 = vadd.f32 %v7264_v0, %v19343_v23  ;;  %v19524_v50 = vadd.f32 %v9102_v36, %v7350_v39  ;;  %v14249_v23 = vld [vmem:[%s22449_s4 + $0x2a4] sm:$0xf0]  ;;  %v7322_v0 = vpop.f32.mrf.mxu2  ;;  %v12415_v39 = vor.u32 %v14369_v12, %v12414_v35  ;;  %7602 = vmatpush.bf16.msra.mxu0 %v11647_v61 }
 0x42e   :  { %v11935_v59 = vor.u32 %v14249_v23, %v11934_v24  ;;  %v11902_v36 = vld [vmem:[%s22449_s4 + $0x248] sm:$0xf]  ;;  %7556 = vmatmul.bf16.gmra.mxu2 %v22522_v7 }
 0x42f   :  { %v7294_v57 = vadd.f32 %v7293_v26, %v7265_v48  ;;  %v7351_v48 = vpop.f32.mrf.mxu3  ;;  %v7296_v40 = vpop.f32.mrf.mxu1  ;;  %v14241_v24 = vld [vmem:[%s22449_s4 + $0x264] sm:$0xf0]  ;;  %7689 = vmatpush.bf16.msra.mxu3 %v12415_v39 }
 0x430   :  { %7630 = vmatpush.bf16.msra.mxu1 %v11935_v59  ;;  %v22521_v59 = vld [vmem:[#allocation16_spill] sm:$0xff]  ;;  %v11614_v60 = vld [vmem:[%s22449_s4 + $0x8] sm:$0xf] }
 0x431   :  { %v7323_v49 = vadd.f32 %v7322_v0, %v7294_v57  ;;  %7527 = vmatmul.bf16.gmra.mxu1 %v22521_v59  ;;  %v22523_v0 = vld [vmem:[#allocation18_spill] sm:$0xff]  ;;  %v14169_v35 = vld [vmem:[%s22449_s4 + $0x24] sm:$0xf0] }
 0x432   :  { %7585 = vmatmul.bf16.gmra.mxu3 %v22523_v0  ;;  %v12382_v12 = vld [vmem:[%s22449_s4 + $0x608] sm:$0xf] }
 0x433   :  { %v7352_v23 = vadd.f32 %v7351_v48, %v7323_v49  ;;  %v14361_v49 = vld [vmem:[%s22449_s4 + $0x624] sm:$0xf0] }
 0x434   :  { %v7267_v4 = vpop.f32.mrf.mxu0  ;;  %v12383_v39 = vor.u32 %v14361_v49, %v12382_v12  ;;  %v19599_v49 = vrot.slane %v19141_v3, 5  ;;  %v13630_v3 = vld [vmem:[%s22449_s4 + $0xfc8] sm:$0xf] }
 0x435   :  { %v7268_v26 = vadd.f32 %v7267_v4, %v19367_v33  ;;  %v11903_v33 = vor.u32 %v14241_v24, %v11902_v36  ;;  %v19566_v14 = vadd.f32 %v9110_v29, %v7352_v23  ;;  %v12126_v4 = vld [vmem:[%s22449_s4 + $0x408] sm:$0xf]  ;;  %v7325_v48 = vpop.f32.mrf.mxu2 }
 0x436   :  { %v12127_v61 = vor.u32 %v14297_v18, %v12126_v4  ;;  %v11870_v36 = vld [vmem:[%s22449_s4 + $0x208] sm:$0xf]  ;;  %7690 = vmatpush.bf16.msra.mxu3 %v12383_v39 }
 0x437   :  { %v7297_v57 = vadd.f32 %v7296_v40, %v7268_v26  ;;  %7498 = vmatmul.bf16.gmra.mxu0 %v19025_v16  ;;  %7631 = vmatpush.bf16.msra.mxu1 %v11903_v33  ;;  %v11615_v40 = vor.u32 %v14169_v35, %v11614_v60  ;;  %v14233_v24 = vld [vmem:[%s22449_s4 + $0x224] sm:$0xf0]  ;;  %v7354_v29 = vpop.f32.mrf.mxu3  ;;  %v7298_v4 = vpop.f32.mrf.mxu1  ;;  %v9118_v60 = vperm.slane %v19564_v15, 0 }
 0x438   :  { %7661 = vmatpush.bf16.msra.mxu2 %v12127_v61  ;;  %v11871_v18 = vor.u32 %v14233_v24, %v11870_v36  ;;  %v12862_v61 = vld [vmem:[%s22449_s4 + $0x9c8] sm:$0xf] }
 0x439   :  { %v7326_v23 = vadd.f32 %v7325_v48, %v7297_v57  ;;  %7603 = vmatpush.bf16.msra.mxu0 %v11615_v40  ;;  %v13374_v57 = vld [vmem:[%s22449_s4 + $0xdc8] sm:$0xf] }
 0x43b   :  { %v7355_v0 = vadd.f32 %v7354_v29, %v7326_v23  ;;  %7632 = vmatpush.bf16.msra.mxu1 %v11871_v18  ;;  %v13118_v23 = vld [vmem:[%s22449_s4 + $0xbc8] sm:$0xf] }
 0x43c   :  { %v7269_v26 = vpop.f32.mrf.mxu0  ;;  %v14545_v29 = vld [vmem:[%s22449_s4 + $0xbe4] sm:$0xf0] }
 0x43d   :  { %v7270_v33 = vadd.f32 %v7269_v26, %v19369_v17  ;;  %v19596_v12 = vadd.f32 %v9118_v60, %v7355_v0  ;;  %v14609_v17 = vld [vmem:[%s22449_s4 + $0xde4] sm:$0xf0]  ;;  %v7327_v40 = vpop.f32.mrf.mxu2 }
 0x43e   :  { %v13375_v48 = vor.u32 %v14609_v17, %v13374_v57  ;;  %v14481_v0 = vld [vmem:[%s22449_s4 + $0x9e4] sm:$0xf0]  ;;  %v13119_v17 = vor.u32 %v14545_v29, %v13118_v23  ;;  %7561 = vmatmul.bf16.gmra.mxu2 %v19115_v38 }
 0x43f   :  { %v7299_v35 = vadd.f32 %v7298_v4, %v7270_v33  ;;  %v14673_v26 = vld [vmem:[%s22449_s4 + $0xfe4] sm:$0xf0]  ;;  %v12863_v36 = vor.u32 %v14481_v0, %v12862_v61  ;;  %v7356_v18 = vpop.f32.mrf.mxu3  ;;  %v7301_v57 = vpop.f32.mrf.mxu1 }
 0x440   :  { %v13631_v24 = vor.u32 %v14673_v26, %v13630_v3  ;;  %v13342_v33 = vld [vmem:[%s22449_s4 + $0xd88] sm:$0xf]  ;;  %7770 = vmatpush.bf16.msrb.mxu2 %v13375_v48  ;;  %7741 = vmatpush.bf16.msrb.mxu1 %v13119_v17 }
 0x441   :  { %v7328_v4 = vadd.f32 %v7327_v40, %v7299_v35  ;;  %v14601_v61 = vld [vmem:[%s22449_s4 + $0xda4] sm:$0xf0]  ;;  %7712 = vmatpush.bf16.msrb.mxu0 %v12863_v36  ;;  %7532 = vmatmul.bf16.gmra.mxu1 %v19113_v8 }
 0x442   :  { %v12830_v0 = vld [vmem:[%s22449_s4 + $0x988] sm:$0xf]  ;;  %7799 = vmatpush.bf16.msrb.mxu3 %v13631_v24  ;;  %v13343_v35 = vor.u32 %v14601_v61, %v13342_v33 }
 0x443   :  { %v14473_v3 = vld [vmem:[%s22449_s4 + $0x9a4] sm:$0xf0]  ;;  %v7357_v40 = vadd.f32 %v7356_v18, %v7328_v4  ;;  %v19657_v4 = vrot.slane %v19201_v53, 6  ;;  %7590 = vmatmul.bf16.gmra.mxu3 %v19117_v27 }
 0x444   :  { %v7272_v39 = vpop.f32.mrf.mxu0  ;;  %v12831_v26 = vor.u32 %v14473_v3, %v12830_v0  ;;  %v14665_v48 = vld [vmem:[%s22449_s4 + $0xfa4] sm:$0xf0]  ;;  %7771 = vmatpush.bf16.msrb.mxu2 %v13343_v35 }
 0x445   :  { %v7273_v60 = vadd.f32 %v7272_v39, %v19399_v55  ;;  %v13598_v55 = vld [vmem:[%s22449_s4 + $0xf88] sm:$0xf]  ;;  %v9126_v39 = vperm.slane %v19599_v49, 0  ;;  %v7330_v35 = vpop.f32.mrf.mxu2 }
 0x446   :  { %v13599_v29 = vor.u32 %v14665_v48, %v13598_v55  ;;  %v13086_v36 = vld [vmem:[%s22449_s4 + $0xb88] sm:$0xf]  ;;  %7713 = vmatpush.bf16.msrb.mxu0 %v12831_v26 }
 0x447   :  { %v7302_v23 = vadd.f32 %v7301_v57, %v7273_v60  ;;  %7503 = vmatmul.bf16.gmra.mxu0 %v19111_v62  ;;  %v14537_v24 = vld [vmem:[%s22449_s4 + $0xba4] sm:$0xf0]  ;;  %v19653_v61 = vadd.f32 %v9126_v39, %v7357_v40  ;;  %v7359_v39 = vpop.f32.mrf.mxu3 }
 0x448   :  { %v13087_v33 = vor.u32 %v14537_v24, %v13086_v36  ;;  %v13310_v18 = vld [vmem:[%s22449_s4 + $0xd48] sm:$0xf]  ;;  %7800 = vmatpush.bf16.msrb.mxu3 %v13599_v29  ;;  %v7303_v36 = vpop.f32.mrf.mxu1  ;;  %v9134_v24 = vperm.slane %v19657_v4, 0 }
 0x449   :  { %v14593_v60 = vld [vmem:[%s22449_s4 + $0xd64] sm:$0xf0]  ;;  %v7331_v26 = vadd.f32 %v7330_v35, %v7302_v23 }
 0x44a   :  { %v12798_v57 = vld [vmem:[%s22449_s4 + $0x948] sm:$0xf]  ;;  %v13311_v17 = vor.u32 %v14593_v60, %v13310_v18  ;;  %7742 = vmatpush.bf16.msrb.mxu1 %v13087_v33 }
 0x44b   :  { %v14465_v53 = vld [vmem:[%s22449_s4 + $0x964] sm:$0xf0]  ;;  %v7360_v18 = vadd.f32 %v7359_v39, %v7331_v26 }
 0x44c   :  { %v13566_v0 = vld [vmem:[%s22449_s4 + $0xf48] sm:$0xf]  ;;  %v7274_v55 = vpop.f32.mrf.mxu0  ;;  %v12799_v48 = vor.u32 %v14465_v53, %v12798_v57  ;;  %7772 = vmatpush.bf16.msrb.mxu2 %v13311_v17 }
 0x44d   :  { %v14657_v3 = vld [vmem:[%s22449_s4 + $0xf64] sm:$0xf0]  ;;  %v7275_v29 = vadd.f32 %v7274_v55, %v19426_v44  ;;  %v7332_v26 = vpop.f32.mrf.mxu2 }
 0x44e   :  { %v13567_v40 = vor.u32 %v14657_v3, %v13566_v0  ;;  %7714 = vmatpush.bf16.msrb.mxu0 %v12799_v48  ;;  %v13054_v27 = vld [vmem:[%s22449_s4 + $0xb48] sm:$0xf]  ;;  %v19698_v0 = vadd.f32 %v9134_v24, %v7360_v18  ;;  %7662 = vmatmul.bf16.vlgmr.msra.gmra.mxu2 %v18457_v9 }
 0x44f   :  { %v7304_v60 = vadd.f32 %v7303_v36, %v7275_v29  ;;  %v14529_v33 = vld [vmem:[%s22449_s4 + $0xb64] sm:$0xf0]  ;;  %v7361_v36 = vpop.f32.mrf.mxu3 }
 0x450   :  { %7801 = vmatpush.bf16.msrb.mxu3 %v13567_v40  ;;  %v13278_v44 = vld [vmem:[%s22449_s4 + $0xd08] sm:$0xf]  ;;  %v13055_v23 = vor.u32 %v14529_v33, %v13054_v27  ;;  %v19707_v40 = vrot.slane %v19164_v2, 7  ;;  %v7402_v24 = vpop.f32.mrf.mxu1 }
 0x451   :  { %v14585_v57 = vld [vmem:[%s22449_s4 + $0xd24] sm:$0xf0]  ;;  %v7333_v29 = vadd.f32 %v7332_v26, %v7304_v60  ;;  %7633 = vmatmul.bf16.vlgmr.msra.gmra.mxu1 %v18449_v20 }
 0x452   :  { %v12766_v17 = vld [vmem:[%s22449_s4 + $0x908] sm:$0xf]  ;;  %v13279_v3 = vor.u32 %v14585_v57, %v13278_v44  ;;  %7743 = vmatpush.bf16.msrb.mxu1 %v13055_v23  ;;  %v9142_v44 = vperm.slane %v19707_v40, 0 }
 0x453   :  { %v14457_v53 = vld [vmem:[%s22449_s4 + $0x924] sm:$0xf0]  ;;  %v7362_v33 = vadd.f32 %v7361_v36, %v7333_v29  ;;  %7691 = vmatmul.bf16.vlgmr.msra.gmra.mxu3 %v18465_v25 }
 0x454   :  { %v12767_v35 = vor.u32 %v14457_v53, %v12766_v17  ;;  %v13534_v27 = vld [vmem:[%s22449_s4 + $0xf08] sm:$0xf]  ;;  %7773 = vmatpush.bf16.msrb.mxu2 %v13279_v3  ;;  %v7373_v39 = vpop.f32.mrf.mxu0 }
 0x455   :  { %v14649_v55 = vld [vmem:[%s22449_s4 + $0xf24] sm:$0xf0]  ;;  %v7403_v18 = vadd.f32 %v7402_v24, %v7373_v39  ;;  %v19718_v60 = vadd.f32 %v9142_v44, %v7362_v33  ;;  %v7431_v26 = vpop.f32.mrf.mxu2 }
 0x456   :  { %v13535_v48 = vor.u32 %v14649_v55, %v13534_v27  ;;  %7715 = vmatpush.bf16.msrb.mxu0 %v12767_v35  ;;  %v13022_v23 = vld [vmem:[%s22449_s4 + $0xb08] sm:$0xf] }
 0x457   :  { %7604 = vmatmul.bf16.vlgmr.msra.gmra.mxu0 %v18438_v13  ;;  %v14521_v2 = vld [vmem:[%s22449_s4 + $0xb24] sm:$0xf0]  ;;  %v7432_v24 = vadd.f32 %v7431_v26, %v7403_v18  ;;  %v7460_v33 = vpop.f32.mrf.mxu3 }
 0x458   :  { %7802 = vmatpush.bf16.msrb.mxu3 %v13535_v48  ;;  %v13023_v57 = vor.u32 %v14521_v2, %v13022_v23  ;;  %v13246_v17 = vld [vmem:[%s22449_s4 + $0xcc8] sm:$0xf]  ;;  %v7404_v44 = vpop.f32.mrf.mxu1 }
 0x459   :  { %v14577_v53 = vld [vmem:[%s22449_s4 + $0xce4] sm:$0xf0]  ;;  %v19740_v2 = vadd.f32 %v7460_v33, %v7432_v24 }
 0x45a   :  { %7744 = vmatpush.bf16.msrb.mxu1 %v13023_v57  ;;  %v12734_v3 = vld [vmem:[%s22449_s4 + $0x8c8] sm:$0xf]  ;;  %v13247_v35 = vor.u32 %v14577_v53, %v13246_v17 }
 0x45b   :  { %v14449_v27 = vld [vmem:[%s22449_s4 + $0x8e4] sm:$0xf0] }
 0x45c   :  { %v13502_v55 = vld [vmem:[%s22449_s4 + $0xec8] sm:$0xf]  ;;  %v7375_v39 = vpop.f32.mrf.mxu0  ;;  %v12735_v29 = vor.u32 %v14449_v27, %v12734_v3  ;;  %7774 = vmatpush.bf16.msrb.mxu2 %v13247_v35 }
 0x45d   :  { %v14641_v48 = vld [vmem:[%s22449_s4 + $0xee4] sm:$0xf0]  ;;  %v7405_v23 = vadd.f32 %v7404_v44, %v7375_v39 }
 0x45e   :  { %v13503_v36 = vor.u32 %v14641_v48, %v13502_v55  ;;  %7716 = vmatpush.bf16.msrb.mxu0 %v12735_v29  ;;  %v12990_v57 = vld [vmem:[%s22449_s4 + $0xac8] sm:$0xf]  ;;  %7667 = vmatmul.bf16.gmra.mxu2 %v18595_v52 }
 0x45f   :  { %v14513_v17 = vld [vmem:[%s22449_s4 + $0xae4] sm:$0xf0]  ;;  %v7462_v44 = vpop.f32.mrf.mxu3 }
 0x460   :  { %7803 = vmatpush.bf16.msrb.mxu3 %v13503_v36  ;;  %v13214_v18 = vld [vmem:[%s22449_s4 + $0xc88] sm:$0xf]  ;;  %v12991_v53 = vor.u32 %v14513_v17, %v12990_v57  ;;  %v7433_v36 = vpop.f32.mrf.mxu2  ;;  %v7407_v57 = vpop.f32.mrf.mxu1 }
 0x461   :  { %v14569_v3 = vld [vmem:[%s22449_s4 + $0xca4] sm:$0xf0]  ;;  %v7434_v33 = vadd.f32 %v7433_v36, %v7405_v23  ;;  %7638 = vmatmul.bf16.gmra.mxu1 %v18587_v42 }
 0x462   :  { %v12702_v35 = vld [vmem:[%s22449_s4 + $0x888] sm:$0xf]  ;;  %v13215_v55 = vor.u32 %v14569_v3, %v13214_v18  ;;  %7745 = vmatpush.bf16.msrb.mxu1 %v12991_v53 }
 0x463   :  { %v14441_v27 = vld [vmem:[%s22449_s4 + $0x8a4] sm:$0xf0]  ;;  %v19766_v18 = vadd.f32 %v7462_v44, %v7434_v33  ;;  %7696 = vmatmul.bf16.gmra.mxu3 %v18603_v10 }
 0x464   :  { %v12703_v48 = vor.u32 %v14441_v27, %v12702_v35  ;;  %v13470_v26 = vld [vmem:[%s22449_s4 + $0xe88] sm:$0xf]  ;;  %7775 = vmatpush.bf16.msrb.mxu2 %v13215_v55  ;;  %v7378_v24 = vpop.f32.mrf.mxu0 }
 0x465   :  { %v14633_v39 = vld [vmem:[%s22449_s4 + $0xea4] sm:$0xf0]  ;;  %v7408_v17 = vadd.f32 %v7407_v57, %v7378_v24 }
 0x466   :  { %v13471_v29 = vor.u32 %v14633_v39, %v13470_v26  ;;  %7717 = vmatpush.bf16.msrb.mxu0 %v12703_v48  ;;  %v12958_v3 = vld [vmem:[%s22449_s4 + $0xa88] sm:$0xf] }
 0x467   :  { %7609 = vmatmul.bf16.gmra.mxu0 %v18576_v31  ;;  %v14505_v53 = vld [vmem:[%s22449_s4 + $0xaa4] sm:$0xf0] }
 0x468   :  { %7804 = vmatpush.bf16.msrb.mxu3 %v13471_v29  ;;  %v12959_v35 = vor.u32 %v14505_v53, %v12958_v3  ;;  %v13182_v23 = vld [vmem:[%s22449_s4 + $0xc48] sm:$0xf]  ;;  %v7436_v36 = vpop.f32.mrf.mxu2  ;;  %v7465_v3 = vpop.f32.mrf.mxu3 }
 0x469   :  { %v14561_v27 = vld [vmem:[%s22449_s4 + $0xc64] sm:$0xf0]  ;;  %v7437_v57 = vadd.f32 %v7436_v36, %v7408_v17  ;;  %v7409_v53 = vpop.f32.mrf.mxu1 }
 0x46a   :  { %7746 = vmatpush.bf16.msrb.mxu1 %v12959_v35  ;;  %v12670_v55 = vld [vmem:[%s22449_s4 + $0x848] sm:$0xf]  ;;  %v13183_v48 = vor.u32 %v14561_v27, %v13182_v23 }
 0x46b   :  { %v14433_v26 = vld [vmem:[%s22449_s4 + $0x864] sm:$0xf0]  ;;  %v19796_v23 = vadd.f32 %v7465_v3, %v7437_v57 }
 0x46c   :  { %v13438_v39 = vld [vmem:[%s22449_s4 + $0xe48] sm:$0xf]  ;;  %v7380_v24 = vpop.f32.mrf.mxu0  ;;  %v12671_v33 = vor.u32 %v14433_v26, %v12670_v55  ;;  %7776 = vmatpush.bf16.msrb.mxu2 %v13183_v48 }
 0x46d   :  { %v14625_v29 = vld [vmem:[%s22449_s4 + $0xe64] sm:$0xf0]  ;;  %v7410_v35 = vadd.f32 %v7409_v53, %v7380_v24 }
 0x46e   :  { %v13439_v44 = vor.u32 %v14625_v29, %v13438_v39  ;;  %7718 = vmatpush.bf16.msrb.mxu0 %v12671_v33  ;;  %v12926_v27 = vld [vmem:[%s22449_s4 + $0xa48] sm:$0xf]  ;;  %7672 = vmatmul.bf16.gmra.mxu2 %v18693_v21 }
 0x46f   :  { %v14497_v10 = vld [vmem:[%s22449_s4 + $0xa64] sm:$0xf0] }
 0x470   :  { %7805 = vmatpush.bf16.msrb.mxu3 %v13439_v44  ;;  %v13150_v17 = vld [vmem:[%s22449_s4 + $0xc08] sm:$0xf]  ;;  %v12927_v55 = vor.u32 %v14497_v10, %v12926_v27  ;;  %v7438_v44 = vpop.f32.mrf.mxu2  ;;  %v7467_v53 = vpop.f32.mrf.mxu3 }
 0x471   :  { %v14553_v48 = vld [vmem:[%s22449_s4 + $0xc24] sm:$0xf0]  ;;  %v7439_v3 = vadd.f32 %v7438_v44, %v7410_v35  ;;  %v7412_v27 = vpop.f32.mrf.mxu1  ;;  %7643 = vmatmul.bf16.gmra.mxu1 %v18691_v11  ;;  %v14349_v35 = vld [vmem:[%s22449_s4 + $0x5cc] sm:$0xf] }
 0x472   :  { %v12638_v26 = vld [vmem:[%s22449_s4 + $0x808] sm:$0xf]  ;;  %v13151_v29 = vor.u32 %v14553_v48, %v13150_v17  ;;  %7747 = vmatpush.bf16.msrb.mxu1 %v12927_v55  ;;  %v12608_v44 = vld [vmem:[%s22449_s4 + $0x7e8] sm:$0xf0] }
 0x473   :  { %v14425_v39 = vld [vmem:[%s22449_s4 + $0x824] sm:$0xf0]  ;;  %v19822_v48 = vadd.f32 %v7467_v53, %v7439_v3  ;;  %7701 = vmatmul.bf16.gmra.mxu3 %v18695_v22 }
 0x474   :  { %v12639_v36 = vor.u32 %v14425_v39, %v12638_v26  ;;  %v13406_v24 = vld [vmem:[%s22449_s4 + $0xe08] sm:$0xf]  ;;  %7777 = vmatpush.bf16.msrb.mxu2 %v13151_v29  ;;  %v7383_v57 = vpop.f32.mrf.mxu0  ;;  %v12352_v29 = vld [vmem:[%s22449_s4 + $0x5e8] sm:$0xf0] }
 0x475   :  { %v14617_v10 = vld [vmem:[%s22449_s4 + $0xe24] sm:$0xf0]  ;;  %v7413_v17 = vadd.f32 %v7412_v27, %v7383_v57 }
 0x476   :  { %v13407_v33 = vor.u32 %v14617_v10, %v13406_v24  ;;  %7719 = vmatpush.bf16.msrb.mxu0 %v12639_v36  ;;  %v12894_v26 = vld [vmem:[%s22449_s4 + $0xa08] sm:$0xf]  ;;  %v14221_v36 = vld [vmem:[%s22449_s4 + $0x1cc] sm:$0xf]  ;;  %v12355_v24 = vor.u32 %v14349_v35, %v12352_v29 }
 0x477   :  { %7614 = vmatmul.bf16.gmra.mxu0 %v18683_v63  ;;  %v14489_v55 = vld [vmem:[%s22449_s4 + $0xa24] sm:$0xf0]  ;;  %v11840_v10 = vld [vmem:[%s22449_s4 + $0x1e8] sm:$0xf0] }
 0x478   :  { %7806 = vmatpush.bf16.msrb.mxu3 %v13407_v33  ;;  %v12895_v39 = vor.u32 %v14489_v55, %v12894_v26  ;;  %v14413_v33 = vld [vmem:[%s22449_s4 + $0x7cc] sm:$0xf]  ;;  %v7441_v57 = vpop.f32.mrf.mxu2  ;;  %v11843_v53 = vor.u32 %v14221_v36, %v11840_v10  ;;  %v7470_v55 = vpop.f32.mrf.mxu3  ;;  %7886 = vmatpush.bf16.msra.mxu2 %v12355_v24 }
 0x479   :  { %v12611_v27 = vor.u32 %v14413_v33, %v12608_v44  ;;  %v7442_v26 = vadd.f32 %v7441_v57, %v7413_v17  ;;  %v14285_v17 = vld [vmem:[%s22449_s4 + $0x3cc] sm:$0xf] }
 0x47a   :  { %7748 = vmatpush.bf16.msrb.mxu1 %v12895_v39  ;;  %v7414_v39 = vpop.f32.mrf.mxu1  ;;  %7828 = vmatpush.bf16.msra.mxu0 %v11843_v53  ;;  %v11808_v36 = vld [vmem:[%s22449_s4 + $0x1a8] sm:$0xf0] }
 0x47b   :  { %v19852_v29 = vadd.f32 %v7470_v55, %v7442_v26  ;;  %v14405_v57 = vld [vmem:[%s22449_s4 + $0x78c] sm:$0xf] }
 0x47c   :  { %v7385_v3 = vpop.f32.mrf.mxu0  ;;  %7915 = vmatpush.bf16.msra.mxu3 %v12611_v27 }
 0x47d   :  { %v7415_v35 = vadd.f32 %v7414_v39, %v7385_v3  ;;  %v12576_v3 = vld [vmem:[%s22449_s4 + $0x7a8] sm:$0xf0] }
 0x47e   :  { %7677 = vmatmul.bf16.gmra.mxu2 %v18778_v34  ;;  %v12579_v55 = vor.u32 %v14405_v57, %v12576_v3  ;;  %v11776_v57 = vld [vmem:[%s22449_s4 + $0x168] sm:$0xf0] }
 0x480   :  { %v7443_v22 = vpop.f32.mrf.mxu2  ;;  %v7472_v63 = vpop.f32.mrf.mxu3  ;;  %7916 = vmatpush.bf16.msra.mxu3 %v12579_v55 }
 0x481   :  { %v7444_v11 = vadd.f32 %v7443_v22, %v7415_v35  ;;  %7648 = vmatmul.bf16.gmra.mxu1 %v18776_v47  ;;  %v12096_v22 = vld [vmem:[%s22449_s4 + $0x3e8] sm:$0xf0] }
 0x482   :  { %v7417_v52 = vpop.f32.mrf.mxu1 }
 0x483   :  { %v19854_v31 = vadd.f32 %v7472_v63, %v7444_v11  ;;  %7706 = vmatmul.bf16.gmra.mxu3 %v18780_v37  ;;  %v12099_v63 = vor.u32 %v14285_v17, %v12096_v22  ;;  %v12320_v11 = vld [vmem:[%s22449_s4 + $0x5a8] sm:$0xf0] }
 0x484   :  { %v7388_v21 = vpop.f32.mrf.mxu0 }
 0x485   :  { %v7418_v42 = vadd.f32 %v7417_v52, %v7388_v21  ;;  %v14341_v52 = vld [vmem:[%s22449_s4 + $0x58c] sm:$0xf]  ;;  %7857 = vmatpush.bf16.msra.mxu1 %v12099_v63 }
 0x486   :  { %v14213_v21 = vld [vmem:[%s22449_s4 + $0x18c] sm:$0xf]  ;;  %v12323_v33 = vor.u32 %v14341_v52, %v12320_v11 }
 0x487   :  { %7619 = vmatmul.bf16.gmra.mxu0 %v18768_v5  ;;  %v11811_v44 = vor.u32 %v14213_v21, %v11808_v36  ;;  %v14277_v52 = vld [vmem:[%s22449_s4 + $0x38c] sm:$0xf] }
 0x488   :  { %v7446_v24 = vpop.f32.mrf.mxu2  ;;  %v7475_v27 = vpop.f32.mrf.mxu3  ;;  %7887 = vmatpush.bf16.msra.mxu2 %v12323_v33  ;;  %v14333_v63 = vld [vmem:[%s22449_s4 + $0x54c] sm:$0xf] }
 0x489   :  { %v7447_v53 = vadd.f32 %v7446_v24, %v7418_v42  ;;  %7829 = vmatpush.bf16.msra.mxu0 %v11811_v44  ;;  %v12064_v42 = vld [vmem:[%s22449_s4 + $0x3a8] sm:$0xf0] }
 0x48a   :  { %v7419_v26 = vpop.f32.mrf.mxu1  ;;  %v12288_v33 = vld [vmem:[%s22449_s4 + $0x568] sm:$0xf0] }
 0x48b   :  { %v19884_v35 = vadd.f32 %v7475_v27, %v7447_v53  ;;  %v14205_v44 = vld [vmem:[%s22449_s4 + $0x14c] sm:$0xf]  ;;  %v12291_v3 = vor.u32 %v14333_v63, %v12288_v33 }
 0x48c   :  { %v7390_v10 = vpop.f32.mrf.mxu0  ;;  %v11779_v53 = vor.u32 %v14205_v44, %v11776_v57  ;;  %v12544_v27 = vld [vmem:[%s22449_s4 + $0x768] sm:$0xf0] }
 0x48d   :  { %v7420_v39 = vadd.f32 %v7419_v26, %v7390_v10  ;;  %v12067_v10 = vor.u32 %v14277_v52, %v12064_v42  ;;  %7888 = vmatpush.bf16.msra.mxu2 %v12291_v3  ;;  %v14325_v52 = vld [vmem:[%s22449_s4 + $0x50c] sm:$0xf] }
 0x48e   :  { %7778 = vmatmul.bf16.vlgmr.msrb.gmra.mxu2 %v18864_v32  ;;  %7830 = vmatpush.bf16.msra.mxu0 %v11779_v53  ;;  %v12256_v63 = vld [vmem:[%s22449_s4 + $0x528] sm:$0xf0] }
 0x48f   :  { %7858 = vmatpush.bf16.msra.mxu1 %v12067_v10  ;;  %v12259_v10 = vor.u32 %v14325_v52, %v12256_v63  ;;  %v14389_v44 = vld [vmem:[%s22449_s4 + $0x70c] sm:$0xf] }
 0x490   :  { %v7448_v17 = vpop.f32.mrf.mxu2  ;;  %v7477_v21 = vpop.f32.mrf.mxu3  ;;  %v12512_v57 = vld [vmem:[%s22449_s4 + $0x728] sm:$0xf0] }
 0x491   :  { %v7449_v11 = vadd.f32 %v7448_v17, %v7420_v39  ;;  %7749 = vmatmul.bf16.vlgmr.msrb.gmra.mxu1 %v18862_v56  ;;  %v14269_v17 = vld [vmem:[%s22449_s4 + $0x34c] sm:$0xf]  ;;  %7889 = vmatpush.bf16.msra.mxu2 %v12259_v10 }
 0x492   :  { %v7518_v24 = vpop.f32.mrf.mxu1 }
 0x493   :  { %v19911_v26 = vadd.f32 %v7477_v21, %v7449_v11  ;;  %7807 = vmatmul.bf16.vlgmr.msrb.gmra.mxu3 %v18866_v41  ;;  %v14197_v11 = vld [vmem:[%s22449_s4 + $0x10c] sm:$0xf] }
 0x494   :  { %v7489_v22 = vpop.f32.mrf.mxu0  ;;  %v11744_v21 = vld [vmem:[%s22449_s4 + $0x128] sm:$0xf0] }
 0x495   :  { %v7490_v36 = vadd.f32 %v7489_v22, %v19740_v2  ;;  %v14397_v2 = vld [vmem:[%s22449_s4 + $0x74c] sm:$0xf]  ;;  %v11747_v33 = vor.u32 %v14197_v11, %v11744_v21 }
 0x496   :  { %v12547_v39 = vor.u32 %v14397_v2, %v12544_v27  ;;  %v12032_v22 = vld [vmem:[%s22449_s4 + $0x368] sm:$0xf0] }
 0x497   :  { %v7519_v55 = vadd.f32 %v7518_v24, %v7490_v36  ;;  %7720 = vmatmul.bf16.vlgmr.msrb.gmra.mxu0 %v18854_v28  ;;  %v12035_v42 = vor.u32 %v14269_v17, %v12032_v22  ;;  %v9087_v22 = vperm.slane %v19178_v19, 1  ;;  %v12000_v21 = vld [vmem:[%s22449_s4 + $0x328] sm:$0xf0] }
 0x498   :  { %7917 = vmatpush.bf16.msra.mxu3 %v12547_v39  ;;  %v7547_v36 = vpop.f32.mrf.mxu2  ;;  %v7576_v53 = vpop.f32.mrf.mxu3  ;;  %v12515_v39 = vor.u32 %v14389_v44, %v12512_v57  ;;  %7831 = vmatpush.bf16.msra.mxu0 %v11747_v33  ;;  %v12224_v57 = vld [vmem:[%s22449_s4 + $0x4e8] sm:$0xf0] }
 0x499   :  { %v7548_v3 = vadd.f32 %v7547_v36, %v7519_v55  ;;  %7859 = vmatpush.bf16.msra.mxu1 %v12035_v42  ;;  %v19947_v55 = vld [vmem:[%s22451_s6] sm:$0xff]  ;;  %v14261_v42 = vld [vmem:[%s22449_s4 + $0x30c] sm:$0xf] }
 0x49a   :  { %v7520_v27 = vpop.f32.mrf.mxu1  ;;  %v12003_v44 = vor.u32 %v14261_v42, %v12000_v21 }
 0x49b   :  { %v7577_v17 = vadd.f32 %v7576_v53, %v7548_v3  ;;  %v14189_v3 = vld [vmem:[%s22449_s4 + $0xcc] sm:$0xf] }
 0x49c   :  { %v7491_v24 = vpop.f32.mrf.mxu0  ;;  %7918 = vmatpush.bf16.msra.mxu3 %v12515_v39  ;;  %v11712_v53 = vld [vmem:[%s22449_s4 + $0xe8] sm:$0xf0] }
 0x49d   :  { %v7492_v2 = vadd.f32 %v7491_v24, %v19766_v18  ;;  %v9215_v63 = vadd.f32 %v9087_v22, %v7577_v17  ;;  %v11715_v39 = vor.u32 %v14189_v3, %v11712_v53  ;;  %v14381_v17 = vld [vmem:[%s22449_s4 + $0x6cc] sm:$0xf]  ;;  %7860 = vmatpush.bf16.msra.mxu1 %v12003_v44 }
 0x49e   :  { %v12480_v22 = vld [vmem:[%s22449_s4 + $0x6e8] sm:$0xf0]  ;;  %7783 = vmatmul.bf16.gmra.mxu2 %v18927_v6 }
 0x49f   :  { %v7521_v52 = vadd.f32 %v7520_v27, %v7492_v2  ;;  %14678 = vtanh.f32 %v9215_v63  ;;  %v19969_v2 = vperm.slane %v19947_v55, 0  ;;  %v19972_v27 = vperm.slane %v19947_v55, 1  ;;  %7832 = vmatpush.bf16.msra.mxu0 %v11715_v39  ;;  %v12192_v44 = vld [vmem:[%s22449_s4 + $0x4a8] sm:$0xf0] }
 0x4a0   :  { %v7549_v18 = vpop.f32.mrf.mxu2  ;;  %v7578_v24 = vpop.f32.mrf.mxu3  ;;  %v12483_v42 = vor.u32 %v14381_v17, %v12480_v22  ;;  %14680 = vtanh.f32 %v19491_v51  ;;  %v14309_v51 = vld [vmem:[%s22449_s4 + $0x48c] sm:$0xf] }
 0x4a1   :  { %v7550_v36 = vadd.f32 %v7549_v18, %v7521_v52  ;;  %v14677_v52 = vpop.eup %14676  ;;  %v9095_v18 = vperm.slane %v19461_v1, 1  ;;  %7754 = vmatmul.bf16.gmra.mxu1 %v18923_v46  ;;  %v14181_v3 = vld [vmem:[%s22449_s4 + $0x8c] sm:$0xf]  ;;  %v12195_v17 = vor.u32 %v14309_v51, %v12192_v44 }
 0x4a2   :  { %v7523_v33 = vpop.f32.mrf.mxu1  ;;  %7919 = vmatpush.bf16.msra.mxu3 %v12483_v42  ;;  %v11680_v53 = vld [vmem:[%s22449_s4 + $0xa8] sm:$0xf0] }
 0x4a3   :  { %v7579_v63 = vadd.f32 %v7578_v24, %v7550_v36  ;;  %7812 = vmatmul.bf16.gmra.mxu3 %v18929_v54  ;;  %v14253_v24 = vld [vmem:[%s22449_s4 + $0x2cc] sm:$0xf]  ;;  %v11683_v22 = vor.u32 %v14181_v3, %v11680_v53  ;;  %v9103_v3 = vperm.slane %v19495_v43, 1 }
 0x4a4   :  { %v7494_v11 = vpop.f32.mrf.mxu0 }
 0x4a5   :  { %v7495_v10 = vadd.f32 %v7494_v11, %v19796_v23  ;;  %v12227_v23 = vor.u32 %v14317_v45, %v12224_v57  ;;  %v14679_v21 = vpop.eup %14678  ;;  %v9223_v45 = vadd.f32 %v9095_v18, %v7579_v63  ;;  %v9360_v57 = vmul.f32 %v14677_v52, %v19969_v2  ;;  %v14373_v52 = vld [vmem:[%s22449_s4 + $0x68c] sm:$0xf]  ;;  %7833 = vmatpush.bf16.msra.mxu0 %v11683_v22 }
 0x4a6   :  { %v9361_v36 = vmul.f32 %v14679_v21, %v19972_v27  ;;  %v12448_v63 = vld [vmem:[%s22449_s4 + $0x6a8] sm:$0xf0]  ;;  %v14681_v51 = vpop.eup %14680 }
 0x4a7   :  { %v7524_v11 = vadd.f32 %v7523_v33, %v7495_v10  ;;  %7725 = vmatmul.bf16.gmra.mxu0 %v18915_v30  ;;  %7890 = vmatpush.bf16.msra.mxu2 %v12227_v23  ;;  %v11968_v10 = vld [vmem:[%s22449_s4 + $0x2e8] sm:$0xf0]  ;;  %14682 = vtanh.f32 %v9223_v45 }
 0x4a8   :  { %v11971_v33 = vor.u32 %v14253_v24, %v11968_v10  ;;  %v7552_v23 = vpop.f32.mrf.mxu2  ;;  %v20012_v18 = vadd.f32 %v9361_v36, %v9360_v57  ;;  %v7581_v21 = vpop.f32.mrf.mxu3  ;;  %v12451_v10 = vor.u32 %v14373_v52, %v12448_v63  ;;  %14684 = vtanh.f32 %v19524_v50  ;;  %v14301_v50 = vld [vmem:[%s22449_s4 + $0x44c] sm:$0xf] }
 0x4a9   :  { %v7553_v42 = vadd.f32 %v7552_v23, %v7524_v11  ;;  %v9368_v11 = vmul.f32 %v14681_v51, %v19969_v2 }
 0x4aa   :  { %v7525_v24 = vpop.f32.mrf.mxu1  ;;  %7861 = vmatpush.bf16.msra.mxu1 %v11971_v33  ;;  %7920 = vmatpush.bf16.msra.mxu3 %v12451_v10 }
 0x4ab   :  { %7891 = vmatpush.bf16.msra.mxu2 %v12195_v17  ;;  %v7582_v44 = vadd.f32 %v7581_v21, %v7553_v42  ;;  %v11936_v17 = vld [vmem:[%s22449_s4 + $0x2a8] sm:$0xf0] }
 0x4ac   :  { %v7496_v39 = vpop.f32.mrf.mxu0  ;;  %v12160_v21 = vld [vmem:[%s22449_s4 + $0x468] sm:$0xf0] }
 0x4ad   :  { %v7497_v45 = vadd.f32 %v7496_v39, %v19822_v48  ;;  %v14683_v54 = vpop.eup %14682  ;;  %v9231_v57 = vadd.f32 %v9103_v3, %v7582_v44  ;;  %v14245_v39 = vld [vmem:[%s22449_s4 + $0x28c] sm:$0xf]  ;;  %v12163_v10 = vor.u32 %v14301_v50, %v12160_v21 }
 0x4ae   :  { %v9369_v36 = vmul.f32 %v14683_v54, %v19972_v27  ;;  %v11939_v42 = vor.u32 %v14245_v39, %v11936_v17  ;;  %v12416_v44 = vld [vmem:[%s22449_s4 + $0x668] sm:$0xf0]  ;;  %v14685_v3 = vpop.eup %14684  ;;  %7788 = vmatmul.bf16.gmra.mxu2 %v22522_v7 }
 0x4af   :  { %v7526_v53 = vadd.f32 %v7525_v24, %v7497_v45  ;;  %14686 = vtanh.f32 %v9231_v57  ;;  %v14173_v45 = vld [vmem:[%s22449_s4 + $0x4c] sm:$0xf]  ;;  %v9111_v57 = vperm.slane %v19527_v58, 1  ;;  %7892 = vmatpush.bf16.msra.mxu2 %v12163_v10 }
 0x4b0   :  { %v20019_v48 = vadd.f32 %v9369_v36, %v9368_v11  ;;  %v7554_v33 = vpop.f32.mrf.mxu2  ;;  %v7583_v52 = vpop.f32.mrf.mxu3  ;;  %v11648_v24 = vld [vmem:[%s22449_s4 + $0x68] sm:$0xf0]  ;;  %7862 = vmatpush.bf16.msra.mxu1 %v11939_v42  ;;  %14688 = vtanh.f32 %v19566_v14 }
 0x4b1   :  { %v7555_v22 = vadd.f32 %v7554_v33, %v7526_v53  ;;  %v11651_v51 = vor.u32 %v14173_v45, %v11648_v24  ;;  %7759 = vmatmul.bf16.gmra.mxu1 %v22521_v59  ;;  %v14237_v33 = vld [vmem:[%s22449_s4 + $0x24c] sm:$0xf] }
 0x4b2   :  { %v7528_v63 = vpop.f32.mrf.mxu1  ;;  %v14293_v14 = vld [vmem:[%s22449_s4 + $0x40c] sm:$0xf] }
 0x4b3   :  { %v7584_v53 = vadd.f32 %v7583_v52, %v7555_v22  ;;  %7834 = vmatpush.bf16.msra.mxu0 %v11651_v51  ;;  %v9376_v22 = vmul.f32 %v14685_v3, %v19969_v2  ;;  %v12128_v21 = vld [vmem:[%s22449_s4 + $0x428] sm:$0xf0] }
 0x4b4   :  { %v7499_v23 = vpop.f32.mrf.mxu0  ;;  %v14165_v45 = vld [vmem:[%s22449_s4 + $0xc] sm:$0xf]  ;;  %v12131_v3 = vor.u32 %v14293_v14, %v12128_v21 }
 0x4b5   :  { %v7500_v54 = vadd.f32 %v7499_v23, %v19852_v29  ;;  %v14365_v29 = vld [vmem:[%s22449_s4 + $0x64c] sm:$0xf]  ;;  %v14687_v39 = vpop.eup %14686  ;;  %v9239_v17 = vadd.f32 %v9111_v57, %v7584_v53 }
 0x4b6   :  { %v12419_v36 = vor.u32 %v14365_v29, %v12416_v44  ;;  %v11904_v23 = vld [vmem:[%s22449_s4 + $0x268] sm:$0xf0]  ;;  %v9377_v52 = vmul.f32 %v14687_v39, %v19972_v27  ;;  %v14689_v39 = vpop.eup %14688  ;;  %7893 = vmatpush.bf16.msra.mxu2 %v12131_v3 }
 0x4b7   :  { %v7529_v11 = vadd.f32 %v7528_v63, %v7500_v54  ;;  %7730 = vmatmul.bf16.gmra.mxu0 %v19025_v16  ;;  %v11907_v50 = vor.u32 %v14237_v33, %v11904_v23  ;;  %v22524_v54 = vld [vmem:[#allocation18_spill] sm:$0xff]  ;;  %14690 = vtanh.f32 %v9239_v17  ;;  %v11616_v53 = vld [vmem:[%s22449_s4 + $0x28] sm:$0xf0]  ;;  %v9384_v14 = vmul.f32 %v14689_v39, %v19969_v2 }
 0x4b8   :  { %7817 = vmatmul.bf16.gmra.mxu3 %v22524_v54  ;;  %v7557_v63 = vpop.f32.mrf.mxu2  ;;  %v20069_v24 = vadd.f32 %v9377_v52, %v9376_v22  ;;  %v7586_v51 = vpop.f32.mrf.mxu3  ;;  %v14357_v57 = vld [vmem:[%s22449_s4 + $0x60c] sm:$0xf]  ;;  %v11619_v33 = vor.u32 %v14165_v45, %v11616_v53  ;;  %14692 = vtanh.f32 %v19596_v12  ;;  %v9127_v45 = vperm.slane %v19599_v49, 1 }
 0x4b9   :  { %7921 = vmatpush.bf16.msra.mxu3 %v12419_v36  ;;  %7863 = vmatpush.bf16.msra.mxu1 %v11907_v50  ;;  %v7558_v10 = vadd.f32 %v7557_v63, %v7529_v11  ;;  %v12384_v36 = vld [vmem:[%s22449_s4 + $0x628] sm:$0xf0]  ;;  %v9119_v50 = vperm.slane %v19564_v15, 1 }
 0x4ba   :  { %v7530_v44 = vpop.f32.mrf.mxu1  ;;  %v12387_v23 = vor.u32 %v14357_v57, %v12384_v36  ;;  %v11872_v11 = vld [vmem:[%s22449_s4 + $0x228] sm:$0xf0]  ;;  %7835 = vmatpush.bf16.msra.mxu0 %v11619_v33 }
 0x4bb   :  { %v7587_v17 = vadd.f32 %v7586_v51, %v7558_v10  ;;  %v13376_v12 = vld [vmem:[%s22449_s4 + $0xde8] sm:$0xf0] }
 0x4bc   :  { %v7501_v42 = vpop.f32.mrf.mxu0  ;;  %v14477_v3 = vld [vmem:[%s22449_s4 + $0x9cc] sm:$0xf] }
 0x4bd   :  { %v7502_v29 = vadd.f32 %v7501_v42, %v19854_v31  ;;  %v14229_v31 = vld [vmem:[%s22449_s4 + $0x20c] sm:$0xf]  ;;  %7922 = vmatpush.bf16.msra.mxu3 %v12387_v23  ;;  %v14691_v63 = vpop.eup %14690  ;;  %v9247_v42 = vadd.f32 %v9119_v50, %v7587_v17 }
 0x4be   :  { %v11875_v52 = vor.u32 %v14229_v31, %v11872_v11  ;;  %v9385_v21 = vmul.f32 %v14691_v63, %v19972_v27  ;;  %v12864_v31 = vld [vmem:[%s22449_s4 + $0x9e8] sm:$0xf0]  ;;  %v14693_v63 = vpop.eup %14692  ;;  %7793 = vmatmul.bf16.gmra.mxu2 %v19115_v38 }
 0x4bf   :  { %v7531_v22 = vadd.f32 %v7530_v44, %v7502_v29  ;;  %14694 = vtanh.f32 %v9247_v42  ;;  %v14605_v44 = vld [vmem:[%s22449_s4 + $0xdcc] sm:$0xf]  ;;  %v12867_v17 = vor.u32 %v14477_v3, %v12864_v31 }
 0x4c0   :  { %7864 = vmatpush.bf16.msra.mxu1 %v11875_v52  ;;  %v20092_v10 = vadd.f32 %v9385_v21, %v9384_v14  ;;  %v7559_v51 = vpop.f32.mrf.mxu2  ;;  %v7588_v57 = vpop.f32.mrf.mxu3  ;;  %v13379_v23 = vor.u32 %v14605_v44, %v13376_v12  ;;  %v14669_v11 = vld [vmem:[%s22449_s4 + $0xfcc] sm:$0xf]  ;;  %14696 = vtanh.f32 %v19653_v61 }
 0x4c1   :  { %v7560_v53 = vadd.f32 %v7559_v51, %v7531_v22  ;;  %v13632_v39 = vld [vmem:[%s22449_s4 + $0xfe8] sm:$0xf0]  ;;  %7764 = vmatmul.bf16.gmra.mxu1 %v19113_v8  ;;  %7944 = vmatpush.bf16.msrb.mxu0 %v12867_v17 }
 0x4c2   :  { %v7533_v33 = vpop.f32.mrf.mxu1  ;;  %v13635_v50 = vor.u32 %v14669_v11, %v13632_v39  ;;  %v13120_v22 = vld [vmem:[%s22449_s4 + $0xbe8] sm:$0xf0]  ;;  %8002 = vmatpush.bf16.msrb.mxu2 %v13379_v23  ;;  %v9392_v39 = vmul.f32 %v14693_v63, %v19969_v2 }
 0x4c3   :  { %v14597_v52 = vld [vmem:[%s22449_s4 + $0xd8c] sm:$0xf]  ;;  %v7589_v42 = vadd.f32 %v7588_v57, %v7560_v53 }
 0x4c4   :  { %v7504_v29 = vpop.f32.mrf.mxu0  ;;  %v13344_v51 = vld [vmem:[%s22449_s4 + $0xda8] sm:$0xf0]  ;;  %8031 = vmatpush.bf16.msrb.mxu3 %v13635_v50 }
 0x4c5   :  { %v7505_v36 = vadd.f32 %v7504_v29, %v19884_v35  ;;  %v14541_v35 = vld [vmem:[%s22449_s4 + $0xbcc] sm:$0xf]  ;;  %v13347_v12 = vor.u32 %v14597_v52, %v13344_v51  ;;  %v9255_v23 = vadd.f32 %v9127_v45, %v7589_v42 }
 0x4c6   :  { %v13123_v21 = vor.u32 %v14541_v35, %v13120_v22  ;;  %v14469_v29 = vld [vmem:[%s22449_s4 + $0x98c] sm:$0xf] }
 0x4c7   :  { %v7534_v14 = vadd.f32 %v7533_v33, %v7505_v36  ;;  %7735 = vmatmul.bf16.gmra.mxu0 %v19111_v62  ;;  %v12832_v44 = vld [vmem:[%s22449_s4 + $0x9a8] sm:$0xf0]  ;;  %v14695_v33 = vpop.eup %14694  ;;  %14698 = vtanh.f32 %v9255_v23  ;;  %8003 = vmatpush.bf16.msrb.mxu2 %v13347_v12 }
 0x4c8   :  { %v12835_v3 = vor.u32 %v14469_v29, %v12832_v44  ;;  %v14661_v53 = vld [vmem:[%s22449_s4 + $0xf8c] sm:$0xf]  ;;  %v9393_v17 = vmul.f32 %v14695_v33, %v19972_v27  ;;  %7973 = vmatpush.bf16.msrb.mxu1 %v13123_v21  ;;  %v7562_v51 = vpop.f32.mrf.mxu2  ;;  %14700 = vtanh.f32 %v19698_v0 }
 0x4c9   :  { %v13600_v57 = vld [vmem:[%s22449_s4 + $0xfa8] sm:$0xf0]  ;;  %v7563_v12 = vadd.f32 %v7562_v51, %v7534_v14 }
 0x4ca   :  { %v14533_v36 = vld [vmem:[%s22449_s4 + $0xb8c] sm:$0xf]  ;;  %v13603_v31 = vor.u32 %v14661_v53, %v13600_v57  ;;  %7945 = vmatpush.bf16.msrb.mxu0 %v12835_v3  ;;  %v20168_v53 = vadd.f32 %v9393_v17, %v9392_v39  ;;  %v7591_v57 = vpop.f32.mrf.mxu3  ;;  %v7535_v33 = vpop.f32.mrf.mxu1 }
 0x4cb   :  { %v13088_v11 = vld [vmem:[%s22449_s4 + $0xba8] sm:$0xf0] }
 0x4cc   :  { %v22525_v35 = vld [vmem:[#allocation19_spill] sm:$0xff]  ;;  %v13091_v22 = vor.u32 %v14533_v36, %v13088_v11  ;;  %v7506_v29 = vpop.f32.mrf.mxu0  ;;  %8032 = vmatpush.bf16.msrb.mxu3 %v13603_v31  ;;  %v9135_v11 = vperm.slane %v19657_v4, 1 }
 0x4cd   :  { %7822 = vmatmul.bf16.gmra.mxu3 %v22525_v35  ;;  %v14589_v61 = vld [vmem:[%s22449_s4 + $0xd4c] sm:$0xf]  ;;  %v7507_v36 = vadd.f32 %v7506_v29, %v19911_v26 }
 0x4ce   :  { %v13312_v45 = vld [vmem:[%s22449_s4 + $0xd68] sm:$0xf0]  ;;  %7974 = vmatpush.bf16.msrb.mxu1 %v13091_v22  ;;  %7894 = vmatmul.bf16.vlgmr.msra.gmra.mxu2 %v18457_v9 }
 0x4cf   :  { %v14461_v50 = vld [vmem:[%s22449_s4 + $0x94c] sm:$0xf]  ;;  %v13315_v52 = vor.u32 %v14589_v61, %v13312_v45  ;;  %v14697_v61 = vpop.eup %14696  ;;  %v7592_v45 = vadd.f32 %v7591_v57, %v7563_v12  ;;  %v7536_v35 = vadd.f32 %v7535_v33, %v7507_v36 }
 0x4d0   :  { %v12800_v63 = vld [vmem:[%s22449_s4 + $0x968] sm:$0xf0]  ;;  %v9400_v29 = vmul.f32 %v14697_v61, %v19969_v2  ;;  %v7564_v57 = vpop.f32.mrf.mxu2  ;;  %v9143_v61 = vperm.slane %v19707_v40, 1 }
 0x4d1   :  { %v14653_v42 = vld [vmem:[%s22449_s4 + $0xf4c] sm:$0xf]  ;;  %v12803_v44 = vor.u32 %v14461_v50, %v12800_v63  ;;  %8004 = vmatpush.bf16.msrb.mxu2 %v13315_v52  ;;  %v14699_v50 = vpop.eup %14698  ;;  %v9263_v52 = vadd.f32 %v9135_v11, %v7592_v45  ;;  %v7565_v33 = vadd.f32 %v7564_v57, %v7536_v35  ;;  %7865 = vmatmul.bf16.vlgmr.msra.gmra.mxu1 %v18449_v20 }
 0x4d2   :  { %v13568_v21 = vld [vmem:[%s22449_s4 + $0xf68] sm:$0xf0]  ;;  %v7634_v11 = vpop.f32.mrf.mxu1 }
 0x4d3   :  { %v13571_v23 = vor.u32 %v14653_v42, %v13568_v21  ;;  %v14525_v3 = vld [vmem:[%s22449_s4 + $0xb4c] sm:$0xf]  ;;  %7946 = vmatpush.bf16.msrb.mxu0 %v12803_v44  ;;  %v9401_v44 = vmul.f32 %v14699_v50, %v19972_v27  ;;  %14702 = vtanh.f32 %v9263_v52 }
 0x4d4   :  { %v13056_v14 = vld [vmem:[%s22449_s4 + $0xb68] sm:$0xf0]  ;;  %v7605_v36 = vpop.f32.mrf.mxu0  ;;  %14704 = vtanh.f32 %v19718_v60 }
 0x4d5   :  { %v14581_v26 = vld [vmem:[%s22449_s4 + $0xd0c] sm:$0xf]  ;;  %v13059_v31 = vor.u32 %v14525_v3, %v13056_v14  ;;  %8033 = vmatpush.bf16.msrb.mxu3 %v13571_v23  ;;  %v20199_v0 = vadd.f32 %v9401_v44, %v9400_v29  ;;  %v7593_v23 = vpop.f32.mrf.mxu3  ;;  %v7635_v45 = vadd.f32 %v7634_v11, %v7605_v36  ;;  %v14701_v3 = vpop.eup %14700 }
 0x4d6   :  { %v13280_v39 = vld [vmem:[%s22449_s4 + $0xd28] sm:$0xf0]  ;;  %v7594_v14 = vadd.f32 %v7593_v23, %v7565_v33 }
 0x4d7   :  { %v14453_v17 = vld [vmem:[%s22449_s4 + $0x90c] sm:$0xf]  ;;  %v13283_v63 = vor.u32 %v14581_v26, %v13280_v39  ;;  %7975 = vmatpush.bf16.msrb.mxu1 %v13059_v31  ;;  %7836 = vmatmul.bf16.vlgmr.msra.gmra.mxu0 %v18438_v13 }
 0x4d8   :  { %v12768_v22 = vld [vmem:[%s22449_s4 + $0x928] sm:$0xf0] }
 0x4d9   :  { %v12771_v42 = vor.u32 %v14453_v17, %v12768_v22  ;;  %v14645_v21 = vld [vmem:[%s22449_s4 + $0xf0c] sm:$0xf]  ;;  %8005 = vmatpush.bf16.msrb.mxu2 %v13283_v63  ;;  %v14703_v39 = vpop.eup %14702  ;;  %v9271_v17 = vadd.f32 %v9143_v61, %v7594_v14  ;;  %v9408_v22 = vmul.f32 %v14701_v3, %v19969_v2 }
 0x4da   :  { %v13536_v51 = vld [vmem:[%s22449_s4 + $0xf28] sm:$0xf0]  ;;  %v9409_v50 = vmul.f32 %v14703_v39, %v19972_v27  ;;  %v7636_v3 = vpop.f32.mrf.mxu1  ;;  %v14705_v61 = vpop.eup %14704 }
 0x4db   :  { %v13539_v12 = vor.u32 %v14645_v21, %v13536_v51  ;;  %7947 = vmatpush.bf16.msrb.mxu0 %v12771_v42  ;;  %v14517_v26 = vld [vmem:[%s22449_s4 + $0xb0c] sm:$0xf]  ;;  %14706 = vtanh.f32 %v9271_v17 }
 0x4dc   :  { %v13024_v31 = vld [vmem:[%s22449_s4 + $0xb28] sm:$0xf0]  ;;  %v20233_v44 = vadd.f32 %v9409_v50, %v9408_v22  ;;  %v7607_v57 = vpop.f32.mrf.mxu0 }
 0x4dd   :  { %8034 = vmatpush.bf16.msrb.mxu3 %v13539_v12  ;;  %v13027_v35 = vor.u32 %v14517_v26, %v13024_v31  ;;  %v14573_v52 = vld [vmem:[%s22449_s4 + $0xccc] sm:$0xf]  ;;  %v7663_v12 = vpop.f32.mrf.mxu2  ;;  %v7692_v11 = vpop.f32.mrf.mxu3  ;;  %v7637_v14 = vadd.f32 %v7636_v3, %v7607_v57 }
 0x4de   :  { %7923 = vmatmul.bf16.vlgmr.msra.gmra.mxu3 %v18465_v25  ;;  %v13248_v63 = vld [vmem:[%s22449_s4 + $0xce8] sm:$0xf0]  ;;  %v7664_v23 = vadd.f32 %v7663_v12, %v7635_v45 }
 0x4df   :  { %7976 = vmatpush.bf16.msrb.mxu1 %v13027_v35  ;;  %v14445_v60 = vld [vmem:[%s22449_s4 + $0x8cc] sm:$0xf]  ;;  %v13251_v42 = vor.u32 %v14573_v52, %v13248_v63 }
 0x4e0   :  { %v12736_v21 = vld [vmem:[%s22449_s4 + $0x8e8] sm:$0xf0]  ;;  %v20235_v26 = vadd.f32 %v7692_v11, %v7664_v23 }
 0x4e1   :  { %v14637_v51 = vld [vmem:[%s22449_s4 + $0xecc] sm:$0xf]  ;;  %v12739_v36 = vor.u32 %v14445_v60, %v12736_v21  ;;  %8006 = vmatpush.bf16.msrb.mxu2 %v13251_v42  ;;  %v14707_v52 = vpop.eup %14706 }
 0x4e2   :  { %v13504_v29 = vld [vmem:[%s22449_s4 + $0xee8] sm:$0xf0]  ;;  %v7639_v3 = vpop.f32.mrf.mxu1 }
 0x4e3   :  { %v13507_v33 = vor.u32 %v14637_v51, %v13504_v29  ;;  %7948 = vmatpush.bf16.msrb.mxu0 %v12739_v36  ;;  %v14509_v31 = vld [vmem:[%s22449_s4 + $0xacc] sm:$0xf]  ;;  %v9416_v51 = vmul.f32 %v14705_v61, %v19969_v2  ;;  %v9417_v29 = vmul.f32 %v14707_v52, %v19972_v27 }
 0x4e4   :  { %v12992_v35 = vld [vmem:[%s22449_s4 + $0xae8] sm:$0xf0] }
 0x4e5   :  { %8035 = vmatpush.bf16.msrb.mxu3 %v13507_v33  ;;  %v14565_v45 = vld [vmem:[%s22449_s4 + $0xc8c] sm:$0xf]  ;;  %v12995_v39 = vor.u32 %v14509_v31, %v12992_v35  ;;  %v20263_v57 = vadd.f32 %v9417_v29, %v9416_v51  ;;  %v7665_v36 = vpop.f32.mrf.mxu2  ;;  %v7610_v33 = vpop.f32.mrf.mxu0 }
 0x4e6   :  { %v13216_v17 = vld [vmem:[%s22449_s4 + $0xca8] sm:$0xf0]  ;;  %v7666_v23 = vadd.f32 %v7665_v36, %v7637_v14  ;;  %v7694_v11 = vpop.f32.mrf.mxu3  ;;  %v7640_v31 = vadd.f32 %v7639_v3, %v7610_v33  ;;  %v22530_v14 = vld [vmem:[#allocation5_spill] sm:$0xff] }
 0x4e7   :  { %v14437_v22 = vld [vmem:[%s22449_s4 + $0x88c] sm:$0xf]  ;;  %v13219_v63 = vor.u32 %v14565_v45, %v13216_v17  ;;  %7977 = vmatpush.bf16.msrb.mxu1 %v12995_v39  ;;  %22526 = vst [vmem:[#allocation16_spill] sm:$0xff] %v20263_v57  ;;  %v22527_v45 = vld [vmem:[#allocation2_spill] sm:$0xff]  ;;  %v22529_v17 = vld [vmem:[#allocation4_spill] sm:$0xff] }
 0x4e8   :  { %v12704_v50 = vld [vmem:[%s22449_s4 + $0x8a8] sm:$0xf0]  ;;  %v20265_v35 = vadd.f32 %v7694_v11, %v7666_v23  ;;  %7841 = vmatmul.bf16.gmra.mxu0 %v22527_v45  ;;  %7899 = vmatmul.bf16.gmra.mxu2 %v22529_v17 }
 0x4e9   :  { %v12707_v60 = vor.u32 %v14437_v22, %v12704_v50  ;;  %v14629_v42 = vld [vmem:[%s22449_s4 + $0xe8c] sm:$0xf]  ;;  %8007 = vmatpush.bf16.msrb.mxu2 %v13219_v63 }
 0x4ea   :  { %v13472_v21 = vld [vmem:[%s22449_s4 + $0xea8] sm:$0xf0]  ;;  %v7641_v11 = vpop.f32.mrf.mxu1 }
 0x4eb   :  { %v13475_v12 = vor.u32 %v14629_v42, %v13472_v21  ;;  %7949 = vmatpush.bf16.msrb.mxu0 %v12707_v60  ;;  %v14501_v2 = vld [vmem:[%s22449_s4 + $0xa8c] sm:$0xf] }
 0x4ec   :  { %v12960_v27 = vld [vmem:[%s22449_s4 + $0xaa8] sm:$0xf0] }
 0x4ed   :  { %8036 = vmatpush.bf16.msrb.mxu3 %v13475_v12  ;;  %v22528_v61 = vld [vmem:[#allocation3_spill] sm:$0xff]  ;;  %v12963_v39 = vor.u32 %v14501_v2, %v12960_v27  ;;  %v7668_v51 = vpop.f32.mrf.mxu2  ;;  %v7612_v29 = vpop.f32.mrf.mxu0 }
 0x4ee   :  { %7870 = vmatmul.bf16.gmra.mxu1 %v22528_v61  ;;  %7928 = vmatmul.bf16.gmra.mxu3 %v22530_v14  ;;  %v14557_v22 = vld [vmem:[%s22449_s4 + $0xc4c] sm:$0xf]  ;;  %v7669_v33 = vadd.f32 %v7668_v51, %v7640_v31  ;;  %v7697_v23 = vpop.f32.mrf.mxu3  ;;  %v7642_v3 = vadd.f32 %v7641_v11, %v7612_v29 }
 0x4ef   :  { %7978 = vmatpush.bf16.msrb.mxu1 %v12963_v39  ;;  %v13184_v50 = vld [vmem:[%s22449_s4 + $0xc68] sm:$0xf0] }
 0x4f0   :  { %v14429_v52 = vld [vmem:[%s22449_s4 + $0x84c] sm:$0xf]  ;;  %v13187_v63 = vor.u32 %v14557_v22, %v13184_v50  ;;  %v20295_v2 = vadd.f32 %v7697_v23, %v7669_v33 }
 0x4f1   :  { %v12672_v60 = vld [vmem:[%s22449_s4 + $0x868] sm:$0xf0] }
 0x4f2   :  { %v14621_v42 = vld [vmem:[%s22449_s4 + $0xe4c] sm:$0xf]  ;;  %v12675_v12 = vor.u32 %v14429_v52, %v12672_v60  ;;  %8008 = vmatpush.bf16.msrb.mxu2 %v13187_v63  ;;  %v7644_v11 = vpop.f32.mrf.mxu1 }
 0x4f3   :  { %v13440_v21 = vld [vmem:[%s22449_s4 + $0xe68] sm:$0xf0] }
 0x4f4   :  { %v13443_v36 = vor.u32 %v14621_v42, %v13440_v21  ;;  %7950 = vmatpush.bf16.msrb.mxu0 %v12675_v12  ;;  %v14493_v27 = vld [vmem:[%s22449_s4 + $0xa4c] sm:$0xf] }
 0x4f5   :  { %v12928_v39 = vld [vmem:[%s22449_s4 + $0xa68] sm:$0xf0]  ;;  %v7670_v12 = vpop.f32.mrf.mxu2 }
 0x4f6   :  { %8037 = vmatpush.bf16.msrb.mxu3 %v13443_v36  ;;  %v14549_v31 = vld [vmem:[%s22449_s4 + $0xc0c] sm:$0xf]  ;;  %v12931_v22 = vor.u32 %v14493_v27, %v12928_v39  ;;  %v7615_v36 = vpop.f32.mrf.mxu0  ;;  %v7671_v33 = vadd.f32 %v7670_v12, %v7642_v3  ;;  %v7699_v23 = vpop.f32.mrf.mxu3  ;;  %v22534_v3 = vld [vmem:[#allocation9_spill] sm:$0xff]  ;;  %v14226_v12 = vld [vmem:[%s22449_s4 + $0x1ec] sm:$0xf0] }
 0x4f7   :  { %v13152_v50 = vld [vmem:[%s22449_s4 + $0xc28] sm:$0xf0]  ;;  %v7645_v27 = vadd.f32 %v7644_v11, %v7615_v36  ;;  %v12614_v36 = vld [vmem:[%s22449_s4 + $0x7d0] sm:$0xf] }
 0x4f8   :  { %v14421_v52 = vld [vmem:[%s22449_s4 + $0x80c] sm:$0xf]  ;;  %v13155_v60 = vor.u32 %v14549_v31, %v13152_v50  ;;  %7979 = vmatpush.bf16.msrb.mxu1 %v12931_v22  ;;  %v20321_v39 = vadd.f32 %v7699_v23, %v7671_v33  ;;  %v22531_v31 = vld [vmem:[#allocation6_spill] sm:$0xff]  ;;  %v14418_v33 = vld [vmem:[%s22449_s4 + $0x7ec] sm:$0xf0] }
 0x4f9   :  { %v12640_v63 = vld [vmem:[%s22449_s4 + $0x828] sm:$0xf0]  ;;  %7846 = vmatmul.bf16.gmra.mxu0 %v22531_v31 }
 0x4fa   :  { %v12643_v42 = vor.u32 %v14421_v52, %v12640_v63  ;;  %v14613_v21 = vld [vmem:[%s22449_s4 + $0xe0c] sm:$0xf]  ;;  %8009 = vmatpush.bf16.msrb.mxu2 %v13155_v60  ;;  %v22533_v60 = vld [vmem:[#allocation8_spill] sm:$0xff] }
 0x4fb   :  { %v13408_v51 = vld [vmem:[%s22449_s4 + $0xe28] sm:$0xf0]  ;;  %7904 = vmatmul.bf16.gmra.mxu2 %v22533_v60  ;;  %v7646_v60 = vpop.f32.mrf.mxu1 }
 0x4fc   :  { %v13411_v29 = vor.u32 %v14613_v21, %v13408_v51  ;;  %7951 = vmatpush.bf16.msrb.mxu0 %v12643_v42  ;;  %v14485_v50 = vld [vmem:[%s22449_s4 + $0xa0c] sm:$0xf]  ;;  %v12358_v42 = vld [vmem:[%s22449_s4 + $0x5d0] sm:$0xf] }
 0x4fd   :  { %v12896_v22 = vld [vmem:[%s22449_s4 + $0xa28] sm:$0xf0]  ;;  %v14354_v21 = vld [vmem:[%s22449_s4 + $0x5ec] sm:$0xf0]  ;;  %v7673_v23 = vpop.f32.mrf.mxu2 }
 0x4fe   :  { %8038 = vmatpush.bf16.msrb.mxu3 %v13411_v29  ;;  %v22532_v52 = vld [vmem:[#allocation7_spill] sm:$0xff]  ;;  %v12899_v63 = vor.u32 %v14485_v50, %v12896_v22  ;;  %v11846_v51 = vld [vmem:[%s22449_s4 + $0x1d0] sm:$0xf]  ;;  %v12359_v29 = vor.u32 %v14354_v21, %v12358_v42  ;;  %v7617_v11 = vpop.f32.mrf.mxu0  ;;  %v12615_v22 = vor.u32 %v14418_v33, %v12614_v36 }
 0x4ff   :  { %7875 = vmatmul.bf16.gmra.mxu1 %v22532_v52  ;;  %7933 = vmatmul.bf16.gmra.mxu3 %v22534_v3  ;;  %v11847_v50 = vor.u32 %v14226_v12, %v11846_v51  ;;  %v7702_v3 = vpop.f32.mrf.mxu3  ;;  %v7647_v42 = vadd.f32 %v7646_v60, %v7617_v11  ;;  %v14218_v60 = vld [vmem:[%s22449_s4 + $0x1ac] sm:$0xf0] }
 0x500   :  { %7980 = vmatpush.bf16.msrb.mxu1 %v12899_v63  ;;  %v7674_v63 = vadd.f32 %v7673_v23, %v7645_v27  ;;  %8118 = vmatpush.bf16.msra.mxu2 %v12359_v29  ;;  %v12102_v27 = vld [vmem:[%s22449_s4 + $0x3d0] sm:$0xf] }
 0x501   :  { %8060 = vmatpush.bf16.msra.mxu0 %v11847_v50  ;;  %v12582_v36 = vld [vmem:[%s22449_s4 + $0x790] sm:$0xf] }
 0x502   :  { %8147 = vmatpush.bf16.msra.mxu3 %v12615_v22  ;;  %v20351_v21 = vadd.f32 %v7702_v3, %v7674_v63  ;;  %v14410_v33 = vld [vmem:[%s22449_s4 + $0x7ac] sm:$0xf0] }
 0x503   :  { %v7649_v61 = vpop.f32.mrf.mxu1  ;;  %v12583_v22 = vor.u32 %v14410_v33, %v12582_v36  ;;  %v14402_v36 = vld [vmem:[%s22449_s4 + $0x76c] sm:$0xf0] }
 0x505   :  { %v7675_v52 = vpop.f32.mrf.mxu2 }
 0x506   :  { %v7620_v31 = vpop.f32.mrf.mxu0  ;;  %v7676_v14 = vadd.f32 %v7675_v52, %v7647_v42  ;;  %v14290_v52 = vld [vmem:[%s22449_s4 + $0x3ec] sm:$0xf0]  ;;  %8148 = vmatpush.bf16.msra.mxu3 %v12583_v22 }
 0x507   :  { %v7704_v17 = vpop.f32.mrf.mxu3  ;;  %v7650_v45 = vadd.f32 %v7649_v61, %v7620_v31  ;;  %v12326_v61 = vld [vmem:[%s22449_s4 + $0x590] sm:$0xf] }
 0x508   :  { %v20353_v57 = vadd.f32 %v7704_v17, %v7676_v14  ;;  %v12103_v17 = vor.u32 %v14290_v52, %v12102_v27  ;;  %v14346_v14 = vld [vmem:[%s22449_s4 + $0x5ac] sm:$0xf0] }
 0x509   :  { %7851 = vmatmul.bf16.gmra.mxu0 %v18768_v5  ;;  %v11814_v31 = vld [vmem:[%s22449_s4 + $0x190] sm:$0xf]  ;;  %v12327_v29 = vor.u32 %v14346_v14, %v12326_v61 }
 0x50a   :  { %v11815_v12 = vor.u32 %v14218_v60, %v11814_v31  ;;  %8089 = vmatpush.bf16.msra.mxu1 %v12103_v17  ;;  %v12070_v27 = vld [vmem:[%s22449_s4 + $0x390] sm:$0xf] }
 0x50b   :  { %7909 = vmatmul.bf16.gmra.mxu2 %v18778_v34  ;;  %v7651_v50 = vpop.f32.mrf.mxu1  ;;  %v14282_v52 = vld [vmem:[%s22449_s4 + $0x3ac] sm:$0xf0] }
 0x50c   :  { %8119 = vmatpush.bf16.msra.mxu2 %v12327_v29  ;;  %8061 = vmatpush.bf16.msra.mxu0 %v11815_v12  ;;  %v12071_v61 = vor.u32 %v14282_v52, %v12070_v27  ;;  %v14338_v17 = vld [vmem:[%s22449_s4 + $0x56c] sm:$0xf0] }
 0x50d   :  { %v7678_v3 = vpop.f32.mrf.mxu2  ;;  %v11782_v14 = vld [vmem:[%s22449_s4 + $0x150] sm:$0xf] }
 0x50e   :  { %v7622_v51 = vpop.f32.mrf.mxu0  ;;  %v7679_v23 = vadd.f32 %v7678_v3, %v7650_v45  ;;  %v12294_v45 = vld [vmem:[%s22449_s4 + $0x550] sm:$0xf]  ;;  %8090 = vmatpush.bf16.msra.mxu1 %v12071_v61 }
 0x50f   :  { %7880 = vmatmul.bf16.gmra.mxu1 %v18776_v47  ;;  %7938 = vmatmul.bf16.gmra.mxu3 %v18780_v37  ;;  %v7707_v11 = vpop.f32.mrf.mxu3  ;;  %v7652_v63 = vadd.f32 %v7651_v50, %v7622_v51  ;;  %v14210_v31 = vld [vmem:[%s22449_s4 + $0x16c] sm:$0xf0]  ;;  %v12295_v51 = vor.u32 %v14338_v17, %v12294_v45 }
 0x510   :  { %v20383_v42 = vadd.f32 %v7707_v11, %v7679_v23  ;;  %v11783_v29 = vor.u32 %v14210_v31, %v11782_v14  ;;  %v12550_v12 = vld [vmem:[%s22449_s4 + $0x750] sm:$0xf] }
 0x511   :  { %v12551_v22 = vor.u32 %v14402_v36, %v12550_v12  ;;  %8120 = vmatpush.bf16.msra.mxu2 %v12295_v51  ;;  %v12262_v45 = vld [vmem:[%s22449_s4 + $0x510] sm:$0xf] }
 0x512   :  { %8062 = vmatpush.bf16.msra.mxu0 %v11783_v29  ;;  %v14330_v17 = vld [vmem:[%s22449_s4 + $0x52c] sm:$0xf0] }
 0x513   :  { %v7750_v50 = vpop.f32.mrf.mxu1  ;;  %8149 = vmatpush.bf16.msra.mxu3 %v12551_v22  ;;  %v11750_v14 = vld [vmem:[%s22449_s4 + $0x110] sm:$0xf]  ;;  %v12263_v51 = vor.u32 %v14330_v17, %v12262_v45 }
 0x514   :  { %v14202_v31 = vld [vmem:[%s22449_s4 + $0x12c] sm:$0xf0] }
 0x515   :  { %v7680_v60 = vpop.f32.mrf.mxu2  ;;  %v11751_v29 = vor.u32 %v14202_v31, %v11750_v14  ;;  %v12518_v12 = vld [vmem:[%s22449_s4 + $0x710] sm:$0xf]  ;;  %8121 = vmatpush.bf16.msra.mxu2 %v12263_v51 }
 0x516   :  { %v7721_v3 = vpop.f32.mrf.mxu0  ;;  %v7681_v33 = vadd.f32 %v7680_v60, %v7652_v63  ;;  %v14274_v63 = vld [vmem:[%s22449_s4 + $0x36c] sm:$0xf0] }
 0x517   :  { %v7709_v23 = vpop.f32.mrf.mxu3  ;;  %v7722_v11 = vadd.f32 %v7721_v3, %v20235_v26  ;;  %v12038_v26 = vld [vmem:[%s22449_s4 + $0x350] sm:$0xf]  ;;  %8063 = vmatpush.bf16.msra.mxu0 %v11751_v29 }
 0x518   :  { %v20410_v27 = vadd.f32 %v7709_v23, %v7681_v33  ;;  %v12039_v61 = vor.u32 %v14274_v63, %v12038_v26  ;;  %v14394_v36 = vld [vmem:[%s22449_s4 + $0x72c] sm:$0xf0]  ;;  %v9088_v63 = vperm.slane %v19178_v19, 2 }
 0x519   :  { %v7751_v52 = vadd.f32 %v7750_v50, %v7722_v11  ;;  %7952 = vmatmul.bf16.vlgmr.msrb.gmra.mxu0 %v18854_v28  ;;  %v12519_v22 = vor.u32 %v14394_v36, %v12518_v12  ;;  %v12006_v14 = vld [vmem:[%s22449_s4 + $0x310] sm:$0xf] }
 0x51a   :  { %8091 = vmatpush.bf16.msra.mxu1 %v12039_v61  ;;  %v14322_v31 = vld [vmem:[%s22449_s4 + $0x4ec] sm:$0xf0] }
 0x51b   :  { %8010 = vmatmul.bf16.vlgmr.msrb.gmra.mxu2 %v18864_v32  ;;  %v7752_v50 = vpop.f32.mrf.mxu1  ;;  %8150 = vmatpush.bf16.msra.mxu3 %v12519_v22 }
 0x51d   :  { %v7779_v60 = vpop.f32.mrf.mxu2 }
 0x51e   :  { %v7723_v3 = vpop.f32.mrf.mxu0  ;;  %v7780_v33 = vadd.f32 %v7779_v60, %v7751_v52  ;;  %v14266_v52 = vld [vmem:[%s22449_s4 + $0x32c] sm:$0xf0] }
 0x51f   :  { %7981 = vmatmul.bf16.vlgmr.msrb.gmra.mxu1 %v18862_v56  ;;  %8039 = vmatmul.bf16.vlgmr.msrb.gmra.mxu3 %v18866_v41  ;;  %v7808_v23 = vpop.f32.mrf.mxu3  ;;  %v7724_v11 = vadd.f32 %v7723_v3, %v20265_v35  ;;  %v12230_v35 = vld [vmem:[%s22449_s4 + $0x4d0] sm:$0xf]  ;;  %v12007_v61 = vor.u32 %v14266_v52, %v12006_v14  ;;  %v9096_v52 = vperm.slane %v19461_v1, 2 }
 0x520   :  { %v7809_v26 = vadd.f32 %v7808_v23, %v7780_v33  ;;  %v11718_v60 = vld [vmem:[%s22449_s4 + $0xd0] sm:$0xf]  ;;  %v12231_v12 = vor.u32 %v14322_v31, %v12230_v35 }
 0x521   :  { %v7753_v45 = vadd.f32 %v7752_v50, %v7724_v11  ;;  %v14194_v3 = vld [vmem:[%s22449_s4 + $0xec] sm:$0xf0]  ;;  %8092 = vmatpush.bf16.msra.mxu1 %v12007_v61  ;;  %v22535_v61 = vld [vmem:[#allocation15_spill] sm:$0xff] }
 0x522   :  { %v9216_v17 = vadd.f32 %v9088_v63, %v7809_v26  ;;  %v11719_v36 = vor.u32 %v14194_v3, %v11718_v60  ;;  %v12486_v33 = vld [vmem:[%s22449_s4 + $0x6d0] sm:$0xf]  ;;  %8122 = vmatpush.bf16.msra.mxu2 %v12231_v12 }
 0x523   :  { %v14386_v23 = vld [vmem:[%s22449_s4 + $0x6ec] sm:$0xf0]  ;;  %v7755_v26 = vpop.f32.mrf.mxu1 }
 0x524   :  { %14708 = vtanh.f32 %v9216_v17  ;;  %v12487_v63 = vor.u32 %v14386_v23, %v12486_v33  ;;  %v20468_v17 = vperm.slane %v19947_v55, 2  ;;  %8064 = vmatpush.bf16.msra.mxu0 %v11719_v36  ;;  %v11974_v55 = vld [vmem:[%s22449_s4 + $0x2d0] sm:$0xf] }
 0x525   :  { %v7781_v51 = vpop.f32.mrf.mxu2  ;;  %v14258_v60 = vld [vmem:[%s22449_s4 + $0x2ec] sm:$0xf0] }
 0x526   :  { %v7726_v29 = vpop.f32.mrf.mxu0  ;;  %v7782_v11 = vadd.f32 %v7781_v51, %v7753_v45  ;;  %8151 = vmatpush.bf16.msra.mxu3 %v12487_v63  ;;  %v12198_v3 = vld [vmem:[%s22449_s4 + $0x490] sm:$0xf]  ;;  %v11975_v51 = vor.u32 %v14258_v60, %v11974_v55 }
 0x527   :  { %v7810_v50 = vpop.f32.mrf.mxu3  ;;  %v7727_v22 = vadd.f32 %v7726_v29, %v20295_v2  ;;  %v14314_v29 = vld [vmem:[%s22449_s4 + $0x4ac] sm:$0xf0] }
 0x528   :  { %v7811_v14 = vadd.f32 %v7810_v50, %v7782_v11  ;;  %v11686_v12 = vld [vmem:[%s22449_s4 + $0x90] sm:$0xf]  ;;  %v12199_v11 = vor.u32 %v14314_v29, %v12198_v3  ;;  %8093 = vmatpush.bf16.msra.mxu1 %v11975_v51  ;;  %v9104_v3 = vperm.slane %v19495_v43, 2 }
 0x529   :  { %v7756_v35 = vadd.f32 %v7755_v26, %v7727_v22  ;;  %7957 = vmatmul.bf16.gmra.mxu0 %v18915_v30  ;;  %v14186_v36 = vld [vmem:[%s22449_s4 + $0xac] sm:$0xf0] }
 0x52a   :  { %v14709_v45 = vpop.eup %14708  ;;  %v9224_v31 = vadd.f32 %v9096_v52, %v7811_v14  ;;  %v11687_v50 = vor.u32 %v14186_v36, %v11686_v12  ;;  %v12454_v22 = vld [vmem:[%s22449_s4 + $0x690] sm:$0xf]  ;;  %8123 = vmatpush.bf16.msra.mxu2 %v12199_v11 }
 0x52b   :  { %8015 = vmatmul.bf16.gmra.mxu2 %v18927_v6  ;;  %v9362_v2 = vmul.f32 %v14709_v45, %v20468_v17  ;;  %v14378_v26 = vld [vmem:[%s22449_s4 + $0x6ac] sm:$0xf0] }
 0x52c   :  { %14710 = vtanh.f32 %v9224_v31  ;;  %v7757_v31 = vpop.f32.mrf.mxu1  ;;  %v12455_v55 = vor.u32 %v14378_v26, %v12454_v22  ;;  %8065 = vmatpush.bf16.msra.mxu0 %v11687_v50  ;;  %v14306_v51 = vld [vmem:[%s22449_s4 + $0x46c] sm:$0xf0] }
 0x52d   :  { %v7784_v33 = vpop.f32.mrf.mxu2  ;;  %v20501_v63 = vadd.f32 %v20012_v18, %v9362_v2  ;;  %v11942_v18 = vld [vmem:[%s22449_s4 + $0x290] sm:$0xf] }
 0x52e   :  { %v7728_v23 = vpop.f32.mrf.mxu0  ;;  %v7785_v14 = vadd.f32 %v7784_v33, %v7756_v35  ;;  %8152 = vmatpush.bf16.msra.mxu3 %v12455_v55  ;;  %v12166_v35 = vld [vmem:[%s22449_s4 + $0x450] sm:$0xf] }
 0x52f   :  { %7986 = vmatmul.bf16.gmra.mxu1 %v18923_v46  ;;  %8044 = vmatmul.bf16.gmra.mxu3 %v22535_v61  ;;  %v7813_v52 = vpop.f32.mrf.mxu3  ;;  %v7729_v45 = vadd.f32 %v7728_v23, %v20321_v39  ;;  %v14250_v39 = vld [vmem:[%s22449_s4 + $0x2ac] sm:$0xf0]  ;;  %v12167_v22 = vor.u32 %v14306_v51, %v12166_v35 }
 0x530   :  { %v7814_v60 = vadd.f32 %v7813_v52, %v7785_v14  ;;  %v11943_v2 = vor.u32 %v14250_v39, %v11942_v18  ;;  %v11654_v33 = vld [vmem:[%s22449_s4 + $0x50] sm:$0xf]  ;;  %v9112_v18 = vperm.slane %v19527_v58, 2 }
 0x531   :  { %v7758_v29 = vadd.f32 %v7757_v31, %v7729_v45  ;;  %v14178_v23 = vld [vmem:[%s22449_s4 + $0x6c] sm:$0xf0]  ;;  %8124 = vmatpush.bf16.msra.mxu2 %v12167_v22 }
 0x532   :  { %v14711_v12 = vpop.eup %14710  ;;  %v9232_v36 = vadd.f32 %v9104_v3, %v7814_v60  ;;  %v11655_v26 = vor.u32 %v14178_v23, %v11654_v33  ;;  %v12422_v14 = vld [vmem:[%s22449_s4 + $0x650] sm:$0xf]  ;;  %8094 = vmatpush.bf16.msra.mxu1 %v11943_v2 }
 0x533   :  { %v9370_v61 = vmul.f32 %v14711_v12, %v20468_v17  ;;  %v14370_v52 = vld [vmem:[%s22449_s4 + $0x66c] sm:$0xf0] }
 0x534   :  { %14712 = vtanh.f32 %v9232_v36  ;;  %v7760_v3 = vpop.f32.mrf.mxu1  ;;  %v12423_v12 = vor.u32 %v14370_v52, %v12422_v14  ;;  %8066 = vmatpush.bf16.msra.mxu0 %v11655_v26  ;;  %v14242_v35 = vld [vmem:[%s22449_s4 + $0x26c] sm:$0xf0] }
 0x535   :  { %v7786_v11 = vpop.f32.mrf.mxu2  ;;  %v20531_v45 = vadd.f32 %v20019_v48, %v9370_v61  ;;  %v12134_v2 = vld [vmem:[%s22449_s4 + $0x410] sm:$0xf] }
 0x536   :  { %v7731_v50 = vpop.f32.mrf.mxu0  ;;  %v7787_v31 = vadd.f32 %v7786_v11, %v7758_v29  ;;  %8153 = vmatpush.bf16.msra.mxu3 %v12423_v12  ;;  %v11910_v29 = vld [vmem:[%s22449_s4 + $0x250] sm:$0xf] }
 0x537   :  { %v7815_v55 = vpop.f32.mrf.mxu3  ;;  %v7732_v60 = vadd.f32 %v7731_v50, %v20351_v21  ;;  %v11911_v51 = vor.u32 %v14242_v35, %v11910_v29  ;;  %v14298_v33 = vld [vmem:[%s22449_s4 + $0x42c] sm:$0xf0] }
 0x538   :  { %v7816_v36 = vadd.f32 %v7815_v55, %v7787_v31  ;;  %v11622_v23 = vld [vmem:[%s22449_s4 + $0x10] sm:$0xf]  ;;  %v12135_v26 = vor.u32 %v14298_v33, %v12134_v2 }
 0x539   :  { %v7761_v39 = vadd.f32 %v7760_v3, %v7732_v60  ;;  %7962 = vmatmul.bf16.gmra.mxu0 %v19025_v16  ;;  %v14170_v11 = vld [vmem:[%s22449_s4 + $0x2c] sm:$0xf0]  ;;  %8095 = vmatpush.bf16.msra.mxu1 %v11911_v51 }
 0x53a   :  { %v14713_v48 = vpop.eup %14712  ;;  %v9240_v61 = vadd.f32 %v9112_v18, %v7816_v36  ;;  %v11623_v14 = vor.u32 %v14170_v11, %v11622_v23  ;;  %v12390_v52 = vld [vmem:[%s22449_s4 + $0x610] sm:$0xf]  ;;  %8125 = vmatpush.bf16.msra.mxu2 %v12135_v26 }
 0x53b   :  { %8020 = vmatmul.bf16.gmra.mxu2 %v22522_v7  ;;  %v9378_v21 = vmul.f32 %v14713_v48, %v20468_v17  ;;  %v14362_v31 = vld [vmem:[%s22449_s4 + $0x62c] sm:$0xf0] }
 0x53c   :  { %14714 = vtanh.f32 %v9240_v61  ;;  %v7762_v36 = vpop.f32.mrf.mxu1  ;;  %v12391_v18 = vor.u32 %v14362_v31, %v12390_v52  ;;  %8067 = vmatpush.bf16.msra.mxu0 %v11623_v14  ;;  %v11878_v48 = vld [vmem:[%s22449_s4 + $0x210] sm:$0xf] }
 0x53d   :  { %v7789_v50 = vpop.f32.mrf.mxu2  ;;  %v20565_v55 = vadd.f32 %v20069_v24, %v9378_v21  ;;  %v14234_v61 = vld [vmem:[%s22449_s4 + $0x22c] sm:$0xf0]  ;;  %v9120_v24 = vperm.slane %v19564_v15, 2 }
 0x53e   :  { %v7733_v22 = vpop.f32.mrf.mxu0  ;;  %v7790_v60 = vadd.f32 %v7789_v50, %v7761_v39  ;;  %8154 = vmatpush.bf16.msra.mxu3 %v12391_v18  ;;  %v11879_v21 = vor.u32 %v14234_v61, %v11878_v48  ;;  %v13382_v51 = vld [vmem:[%s22449_s4 + $0xdd0] sm:$0xf] }
 0x53f   :  { %7991 = vmatmul.bf16.gmra.mxu1 %v22521_v59  ;;  %8049 = vmatmul.bf16.gmra.mxu3 %v22524_v54  ;;  %v7818_v3 = vpop.f32.mrf.mxu3  ;;  %v7734_v12 = vadd.f32 %v7733_v22, %v20353_v57  ;;  %v14610_v33 = vld [vmem:[%s22449_s4 + $0xdec] sm:$0xf0] }
 0x540   :  { %v7819_v29 = vadd.f32 %v7818_v3, %v7790_v60  ;;  %8096 = vmatpush.bf16.msra.mxu1 %v11879_v21  ;;  %v12870_v23 = vld [vmem:[%s22449_s4 + $0x9d0] sm:$0xf]  ;;  %v13383_v11 = vor.u32 %v14610_v33, %v13382_v51 }
 0x541   :  { %v7763_v39 = vadd.f32 %v7762_v36, %v7734_v12  ;;  %v14482_v50 = vld [vmem:[%s22449_s4 + $0x9ec] sm:$0xf0] }
 0x542   :  { %v14715_v57 = vpop.eup %14714  ;;  %v9248_v35 = vadd.f32 %v9120_v24, %v7819_v29  ;;  %v13638_v22 = vld [vmem:[%s22449_s4 + $0xfd0] sm:$0xf]  ;;  %v12871_v31 = vor.u32 %v14482_v50, %v12870_v23  ;;  %8234 = vmatpush.bf16.msrb.mxu2 %v13383_v11  ;;  %v9128_v23 = vperm.slane %v19599_v49, 2 }
 0x543   :  { %v9386_v2 = vmul.f32 %v14715_v57, %v20468_v17  ;;  %v14674_v26 = vld [vmem:[%s22449_s4 + $0xfec] sm:$0xf0] }
 0x544   :  { %14716 = vtanh.f32 %v9248_v35  ;;  %v13639_v60 = vor.u32 %v14674_v26, %v13638_v22  ;;  %v13126_v3 = vld [vmem:[%s22449_s4 + $0xbd0] sm:$0xf]  ;;  %v7765_v24 = vpop.f32.mrf.mxu1  ;;  %8176 = vmatpush.bf16.msrb.mxu0 %v12871_v31 }
 0x545   :  { %v7791_v14 = vpop.f32.mrf.mxu2  ;;  %v14546_v12 = vld [vmem:[%s22449_s4 + $0xbec] sm:$0xf0]  ;;  %v20604_v18 = vadd.f32 %v20092_v10, %v9386_v2 }
 0x546   :  { %v7736_v52 = vpop.f32.mrf.mxu0  ;;  %v13350_v36 = vld [vmem:[%s22449_s4 + $0xd90] sm:$0xf]  ;;  %v7792_v48 = vadd.f32 %v7791_v14, %v7763_v39  ;;  %v13127_v21 = vor.u32 %v14546_v12, %v13126_v3  ;;  %8263 = vmatpush.bf16.msrb.mxu3 %v13639_v60  ;;  %v22536_v3 = vld [vmem:[#allocation19_spill] sm:$0xff] }
 0x547   :  { %v7820_v61 = vpop.f32.mrf.mxu3  ;;  %v7737_v29 = vadd.f32 %v7736_v52, %v20383_v42  ;;  %v14602_v57 = vld [vmem:[%s22449_s4 + $0xdac] sm:$0xf0] }
 0x548   :  { %v12838_v35 = vld [vmem:[%s22449_s4 + $0x990] sm:$0xf]  ;;  %v13351_v39 = vor.u32 %v14602_v57, %v13350_v36  ;;  %v7821_v33 = vadd.f32 %v7820_v61, %v7792_v48  ;;  %8205 = vmatpush.bf16.msrb.mxu1 %v13127_v21 }
 0x549   :  { %v14474_v10 = vld [vmem:[%s22449_s4 + $0x9ac] sm:$0xf0]  ;;  %v7766_v11 = vadd.f32 %v7765_v24, %v7737_v29  ;;  %7967 = vmatmul.bf16.gmra.mxu0 %v19111_v62 }
 0x54a   :  { %v12839_v2 = vor.u32 %v14474_v10, %v12838_v35  ;;  %v13606_v42 = vld [vmem:[%s22449_s4 + $0xf90] sm:$0xf]  ;;  %v14717_v52 = vpop.eup %14716  ;;  %v9256_v31 = vadd.f32 %v9128_v23, %v7821_v33  ;;  %8235 = vmatpush.bf16.msrb.mxu2 %v13351_v39 }
 0x54b   :  { %v14666_v51 = vld [vmem:[%s22449_s4 + $0xfac] sm:$0xf0]  ;;  %8025 = vmatmul.bf16.gmra.mxu2 %v19115_v38  ;;  %v9394_v60 = vmul.f32 %v14717_v52, %v20468_v17 }
 0x54c   :  { %v13607_v50 = vor.u32 %v14666_v51, %v13606_v42  ;;  %v13094_v22 = vld [vmem:[%s22449_s4 + $0xb90] sm:$0xf]  ;;  %14718 = vtanh.f32 %v9256_v31  ;;  %8177 = vmatpush.bf16.msrb.mxu0 %v12839_v2  ;;  %v7767_v23 = vpop.f32.mrf.mxu1 }
 0x54d   :  { %v14538_v26 = vld [vmem:[%s22449_s4 + $0xbac] sm:$0xf0]  ;;  %v7794_v57 = vpop.f32.mrf.mxu2  ;;  %v20653_v2 = vadd.f32 %v20168_v53, %v9394_v60 }
 0x54e   :  { %v13095_v14 = vor.u32 %v14538_v26, %v13094_v22  ;;  %v13318_v12 = vld [vmem:[%s22449_s4 + $0xd50] sm:$0xf]  ;;  %8264 = vmatpush.bf16.msrb.mxu3 %v13607_v50  ;;  %v7738_v35 = vpop.f32.mrf.mxu0  ;;  %v7795_v42 = vadd.f32 %v7794_v57, %v7766_v11  ;;  %v9136_v50 = vperm.slane %v19657_v4, 2 }
 0x54f   :  { %7996 = vmatmul.bf16.gmra.mxu1 %v19113_v8  ;;  %8054 = vmatmul.bf16.gmra.mxu3 %v22536_v3  ;;  %v14594_v36 = vld [vmem:[%s22449_s4 + $0xd6c] sm:$0xf0]  ;;  %v7739_v33 = vadd.f32 %v7738_v35, %v20410_v27 }
 0x550   :  { %v12806_v48 = vld [vmem:[%s22449_s4 + $0x950] sm:$0xf]  ;;  %v13319_v61 = vor.u32 %v14594_v36, %v13318_v12  ;;  %8206 = vmatpush.bf16.msrb.mxu1 %v13095_v14  ;;  %v7823_v51 = vpop.f32.mrf.mxu3 }
 0x551   :  { %v14466_v29 = vld [vmem:[%s22449_s4 + $0x96c] sm:$0xf0]  ;;  %v7824_v22 = vadd.f32 %v7823_v51, %v7795_v42  ;;  %v7768_v26 = vadd.f32 %v7767_v23, %v7739_v33 }
 0x552   :  { %v13574_v24 = vld [vmem:[%s22449_s4 + $0xf50] sm:$0xf]  ;;  %v12807_v10 = vor.u32 %v14466_v29, %v12806_v48  ;;  %8236 = vmatpush.bf16.msrb.mxu2 %v13319_v61  ;;  %v14719_v12 = vpop.eup %14718 }
 0x553   :  { %v14658_v21 = vld [vmem:[%s22449_s4 + $0xf6c] sm:$0xf0]  ;;  %v9264_v36 = vadd.f32 %v9136_v50, %v7824_v22  ;;  %v9144_v22 = vperm.slane %v19707_v40, 2 }
 0x554   :  { %v13575_v39 = vor.u32 %v14658_v21, %v13574_v24  ;;  %8178 = vmatpush.bf16.msrb.mxu0 %v12807_v10  ;;  %v13062_v14 = vld [vmem:[%s22449_s4 + $0xb50] sm:$0xf]  ;;  %v9402_v21 = vmul.f32 %v14719_v12, %v20468_v17  ;;  %v7866_v33 = vpop.f32.mrf.mxu1 }
 0x555   :  { %v14530_v53 = vld [vmem:[%s22449_s4 + $0xb6c] sm:$0xf0]  ;;  %14720 = vtanh.f32 %v9264_v36  ;;  %v7796_v35 = vpop.f32.mrf.mxu2 }
 0x556   :  { %8265 = vmatpush.bf16.msrb.mxu3 %v13575_v39  ;;  %v13286_v27 = vld [vmem:[%s22449_s4 + $0xd10] sm:$0xf]  ;;  %v13063_v11 = vor.u32 %v14530_v53, %v13062_v14  ;;  %v7837_v10 = vpop.f32.mrf.mxu0  ;;  %v20683_v39 = vadd.f32 %v20199_v0, %v9402_v21  ;;  %v7797_v42 = vadd.f32 %v7796_v35, %v7768_v26 }
 0x557   :  { %v14586_v52 = vld [vmem:[%s22449_s4 + $0xd2c] sm:$0xf0]  ;;  %v7867_v23 = vadd.f32 %v7866_v33, %v7837_v10 }
 0x558   :  { %v12774_v31 = vld [vmem:[%s22449_s4 + $0x910] sm:$0xf]  ;;  %v13287_v48 = vor.u32 %v14586_v52, %v13286_v27  ;;  %8207 = vmatpush.bf16.msrb.mxu1 %v13063_v11  ;;  %v7825_v51 = vpop.f32.mrf.mxu3 }
 0x559   :  { %v14458_v60 = vld [vmem:[%s22449_s4 + $0x92c] sm:$0xf0]  ;;  %v7826_v50 = vadd.f32 %v7825_v51, %v7797_v42  ;;  %8068 = vmatmul.bf16.vlgmr.msra.gmra.mxu0 %v18438_v13 }
 0x55a   :  { %v12775_v61 = vor.u32 %v14458_v60, %v12774_v31  ;;  %v13542_v29 = vld [vmem:[%s22449_s4 + $0xf10] sm:$0xf]  ;;  %8237 = vmatpush.bf16.msrb.mxu2 %v13287_v48 }
 0x55b   :  { %v14650_v24 = vld [vmem:[%s22449_s4 + $0xf2c] sm:$0xf0]  ;;  %v14721_v26 = vpop.eup %14720  ;;  %v9272_v27 = vadd.f32 %v9144_v22, %v7826_v50  ;;  %8126 = vmatmul.bf16.vlgmr.msra.gmra.mxu2 %v18457_v9 }
 0x55c   :  { %v13543_v57 = vor.u32 %v14650_v24, %v13542_v29  ;;  %8179 = vmatpush.bf16.msrb.mxu0 %v12775_v61  ;;  %v13030_v14 = vld [vmem:[%s22449_s4 + $0xb10] sm:$0xf]  ;;  %v9410_v11 = vmul.f32 %v14721_v26, %v20468_v17  ;;  %v7868_v51 = vpop.f32.mrf.mxu1 }
 0x55d   :  { %v14522_v53 = vld [vmem:[%s22449_s4 + $0xb2c] sm:$0xf0]  ;;  %14722 = vtanh.f32 %v9272_v27  ;;  %v7895_v29 = vpop.f32.mrf.mxu2 }
 0x55e   :  { %8266 = vmatpush.bf16.msrb.mxu3 %v13543_v57  ;;  %v13031_v0 = vor.u32 %v14522_v53, %v13030_v14  ;;  %v13254_v52 = vld [vmem:[%s22449_s4 + $0xcd0] sm:$0xf]  ;;  %v7839_v24 = vpop.f32.mrf.mxu0  ;;  %v20716_v35 = vadd.f32 %v20233_v44, %v9410_v11  ;;  %v7896_v10 = vadd.f32 %v7895_v29, %v7867_v23 }
 0x55f   :  { %8097 = vmatmul.bf16.vlgmr.msra.gmra.mxu1 %v18449_v20  ;;  %8155 = vmatmul.bf16.vlgmr.msra.gmra.mxu3 %v18465_v25  ;;  %v14578_v31 = vld [vmem:[%s22449_s4 + $0xcec] sm:$0xf0]  ;;  %v7869_v33 = vadd.f32 %v7868_v51, %v7839_v24 }
 0x560   :  { %8208 = vmatpush.bf16.msrb.mxu1 %v13031_v0  ;;  %v12742_v60 = vld [vmem:[%s22449_s4 + $0x8d0] sm:$0xf]  ;;  %v13255_v12 = vor.u32 %v14578_v31, %v13254_v52 }
 0x561   :  { %v14450_v36 = vld [vmem:[%s22449_s4 + $0x8ec] sm:$0xf0]  ;;  %v7924_v42 = vpop.f32.mrf.mxu3 }
 0x562   :  { %v13510_v48 = vld [vmem:[%s22449_s4 + $0xed0] sm:$0xf]  ;;  %v12743_v21 = vor.u32 %v14450_v36, %v12742_v60  ;;  %8238 = vmatpush.bf16.msrb.mxu2 %v13255_v12  ;;  %v20718_v50 = vadd.f32 %v7924_v42, %v7896_v10 }
 0x563   :  { %v14642_v61 = vld [vmem:[%s22449_s4 + $0xeec] sm:$0xf0]  ;;  %v14723_v27 = vpop.eup %14722 }
 0x564   :  { %v13511_v57 = vor.u32 %v14642_v61, %v13510_v48  ;;  %8180 = vmatpush.bf16.msrb.mxu0 %v12743_v21  ;;  %v12998_v22 = vld [vmem:[%s22449_s4 + $0xad0] sm:$0xf]  ;;  %v9418_v12 = vmul.f32 %v14723_v27, %v20468_v17 }
 0x565   :  { %v14514_v14 = vld [vmem:[%s22449_s4 + $0xaec] sm:$0xf0]  ;;  %v7897_v48 = vpop.f32.mrf.mxu2 }
 0x566   :  { %8267 = vmatpush.bf16.msrb.mxu3 %v13511_v57  ;;  %v13222_v44 = vld [vmem:[%s22449_s4 + $0xc90] sm:$0xf]  ;;  %v12999_v23 = vor.u32 %v14514_v14, %v12998_v22  ;;  %v7842_v61 = vpop.f32.mrf.mxu0  ;;  %v7898_v21 = vadd.f32 %v7897_v48, %v7869_v33  ;;  %v22538_v22 = vld [vmem:[#allocation2_spill] sm:$0xff]  ;;  %v22541_v33 = vld [vmem:[#allocation5_spill] sm:$0xff] }
 0x567   :  { %v14570_v53 = vld [vmem:[%s22449_s4 + $0xcac] sm:$0xf0] }
 0x568   :  { %v12710_v0 = vld [vmem:[%s22449_s4 + $0x890] sm:$0xf]  ;;  %v13223_v11 = vor.u32 %v14570_v53, %v13222_v44  ;;  %8209 = vmatpush.bf16.msrb.mxu1 %v12999_v23  ;;  %v22539_v44 = vld [vmem:[#allocation3_spill] sm:$0xff] }
 0x569   :  { %v14442_v26 = vld [vmem:[%s22449_s4 + $0x8ac] sm:$0xf0]  ;;  %v7926_v57 = vpop.f32.mrf.mxu3  ;;  %8073 = vmatmul.bf16.gmra.mxu0 %v22538_v22 }
 0x56a   :  { %v12711_v52 = vor.u32 %v14442_v26, %v12710_v0  ;;  %v13478_v31 = vld [vmem:[%s22449_s4 + $0xe90] sm:$0xf]  ;;  %8239 = vmatpush.bf16.msrb.mxu2 %v13223_v11  ;;  %v20748_v51 = vadd.f32 %v7926_v57, %v7898_v21 }
 0x56b   :  { %v14634_v60 = vld [vmem:[%s22449_s4 + $0xeac] sm:$0xf0]  ;;  %v7871_v10 = vpop.f32.mrf.mxu1 }
 0x56c   :  { %v13479_v36 = vor.u32 %v14634_v60, %v13478_v31  ;;  %8181 = vmatpush.bf16.msrb.mxu0 %v12711_v52  ;;  %v22537_v29 = vld [vmem:[#allocation16_spill] sm:$0xff]  ;;  %v7872_v42 = vadd.f32 %v7871_v10, %v7842_v61 }
 0x56d   :  { %v20746_v24 = vadd.f32 %v22537_v29, %v9418_v12  ;;  %v12966_v17 = vld [vmem:[%s22449_s4 + $0xa90] sm:$0xf]  ;;  %v7900_v12 = vpop.f32.mrf.mxu2 }
 0x56e   :  { %8268 = vmatpush.bf16.msrb.mxu3 %v13479_v36  ;;  %v14506_v14 = vld [vmem:[%s22449_s4 + $0xaac] sm:$0xf0]  ;;  %v7844_v36 = vpop.f32.mrf.mxu0  ;;  %v7901_v29 = vadd.f32 %v7900_v12, %v7872_v42 }
 0x56f   :  { %8102 = vmatmul.bf16.gmra.mxu1 %v22539_v44  ;;  %v12967_v23 = vor.u32 %v14506_v14, %v12966_v17  ;;  %v22540_v53 = vld [vmem:[#allocation4_spill] sm:$0xff]  ;;  %8160 = vmatmul.bf16.gmra.mxu3 %v22541_v33 }
 0x570   :  { %8131 = vmatmul.bf16.gmra.mxu2 %v22540_v53  ;;  %v13190_v0 = vld [vmem:[%s22449_s4 + $0xc50] sm:$0xf] }
 0x571   :  { %8210 = vmatpush.bf16.msrb.mxu1 %v12967_v23  ;;  %v14562_v26 = vld [vmem:[%s22449_s4 + $0xc6c] sm:$0xf0]  ;;  %v7929_v21 = vpop.f32.mrf.mxu3 }
 0x572   :  { %v12678_v27 = vld [vmem:[%s22449_s4 + $0x850] sm:$0xf]  ;;  %v13191_v11 = vor.u32 %v14562_v26, %v13190_v0  ;;  %v20778_v17 = vadd.f32 %v7929_v21, %v7901_v29 }
 0x573   :  { %v14434_v52 = vld [vmem:[%s22449_s4 + $0x86c] sm:$0xf0]  ;;  %v7873_v57 = vpop.f32.mrf.mxu1 }
 0x574   :  { %v13446_v31 = vld [vmem:[%s22449_s4 + $0xe50] sm:$0xf]  ;;  %v12679_v48 = vor.u32 %v14434_v52, %v12678_v27  ;;  %8240 = vmatpush.bf16.msrb.mxu2 %v13191_v11  ;;  %v7874_v10 = vadd.f32 %v7873_v57, %v7844_v36 }
 0x575   :  { %v14626_v60 = vld [vmem:[%s22449_s4 + $0xe6c] sm:$0xf0] }
 0x576   :  { %v13447_v61 = vor.u32 %v14626_v60, %v13446_v31  ;;  %8182 = vmatpush.bf16.msrb.mxu0 %v12679_v48  ;;  %v12934_v14 = vld [vmem:[%s22449_s4 + $0xa50] sm:$0xf]  ;;  %v7902_v48 = vpop.f32.mrf.mxu2 }
 0x577   :  { %v14498_v23 = vld [vmem:[%s22449_s4 + $0xa6c] sm:$0xf0]  ;;  %v7903_v29 = vadd.f32 %v7902_v48, %v7874_v10  ;;  %v22545_v10 = vld [vmem:[#allocation9_spill] sm:$0xff]  ;;  %v11848_v48 = vld [vmem:[%s22449_s4 + $0x1f0] sm:$0xf0] }
 0x578   :  { %8269 = vmatpush.bf16.msrb.mxu3 %v13447_v61  ;;  %v13158_v42 = vld [vmem:[%s22449_s4 + $0xc10] sm:$0xf]  ;;  %v12935_v0 = vor.u32 %v14498_v23, %v12934_v14  ;;  %v7847_v61 = vpop.f32.mrf.mxu0 }
 0x579   :  { %v14554_v26 = vld [vmem:[%s22449_s4 + $0xc2c] sm:$0xf0]  ;;  %v7931_v21 = vpop.f32.mrf.mxu3 }
 0x57a   :  { %v12646_v27 = vld [vmem:[%s22449_s4 + $0x810] sm:$0xf]  ;;  %v13159_v52 = vor.u32 %v14554_v26, %v13158_v42  ;;  %8211 = vmatpush.bf16.msrb.mxu1 %v12935_v0  ;;  %v20804_v23 = vadd.f32 %v7931_v21, %v7903_v29  ;;  %v22542_v42 = vld [vmem:[#allocation6_spill] sm:$0xff]  ;;  %v12616_v29 = vld [vmem:[%s22449_s4 + $0x7f0] sm:$0xf0] }
 0x57b   :  { %v14426_v11 = vld [vmem:[%s22449_s4 + $0x82c] sm:$0xf0]  ;;  %8078 = vmatmul.bf16.gmra.mxu0 %v22542_v42  ;;  %v12104_v42 = vld [vmem:[%s22449_s4 + $0x3f0] sm:$0xf0] }
 0x57c   :  { %v12647_v31 = vor.u32 %v14426_v11, %v12646_v27  ;;  %v13414_v60 = vld [vmem:[%s22449_s4 + $0xe10] sm:$0xf]  ;;  %8241 = vmatpush.bf16.msrb.mxu2 %v13159_v52  ;;  %v7876_v57 = vpop.f32.mrf.mxu1  ;;  %v22543_v27 = vld [vmem:[#allocation7_spill] sm:$0xff] }
 0x57d   :  { %v14618_v12 = vld [vmem:[%s22449_s4 + $0xe2c] sm:$0xf0]  ;;  %v7877_v14 = vadd.f32 %v7876_v57, %v7847_v61  ;;  %v14414_v61 = vld [vmem:[%s22449_s4 + $0x7d4] sm:$0xf] }
 0x57e   :  { %v13415_v36 = vor.u32 %v14618_v12, %v13414_v60  ;;  %8183 = vmatpush.bf16.msrb.mxu0 %v12647_v31  ;;  %v12902_v26 = vld [vmem:[%s22449_s4 + $0xa10] sm:$0xf]  ;;  %v14350_v31 = vld [vmem:[%s22449_s4 + $0x5d4] sm:$0xf]  ;;  %v7905_v21 = vpop.f32.mrf.mxu2 }
 0x57f   :  { %v14490_v0 = vld [vmem:[%s22449_s4 + $0xa2c] sm:$0xf0]  ;;  %8107 = vmatmul.bf16.gmra.mxu1 %v22543_v27  ;;  %8165 = vmatmul.bf16.gmra.mxu3 %v22545_v10  ;;  %v12360_v60 = vld [vmem:[%s22449_s4 + $0x5f0] sm:$0xf0] }
 0x580   :  { %8270 = vmatpush.bf16.msrb.mxu3 %v13415_v36  ;;  %v12903_v11 = vor.u32 %v14490_v0, %v12902_v26  ;;  %v22544_v52 = vld [vmem:[#allocation8_spill] sm:$0xff]  ;;  %v12363_v36 = vor.u32 %v14350_v31, %v12360_v60  ;;  %v7849_v57 = vpop.f32.mrf.mxu0  ;;  %v12619_v0 = vor.u32 %v14414_v61, %v12616_v29 }
 0x581   :  { %8136 = vmatmul.bf16.gmra.mxu2 %v22544_v52  ;;  %v14222_v12 = vld [vmem:[%s22449_s4 + $0x1d4] sm:$0xf] }
 0x582   :  { %8212 = vmatpush.bf16.msrb.mxu1 %v12903_v11  ;;  %v11851_v26 = vor.u32 %v14222_v12, %v11848_v48  ;;  %v7906_v11 = vadd.f32 %v7905_v21, %v7877_v14  ;;  %v7934_v10 = vpop.f32.mrf.mxu3  ;;  %8350 = vmatpush.bf16.msra.mxu2 %v12363_v36  ;;  %v14286_v27 = vld [vmem:[%s22449_s4 + $0x3d4] sm:$0xf] }
 0x583   :  { %v14342_v14 = vld [vmem:[%s22449_s4 + $0x594] sm:$0xf]  ;;  %v12107_v36 = vor.u32 %v14286_v27, %v12104_v42 }
 0x584   :  { %v7878_v52 = vpop.f32.mrf.mxu1  ;;  %8292 = vmatpush.bf16.msra.mxu0 %v11851_v26  ;;  %8379 = vmatpush.bf16.msra.mxu3 %v12619_v0  ;;  %v20834_v60 = vadd.f32 %v7934_v10, %v7906_v11  ;;  %v14214_v10 = vld [vmem:[%s22449_s4 + $0x194] sm:$0xf] }
 0x585   :  { %v7879_v31 = vadd.f32 %v7878_v52, %v7849_v57  ;;  %v12328_v52 = vld [vmem:[%s22449_s4 + $0x5b0] sm:$0xf0] }
 0x586   :  { %v7907_v12 = vpop.f32.mrf.mxu2  ;;  %v11816_v61 = vld [vmem:[%s22449_s4 + $0x1b0] sm:$0xf0]  ;;  %v12331_v26 = vor.u32 %v14342_v14, %v12328_v52  ;;  %8321 = vmatpush.bf16.msra.mxu1 %v12107_v36 }
 0x587   :  { %v7908_v29 = vadd.f32 %v7907_v12, %v7879_v31  ;;  %v11819_v0 = vor.u32 %v14214_v10, %v11816_v61  ;;  %v14406_v42 = vld [vmem:[%s22449_s4 + $0x794] sm:$0xf] }
 0x588   :  { %v7852_v48 = vpop.f32.mrf.mxu0  ;;  %v12584_v27 = vld [vmem:[%s22449_s4 + $0x7b0] sm:$0xf0]  ;;  %8351 = vmatpush.bf16.msra.mxu2 %v12331_v26 }
 0x589   :  { %v12587_v33 = vor.u32 %v14406_v42, %v12584_v27  ;;  %8293 = vmatpush.bf16.msra.mxu0 %v11819_v0  ;;  %v14278_v61 = vld [vmem:[%s22449_s4 + $0x394] sm:$0xf] }
 0x58a   :  { %v7936_v21 = vpop.f32.mrf.mxu3  ;;  %v14206_v26 = vld [vmem:[%s22449_s4 + $0x154] sm:$0xf] }
 0x58b   :  { %v20860_v53 = vadd.f32 %v7936_v21, %v7908_v29  ;;  %8083 = vmatmul.bf16.gmra.mxu0 %v18768_v5  ;;  %8380 = vmatpush.bf16.msra.mxu3 %v12587_v33  ;;  %v12072_v29 = vld [vmem:[%s22449_s4 + $0x3b0] sm:$0xf0] }
 0x58c   :  { %v7881_v57 = vpop.f32.mrf.mxu1  ;;  %v14334_v33 = vld [vmem:[%s22449_s4 + $0x554] sm:$0xf]  ;;  %v12075_v21 = vor.u32 %v14278_v61, %v12072_v29 }
 0x58d   :  { %v7882_v11 = vadd.f32 %v7881_v57, %v7852_v48  ;;  %v12296_v57 = vld [vmem:[%s22449_s4 + $0x570] sm:$0xf0] }
 0x58e   :  { %v7910_v31 = vpop.f32.mrf.mxu2  ;;  %v11784_v0 = vld [vmem:[%s22449_s4 + $0x170] sm:$0xf0]  ;;  %8322 = vmatpush.bf16.msra.mxu1 %v12075_v21 }
 0x58f   :  { %8112 = vmatmul.bf16.gmra.mxu1 %v18776_v47  ;;  %8170 = vmatmul.bf16.gmra.mxu3 %v18780_v37  ;;  %v7911_v12 = vadd.f32 %v7910_v31, %v7882_v11  ;;  %v12299_v11 = vor.u32 %v14334_v33, %v12296_v57  ;;  %v11787_v31 = vor.u32 %v14206_v26, %v11784_v0  ;;  %v12040_v57 = vld [vmem:[%s22449_s4 + $0x370] sm:$0xf0] }
 0x590   :  { %v7854_v14 = vpop.f32.mrf.mxu0  ;;  %v14326_v26 = vld [vmem:[%s22449_s4 + $0x514] sm:$0xf] }
 0x591   :  { %8141 = vmatmul.bf16.gmra.mxu2 %v18778_v34  ;;  %v12264_v0 = vld [vmem:[%s22449_s4 + $0x530] sm:$0xf0]  ;;  %8294 = vmatpush.bf16.msra.mxu0 %v11787_v31 }
 0x592   :  { %v7939_v52 = vpop.f32.mrf.mxu3  ;;  %8352 = vmatpush.bf16.msra.mxu2 %v12299_v11  ;;  %v11752_v21 = vld [vmem:[%s22449_s4 + $0x130] sm:$0xf0] }
 0x593   :  { %v20866_v10 = vadd.f32 %v7939_v52, %v7911_v12  ;;  %v12552_v12 = vld [vmem:[%s22449_s4 + $0x770] sm:$0xf0] }
 0x594   :  { %v7883_v48 = vpop.f32.mrf.mxu1  ;;  %v14270_v52 = vld [vmem:[%s22449_s4 + $0x354] sm:$0xf] }
 0x595   :  { %v7884_v36 = vadd.f32 %v7883_v48, %v7854_v14  ;;  %v14398_v14 = vld [vmem:[%s22449_s4 + $0x754] sm:$0xf] }
 0x596   :  { %v7912_v42 = vpop.f32.mrf.mxu2  ;;  %v12555_v33 = vor.u32 %v14398_v14, %v12552_v12  ;;  %v12520_v31 = vld [vmem:[%s22449_s4 + $0x730] sm:$0xf0] }
 0x597   :  { %v7913_v48 = vadd.f32 %v7912_v42, %v7884_v36  ;;  %v12043_v36 = vor.u32 %v14270_v52, %v12040_v57  ;;  %v12267_v42 = vor.u32 %v14326_v26, %v12264_v0  ;;  %v9089_v0 = vperm.slane %v19178_v19, 3 }
 0x598   :  { %v7953_v27 = vpop.f32.mrf.mxu0  ;;  %8381 = vmatpush.bf16.msra.mxu3 %v12555_v33 }
 0x599   :  { %v7954_v29 = vadd.f32 %v7953_v27, %v20718_v50  ;;  %v14198_v50 = vld [vmem:[%s22449_s4 + $0x114] sm:$0xf]  ;;  %8323 = vmatpush.bf16.msra.mxu1 %v12043_v36  ;;  %8353 = vmatpush.bf16.msra.mxu2 %v12267_v42  ;;  %v20928_v36 = vld [vmem:[%s22451_s6] sm:$0xff] }
 0x59a   :  { %v7941_v61 = vpop.f32.mrf.mxu3  ;;  %v14390_v27 = vld [vmem:[%s22449_s4 + $0x714] sm:$0xf]  ;;  %v11755_v11 = vor.u32 %v14198_v50, %v11752_v21  ;;  %22546 = vst [vmem:[#allocation17_spill] sm:$0xff] %v20928_v36  ;;  %v20931_v42 = vperm.slane %v20928_v36, 3 }
 0x59b   :  { %v20914_v14 = vadd.f32 %v7941_v61, %v7913_v48  ;;  %8184 = vmatmul.bf16.vlgmr.msrb.gmra.mxu0 %v18854_v28  ;;  %v12523_v52 = vor.u32 %v14390_v27, %v12520_v31  ;;  %v14262_v27 = vld [vmem:[%s22449_s4 + $0x314] sm:$0xf] }
 0x59c   :  { %v7982_v37 = vpop.f32.mrf.mxu1  ;;  %8295 = vmatpush.bf16.msra.mxu0 %v11755_v11  ;;  %v12232_v31 = vld [vmem:[%s22449_s4 + $0x4f0] sm:$0xf0] }
 0x59d   :  { %v7983_v12 = vadd.f32 %v7982_v37, %v7954_v29  ;;  %8382 = vmatpush.bf16.msra.mxu3 %v12523_v52  ;;  %v14190_v52 = vld [vmem:[%s22449_s4 + $0xd4] sm:$0xf] }
 0x59e   :  { %v8011_v37 = vpop.f32.mrf.mxu2 }
 0x59f   :  { %8213 = vmatmul.bf16.vlgmr.msrb.gmra.mxu1 %v18862_v56  ;;  %8271 = vmatmul.bf16.vlgmr.msrb.gmra.mxu3 %v18866_v41  ;;  %v8012_v61 = vadd.f32 %v8011_v37, %v7983_v12  ;;  %v14318_v12 = vld [vmem:[%s22449_s4 + $0x4d4] sm:$0xf] }
 0x5a0   :  { %v7955_v48 = vpop.f32.mrf.mxu0  ;;  %v11720_v37 = vld [vmem:[%s22449_s4 + $0xf0] sm:$0xf0] }
 0x5a1   :  { %8242 = vmatmul.bf16.vlgmr.msrb.gmra.mxu2 %v18864_v32  ;;  %v7956_v33 = vadd.f32 %v7955_v48, %v20748_v51  ;;  %v12008_v51 = vld [vmem:[%s22449_s4 + $0x330] sm:$0xf0] }
 0x5a2   :  { %v8040_v29 = vpop.f32.mrf.mxu3  ;;  %v12011_v11 = vor.u32 %v14262_v27, %v12008_v51 }
 0x5a3   :  { %v8041_v26 = vadd.f32 %v8040_v29, %v8012_v61  ;;  %v12235_v29 = vor.u32 %v14318_v12, %v12232_v31  ;;  %v11976_v31 = vld [vmem:[%s22449_s4 + $0x2f0] sm:$0xf0] }
 0x5a4   :  { %v7984_v57 = vpop.f32.mrf.mxu1  ;;  %8324 = vmatpush.bf16.msra.mxu1 %v12011_v11  ;;  %v11688_v11 = vld [vmem:[%s22449_s4 + $0xb0] sm:$0xf0] }
 0x5a5   :  { %v7985_v50 = vadd.f32 %v7984_v57, %v7956_v33  ;;  %v9217_v21 = vadd.f32 %v9089_v0, %v8041_v26  ;;  %v11723_v33 = vor.u32 %v14190_v52, %v11720_v37  ;;  %v14382_v57 = vld [vmem:[%s22449_s4 + $0x6d4] sm:$0xf]  ;;  %8354 = vmatpush.bf16.msra.mxu2 %v12235_v29 }
 0x5a6   :  { %v8013_v48 = vpop.f32.mrf.mxu2  ;;  %v12488_v26 = vld [vmem:[%s22449_s4 + $0x6f0] sm:$0xf0] }
 0x5a7   :  { %14724 = vtanh.f32 %v9217_v21  ;;  %v14254_v0 = vld [vmem:[%s22449_s4 + $0x2d4] sm:$0xf]  ;;  %v8014_v21 = vadd.f32 %v8013_v48, %v7985_v50  ;;  %v12491_v12 = vor.u32 %v14382_v57, %v12488_v26  ;;  %8296 = vmatpush.bf16.msra.mxu0 %v11723_v33  ;;  %v9097_v26 = vperm.slane %v19461_v1, 3 }
 0x5a8   :  { %v7958_v61 = vpop.f32.mrf.mxu0  ;;  %v14310_v52 = vld [vmem:[%s22449_s4 + $0x494] sm:$0xf]  ;;  %v11979_v50 = vor.u32 %v14254_v0, %v11976_v31 }
 0x5a9   :  { %v7959_v51 = vadd.f32 %v7958_v61, %v20778_v17  ;;  %v12200_v37 = vld [vmem:[%s22449_s4 + $0x4b0] sm:$0xf0]  ;;  %8383 = vmatpush.bf16.msra.mxu3 %v12491_v12 }
 0x5aa   :  { %v8042_v27 = vpop.f32.mrf.mxu3  ;;  %v12203_v48 = vor.u32 %v14310_v52, %v12200_v37  ;;  %v14182_v17 = vld [vmem:[%s22449_s4 + $0x94] sm:$0xf]  ;;  %8325 = vmatpush.bf16.msra.mxu1 %v11979_v50  ;;  %v9105_v50 = vperm.slane %v19495_v43, 3 }
 0x5ab   :  { %v14374_v61 = vld [vmem:[%s22449_s4 + $0x694] sm:$0xf]  ;;  %v8043_v57 = vadd.f32 %v8042_v27, %v8014_v21  ;;  %8189 = vmatmul.bf16.gmra.mxu0 %v18915_v30  ;;  %v11691_v29 = vor.u32 %v14182_v17, %v11688_v11  ;;  %v22547_v21 = vld [vmem:[#allocation15_spill] sm:$0xff] }
 0x5ac   :  { %v7987_v36 = vpop.f32.mrf.mxu1  ;;  %v12456_v33 = vld [vmem:[%s22449_s4 + $0x6b0] sm:$0xf0]  ;;  %8355 = vmatpush.bf16.msra.mxu2 %v12203_v48 }
 0x5ad   :  { %v7988_v19 = vadd.f32 %v7987_v36, %v7959_v51  ;;  %v12459_v0 = vor.u32 %v14374_v61, %v12456_v33  ;;  %v14725_v31 = vpop.eup %14724  ;;  %v9225_v52 = vadd.f32 %v9097_v26, %v8043_v57  ;;  %8297 = vmatpush.bf16.msra.mxu0 %v11691_v29  ;;  %v14246_v29 = vld [vmem:[%s22449_s4 + $0x294] sm:$0xf] }
 0x5ae   :  { %v9363_v36 = vmul.f32 %v14725_v31, %v20931_v42  ;;  %v8016_v27 = vpop.f32.mrf.mxu2 }
 0x5af   :  { %8218 = vmatmul.bf16.gmra.mxu1 %v18923_v46  ;;  %8276 = vmatmul.bf16.gmra.mxu3 %v22547_v21  ;;  %14726 = vtanh.f32 %v9225_v52  ;;  %v8017_v37 = vadd.f32 %v8016_v27, %v7988_v19  ;;  %v11944_v19 = vld [vmem:[%s22449_s4 + $0x2b0] sm:$0xf0] }
 0x5b0   :  { %8384 = vmatpush.bf16.msra.mxu3 %v12459_v0  ;;  %v7960_v51 = vpop.f32.mrf.mxu0  ;;  %v20989_v12 = vadd.f32 %v20501_v63, %v9363_v36  ;;  %v14302_v63 = vld [vmem:[%s22449_s4 + $0x454] sm:$0xf] }
 0x5b1   :  { %8247 = vmatmul.bf16.gmra.mxu2 %v18927_v6  ;;  %v7961_v11 = vadd.f32 %v7960_v51, %v20804_v23  ;;  %v11947_v23 = vor.u32 %v14246_v29, %v11944_v19  ;;  %v12168_v0 = vld [vmem:[%s22449_s4 + $0x470] sm:$0xf0] }
 0x5b2   :  { %v8045_v17 = vpop.f32.mrf.mxu3  ;;  %v14174_v52 = vld [vmem:[%s22449_s4 + $0x54] sm:$0xf] }
 0x5b3   :  { %v8046_v57 = vadd.f32 %v8045_v17, %v8017_v37  ;;  %v11656_v36 = vld [vmem:[%s22449_s4 + $0x70] sm:$0xf0]  ;;  %v12171_v37 = vor.u32 %v14302_v63, %v12168_v0  ;;  %8326 = vmatpush.bf16.msra.mxu1 %v11947_v23  ;;  %v9113_v0 = vperm.slane %v19527_v58, 3 }
 0x5b4   :  { %v7989_v61 = vpop.f32.mrf.mxu1  ;;  %v11659_v17 = vor.u32 %v14174_v52, %v11656_v36  ;;  %v14294_v23 = vld [vmem:[%s22449_s4 + $0x414] sm:$0xf] }
 0x5b5   :  { %v7990_v26 = vadd.f32 %v7989_v61, %v7961_v11  ;;  %v14727_v48 = vpop.eup %14726  ;;  %v9233_v33 = vadd.f32 %v9105_v50, %v8046_v57  ;;  %v14366_v11 = vld [vmem:[%s22449_s4 + $0x654] sm:$0xf]  ;;  %8356 = vmatpush.bf16.msra.mxu2 %v12171_v37 }
 0x5b6   :  { %v9371_v31 = vmul.f32 %v14727_v48, %v20931_v42  ;;  %v8018_v27 = vpop.f32.mrf.mxu2  ;;  %v12424_v61 = vld [vmem:[%s22449_s4 + $0x670] sm:$0xf0]  ;;  %8298 = vmatpush.bf16.msra.mxu0 %v11659_v17 }
 0x5b7   :  { %14728 = vtanh.f32 %v9233_v33  ;;  %v8019_v50 = vadd.f32 %v8018_v27, %v7990_v26  ;;  %v12427_v19 = vor.u32 %v14366_v11, %v12424_v61  ;;  %v11912_v26 = vld [vmem:[%s22449_s4 + $0x270] sm:$0xf0] }
 0x5b8   :  { %v7963_v51 = vpop.f32.mrf.mxu0  ;;  %v21019_v57 = vadd.f32 %v20531_v45, %v9371_v31  ;;  %v14166_v37 = vld [vmem:[%s22449_s4 + $0x14] sm:$0xf] }
 0x5b9   :  { %v7964_v33 = vadd.f32 %v7963_v51, %v20834_v60  ;;  %8385 = vmatpush.bf16.msra.mxu3 %v12427_v19  ;;  %v14238_v60 = vld [vmem:[%s22449_s4 + $0x254] sm:$0xf] }
 0x5ba   :  { %v8047_v48 = vpop.f32.mrf.mxu3  ;;  %v11915_v27 = vor.u32 %v14238_v60, %v11912_v26  ;;  %v12136_v51 = vld [vmem:[%s22449_s4 + $0x430] sm:$0xf0] }
 0x5bb   :  { %v8048_v63 = vadd.f32 %v8047_v48, %v8019_v50  ;;  %8194 = vmatmul.bf16.gmra.mxu0 %v19025_v16  ;;  %v11624_v17 = vld [vmem:[%s22449_s4 + $0x30] sm:$0xf0]  ;;  %v12139_v50 = vor.u32 %v14294_v23, %v12136_v51  ;;  %v9121_v23 = vperm.slane %v19564_v15, 3 }
 0x5bc   :  { %v7992_v29 = vpop.f32.mrf.mxu1  ;;  %v11627_v48 = vor.u32 %v14166_v37, %v11624_v17  ;;  %8327 = vmatpush.bf16.msra.mxu1 %v11915_v27  ;;  %v14606_v27 = vld [vmem:[%s22449_s4 + $0xdd4] sm:$0xf] }
 0x5bd   :  { %v7993_v52 = vadd.f32 %v7992_v29, %v7964_v33  ;;  %v14729_v45 = vpop.eup %14728  ;;  %v9241_v31 = vadd.f32 %v9113_v0, %v8048_v63  ;;  %v14358_v33 = vld [vmem:[%s22449_s4 + $0x614] sm:$0xf]  ;;  %8357 = vmatpush.bf16.msra.mxu2 %v12139_v50 }
 0x5be   :  { %v9379_v36 = vmul.f32 %v14729_v45, %v20931_v42  ;;  %v8021_v11 = vpop.f32.mrf.mxu2  ;;  %v12392_v29 = vld [vmem:[%s22449_s4 + $0x630] sm:$0xf0]  ;;  %8299 = vmatpush.bf16.msra.mxu0 %v11627_v48 }
 0x5bf   :  { %8223 = vmatmul.bf16.gmra.mxu1 %v22521_v59  ;;  %8281 = vmatmul.bf16.gmra.mxu3 %v22524_v54  ;;  %14730 = vtanh.f32 %v9241_v31  ;;  %v8022_v63 = vadd.f32 %v8021_v11, %v7993_v52  ;;  %v12395_v60 = vor.u32 %v14358_v33, %v12392_v29  ;;  %v13384_v11 = vld [vmem:[%s22449_s4 + $0xdf0] sm:$0xf0] }
 0x5c0   :  { %v7965_v61 = vpop.f32.mrf.mxu0  ;;  %v21053_v19 = vadd.f32 %v20565_v55, %v9379_v36  ;;  %v14230_v55 = vld [vmem:[%s22449_s4 + $0x214] sm:$0xf]  ;;  %v13387_v50 = vor.u32 %v14606_v27, %v13384_v11 }
 0x5c1   :  { %8252 = vmatmul.bf16.gmra.mxu2 %v22522_v7  ;;  %v7966_v45 = vadd.f32 %v7965_v61, %v20860_v53  ;;  %8386 = vmatpush.bf16.msra.mxu3 %v12395_v60  ;;  %v11880_v53 = vld [vmem:[%s22449_s4 + $0x230] sm:$0xf0] }
 0x5c2   :  { %v8050_v0 = vpop.f32.mrf.mxu3  ;;  %v11883_v36 = vor.u32 %v14230_v55, %v11880_v53  ;;  %v14478_v61 = vld [vmem:[%s22449_s4 + $0x9d4] sm:$0xf]  ;;  %8466 = vmatpush.bf16.msrb.mxu2 %v13387_v50 }
 0x5c3   :  { %v8051_v26 = vadd.f32 %v8050_v0, %v8022_v63  ;;  %v12872_v48 = vld [vmem:[%s22449_s4 + $0x9f0] sm:$0xf0] }
 0x5c4   :  { %v7994_v31 = vpop.f32.mrf.mxu1  ;;  %v14670_v33 = vld [vmem:[%s22449_s4 + $0xfd4] sm:$0xf]  ;;  %8328 = vmatpush.bf16.msra.mxu1 %v11883_v36 }
 0x5c5   :  { %v7995_v51 = vadd.f32 %v7994_v31, %v7966_v45  ;;  %v14731_v37 = vpop.eup %14730  ;;  %v9249_v17 = vadd.f32 %v9121_v23, %v8051_v26  ;;  %v13640_v29 = vld [vmem:[%s22449_s4 + $0xff0] sm:$0xf0]  ;;  %v12875_v45 = vor.u32 %v14478_v61, %v12872_v48 }
 0x5c6   :  { %v9387_v52 = vmul.f32 %v14731_v37, %v20931_v42  ;;  %v8023_v63 = vpop.f32.mrf.mxu2  ;;  %v13643_v31 = vor.u32 %v14670_v33, %v13640_v29  ;;  %v14542_v60 = vld [vmem:[%s22449_s4 + $0xbd4] sm:$0xf]  ;;  %v9129_v33 = vperm.slane %v19599_v49, 3 }
 0x5c7   :  { %14732 = vtanh.f32 %v9249_v17  ;;  %v13128_v26 = vld [vmem:[%s22449_s4 + $0xbf0] sm:$0xf0]  ;;  %v8024_v17 = vadd.f32 %v8023_v63, %v7995_v51  ;;  %8408 = vmatpush.bf16.msrb.mxu0 %v12875_v45 }
 0x5c8   :  { %v7968_v0 = vpop.f32.mrf.mxu0  ;;  %v14598_v23 = vld [vmem:[%s22449_s4 + $0xd94] sm:$0xf]  ;;  %v21092_v37 = vadd.f32 %v20604_v18, %v9387_v52  ;;  %v13131_v27 = vor.u32 %v14542_v60, %v13128_v26  ;;  %8495 = vmatpush.bf16.msrb.mxu3 %v13643_v31 }
 0x5c9   :  { %v7969_v53 = vadd.f32 %v7968_v0, %v20866_v10  ;;  %v13352_v11 = vld [vmem:[%s22449_s4 + $0xdb0] sm:$0xf0] }
 0x5ca   :  { %v8052_v55 = vpop.f32.mrf.mxu3  ;;  %v14470_v61 = vld [vmem:[%s22449_s4 + $0x994] sm:$0xf]  ;;  %v13355_v51 = vor.u32 %v14598_v23, %v13352_v11  ;;  %8437 = vmatpush.bf16.msrb.mxu1 %v13131_v27 }
 0x5cb   :  { %v12840_v18 = vld [vmem:[%s22449_s4 + $0x9b0] sm:$0xf0]  ;;  %v8053_v48 = vadd.f32 %v8052_v55, %v8024_v17  ;;  %8199 = vmatmul.bf16.gmra.mxu0 %v19111_v62 }
 0x5cc   :  { %v7997_v36 = vpop.f32.mrf.mxu1  ;;  %v12843_v52 = vor.u32 %v14470_v61, %v12840_v18  ;;  %v14662_v10 = vld [vmem:[%s22449_s4 + $0xf94] sm:$0xf]  ;;  %8467 = vmatpush.bf16.msrb.mxu2 %v13355_v51 }
 0x5cd   :  { %v13608_v50 = vld [vmem:[%s22449_s4 + $0xfb0] sm:$0xf0]  ;;  %v7998_v29 = vadd.f32 %v7997_v36, %v7969_v53  ;;  %v14733_v60 = vpop.eup %14732  ;;  %v9257_v26 = vadd.f32 %v9129_v33, %v8053_v48 }
 0x5ce   :  { %v13611_v63 = vor.u32 %v14662_v10, %v13608_v50  ;;  %v14534_v0 = vld [vmem:[%s22449_s4 + $0xb94] sm:$0xf]  ;;  %v9395_v53 = vmul.f32 %v14733_v60, %v20931_v42  ;;  %8409 = vmatpush.bf16.msrb.mxu0 %v12843_v52  ;;  %v8026_v18 = vpop.f32.mrf.mxu2 }
 0x5cf   :  { %v13096_v45 = vld [vmem:[%s22449_s4 + $0xbb0] sm:$0xf0]  ;;  %8228 = vmatmul.bf16.gmra.mxu1 %v19113_v8  ;;  %8286 = vmatmul.bf16.gmra.mxu3 %v22536_v3  ;;  %14734 = vtanh.f32 %v9257_v26  ;;  %v8027_v48 = vadd.f32 %v8026_v18, %v7998_v29 }
 0x5d0   :  { %v13099_v31 = vor.u32 %v14534_v0, %v13096_v45  ;;  %v14590_v23 = vld [vmem:[%s22449_s4 + $0xd54] sm:$0xf]  ;;  %8496 = vmatpush.bf16.msrb.mxu3 %v13611_v63  ;;  %v7970_v51 = vpop.f32.mrf.mxu0  ;;  %v21141_v52 = vadd.f32 %v20653_v2, %v9395_v53  ;;  %v9137_v45 = vperm.slane %v19657_v4, 3 }
 0x5d1   :  { %8257 = vmatmul.bf16.gmra.mxu2 %v19115_v38  ;;  %v13320_v17 = vld [vmem:[%s22449_s4 + $0xd70] sm:$0xf0]  ;;  %v7971_v63 = vadd.f32 %v7970_v51, %v20914_v14 }
 0x5d2   :  { %v14462_v55 = vld [vmem:[%s22449_s4 + $0x954] sm:$0xf]  ;;  %v13323_v36 = vor.u32 %v14590_v23, %v13320_v17  ;;  %8438 = vmatpush.bf16.msrb.mxu1 %v13099_v31  ;;  %v8055_v33 = vpop.f32.mrf.mxu3 }
 0x5d3   :  { %v12808_v27 = vld [vmem:[%s22449_s4 + $0x970] sm:$0xf0]  ;;  %v8056_v60 = vadd.f32 %v8055_v33, %v8027_v48 }
 0x5d4   :  { %v14654_v11 = vld [vmem:[%s22449_s4 + $0xf54] sm:$0xf]  ;;  %v12811_v10 = vor.u32 %v14462_v55, %v12808_v27  ;;  %v7999_v0 = vpop.f32.mrf.mxu1  ;;  %8468 = vmatpush.bf16.msrb.mxu2 %v13323_v36 }
 0x5d5   :  { %v13576_v61 = vld [vmem:[%s22449_s4 + $0xf70] sm:$0xf0]  ;;  %v8000_v26 = vadd.f32 %v7999_v0, %v7971_v63  ;;  %v14735_v53 = vpop.eup %14734  ;;  %v9265_v36 = vadd.f32 %v9137_v45, %v8056_v60 }
 0x5d6   :  { %v13579_v50 = vor.u32 %v14654_v11, %v13576_v61  ;;  %8410 = vmatpush.bf16.msrb.mxu0 %v12811_v10  ;;  %v14526_v31 = vld [vmem:[%s22449_s4 + $0xb54] sm:$0xf]  ;;  %v9403_v51 = vmul.f32 %v14735_v53, %v20931_v42 }
 0x5d7   :  { %v13064_v2 = vld [vmem:[%s22449_s4 + $0xb70] sm:$0xf0]  ;;  %14736 = vtanh.f32 %v9265_v36 }
 0x5d8   :  { %8497 = vmatpush.bf16.msrb.mxu3 %v13579_v50  ;;  %v14582_v14 = vld [vmem:[%s22449_s4 + $0xd14] sm:$0xf]  ;;  %v13067_v29 = vor.u32 %v14526_v31, %v13064_v2  ;;  %v8028_v50 = vpop.f32.mrf.mxu2  ;;  %v8069_v48 = vpop.f32.mrf.mxu0  ;;  %v21171_v33 = vadd.f32 %v20683_v39, %v9403_v51  ;;  %v9145_v2 = vperm.slane %v19707_v40, 3 }
 0x5d9   :  { %v13288_v23 = vld [vmem:[%s22449_s4 + $0xd30] sm:$0xf0]  ;;  %v8029_v63 = vadd.f32 %v8028_v50, %v8000_v26 }
 0x5da   :  { %v14454_v17 = vld [vmem:[%s22449_s4 + $0x914] sm:$0xf]  ;;  %v13291_v27 = vor.u32 %v14582_v14, %v13288_v23  ;;  %8439 = vmatpush.bf16.msrb.mxu1 %v13067_v29  ;;  %v8057_v0 = vpop.f32.mrf.mxu3 }
 0x5db   :  { %v12776_v55 = vld [vmem:[%s22449_s4 + $0x930] sm:$0xf0]  ;;  %v8058_v31 = vadd.f32 %v8057_v0, %v8029_v63  ;;  %8300 = vmatmul.bf16.vlgmr.msra.gmra.mxu0 %v18438_v13 }
 0x5dc   :  { %v12779_v11 = vor.u32 %v14454_v17, %v12776_v55  ;;  %v14646_v61 = vld [vmem:[%s22449_s4 + $0xf14] sm:$0xf]  ;;  %8469 = vmatpush.bf16.msrb.mxu2 %v13291_v27  ;;  %v8098_v45 = vpop.f32.mrf.mxu1 }
 0x5dd   :  { %v13544_v18 = vld [vmem:[%s22449_s4 + $0xf30] sm:$0xf0]  ;;  %v8099_v60 = vadd.f32 %v8098_v45, %v8069_v48  ;;  %v14737_v26 = vpop.eup %14736  ;;  %v9273_v23 = vadd.f32 %v9145_v2, %v8058_v31 }
 0x5de   :  { %v13547_v10 = vor.u32 %v14646_v61, %v13544_v18  ;;  %8411 = vmatpush.bf16.msrb.mxu0 %v12779_v11  ;;  %v14518_v14 = vld [vmem:[%s22449_s4 + $0xb14] sm:$0xf]  ;;  %v9411_v17 = vmul.f32 %v14737_v26, %v20931_v42 }
 0x5df   :  { %v13032_v29 = vld [vmem:[%s22449_s4 + $0xb30] sm:$0xf0]  ;;  %8329 = vmatmul.bf16.vlgmr.msra.gmra.mxu1 %v18449_v20  ;;  %8387 = vmatmul.bf16.vlgmr.msra.gmra.mxu3 %v18465_v25  ;;  %14738 = vtanh.f32 %v9273_v23 }
 0x5e0   :  { %8498 = vmatpush.bf16.msrb.mxu3 %v13547_v10  ;;  %v13035_v39 = vor.u32 %v14518_v14, %v13032_v29  ;;  %v14574_v55 = vld [vmem:[%s22449_s4 + $0xcd4] sm:$0xf]  ;;  %v8127_v51 = vpop.f32.mrf.mxu2  ;;  %v8071_v10 = vpop.f32.mrf.mxu0  ;;  %v21204_v63 = vadd.f32 %v20716_v35, %v9411_v17 }
 0x5e1   :  { %8358 = vmatmul.bf16.vlgmr.msra.gmra.mxu2 %v18457_v9  ;;  %v13256_v53 = vld [vmem:[%s22449_s4 + $0xcf0] sm:$0xf0]  ;;  %v8128_v0 = vadd.f32 %v8127_v51, %v8099_v60 }
 0x5e2   :  { %8440 = vmatpush.bf16.msrb.mxu1 %v13035_v39  ;;  %v14446_v36 = vld [vmem:[%s22449_s4 + $0x8d4] sm:$0xf]  ;;  %v13259_v27 = vor.u32 %v14574_v55, %v13256_v53  ;;  %v8156_v45 = vpop.f32.mrf.mxu3 }
 0x5e3   :  { %v12744_v11 = vld [vmem:[%s22449_s4 + $0x8f0] sm:$0xf0]  ;;  %v21206_v14 = vadd.f32 %v8156_v45, %v8128_v0 }
 0x5e4   :  { %v14638_v61 = vld [vmem:[%s22449_s4 + $0xed4] sm:$0xf]  ;;  %v12747_v50 = vor.u32 %v14446_v36, %v12744_v11  ;;  %v8100_v31 = vpop.f32.mrf.mxu1  ;;  %8470 = vmatpush.bf16.msrb.mxu2 %v13259_v27 }
 0x5e5   :  { %v13512_v18 = vld [vmem:[%s22449_s4 + $0xef0] sm:$0xf0]  ;;  %v8101_v2 = vadd.f32 %v8100_v31, %v8071_v10  ;;  %v14739_v55 = vpop.eup %14738 }
 0x5e6   :  { %v13515_v48 = vor.u32 %v14638_v61, %v13512_v18  ;;  %8412 = vmatpush.bf16.msrb.mxu0 %v12747_v50  ;;  %v14510_v29 = vld [vmem:[%s22449_s4 + $0xad4] sm:$0xf]  ;;  %v9419_v61 = vmul.f32 %v14739_v55, %v20931_v42 }
 0x5e7   :  { %v13000_v39 = vld [vmem:[%s22449_s4 + $0xaf0] sm:$0xf0] }
 0x5e8   :  { %8499 = vmatpush.bf16.msrb.mxu3 %v13515_v48  ;;  %v14566_v35 = vld [vmem:[%s22449_s4 + $0xc94] sm:$0xf]  ;;  %v13003_v60 = vor.u32 %v14510_v29, %v13000_v39  ;;  %v8129_v51 = vpop.f32.mrf.mxu2  ;;  %v8074_v10 = vpop.f32.mrf.mxu0  ;;  %v21234_v50 = vadd.f32 %v20746_v24, %v9419_v61 }
 0x5e9   :  { %v13224_v26 = vld [vmem:[%s22449_s4 + $0xcb0] sm:$0xf0]  ;;  %v8130_v48 = vadd.f32 %v8129_v51, %v8101_v2  ;;  %v22549_v2 = vld [vmem:[#allocation5_spill] sm:$0xff] }
 0x5ea   :  { %v14438_v23 = vld [vmem:[%s22449_s4 + $0x894] sm:$0xf]  ;;  %v13227_v53 = vor.u32 %v14566_v35, %v13224_v26  ;;  %8441 = vmatpush.bf16.msrb.mxu1 %v13003_v60  ;;  %v8158_v0 = vpop.f32.mrf.mxu3 }
 0x5eb   :  { %v12712_v17 = vld [vmem:[%s22449_s4 + $0x8b0] sm:$0xf0]  ;;  %v21236_v29 = vadd.f32 %v8158_v0, %v8130_v48  ;;  %8305 = vmatmul.bf16.gmra.mxu0 %v22538_v22 }
 0x5ec   :  { %v12715_v36 = vor.u32 %v14438_v23, %v12712_v17  ;;  %v14630_v27 = vld [vmem:[%s22449_s4 + $0xe94] sm:$0xf]  ;;  %8471 = vmatpush.bf16.msrb.mxu2 %v13227_v53  ;;  %v8103_v45 = vpop.f32.mrf.mxu1 }
 0x5ed   :  { %v13480_v11 = vld [vmem:[%s22449_s4 + $0xeb0] sm:$0xf0]  ;;  %v8104_v31 = vadd.f32 %v8103_v45, %v8074_v10 }
 0x5ee   :  { %v13483_v18 = vor.u32 %v14630_v27, %v13480_v11  ;;  %8413 = vmatpush.bf16.msrb.mxu0 %v12715_v36  ;;  %v14502_v42 = vld [vmem:[%s22449_s4 + $0xa94] sm:$0xf] }
 0x5ef   :  { %v12968_v39 = vld [vmem:[%s22449_s4 + $0xab0] sm:$0xf0]  ;;  %8334 = vmatmul.bf16.gmra.mxu1 %v22539_v44  ;;  %8392 = vmatmul.bf16.gmra.mxu3 %v22549_v2 }
 0x5f0   :  { %8500 = vmatpush.bf16.msrb.mxu3 %v13483_v18  ;;  %v12971_v24 = vor.u32 %v14502_v42, %v12968_v39  ;;  %v22548_v35 = vld [vmem:[#allocation4_spill] sm:$0xff]  ;;  %v8076_v11 = vpop.f32.mrf.mxu0 }
 0x5f1   :  { %8363 = vmatmul.bf16.gmra.mxu2 %v22548_v35  ;;  %v14558_v60 = vld [vmem:[%s22449_s4 + $0xc54] sm:$0xf] }
 0x5f2   :  { %8442 = vmatpush.bf16.msrb.mxu1 %v12971_v24  ;;  %v13192_v26 = vld [vmem:[%s22449_s4 + $0xc70] sm:$0xf0]  ;;  %v8161_v10 = vpop.f32.mrf.mxu3 }
 0x5f3   :  { %v14430_v23 = vld [vmem:[%s22449_s4 + $0x854] sm:$0xf]  ;;  %v13195_v17 = vor.u32 %v14558_v60, %v13192_v26  ;;  %v8132_v27 = vpop.f32.mrf.mxu2 }
 0x5f4   :  { %v12680_v55 = vld [vmem:[%s22449_s4 + $0x870] sm:$0xf0]  ;;  %v8133_v51 = vadd.f32 %v8132_v27, %v8104_v31  ;;  %v8105_v48 = vpop.f32.mrf.mxu1 }
 0x5f5   :  { %v14622_v53 = vld [vmem:[%s22449_s4 + $0xe54] sm:$0xf]  ;;  %v12683_v61 = vor.u32 %v14430_v23, %v12680_v55  ;;  %8472 = vmatpush.bf16.msrb.mxu2 %v13195_v17  ;;  %v8106_v0 = vadd.f32 %v8105_v48, %v8076_v11 }
 0x5f6   :  { %v13448_v36 = vld [vmem:[%s22449_s4 + $0xe70] sm:$0xf0]  ;;  %v21266_v45 = vadd.f32 %v8161_v10, %v8133_v51 }
 0x5f7   :  { %v13451_v18 = vor.u32 %v14622_v53, %v13448_v36  ;;  %8414 = vmatpush.bf16.msrb.mxu0 %v12683_v61  ;;  %v14494_v42 = vld [vmem:[%s22449_s4 + $0xa54] sm:$0xf] }
 0x5f8   :  { %v12936_v39 = vld [vmem:[%s22449_s4 + $0xa70] sm:$0xf0]  ;;  %v8079_v61 = vpop.f32.mrf.mxu0 }
 0x5f9   :  { %8501 = vmatpush.bf16.msrb.mxu3 %v13451_v18  ;;  %v14550_v31 = vld [vmem:[%s22449_s4 + $0xc14] sm:$0xf]  ;;  %v12939_v24 = vor.u32 %v14494_v42, %v12936_v39  ;;  %v22550_v39 = vld [vmem:[#allocation6_spill] sm:$0xff] }
 0x5fa   :  { %v13160_v60 = vld [vmem:[%s22449_s4 + $0xc30] sm:$0xf0]  ;;  %v8163_v51 = vpop.f32.mrf.mxu3 }
 0x5fb   :  { %v14422_v26 = vld [vmem:[%s22449_s4 + $0x814] sm:$0xf]  ;;  %v13163_v17 = vor.u32 %v14550_v31, %v13160_v60  ;;  %8443 = vmatpush.bf16.msrb.mxu1 %v12939_v24  ;;  %v8134_v11 = vpop.f32.mrf.mxu2  ;;  %8310 = vmatmul.bf16.gmra.mxu0 %v22550_v39  ;;  %v22551_v60 = vld [vmem:[#allocation7_spill] sm:$0xff] }
 0x5fc   :  { %v12648_v23 = vld [vmem:[%s22449_s4 + $0x830] sm:$0xf0]  ;;  %v8135_v18 = vadd.f32 %v8134_v11, %v8106_v0  ;;  %v8108_v10 = vpop.f32.mrf.mxu1  ;;  %v22553_v0 = vld [vmem:[#allocation9_spill] sm:$0xff] }
 0x5fd   :  { %v12651_v55 = vor.u32 %v14422_v26, %v12648_v23  ;;  %v14614_v53 = vld [vmem:[%s22449_s4 + $0xe14] sm:$0xf]  ;;  %8473 = vmatpush.bf16.msrb.mxu2 %v13163_v17  ;;  %v8109_v48 = vadd.f32 %v8108_v10, %v8079_v61  ;;  %v12366_v17 = vld [vmem:[%s22449_s4 + $0x5d8] sm:$0xf] }
 0x5fe   :  { %v13416_v36 = vld [vmem:[%s22449_s4 + $0xe30] sm:$0xf0]  ;;  %v21292_v42 = vadd.f32 %v8163_v51, %v8135_v18  ;;  %v12622_v11 = vld [vmem:[%s22449_s4 + $0x7d8] sm:$0xf] }
 0x5ff   :  { %v13419_v27 = vor.u32 %v14614_v53, %v13416_v36  ;;  %8415 = vmatpush.bf16.msrb.mxu0 %v12651_v55  ;;  %v14486_v31 = vld [vmem:[%s22449_s4 + $0xa14] sm:$0xf]  ;;  %8339 = vmatmul.bf16.gmra.mxu1 %v22551_v60  ;;  %v14355_v55 = vld [vmem:[%s22449_s4 + $0x5f4] sm:$0xf0] }
 0x600   :  { %v12904_v24 = vld [vmem:[%s22449_s4 + $0xa30] sm:$0xf0]  ;;  %8397 = vmatmul.bf16.gmra.mxu3 %v22553_v0  ;;  %v11854_v53 = vld [vmem:[%s22449_s4 + $0x1d8] sm:$0xf]  ;;  %v12367_v36 = vor.u32 %v14355_v55, %v12366_v17  ;;  %v8081_v51 = vpop.f32.mrf.mxu0 }
 0x601   :  { %8502 = vmatpush.bf16.msrb.mxu3 %v13419_v27  ;;  %v12907_v26 = vor.u32 %v14486_v31, %v12904_v24  ;;  %v22552_v23 = vld [vmem:[#allocation8_spill] sm:$0xff]  ;;  %v14227_v27 = vld [vmem:[%s22449_s4 + $0x1f4] sm:$0xf0] }
 0x602   :  { %8368 = vmatmul.bf16.gmra.mxu2 %v22552_v23  ;;  %v14419_v61 = vld [vmem:[%s22449_s4 + $0x7f4] sm:$0xf0]  ;;  %v11855_v10 = vor.u32 %v14227_v27, %v11854_v53 }
 0x603   :  { %8444 = vmatpush.bf16.msrb.mxu1 %v12907_v26  ;;  %v12623_v31 = vor.u32 %v14419_v61, %v12622_v11  ;;  %v8166_v26 = vpop.f32.mrf.mxu3  ;;  %8582 = vmatpush.bf16.msra.mxu2 %v12367_v36  ;;  %v12110_v23 = vld [vmem:[%s22449_s4 + $0x3d8] sm:$0xf] }
 0x604   :  { %v8137_v18 = vpop.f32.mrf.mxu2  ;;  %v8110_v0 = vpop.f32.mrf.mxu1  ;;  %8524 = vmatpush.bf16.msra.mxu0 %v11855_v10  ;;  %v14291_v60 = vld [vmem:[%s22449_s4 + $0x3f4] sm:$0xf0] }
 0x605   :  { %v8138_v24 = vadd.f32 %v8137_v18, %v8109_v48  ;;  %v8111_v17 = vadd.f32 %v8110_v0, %v8081_v51  ;;  %8611 = vmatpush.bf16.msra.mxu3 %v12623_v31  ;;  %v12334_v48 = vld [vmem:[%s22449_s4 + $0x598] sm:$0xf]  ;;  %v12111_v36 = vor.u32 %v14291_v60, %v12110_v23 }
 0x606   :  { %v14347_v0 = vld [vmem:[%s22449_s4 + $0x5b4] sm:$0xf0] }
 0x607   :  { %v21322_v55 = vadd.f32 %v8166_v26, %v8138_v24  ;;  %v11822_v11 = vld [vmem:[%s22449_s4 + $0x198] sm:$0xf]  ;;  %v12335_v31 = vor.u32 %v14347_v0, %v12334_v48  ;;  %8553 = vmatpush.bf16.msra.mxu1 %v12111_v36 }
 0x608   :  { %v8084_v27 = vpop.f32.mrf.mxu0  ;;  %v14219_v61 = vld [vmem:[%s22449_s4 + $0x1b4] sm:$0xf0] }
 0x609   :  { %v11823_v24 = vor.u32 %v14219_v61, %v11822_v11  ;;  %v12590_v60 = vld [vmem:[%s22449_s4 + $0x798] sm:$0xf]  ;;  %8583 = vmatpush.bf16.msra.mxu2 %v12335_v31 }
 0x60a   :  { %v14411_v23 = vld [vmem:[%s22449_s4 + $0x7b4] sm:$0xf0] }
 0x60b   :  { %v8168_v51 = vpop.f32.mrf.mxu3  ;;  %v12591_v39 = vor.u32 %v14411_v23, %v12590_v60  ;;  %8315 = vmatmul.bf16.gmra.mxu0 %v18768_v5  ;;  %v12078_v48 = vld [vmem:[%s22449_s4 + $0x398] sm:$0xf] }
 0x60c   :  { %v8139_v53 = vpop.f32.mrf.mxu2  ;;  %v8113_v10 = vpop.f32.mrf.mxu1  ;;  %8525 = vmatpush.bf16.msra.mxu0 %v11823_v24  ;;  %v11790_v61 = vld [vmem:[%s22449_s4 + $0x158] sm:$0xf] }
 0x60d   :  { %v8140_v18 = vadd.f32 %v8139_v53, %v8111_v17  ;;  %v8114_v26 = vadd.f32 %v8113_v10, %v8084_v27  ;;  %8612 = vmatpush.bf16.msra.mxu3 %v12591_v39  ;;  %v22554_v17 = vld [vmem:[#allocation13_spill] sm:$0xff] }
 0x60e   :  { %v14283_v53 = vld [vmem:[%s22449_s4 + $0x3b4] sm:$0xf0] }
 0x60f   :  { %v21348_v2 = vadd.f32 %v8168_v51, %v8140_v18  ;;  %8344 = vmatmul.bf16.gmra.mxu1 %v18776_v47  ;;  %v12302_v27 = vld [vmem:[%s22449_s4 + $0x558] sm:$0xf]  ;;  %v12079_v11 = vor.u32 %v14283_v53, %v12078_v48 }
 0x610   :  { %8402 = vmatmul.bf16.gmra.mxu3 %v22554_v17  ;;  %v8086_v0 = vpop.f32.mrf.mxu0  ;;  %v14339_v39 = vld [vmem:[%s22449_s4 + $0x574] sm:$0xf0] }
 0x611   :  { %v14211_v18 = vld [vmem:[%s22449_s4 + $0x174] sm:$0xf0]  ;;  %v12303_v24 = vor.u32 %v14339_v39, %v12302_v27  ;;  %8554 = vmatpush.bf16.msra.mxu1 %v12079_v11 }
 0x612   :  { %8373 = vmatmul.bf16.gmra.mxu2 %v18778_v34  ;;  %v11791_v60 = vor.u32 %v14211_v18, %v11790_v61  ;;  %v12558_v23 = vld [vmem:[%s22449_s4 + $0x758] sm:$0xf] }
 0x613   :  { %v8171_v10 = vpop.f32.mrf.mxu3  ;;  %v14403_v48 = vld [vmem:[%s22449_s4 + $0x774] sm:$0xf0]  ;;  %8584 = vmatpush.bf16.msra.mxu2 %v12303_v24 }
 0x614   :  { %v8142_v36 = vpop.f32.mrf.mxu2  ;;  %v8115_v31 = vpop.f32.mrf.mxu1  ;;  %v12559_v17 = vor.u32 %v14403_v48, %v12558_v23  ;;  %8526 = vmatpush.bf16.msra.mxu0 %v11791_v60  ;;  %v14275_v27 = vld [vmem:[%s22449_s4 + $0x374] sm:$0xf0] }
 0x615   :  { %v8143_v51 = vadd.f32 %v8142_v36, %v8114_v26  ;;  %v8116_v53 = vadd.f32 %v8115_v31, %v8086_v0  ;;  %v12046_v26 = vld [vmem:[%s22449_s4 + $0x358] sm:$0xf] }
 0x616   :  { %8613 = vmatpush.bf16.msra.mxu3 %v12559_v17  ;;  %v12270_v36 = vld [vmem:[%s22449_s4 + $0x518] sm:$0xf]  ;;  %v12047_v39 = vor.u32 %v14275_v27, %v12046_v26 }
 0x617   :  { %v21378_v34 = vadd.f32 %v8171_v10, %v8143_v51  ;;  %v14331_v61 = vld [vmem:[%s22449_s4 + $0x534] sm:$0xf0] }
 0x618   :  { %v8185_v11 = vpop.f32.mrf.mxu0  ;;  %v11758_v17 = vld [vmem:[%s22449_s4 + $0x118] sm:$0xf]  ;;  %v12271_v60 = vor.u32 %v14331_v61, %v12270_v36  ;;  %8555 = vmatpush.bf16.msra.mxu1 %v12047_v39 }
 0x619   :  { %v14203_v18 = vld [vmem:[%s22449_s4 + $0x134] sm:$0xf0]  ;;  %v8186_v31 = vadd.f32 %v8185_v11, %v21206_v14 }
 0x61a   :  { %v11759_v23 = vor.u32 %v14203_v18, %v11758_v17  ;;  %v12526_v48 = vld [vmem:[%s22449_s4 + $0x718] sm:$0xf]  ;;  %8585 = vmatpush.bf16.msra.mxu2 %v12271_v60 }
 0x61b   :  { %v8173_v10 = vpop.f32.mrf.mxu3  ;;  %v14395_v26 = vld [vmem:[%s22449_s4 + $0x734] sm:$0xf0]  ;;  %8416 = vmatmul.bf16.vlgmr.msrb.gmra.mxu0 %v18854_v28 }
 0x61c   :  { %v8144_v0 = vpop.f32.mrf.mxu2  ;;  %v8214_v24 = vpop.f32.mrf.mxu1  ;;  %v12527_v27 = vor.u32 %v14395_v26, %v12526_v48  ;;  %8527 = vmatpush.bf16.msra.mxu0 %v11759_v23  ;;  %v12014_v14 = vld [vmem:[%s22449_s4 + $0x318] sm:$0xf] }
 0x61d   :  { %v8145_v51 = vadd.f32 %v8144_v0, %v8116_v53  ;;  %v8215_v5 = vadd.f32 %v8214_v24, %v8186_v31  ;;  %v14267_v53 = vld [vmem:[%s22449_s4 + $0x334] sm:$0xf0] }
 0x61e   :  { %8614 = vmatpush.bf16.msra.mxu3 %v12527_v27  ;;  %v12238_v36 = vld [vmem:[%s22449_s4 + $0x4d8] sm:$0xf]  ;;  %v12015_v39 = vor.u32 %v14267_v53, %v12014_v14  ;;  %v22555_v53 = vld [vmem:[#allocation20_spill] sm:$0xff] }
 0x61f   :  { %v21405_v47 = vadd.f32 %v8173_v10, %v8145_v51  ;;  %8445 = vmatmul.bf16.vlgmr.msrb.gmra.mxu1 %v18862_v56  ;;  %v14323_v61 = vld [vmem:[%s22449_s4 + $0x4f4] sm:$0xf0] }
 0x620   :  { %8503 = vmatmul.bf16.vlgmr.msrb.gmra.mxu3 %v18866_v41  ;;  %v8187_v11 = vpop.f32.mrf.mxu0  ;;  %v11726_v17 = vld [vmem:[%s22449_s4 + $0xd8] sm:$0xf]  ;;  %v12239_v60 = vor.u32 %v14323_v61, %v12238_v36  ;;  %8556 = vmatpush.bf16.msra.mxu1 %v12015_v39  ;;  %v9090_v41 = vperm.slane %v22555_v53, 4 }
 0x621   :  { %v14195_v18 = vld [vmem:[%s22449_s4 + $0xf4] sm:$0xf0]  ;;  %v8188_v31 = vadd.f32 %v8187_v11, %v21236_v29 }
 0x622   :  { %8474 = vmatmul.bf16.vlgmr.msrb.gmra.mxu2 %v18864_v32  ;;  %v11727_v23 = vor.u32 %v14195_v18, %v11726_v17  ;;  %v12494_v48 = vld [vmem:[%s22449_s4 + $0x6d8] sm:$0xf] }
 0x623   :  { %v8272_v10 = vpop.f32.mrf.mxu3  ;;  %v14387_v26 = vld [vmem:[%s22449_s4 + $0x6f4] sm:$0xf0]  ;;  %8586 = vmatpush.bf16.msra.mxu2 %v12239_v60 }
 0x624   :  { %v8243_v0 = vpop.f32.mrf.mxu2  ;;  %v8216_v24 = vpop.f32.mrf.mxu1  ;;  %v12495_v27 = vor.u32 %v14387_v26, %v12494_v48  ;;  %8528 = vmatpush.bf16.msra.mxu0 %v11727_v23  ;;  %v11982_v36 = vld [vmem:[%s22449_s4 + $0x2d8] sm:$0xf] }
 0x625   :  { %v8244_v51 = vadd.f32 %v8243_v0, %v8215_v5  ;;  %v8217_v5 = vadd.f32 %v8216_v24, %v8188_v31  ;;  %v14259_v0 = vld [vmem:[%s22449_s4 + $0x2f4] sm:$0xf0] }
 0x626   :  { %8615 = vmatpush.bf16.msra.mxu3 %v12495_v27  ;;  %v12206_v11 = vld [vmem:[%s22449_s4 + $0x498] sm:$0xf]  ;;  %v11983_v17 = vor.u32 %v14259_v0, %v11982_v36  ;;  %v9098_v0 = vperm.slane %v19461_v1, 4 }
 0x627   :  { %v8273_v14 = vadd.f32 %v8272_v10, %v8244_v51  ;;  %v11694_v18 = vld [vmem:[%s22449_s4 + $0x98] sm:$0xf] }
 0x628   :  { %v8190_v61 = vpop.f32.mrf.mxu0  ;;  %v14187_v51 = vld [vmem:[%s22449_s4 + $0xb4] sm:$0xf0]  ;;  %8557 = vmatpush.bf16.msra.mxu1 %v11983_v17 }
 0x629   :  { %v9218_v29 = vadd.f32 %v9090_v41, %v8273_v14  ;;  %v14315_v41 = vld [vmem:[%s22449_s4 + $0x4b4] sm:$0xf0]  ;;  %v8191_v24 = vadd.f32 %v8190_v61, %v21266_v45  ;;  %v11695_v48 = vor.u32 %v14187_v51, %v11694_v18 }
 0x62a   :  { %v12207_v23 = vor.u32 %v14315_v41, %v12206_v11  ;;  %v12462_v26 = vld [vmem:[%s22449_s4 + $0x698] sm:$0xf] }
 0x62b   :  { %14740 = vtanh.f32 %v9218_v29  ;;  %v8274_v31 = vpop.f32.mrf.mxu3  ;;  %v14379_v27 = vld [vmem:[%s22449_s4 + $0x6b4] sm:$0xf0]  ;;  %8421 = vmatmul.bf16.gmra.mxu0 %v18915_v30 }
 0x62c   :  { %v8245_v39 = vpop.f32.mrf.mxu2  ;;  %v8219_v60 = vpop.f32.mrf.mxu1  ;;  %v12463_v14 = vor.u32 %v14379_v27, %v12462_v26  ;;  %v22556_v29 = vld [vmem:[#allocation17_spill] sm:$0xff]  ;;  %8587 = vmatpush.bf16.msra.mxu2 %v12207_v23  ;;  %8529 = vmatpush.bf16.msra.mxu0 %v11695_v48 }
 0x62d   :  { %v8246_v10 = vadd.f32 %v8245_v39, %v8217_v5  ;;  %v21463_v36 = vperm.slane %v22556_v29, 4  ;;  %v8220_v45 = vadd.f32 %v8219_v60, %v8191_v24  ;;  %v11950_v17 = vld [vmem:[%s22449_s4 + $0x298] sm:$0xf] }
 0x62e   :  { %8616 = vmatpush.bf16.msra.mxu3 %v12463_v14  ;;  %v14251_v41 = vld [vmem:[%s22449_s4 + $0x2b4] sm:$0xf0] }
 0x62f   :  { %v8275_v5 = vadd.f32 %v8274_v31, %v8246_v10  ;;  %8450 = vmatmul.bf16.gmra.mxu1 %v18923_v46  ;;  %v12174_v18 = vld [vmem:[%s22449_s4 + $0x458] sm:$0xf]  ;;  %v11951_v31 = vor.u32 %v14251_v41, %v11950_v17 }
 0x630   :  { %8508 = vmatmul.bf16.gmra.mxu3 %v22547_v21  ;;  %v8192_v10 = vpop.f32.mrf.mxu0  ;;  %v14307_v24 = vld [vmem:[%s22449_s4 + $0x474] sm:$0xf0] }
 0x631   :  { %v14741_v11 = vpop.eup %14740  ;;  %v9226_v39 = vadd.f32 %v9098_v0, %v8275_v5  ;;  %v11662_v60 = vld [vmem:[%s22449_s4 + $0x58] sm:$0xf]  ;;  %v8193_v14 = vadd.f32 %v8192_v10, %v21292_v42  ;;  %v12175_v5 = vor.u32 %v14307_v24, %v12174_v18  ;;  %8558 = vmatpush.bf16.msra.mxu1 %v11951_v31 }
 0x632   :  { %8479 = vmatmul.bf16.gmra.mxu2 %v18927_v6  ;;  %v9364_v61 = vmul.f32 %v14741_v11, %v21463_v36  ;;  %v14179_v23 = vld [vmem:[%s22449_s4 + $0x74] sm:$0xf0] }
 0x633   :  { %14742 = vtanh.f32 %v9226_v39  ;;  %v8277_v27 = vpop.f32.mrf.mxu3  ;;  %v11663_v0 = vor.u32 %v14179_v23, %v11662_v60  ;;  %v12430_v11 = vld [vmem:[%s22449_s4 + $0x658] sm:$0xf]  ;;  %8588 = vmatpush.bf16.msra.mxu2 %v12175_v5 }
 0x634   :  { %v8248_v51 = vpop.f32.mrf.mxu2  ;;  %v21490_v48 = vadd.f32 %v20989_v12, %v9364_v61  ;;  %v8221_v29 = vpop.f32.mrf.mxu1  ;;  %v14371_v39 = vld [vmem:[%s22449_s4 + $0x674] sm:$0xf0]  ;;  %v9106_v12 = vperm.slane %v19495_v43, 4 }
 0x635   :  { %v8249_v26 = vadd.f32 %v8248_v51, %v8220_v45  ;;  %v12431_v17 = vor.u32 %v14371_v39, %v12430_v11  ;;  %v8222_v45 = vadd.f32 %v8221_v29, %v8193_v14  ;;  %8530 = vmatpush.bf16.msra.mxu0 %v11663_v0  ;;  %v11918_v51 = vld [vmem:[%s22449_s4 + $0x258] sm:$0xf] }
 0x636   :  { %v14243_v10 = vld [vmem:[%s22449_s4 + $0x274] sm:$0xf0] }
 0x637   :  { %v8278_v41 = vadd.f32 %v8277_v27, %v8249_v26  ;;  %8617 = vmatpush.bf16.msra.mxu3 %v12431_v17  ;;  %v12142_v31 = vld [vmem:[%s22449_s4 + $0x418] sm:$0xf]  ;;  %v11919_v23 = vor.u32 %v14243_v10, %v11918_v51 }
 0x638   :  { %v8195_v60 = vpop.f32.mrf.mxu0  ;;  %v14299_v26 = vld [vmem:[%s22449_s4 + $0x434] sm:$0xf0] }
 0x639   :  { %v14743_v42 = vpop.eup %14742  ;;  %v9234_v61 = vadd.f32 %v9106_v12, %v8278_v41  ;;  %v11630_v27 = vld [vmem:[%s22449_s4 + $0x18] sm:$0xf]  ;;  %v8196_v11 = vadd.f32 %v8195_v60, %v21322_v55  ;;  %v12143_v17 = vor.u32 %v14299_v26, %v12142_v31  ;;  %8559 = vmatpush.bf16.msra.mxu1 %v11919_v23 }
 0x63a   :  { %v9372_v18 = vmul.f32 %v14743_v42, %v21463_v36  ;;  %v14171_v14 = vld [vmem:[%s22449_s4 + $0x34] sm:$0xf0] }
 0x63b   :  { %14744 = vtanh.f32 %v9234_v61  ;;  %v8279_v0 = vpop.f32.mrf.mxu3  ;;  %v11631_v41 = vor.u32 %v14171_v14, %v11630_v27  ;;  %v12398_v12 = vld [vmem:[%s22449_s4 + $0x618] sm:$0xf]  ;;  %8426 = vmatmul.bf16.gmra.mxu0 %v19025_v16  ;;  %8589 = vmatpush.bf16.msra.mxu2 %v12143_v17 }
 0x63c   :  { %v8250_v24 = vpop.f32.mrf.mxu2  ;;  %v21520_v29 = vadd.f32 %v21019_v57, %v9372_v18  ;;  %v8224_v39 = vpop.f32.mrf.mxu1  ;;  %v14363_v42 = vld [vmem:[%s22449_s4 + $0x634] sm:$0xf0]  ;;  %v9114_v57 = vperm.slane %v19527_v58, 4 }
 0x63d   :  { %v8251_v5 = vadd.f32 %v8250_v24, %v8222_v45  ;;  %v12399_v61 = vor.u32 %v14363_v42, %v12398_v12  ;;  %v8225_v45 = vadd.f32 %v8224_v39, %v8196_v11  ;;  %8531 = vmatpush.bf16.msra.mxu0 %v11631_v41  ;;  %v11886_v31 = vld [vmem:[%s22449_s4 + $0x218] sm:$0xf] }
 0x63e   :  { %v14235_v24 = vld [vmem:[%s22449_s4 + $0x234] sm:$0xf0] }
 0x63f   :  { %v8280_v51 = vadd.f32 %v8279_v0, %v8251_v5  ;;  %8455 = vmatmul.bf16.gmra.mxu1 %v22521_v59  ;;  %8618 = vmatpush.bf16.msra.mxu3 %v12399_v61  ;;  %v13390_v60 = vld [vmem:[%s22449_s4 + $0xdd8] sm:$0xf]  ;;  %v11887_v27 = vor.u32 %v14235_v24, %v11886_v31 }
 0x640   :  { %8513 = vmatmul.bf16.gmra.mxu3 %v22524_v54  ;;  %v8197_v26 = vpop.f32.mrf.mxu0  ;;  %v14611_v14 = vld [vmem:[%s22449_s4 + $0xdf4] sm:$0xf0] }
 0x641   :  { %v14745_v55 = vpop.eup %14744  ;;  %v9242_v18 = vadd.f32 %v9114_v57, %v8280_v51  ;;  %v12878_v5 = vld [vmem:[%s22449_s4 + $0x9d8] sm:$0xf]  ;;  %v8198_v41 = vadd.f32 %v8197_v26, %v21348_v2  ;;  %v13391_v42 = vor.u32 %v14611_v14, %v13390_v60  ;;  %8560 = vmatpush.bf16.msra.mxu1 %v11887_v27 }
 0x642   :  { %8484 = vmatmul.bf16.gmra.mxu2 %v22522_v7  ;;  %v9380_v10 = vmul.f32 %v14745_v55, %v21463_v36  ;;  %v14483_v0 = vld [vmem:[%s22449_s4 + $0x9f4] sm:$0xf0]  ;;  %v9122_v55 = vperm.slane %v19564_v15, 4 }
 0x643   :  { %14746 = vtanh.f32 %v9242_v18  ;;  %v8282_v17 = vpop.f32.mrf.mxu3  ;;  %v12879_v61 = vor.u32 %v14483_v0, %v12878_v5  ;;  %v13646_v51 = vld [vmem:[%s22449_s4 + $0xfd8] sm:$0xf]  ;;  %8698 = vmatpush.bf16.msrb.mxu2 %v13391_v42 }
 0x644   :  { %v8253_v23 = vpop.f32.mrf.mxu2  ;;  %v21554_v11 = vadd.f32 %v21053_v19, %v9380_v10  ;;  %v8226_v12 = vpop.f32.mrf.mxu1  ;;  %v14675_v57 = vld [vmem:[%s22449_s4 + $0xff4] sm:$0xf0] }
 0x645   :  { %v8254_v39 = vadd.f32 %v8253_v23, %v8225_v45  ;;  %v13647_v19 = vor.u32 %v14675_v57, %v13646_v51  ;;  %v8227_v45 = vadd.f32 %v8226_v12, %v8198_v41  ;;  %8640 = vmatpush.bf16.msrb.mxu0 %v12879_v61  ;;  %v13134_v2 = vld [vmem:[%s22449_s4 + $0xbd8] sm:$0xf] }
 0x646   :  { %v14547_v10 = vld [vmem:[%s22449_s4 + $0xbf4] sm:$0xf0] }
 0x647   :  { %v8283_v18 = vadd.f32 %v8282_v17, %v8254_v39  ;;  %v13358_v31 = vld [vmem:[%s22449_s4 + $0xd98] sm:$0xf]  ;;  %8727 = vmatpush.bf16.msrb.mxu3 %v13647_v19  ;;  %v13135_v24 = vor.u32 %v14547_v10, %v13134_v2  ;;  %v9130_v10 = vperm.slane %v19599_v49, 4 }
 0x648   :  { %v14603_v60 = vld [vmem:[%s22449_s4 + $0xdb4] sm:$0xf0]  ;;  %v8200_v61 = vpop.f32.mrf.mxu0 }
 0x649   :  { %v12846_v23 = vld [vmem:[%s22449_s4 + $0x998] sm:$0xf]  ;;  %v14747_v27 = vpop.eup %14746  ;;  %v9250_v14 = vadd.f32 %v9122_v55, %v8283_v18  ;;  %v13359_v5 = vor.u32 %v14603_v60, %v13358_v31  ;;  %8669 = vmatpush.bf16.msrb.mxu1 %v13135_v24  ;;  %v8201_v19 = vadd.f32 %v8200_v61, %v21378_v34 }
 0x64a   :  { %v14475_v26 = vld [vmem:[%s22449_s4 + $0x9b4] sm:$0xf0]  ;;  %v9388_v12 = vmul.f32 %v14747_v27, %v21463_v36 }
 0x64b   :  { %v12847_v0 = vor.u32 %v14475_v26, %v12846_v23  ;;  %v13614_v39 = vld [vmem:[%s22449_s4 + $0xf98] sm:$0xf]  ;;  %14748 = vtanh.f32 %v9250_v14  ;;  %8699 = vmatpush.bf16.msrb.mxu2 %v13359_v5  ;;  %v8284_v55 = vpop.f32.mrf.mxu3  ;;  %8431 = vmatmul.bf16.gmra.mxu0 %v19111_v62 }
 0x64c   :  { %v14667_v17 = vld [vmem:[%s22449_s4 + $0xfb4] sm:$0xf0]  ;;  %v8255_v42 = vpop.f32.mrf.mxu2  ;;  %v21590_v51 = vadd.f32 %v21092_v37, %v9388_v12  ;;  %v8229_v18 = vpop.f32.mrf.mxu1 }
 0x64d   :  { %v13615_v41 = vor.u32 %v14667_v17, %v13614_v39  ;;  %8641 = vmatpush.bf16.msrb.mxu0 %v12847_v0  ;;  %v8256_v57 = vadd.f32 %v8255_v42, %v8227_v45  ;;  %v8230_v31 = vadd.f32 %v8229_v18, %v8201_v19  ;;  %v13102_v24 = vld [vmem:[%s22449_s4 + $0xb98] sm:$0xf] }
 0x64e   :  { %v14539_v37 = vld [vmem:[%s22449_s4 + $0xbb4] sm:$0xf0] }
 0x64f   :  { %8728 = vmatpush.bf16.msrb.mxu3 %v13615_v41  ;;  %v8285_v2 = vadd.f32 %v8284_v55, %v8256_v57  ;;  %8460 = vmatmul.bf16.gmra.mxu1 %v19113_v8  ;;  %v13103_v45 = vor.u32 %v14539_v37, %v13102_v24  ;;  %v13326_v23 = vld [vmem:[%s22449_s4 + $0xd58] sm:$0xf] }
 0x650   :  { %8518 = vmatmul.bf16.gmra.mxu3 %v22536_v3  ;;  %v14595_v26 = vld [vmem:[%s22449_s4 + $0xd74] sm:$0xf0]  ;;  %v8202_v12 = vpop.f32.mrf.mxu0 }
 0x651   :  { %v14749_v60 = vpop.eup %14748  ;;  %v9258_v34 = vadd.f32 %v9130_v10, %v8285_v2  ;;  %8670 = vmatpush.bf16.msrb.mxu1 %v13103_v45  ;;  %v12814_v27 = vld [vmem:[%s22449_s4 + $0x958] sm:$0xf]  ;;  %v13327_v5 = vor.u32 %v14595_v26, %v13326_v23  ;;  %v8203_v18 = vadd.f32 %v8202_v12, %v21405_v47  ;;  %v9138_v10 = vperm.slane %v19657_v4, 4 }
 0x652   :  { %8489 = vmatmul.bf16.gmra.mxu2 %v19115_v38  ;;  %v9396_v14 = vmul.f32 %v14749_v60, %v21463_v36  ;;  %v14467_v0 = vld [vmem:[%s22449_s4 + $0x974] sm:$0xf0] }
 0x653   :  { %14750 = vtanh.f32 %v9258_v34  ;;  %v13582_v39 = vld [vmem:[%s22449_s4 + $0xf58] sm:$0xf]  ;;  %v12815_v42 = vor.u32 %v14467_v0, %v12814_v27  ;;  %v8287_v19 = vpop.f32.mrf.mxu3  ;;  %8700 = vmatpush.bf16.msrb.mxu2 %v13327_v5 }
 0x654   :  { %v14659_v17 = vld [vmem:[%s22449_s4 + $0xf74] sm:$0xf0]  ;;  %v8258_v41 = vpop.f32.mrf.mxu2  ;;  %v21624_v57 = vadd.f32 %v21141_v52, %v9396_v14  ;;  %v8231_v2 = vpop.f32.mrf.mxu1 }
 0x655   :  { %v13583_v61 = vor.u32 %v14659_v17, %v13582_v39  ;;  %v8259_v55 = vadd.f32 %v8258_v41, %v8230_v31  ;;  %8642 = vmatpush.bf16.msrb.mxu0 %v12815_v42  ;;  %v8232_v37 = vadd.f32 %v8231_v2, %v8203_v18  ;;  %v13070_v45 = vld [vmem:[%s22449_s4 + $0xb58] sm:$0xf] }
 0x656   :  { %v14531_v52 = vld [vmem:[%s22449_s4 + $0xb74] sm:$0xf0] }
 0x657   :  { %8729 = vmatpush.bf16.msrb.mxu3 %v13583_v61  ;;  %v8288_v24 = vadd.f32 %v8287_v19, %v8259_v55  ;;  %v13294_v47 = vld [vmem:[%s22449_s4 + $0xd18] sm:$0xf]  ;;  %v13071_v31 = vor.u32 %v14531_v52, %v13070_v45 }
 0x658   :  { %v14587_v60 = vld [vmem:[%s22449_s4 + $0xd34] sm:$0xf0]  ;;  %v8301_v42 = vpop.f32.mrf.mxu0 }
 0x659   :  { %v12782_v34 = vld [vmem:[%s22449_s4 + $0x918] sm:$0xf]  ;;  %v14751_v26 = vpop.eup %14750  ;;  %v9266_v27 = vadd.f32 %v9138_v10, %v8288_v24  ;;  %v13295_v14 = vor.u32 %v14587_v60, %v13294_v47  ;;  %8671 = vmatpush.bf16.msrb.mxu1 %v13071_v31  ;;  %v9146_v24 = vperm.slane %v19707_v40, 4 }
 0x65a   :  { %v14459_v23 = vld [vmem:[%s22449_s4 + $0x934] sm:$0xf0]  ;;  %v9404_v41 = vmul.f32 %v14751_v26, %v21463_v36 }
 0x65b   :  { %v12783_v5 = vor.u32 %v14459_v23, %v12782_v34  ;;  %v13550_v0 = vld [vmem:[%s22449_s4 + $0xf18] sm:$0xf]  ;;  %14752 = vtanh.f32 %v9266_v27  ;;  %8701 = vmatpush.bf16.msrb.mxu2 %v13295_v14  ;;  %v8289_v19 = vpop.f32.mrf.mxu3  ;;  %8532 = vmatmul.bf16.vlgmr.msra.gmra.mxu0 %v18438_v13 }
 0x65c   :  { %v14651_v39 = vld [vmem:[%s22449_s4 + $0xf34] sm:$0xf0]  ;;  %v8260_v12 = vpop.f32.mrf.mxu2  ;;  %v21654_v61 = vadd.f32 %v21171_v33, %v9404_v41  ;;  %v8330_v18 = vpop.f32.mrf.mxu1 }
 0x65d   :  { %v13551_v17 = vor.u32 %v14651_v39, %v13550_v0  ;;  %8643 = vmatpush.bf16.msrb.mxu0 %v12783_v5  ;;  %v8261_v55 = vadd.f32 %v8260_v12, %v8232_v37  ;;  %v8331_v2 = vadd.f32 %v8330_v18, %v8301_v42  ;;  %v13038_v45 = vld [vmem:[%s22449_s4 + $0xb18] sm:$0xf] }
 0x65e   :  { %v14523_v52 = vld [vmem:[%s22449_s4 + $0xb34] sm:$0xf0] }
 0x65f   :  { %8730 = vmatpush.bf16.msrb.mxu3 %v13551_v17  ;;  %v8290_v10 = vadd.f32 %v8289_v19, %v8261_v55  ;;  %8561 = vmatmul.bf16.vlgmr.msra.gmra.mxu1 %v18449_v20  ;;  %v13039_v33 = vor.u32 %v14523_v52, %v13038_v45  ;;  %v13262_v31 = vld [vmem:[%s22449_s4 + $0xcd8] sm:$0xf] }
 0x660   :  { %8619 = vmatmul.bf16.vlgmr.msra.gmra.mxu3 %v18465_v25  ;;  %v14579_v60 = vld [vmem:[%s22449_s4 + $0xcf4] sm:$0xf0]  ;;  %v8303_v39 = vpop.f32.mrf.mxu0 }
 0x661   :  { %v14753_v37 = vpop.eup %14752  ;;  %v9274_v47 = vadd.f32 %v9146_v24, %v8290_v10  ;;  %8672 = vmatpush.bf16.msrb.mxu1 %v13039_v33  ;;  %v12750_v34 = vld [vmem:[%s22449_s4 + $0x8d8] sm:$0xf]  ;;  %v13263_v26 = vor.u32 %v14579_v60, %v13262_v31 }
 0x662   :  { %8590 = vmatmul.bf16.vlgmr.msra.gmra.mxu2 %v18457_v9  ;;  %v9412_v23 = vmul.f32 %v14753_v37, %v21463_v36  ;;  %v14451_v27 = vld [vmem:[%s22449_s4 + $0x8f4] sm:$0xf0] }
 0x663   :  { %14754 = vtanh.f32 %v9274_v47  ;;  %v13518_v14 = vld [vmem:[%s22449_s4 + $0xed8] sm:$0xf]  ;;  %v12751_v17 = vor.u32 %v14451_v27, %v12750_v34  ;;  %v8388_v55 = vpop.f32.mrf.mxu3  ;;  %8702 = vmatpush.bf16.msrb.mxu2 %v13263_v26 }
 0x664   :  { %v14643_v5 = vld [vmem:[%s22449_s4 + $0xef4] sm:$0xf0]  ;;  %v8359_v0 = vpop.f32.mrf.mxu2  ;;  %v21687_v12 = vadd.f32 %v21204_v63, %v9412_v23  ;;  %v8332_v19 = vpop.f32.mrf.mxu1 }
 0x665   :  { %v13519_v41 = vor.u32 %v14643_v5, %v13518_v14  ;;  %v8360_v42 = vadd.f32 %v8359_v0, %v8331_v2  ;;  %v8333_v18 = vadd.f32 %v8332_v19, %v8303_v39  ;;  %8644 = vmatpush.bf16.msrb.mxu0 %v12751_v17  ;;  %v13006_v24 = vld [vmem:[%s22449_s4 + $0xad8] sm:$0xf] }
 0x666   :  { %v14515_v45 = vld [vmem:[%s22449_s4 + $0xaf4] sm:$0xf0] }
 0x667   :  { %8731 = vmatpush.bf16.msrb.mxu3 %v13519_v41  ;;  %v21689_v10 = vadd.f32 %v8388_v55, %v8360_v42  ;;  %v13230_v63 = vld [vmem:[%s22449_s4 + $0xc98] sm:$0xf]  ;;  %v13007_v2 = vor.u32 %v14515_v45, %v13006_v24 }
 0x668   :  { %v14571_v52 = vld [vmem:[%s22449_s4 + $0xcb4] sm:$0xf0]  ;;  %v8306_v5 = vpop.f32.mrf.mxu0 }
 0x669   :  { %v12718_v33 = vld [vmem:[%s22449_s4 + $0x898] sm:$0xf]  ;;  %v14755_v47 = vpop.eup %14754  ;;  %v13231_v31 = vor.u32 %v14571_v52, %v13230_v63  ;;  %8673 = vmatpush.bf16.msrb.mxu1 %v13007_v2 }
 0x66a   :  { %v14443_v37 = vld [vmem:[%s22449_s4 + $0x8b4] sm:$0xf0]  ;;  %v9420_v27 = vmul.f32 %v14755_v47, %v21463_v36 }
 0x66b   :  { %v12719_v60 = vor.u32 %v14443_v37, %v12718_v33  ;;  %v13486_v34 = vld [vmem:[%s22449_s4 + $0xe98] sm:$0xf]  ;;  %8703 = vmatpush.bf16.msrb.mxu2 %v13231_v31  ;;  %v8390_v17 = vpop.f32.mrf.mxu3  ;;  %8537 = vmatmul.bf16.gmra.mxu0 %v22538_v22 }
 0x66c   :  { %v14635_v23 = vld [vmem:[%s22449_s4 + $0xeb4] sm:$0xf0]  ;;  %v8361_v14 = vpop.f32.mrf.mxu2  ;;  %v21717_v0 = vadd.f32 %v21234_v50, %v9420_v27  ;;  %v8335_v41 = vpop.f32.mrf.mxu1 }
 0x66d   :  { %v13487_v26 = vor.u32 %v14635_v23, %v13486_v34  ;;  %8645 = vmatpush.bf16.msrb.mxu0 %v12719_v60  ;;  %v8362_v39 = vadd.f32 %v8361_v14, %v8333_v18  ;;  %v8336_v42 = vadd.f32 %v8335_v41, %v8306_v5  ;;  %v12974_v36 = vld [vmem:[%s22449_s4 + $0xa98] sm:$0xf] }
 0x66e   :  { %v14507_v19 = vld [vmem:[%s22449_s4 + $0xab4] sm:$0xf0] }
 0x66f   :  { %8732 = vmatpush.bf16.msrb.mxu3 %v13487_v26  ;;  %v21719_v55 = vadd.f32 %v8390_v17, %v8362_v39  ;;  %8566 = vmatmul.bf16.gmra.mxu1 %v22539_v44  ;;  %v12975_v50 = vor.u32 %v14507_v19, %v12974_v36  ;;  %v22557_v18 = vld [vmem:[#allocation5_spill] sm:$0xff] }
 0x670   :  { %8624 = vmatmul.bf16.gmra.mxu3 %v22557_v18  ;;  %v13198_v24 = vld [vmem:[%s22449_s4 + $0xc58] sm:$0xf]  ;;  %v8308_v31 = vpop.f32.mrf.mxu0 }
 0x671   :  { %8674 = vmatpush.bf16.msrb.mxu1 %v12975_v50  ;;  %v14563_v45 = vld [vmem:[%s22449_s4 + $0xc74] sm:$0xf0] }
 0x672   :  { %8595 = vmatmul.bf16.gmra.mxu2 %v22548_v35  ;;  %v12686_v63 = vld [vmem:[%s22449_s4 + $0x858] sm:$0xf]  ;;  %v13199_v2 = vor.u32 %v14563_v45, %v13198_v24 }
 0x673   :  { %v14435_v52 = vld [vmem:[%s22449_s4 + $0x874] sm:$0xf0]  ;;  %v8393_v26 = vpop.f32.mrf.mxu3 }
 0x674   :  { %v13454_v33 = vld [vmem:[%s22449_s4 + $0xe58] sm:$0xf]  ;;  %v8364_v47 = vpop.f32.mrf.mxu2  ;;  %v12687_v60 = vor.u32 %v14435_v52, %v12686_v63  ;;  %v8337_v27 = vpop.f32.mrf.mxu1  ;;  %8704 = vmatpush.bf16.msrb.mxu2 %v13199_v2 }
 0x675   :  { %v14627_v37 = vld [vmem:[%s22449_s4 + $0xe74] sm:$0xf0]  ;;  %v8365_v23 = vadd.f32 %v8364_v47, %v8336_v42  ;;  %v8338_v14 = vadd.f32 %v8337_v27, %v8308_v31 }
 0x676   :  { %v13455_v34 = vor.u32 %v14627_v37, %v13454_v33  ;;  %8646 = vmatpush.bf16.msrb.mxu0 %v12687_v60  ;;  %v12942_v39 = vld [vmem:[%s22449_s4 + $0xa58] sm:$0xf] }
 0x677   :  { %v21749_v5 = vadd.f32 %v8393_v26, %v8365_v23  ;;  %v14499_v17 = vld [vmem:[%s22449_s4 + $0xa74] sm:$0xf0]  ;;  %v22558_v26 = vld [vmem:[#allocation6_spill] sm:$0xff] }
 0x678   :  { %8733 = vmatpush.bf16.msrb.mxu3 %v13455_v34  ;;  %v13166_v41 = vld [vmem:[%s22449_s4 + $0xc18] sm:$0xf]  ;;  %v12943_v42 = vor.u32 %v14499_v17, %v12942_v39  ;;  %v8311_v37 = vpop.f32.mrf.mxu0  ;;  %v22559_v17 = vld [vmem:[#allocation7_spill] sm:$0xff] }
 0x679   :  { %v14555_v36 = vld [vmem:[%s22449_s4 + $0xc34] sm:$0xf0] }
 0x67a   :  { %v12654_v19 = vld [vmem:[%s22449_s4 + $0x818] sm:$0xf]  ;;  %v13167_v24 = vor.u32 %v14555_v36, %v13166_v41  ;;  %8675 = vmatpush.bf16.msrb.mxu1 %v12943_v42  ;;  %v22560_v42 = vld [vmem:[#allocation8_spill] sm:$0xff]  ;;  %v14351_v36 = vld [vmem:[%s22449_s4 + $0x5dc] sm:$0xf] }
 0x67b   :  { %v14427_v50 = vld [vmem:[%s22449_s4 + $0x834] sm:$0xf0]  ;;  %v8395_v31 = vpop.f32.mrf.mxu3  ;;  %8542 = vmatmul.bf16.gmra.mxu0 %v22558_v26 }
 0x67c   :  { %v12655_v45 = vor.u32 %v14427_v50, %v12654_v19  ;;  %v13422_v63 = vld [vmem:[%s22449_s4 + $0xe18] sm:$0xf]  ;;  %8705 = vmatpush.bf16.msrb.mxu2 %v13167_v24  ;;  %v8366_v33 = vpop.f32.mrf.mxu2  ;;  %v8340_v60 = vpop.f32.mrf.mxu1  ;;  %v12368_v19 = vld [vmem:[%s22449_s4 + $0x5f8] sm:$0xf0] }
 0x67d   :  { %v14619_v2 = vld [vmem:[%s22449_s4 + $0xe34] sm:$0xf0]  ;;  %v8367_v47 = vadd.f32 %v8366_v33, %v8338_v14  ;;  %v8341_v34 = vadd.f32 %v8340_v60, %v8311_v37  ;;  %v14223_v50 = vld [vmem:[%s22449_s4 + $0x1dc] sm:$0xf]  ;;  %v12371_v24 = vor.u32 %v14351_v36, %v12368_v19 }
 0x67e   :  { %v13423_v52 = vor.u32 %v14619_v2, %v13422_v63  ;;  %8647 = vmatpush.bf16.msrb.mxu0 %v12655_v45  ;;  %v12910_v27 = vld [vmem:[%s22449_s4 + $0xa18] sm:$0xf]  ;;  %v11856_v45 = vld [vmem:[%s22449_s4 + $0x1f8] sm:$0xf0] }
 0x67f   :  { %v21775_v23 = vadd.f32 %v8395_v31, %v8367_v47  ;;  %v14491_v39 = vld [vmem:[%s22449_s4 + $0xa34] sm:$0xf0]  ;;  %8571 = vmatmul.bf16.gmra.mxu1 %v22559_v17  ;;  %v14415_v63 = vld [vmem:[%s22449_s4 + $0x7dc] sm:$0xf]  ;;  %v11859_v37 = vor.u32 %v14223_v50, %v11856_v45  ;;  %v22562_v17 = vld [vmem:[#allocation10_spill] sm:$0xff] }
 0x680   :  { %8734 = vmatpush.bf16.msrb.mxu3 %v13423_v52  ;;  %v12911_v41 = vor.u32 %v14491_v39, %v12910_v27  ;;  %v22561_v14 = vld [vmem:[#allocation9_spill] sm:$0xff]  ;;  %v8313_v33 = vpop.f32.mrf.mxu0  ;;  %8814 = vmatpush.bf16.msra.mxu2 %v12371_v24 }
 0x681   :  { %8629 = vmatmul.bf16.gmra.mxu3 %v22561_v14  ;;  %v12624_v2 = vld [vmem:[%s22449_s4 + $0x7f8] sm:$0xf0] }
 0x682   :  { %8600 = vmatmul.bf16.gmra.mxu2 %v22560_v42  ;;  %8676 = vmatpush.bf16.msrb.mxu1 %v12911_v41  ;;  %v12627_v47 = vor.u32 %v14415_v63, %v12624_v2  ;;  %v14287_v36 = vld [vmem:[%s22449_s4 + $0x3dc] sm:$0xf] }
 0x683   :  { %v8398_v60 = vpop.f32.mrf.mxu3  ;;  %8756 = vmatpush.bf16.msra.mxu0 %v11859_v37  ;;  %v12112_v19 = vld [vmem:[%s22449_s4 + $0x3f8] sm:$0xf0] }
 0x684   :  { %v8342_v27 = vpop.f32.mrf.mxu1  ;;  %8843 = vmatpush.bf16.msra.mxu3 %v12627_v47  ;;  %v12115_v24 = vor.u32 %v14287_v36, %v12112_v19  ;;  %v12336_v63 = vld [vmem:[%s22449_s4 + $0x5b8] sm:$0xf0] }
 0x685   :  { %v8369_v52 = vpop.f32.mrf.mxu2  ;;  %v8343_v39 = vadd.f32 %v8342_v27, %v8313_v33  ;;  %v14215_v2 = vld [vmem:[%s22449_s4 + $0x19c] sm:$0xf] }
 0x686   :  { %v8370_v31 = vadd.f32 %v8369_v52, %v8341_v34  ;;  %v14343_v34 = vld [vmem:[%s22449_s4 + $0x59c] sm:$0xf]  ;;  %8785 = vmatpush.bf16.msra.mxu1 %v12115_v24 }
 0x687   :  { %v11824_v52 = vld [vmem:[%s22449_s4 + $0x1b8] sm:$0xf0] }
 0x688   :  { %v21805_v41 = vadd.f32 %v8398_v60, %v8370_v31  ;;  %v8316_v45 = vpop.f32.mrf.mxu0  ;;  %v12339_v31 = vor.u32 %v14343_v34, %v12336_v63  ;;  %v11827_v60 = vor.u32 %v14215_v2, %v11824_v52  ;;  %v14407_v27 = vld [vmem:[%s22449_s4 + $0x79c] sm:$0xf]  ;;  %v22564_v34 = vld [vmem:[#allocation12_spill] sm:$0xff] }
 0x689   :  { %v12592_v36 = vld [vmem:[%s22449_s4 + $0x7b8] sm:$0xf0] }
 0x68a   :  { %v12595_v14 = vor.u32 %v14407_v27, %v12592_v36  ;;  %8815 = vmatpush.bf16.msra.mxu2 %v12339_v31  ;;  %8757 = vmatpush.bf16.msra.mxu0 %v11827_v60  ;;  %v14279_v63 = vld [vmem:[%s22449_s4 + $0x39c] sm:$0xf] }
 0x68b   :  { %v8400_v37 = vpop.f32.mrf.mxu3  ;;  %8547 = vmatmul.bf16.gmra.mxu0 %v22562_v17  ;;  %v14335_v24 = vld [vmem:[%s22449_s4 + $0x55c] sm:$0xf] }
 0x68c   :  { %v8345_v47 = vpop.f32.mrf.mxu1  ;;  %8844 = vmatpush.bf16.msra.mxu3 %v12595_v14  ;;  %v12304_v14 = vld [vmem:[%s22449_s4 + $0x578] sm:$0xf0] }
 0x68d   :  { %v8371_v50 = vpop.f32.mrf.mxu2  ;;  %v8346_v19 = vadd.f32 %v8345_v47, %v8316_v45  ;;  %v12080_v45 = vld [vmem:[%s22449_s4 + $0x3b8] sm:$0xf0]  ;;  %v12307_v36 = vor.u32 %v14335_v24, %v12304_v14 }
 0x68e   :  { %v8372_v33 = vadd.f32 %v8371_v50, %v8343_v39  ;;  %v22563_v39 = vld [vmem:[#allocation11_spill] sm:$0xff]  ;;  %v22565_v50 = vld [vmem:[#allocation13_spill] sm:$0xff] }
 0x68f   :  { %8576 = vmatmul.bf16.gmra.mxu1 %v22563_v39  ;;  %v11792_v47 = vld [vmem:[%s22449_s4 + $0x178] sm:$0xf0]  ;;  %8816 = vmatpush.bf16.msra.mxu2 %v12307_v36 }
 0x690   :  { %v21831_v42 = vadd.f32 %v8400_v37, %v8372_v33  ;;  %v8318_v52 = vpop.f32.mrf.mxu0  ;;  %v12083_v33 = vor.u32 %v14279_v63, %v12080_v45  ;;  %v14207_v37 = vld [vmem:[%s22449_s4 + $0x15c] sm:$0xf] }
 0x691   :  { %8634 = vmatmul.bf16.gmra.mxu3 %v22565_v50  ;;  %v11795_v50 = vor.u32 %v14207_v37, %v11792_v47  ;;  %v14399_v63 = vld [vmem:[%s22449_s4 + $0x75c] sm:$0xf] }
 0x692   :  { %8605 = vmatmul.bf16.gmra.mxu2 %v22564_v34  ;;  %v12560_v45 = vld [vmem:[%s22449_s4 + $0x778] sm:$0xf0]  ;;  %8786 = vmatpush.bf16.msra.mxu1 %v12083_v33 }
 0x693   :  { %v8403_v60 = vpop.f32.mrf.mxu3  ;;  %v12563_v39 = vor.u32 %v14399_v63, %v12560_v45  ;;  %8758 = vmatpush.bf16.msra.mxu0 %v11795_v50  ;;  %v12048_v24 = vld [vmem:[%s22449_s4 + $0x378] sm:$0xf0] }
 0x694   :  { %v8347_v27 = vpop.f32.mrf.mxu1  ;;  %v12272_v50 = vld [vmem:[%s22449_s4 + $0x538] sm:$0xf0] }
 0x695   :  { %v8374_v2 = vpop.f32.mrf.mxu2  ;;  %v8348_v34 = vadd.f32 %v8347_v27, %v8318_v52  ;;  %8845 = vmatpush.bf16.msra.mxu3 %v12563_v39  ;;  %v14199_v39 = vld [vmem:[%s22449_s4 + $0x11c] sm:$0xf] }
 0x696   :  { %v8375_v31 = vadd.f32 %v8374_v2, %v8346_v19  ;;  %v14271_v19 = vld [vmem:[%s22449_s4 + $0x35c] sm:$0xf] }
 0x697   :  { %v14327_v2 = vld [vmem:[%s22449_s4 + $0x51c] sm:$0xf]  ;;  %v12051_v14 = vor.u32 %v14271_v19, %v12048_v24 }
 0x698   :  { %v21861_v17 = vadd.f32 %v8403_v60, %v8375_v31  ;;  %v8417_v33 = vpop.f32.mrf.mxu0  ;;  %v11760_v37 = vld [vmem:[%s22449_s4 + $0x138] sm:$0xf0]  ;;  %v12275_v36 = vor.u32 %v14327_v2, %v12272_v50 }
 0x699   :  { %v8418_v60 = vadd.f32 %v8417_v33, %v21689_v10  ;;  %v11763_v63 = vor.u32 %v14199_v39, %v11760_v37  ;;  %v14391_v45 = vld [vmem:[%s22449_s4 + $0x71c] sm:$0xf]  ;;  %8787 = vmatpush.bf16.msra.mxu1 %v12051_v14  ;;  %v22566_v10 = vld [vmem:[#allocation14_spill] sm:$0xff] }
 0x69a   :  { %v12528_v19 = vld [vmem:[%s22449_s4 + $0x738] sm:$0xf0]  ;;  %8817 = vmatpush.bf16.msra.mxu2 %v12275_v36 }
 0x69b   :  { %v8405_v31 = vpop.f32.mrf.mxu3  ;;  %v12531_v24 = vor.u32 %v14391_v45, %v12528_v19  ;;  %8648 = vmatmul.bf16.vlgmr.msrb.gmra.mxu0 %v18854_v28  ;;  %v12016_v2 = vld [vmem:[%s22449_s4 + $0x338] sm:$0xf0] }
 0x69c   :  { %v8446_v27 = vpop.f32.mrf.mxu1  ;;  %8759 = vmatpush.bf16.msra.mxu0 %v11763_v63  ;;  %v12240_v39 = vld [vmem:[%s22449_s4 + $0x4f8] sm:$0xf0] }
 0x69d   :  { %v8376_v52 = vpop.f32.mrf.mxu2  ;;  %v8447_v18 = vadd.f32 %v8446_v27, %v8418_v60  ;;  %8846 = vmatpush.bf16.msra.mxu3 %v12531_v24  ;;  %v14191_v37 = vld [vmem:[%s22449_s4 + $0xdc] sm:$0xf] }
 0x69e   :  { %v8377_v47 = vadd.f32 %v8376_v52, %v8348_v34  ;;  %v14263_v34 = vld [vmem:[%s22449_s4 + $0x31c] sm:$0xf] }
 0x69f   :  { %8677 = vmatmul.bf16.vlgmr.msrb.gmra.mxu1 %v18862_v56  ;;  %v14319_v52 = vld [vmem:[%s22449_s4 + $0x4dc] sm:$0xf]  ;;  %v12019_v50 = vor.u32 %v14263_v34, %v12016_v2 }
 0x6a0   :  { %v21888_v26 = vadd.f32 %v8405_v31, %v8377_v47  ;;  %v8419_v14 = vpop.f32.mrf.mxu0  ;;  %v11728_v47 = vld [vmem:[%s22449_s4 + $0xf8] sm:$0xf0]  ;;  %v12243_v63 = vor.u32 %v14319_v52, %v12240_v39 }
 0x6a1   :  { %8735 = vmatmul.bf16.vlgmr.msrb.gmra.mxu3 %v22566_v10  ;;  %v8420_v27 = vadd.f32 %v8419_v14, %v21719_v55  ;;  %v11731_v45 = vor.u32 %v14191_v37, %v11728_v47  ;;  %v14383_v19 = vld [vmem:[%s22449_s4 + $0x6dc] sm:$0xf]  ;;  %8788 = vmatpush.bf16.msra.mxu1 %v12019_v50  ;;  %v9091_v10 = vperm.slane %v22555_v53, 5 }
 0x6a2   :  { %8706 = vmatmul.bf16.vlgmr.msrb.gmra.mxu2 %v18864_v32  ;;  %v12496_v24 = vld [vmem:[%s22449_s4 + $0x6f8] sm:$0xf0] }
 0x6a3   :  { %v8504_v60 = vpop.f32.mrf.mxu3  ;;  %v12499_v34 = vor.u32 %v14383_v19, %v12496_v24  ;;  %8818 = vmatpush.bf16.msra.mxu2 %v12243_v63  ;;  %8760 = vmatpush.bf16.msra.mxu0 %v11731_v45  ;;  %v14255_v52 = vld [vmem:[%s22449_s4 + $0x2dc] sm:$0xf] }
 0x6a4   :  { %v8448_v36 = vpop.f32.mrf.mxu1  ;;  %v14311_v14 = vld [vmem:[%s22449_s4 + $0x49c] sm:$0xf] }
 0x6a5   :  { %v8475_v33 = vpop.f32.mrf.mxu2  ;;  %8847 = vmatpush.bf16.msra.mxu3 %v12499_v34  ;;  %v14183_v47 = vld [vmem:[%s22449_s4 + $0x9c] sm:$0xf] }
 0x6a6   :  { %v8476_v31 = vadd.f32 %v8475_v33, %v8447_v18  ;;  %v8449_v18 = vadd.f32 %v8448_v36, %v8420_v27  ;;  %v11984_v33 = vld [vmem:[%s22449_s4 + $0x2f8] sm:$0xf0] }
 0x6a7   :  { %v11987_v37 = vor.u32 %v14255_v52, %v11984_v33  ;;  %v14375_v24 = vld [vmem:[%s22449_s4 + $0x69c] sm:$0xf]  ;;  %v9099_v52 = vperm.slane %v19461_v1, 5 }
 0x6a8   :  { %v8505_v2 = vadd.f32 %v8504_v60, %v8476_v31  ;;  %v8422_v39 = vpop.f32.mrf.mxu0  ;;  %v11696_v31 = vld [vmem:[%s22449_s4 + $0xb8] sm:$0xf0] }
 0x6a9   :  { %v8423_v36 = vadd.f32 %v8422_v39, %v21749_v5  ;;  %v11699_v19 = vor.u32 %v14183_v47, %v11696_v31  ;;  %v12464_v34 = vld [vmem:[%s22449_s4 + $0x6b8] sm:$0xf0]  ;;  %8789 = vmatpush.bf16.msra.mxu1 %v11987_v37 }
 0x6aa   :  { %v9219_v55 = vadd.f32 %v9091_v10, %v8505_v2  ;;  %v12208_v10 = vld [vmem:[%s22449_s4 + $0x4b8] sm:$0xf0]  ;;  %v12467_v2 = vor.u32 %v14375_v24, %v12464_v34 }
 0x6ab   :  { %v8506_v27 = vpop.f32.mrf.mxu3  ;;  %v12211_v45 = vor.u32 %v14311_v14, %v12208_v10  ;;  %8653 = vmatmul.bf16.gmra.mxu0 %v18915_v30  ;;  %v14247_v37 = vld [vmem:[%s22449_s4 + $0x29c] sm:$0xf] }
 0x6ac   :  { %14756 = vtanh.f32 %v9219_v55  ;;  %v8451_v63 = vpop.f32.mrf.mxu1  ;;  %8761 = vmatpush.bf16.msra.mxu0 %v11699_v19  ;;  %8848 = vmatpush.bf16.msra.mxu3 %v12467_v2  ;;  %v11952_v10 = vld [vmem:[%s22449_s4 + $0x2b8] sm:$0xf0] }
 0x6ad   :  { %v8477_v50 = vpop.f32.mrf.mxu2  ;;  %v8452_v33 = vadd.f32 %v8451_v63, %v8423_v36  ;;  %8819 = vmatpush.bf16.msra.mxu2 %v12211_v45  ;;  %v14303_v47 = vld [vmem:[%s22449_s4 + $0x45c] sm:$0xf] }
 0x6ae   :  { %v8478_v60 = vadd.f32 %v8477_v50, %v8449_v18  ;;  %v21948_v18 = vld [vmem:[%s22451_s6] sm:$0xff]  ;;  %v12176_v36 = vld [vmem:[%s22449_s4 + $0x478] sm:$0xf0] }
 0x6af   :  { %v21951_v5 = vperm.slane %v21948_v18, 5  ;;  %8682 = vmatmul.bf16.gmra.mxu1 %v18923_v46  ;;  %v14175_v63 = vld [vmem:[%s22449_s4 + $0x5c] sm:$0xf] }
 0x6b0   :  { %v8507_v55 = vadd.f32 %v8506_v27, %v8478_v60  ;;  %v8424_v60 = vpop.f32.mrf.mxu0  ;;  %v11955_v27 = vor.u32 %v14247_v37, %v11952_v10  ;;  %v11664_v45 = vld [vmem:[%s22449_s4 + $0x78] sm:$0xf0] }
 0x6b1   :  { %8740 = vmatmul.bf16.gmra.mxu3 %v22547_v21  ;;  %v8425_v2 = vadd.f32 %v8424_v60, %v21775_v23  ;;  %v12432_v37 = vld [vmem:[%s22449_s4 + $0x678] sm:$0xf0] }
 0x6b2   :  { %v14757_v14 = vpop.eup %14756  ;;  %v9227_v50 = vadd.f32 %v9099_v52, %v8507_v55  ;;  %8711 = vmatmul.bf16.gmra.mxu2 %v18927_v6  ;;  %v12179_v52 = vor.u32 %v14303_v47, %v12176_v36  ;;  %8790 = vmatpush.bf16.msra.mxu1 %v11955_v27  ;;  %v11920_v60 = vld [vmem:[%s22449_s4 + $0x278] sm:$0xf0] }
 0x6b3   :  { %v9365_v39 = vmul.f32 %v14757_v14, %v21951_v5  ;;  %v8509_v34 = vpop.f32.mrf.mxu3  ;;  %v11667_v14 = vor.u32 %v14175_v63, %v11664_v45  ;;  %v14295_v27 = vld [vmem:[%s22449_s4 + $0x41c] sm:$0xf] }
 0x6b4   :  { %14758 = vtanh.f32 %v9227_v50  ;;  %v8453_v55 = vpop.f32.mrf.mxu1  ;;  %v14367_v50 = vld [vmem:[%s22449_s4 + $0x65c] sm:$0xf]  ;;  %8820 = vmatpush.bf16.msra.mxu2 %v12179_v52 }
 0x6b5   :  { %v8480_v31 = vpop.f32.mrf.mxu2  ;;  %v21978_v19 = vadd.f32 %v21490_v48, %v9365_v39  ;;  %v12435_v10 = vor.u32 %v14367_v50, %v12432_v37  ;;  %v9107_v48 = vperm.slane %v19495_v43, 5  ;;  %8762 = vmatpush.bf16.msra.mxu0 %v11667_v14 }
 0x6b6   :  { %v8481_v24 = vadd.f32 %v8480_v31, %v8452_v33  ;;  %v8454_v33 = vadd.f32 %v8453_v55, %v8425_v2  ;;  %v14239_v31 = vld [vmem:[%s22449_s4 + $0x25c] sm:$0xf] }
 0x6b7   :  { %8849 = vmatpush.bf16.msra.mxu3 %v12435_v10  ;;  %v11923_v45 = vor.u32 %v14239_v31, %v11920_v60 }
 0x6b8   :  { %v8510_v21 = vadd.f32 %v8509_v34, %v8481_v24  ;;  %v8427_v63 = vpop.f32.mrf.mxu0  ;;  %v14167_v24 = vld [vmem:[%s22449_s4 + $0x1c] sm:$0xf] }
 0x6b9   :  { %v11632_v34 = vld [vmem:[%s22449_s4 + $0x38] sm:$0xf0]  ;;  %v8428_v14 = vadd.f32 %v8427_v63, %v21805_v41  ;;  %8791 = vmatpush.bf16.msra.mxu1 %v11923_v45 }
 0x6ba   :  { %v14759_v23 = vpop.eup %14758  ;;  %v9235_v39 = vadd.f32 %v9107_v48, %v8510_v21  ;;  %v12144_v21 = vld [vmem:[%s22449_s4 + $0x438] sm:$0xf0]  ;;  %v11635_v10 = vor.u32 %v14167_v24, %v11632_v34 }
 0x6bb   :  { %v9373_v47 = vmul.f32 %v14759_v23, %v21951_v5  ;;  %v8511_v52 = vpop.f32.mrf.mxu3  ;;  %v12147_v37 = vor.u32 %v14295_v27, %v12144_v21  ;;  %v14359_v48 = vld [vmem:[%s22449_s4 + $0x61c] sm:$0xf]  ;;  %8658 = vmatmul.bf16.gmra.mxu0 %v19025_v16 }
 0x6bc   :  { %14760 = vtanh.f32 %v9235_v39  ;;  %v8456_v50 = vpop.f32.mrf.mxu1  ;;  %v12400_v23 = vld [vmem:[%s22449_s4 + $0x638] sm:$0xf0]  ;;  %8763 = vmatpush.bf16.msra.mxu0 %v11635_v10 }
 0x6bd   :  { %v8482_v36 = vpop.f32.mrf.mxu2  ;;  %v22008_v2 = vadd.f32 %v21520_v29, %v9373_v47  ;;  %v12403_v39 = vor.u32 %v14359_v48, %v12400_v23  ;;  %v9115_v29 = vperm.slane %v19527_v58, 5  ;;  %8821 = vmatpush.bf16.msra.mxu2 %v12147_v37  ;;  %v14231_v27 = vld [vmem:[%s22449_s4 + $0x21c] sm:$0xf] }
 0x6be   :  { %v8483_v55 = vadd.f32 %v8482_v36, %v8454_v33  ;;  %v8457_v33 = vadd.f32 %v8456_v50, %v8428_v14  ;;  %v11888_v36 = vld [vmem:[%s22449_s4 + $0x238] sm:$0xf0] }
 0x6bf   :  { %8687 = vmatmul.bf16.gmra.mxu1 %v22521_v59  ;;  %8850 = vmatpush.bf16.msra.mxu3 %v12403_v39  ;;  %v14607_v63 = vld [vmem:[%s22449_s4 + $0xddc] sm:$0xf]  ;;  %v11891_v24 = vor.u32 %v14231_v27, %v11888_v36 }
 0x6c0   :  { %v8512_v31 = vadd.f32 %v8511_v52, %v8483_v55  ;;  %v8429_v21 = vpop.f32.mrf.mxu0  ;;  %v13392_v34 = vld [vmem:[%s22449_s4 + $0xdf8] sm:$0xf0] }
 0x6c1   :  { %8745 = vmatmul.bf16.gmra.mxu3 %v22524_v54  ;;  %v14479_v55 = vld [vmem:[%s22449_s4 + $0x9dc] sm:$0xf]  ;;  %v8430_v10 = vadd.f32 %v8429_v21, %v21831_v42  ;;  %v13395_v23 = vor.u32 %v14607_v63, %v13392_v34  ;;  %8792 = vmatpush.bf16.msra.mxu1 %v11891_v24 }
 0x6c2   :  { %v14761_v41 = vpop.eup %14760  ;;  %v9243_v47 = vadd.f32 %v9115_v29, %v8512_v31  ;;  %8716 = vmatmul.bf16.gmra.mxu2 %v22522_v7  ;;  %v12880_v52 = vld [vmem:[%s22449_s4 + $0x9f8] sm:$0xf0] }
 0x6c3   :  { %v9381_v60 = vmul.f32 %v14761_v41, %v21951_v5  ;;  %v8514_v37 = vpop.f32.mrf.mxu3  ;;  %v12883_v39 = vor.u32 %v14479_v55, %v12880_v52  ;;  %v14671_v31 = vld [vmem:[%s22449_s4 + $0xfdc] sm:$0xf]  ;;  %v9123_v41 = vperm.slane %v19564_v15, 5  ;;  %8930 = vmatpush.bf16.msrb.mxu2 %v13395_v23 }
 0x6c4   :  { %14762 = vtanh.f32 %v9243_v47  ;;  %v8458_v48 = vpop.f32.mrf.mxu1  ;;  %v13648_v29 = vld [vmem:[%s22449_s4 + $0xff8] sm:$0xf0] }
 0x6c5   :  { %v8485_v45 = vpop.f32.mrf.mxu2  ;;  %v22042_v14 = vadd.f32 %v21554_v11, %v9381_v60  ;;  %v13651_v11 = vor.u32 %v14671_v31, %v13648_v29  ;;  %8872 = vmatpush.bf16.msrb.mxu0 %v12883_v39  ;;  %v14543_v42 = vld [vmem:[%s22449_s4 + $0xbdc] sm:$0xf] }
 0x6c6   :  { %v8486_v50 = vadd.f32 %v8485_v45, %v8457_v33  ;;  %v8459_v33 = vadd.f32 %v8458_v48, %v8430_v10  ;;  %v13136_v60 = vld [vmem:[%s22449_s4 + $0xbf8] sm:$0xf0] }
 0x6c7   :  { %v14599_v27 = vld [vmem:[%s22449_s4 + $0xd9c] sm:$0xf]  ;;  %8959 = vmatpush.bf16.msrb.mxu3 %v13651_v11  ;;  %v13139_v36 = vor.u32 %v14543_v42, %v13136_v60  ;;  %v9131_v60 = vperm.slane %v19599_v49, 5 }
 0x6c8   :  { %v8515_v47 = vadd.f32 %v8514_v37, %v8486_v50  ;;  %v13360_v63 = vld [vmem:[%s22449_s4 + $0xdb8] sm:$0xf0]  ;;  %v8432_v39 = vpop.f32.mrf.mxu0 }
 0x6c9   :  { %v14471_v45 = vld [vmem:[%s22449_s4 + $0x99c] sm:$0xf]  ;;  %v13363_v55 = vor.u32 %v14599_v27, %v13360_v63  ;;  %8901 = vmatpush.bf16.msrb.mxu1 %v13139_v36  ;;  %v8433_v11 = vadd.f32 %v8432_v39, %v21861_v17 }
 0x6ca   :  { %v12848_v21 = vld [vmem:[%s22449_s4 + $0x9b8] sm:$0xf0]  ;;  %v14763_v24 = vpop.eup %14762  ;;  %v9251_v34 = vadd.f32 %v9123_v41, %v8515_v47 }
 0x6cb   :  { %v12851_v52 = vor.u32 %v14471_v45, %v12848_v21  ;;  %v14663_v50 = vld [vmem:[%s22449_s4 + $0xf9c] sm:$0xf]  ;;  %v9389_v48 = vmul.f32 %v14763_v24, %v21951_v5  ;;  %8931 = vmatpush.bf16.msrb.mxu2 %v13363_v55  ;;  %v8516_v41 = vpop.f32.mrf.mxu3  ;;  %8663 = vmatmul.bf16.gmra.mxu0 %v19111_v62 }
 0x6cc   :  { %v13616_v37 = vld [vmem:[%s22449_s4 + $0xfb8] sm:$0xf0]  ;;  %14764 = vtanh.f32 %v9251_v34  ;;  %v8461_v47 = vpop.f32.mrf.mxu1 }
 0x6cd   :  { %v13619_v10 = vor.u32 %v14663_v50, %v13616_v37  ;;  %8873 = vmatpush.bf16.msrb.mxu0 %v12851_v52  ;;  %v8487_v23 = vpop.f32.mrf.mxu2  ;;  %v22078_v31 = vadd.f32 %v21590_v51, %v9389_v48  ;;  %v8462_v27 = vadd.f32 %v8461_v47, %v8433_v11  ;;  %v14535_v36 = vld [vmem:[%s22449_s4 + $0xb9c] sm:$0xf] }
 0x6ce   :  { %v8488_v29 = vadd.f32 %v8487_v23, %v8459_v33  ;;  %v13104_v51 = vld [vmem:[%s22449_s4 + $0xbb8] sm:$0xf0] }
 0x6cf   :  { %8960 = vmatpush.bf16.msrb.mxu3 %v13619_v10  ;;  %8692 = vmatmul.bf16.gmra.mxu1 %v19113_v8  ;;  %v13107_v33 = vor.u32 %v14535_v36, %v13104_v51  ;;  %v14591_v45 = vld [vmem:[%s22449_s4 + $0xd5c] sm:$0xf] }
 0x6d0   :  { %v8517_v42 = vadd.f32 %v8516_v41, %v8488_v29  ;;  %v13328_v21 = vld [vmem:[%s22449_s4 + $0xd78] sm:$0xf0]  ;;  %v8434_v48 = vpop.f32.mrf.mxu0 }
 0x6d1   :  { %8750 = vmatmul.bf16.gmra.mxu3 %v22536_v3  ;;  %8902 = vmatpush.bf16.msrb.mxu1 %v13107_v33  ;;  %v14463_v24 = vld [vmem:[%s22449_s4 + $0x95c] sm:$0xf]  ;;  %v13331_v55 = vor.u32 %v14591_v45, %v13328_v21  ;;  %v8435_v47 = vadd.f32 %v8434_v48, %v21888_v26 }
 0x6d2   :  { %v14765_v63 = vpop.eup %14764  ;;  %v9259_v17 = vadd.f32 %v9131_v60, %v8517_v42  ;;  %8721 = vmatmul.bf16.gmra.mxu2 %v19115_v38  ;;  %v12816_v52 = vld [vmem:[%s22449_s4 + $0x978] sm:$0xf0]  ;;  %v9139_v60 = vperm.slane %v19657_v4, 5 }
 0x6d3   :  { %v9397_v34 = vmul.f32 %v14765_v63, %v21951_v5  ;;  %v14655_v50 = vld [vmem:[%s22449_s4 + $0xf5c] sm:$0xf]  ;;  %v12819_v23 = vor.u32 %v14463_v24, %v12816_v52  ;;  %v8519_v11 = vpop.f32.mrf.mxu3  ;;  %8932 = vmatpush.bf16.msrb.mxu2 %v13331_v55 }
 0x6d4   :  { %14766 = vtanh.f32 %v9259_v17  ;;  %v13584_v37 = vld [vmem:[%s22449_s4 + $0xf78] sm:$0xf0]  ;;  %v8463_v42 = vpop.f32.mrf.mxu1 }
 0x6d5   :  { %v8490_v10 = vpop.f32.mrf.mxu2  ;;  %v13587_v39 = vor.u32 %v14655_v50, %v13584_v37  ;;  %v22112_v29 = vadd.f32 %v21624_v57, %v9397_v34  ;;  %8874 = vmatpush.bf16.msrb.mxu0 %v12819_v23  ;;  %v8464_v51 = vadd.f32 %v8463_v42, %v8435_v47  ;;  %v14527_v33 = vld [vmem:[%s22449_s4 + $0xb5c] sm:$0xf] }
 0x6d6   :  { %v8491_v41 = vadd.f32 %v8490_v10, %v8462_v27  ;;  %v13072_v57 = vld [vmem:[%s22449_s4 + $0xb78] sm:$0xf0] }
 0x6d7   :  { %8961 = vmatpush.bf16.msrb.mxu3 %v13587_v39  ;;  %v14583_v26 = vld [vmem:[%s22449_s4 + $0xd1c] sm:$0xf]  ;;  %v13075_v27 = vor.u32 %v14527_v33, %v13072_v57 }
 0x6d8   :  { %v8520_v36 = vadd.f32 %v8519_v11, %v8491_v41  ;;  %v13296_v63 = vld [vmem:[%s22449_s4 + $0xd38] sm:$0xf0]  ;;  %v8533_v23 = vpop.f32.mrf.mxu0 }
 0x6d9   :  { %v14455_v17 = vld [vmem:[%s22449_s4 + $0x91c] sm:$0xf]  ;;  %v13299_v34 = vor.u32 %v14583_v26, %v13296_v63  ;;  %8903 = vmatpush.bf16.msrb.mxu1 %v13075_v27 }
 0x6da   :  { %v12784_v45 = vld [vmem:[%s22449_s4 + $0x938] sm:$0xf0]  ;;  %v14767_v21 = vpop.eup %14766  ;;  %v9267_v24 = vadd.f32 %v9139_v60, %v8520_v36  ;;  %v9147_v36 = vperm.slane %v19707_v40, 5 }
 0x6db   :  { %v12787_v55 = vor.u32 %v14455_v17, %v12784_v45  ;;  %v14647_v52 = vld [vmem:[%s22449_s4 + $0xf1c] sm:$0xf]  ;;  %v9405_v10 = vmul.f32 %v14767_v21, %v21951_v5  ;;  %8933 = vmatpush.bf16.msrb.mxu2 %v13299_v34  ;;  %v8521_v11 = vpop.f32.mrf.mxu3  ;;  %8764 = vmatmul.bf16.vlgmr.msra.gmra.mxu0 %v18438_v13 }
 0x6dc   :  { %v13552_v50 = vld [vmem:[%s22449_s4 + $0xf38] sm:$0xf0]  ;;  %14768 = vtanh.f32 %v9267_v24  ;;  %v8562_v47 = vpop.f32.mrf.mxu1 }
 0x6dd   :  { %v13555_v37 = vor.u32 %v14647_v52, %v13552_v50  ;;  %8875 = vmatpush.bf16.msrb.mxu0 %v12787_v55  ;;  %v8492_v48 = vpop.f32.mrf.mxu2  ;;  %v22142_v39 = vadd.f32 %v21654_v61, %v9405_v10  ;;  %v8563_v42 = vadd.f32 %v8562_v47, %v8533_v23  ;;  %v14519_v33 = vld [vmem:[%s22449_s4 + $0xb1c] sm:$0xf] }
 0x6de   :  { %v8493_v41 = vadd.f32 %v8492_v48, %v8464_v51  ;;  %v13040_v57 = vld [vmem:[%s22449_s4 + $0xb38] sm:$0xf0] }
 0x6df   :  { %8962 = vmatpush.bf16.msrb.mxu3 %v13555_v37  ;;  %8793 = vmatmul.bf16.vlgmr.msra.gmra.mxu1 %v18449_v20  ;;  %v13043_v61 = vor.u32 %v14519_v33, %v13040_v57  ;;  %v14575_v13 = vld [vmem:[%s22449_s4 + $0xcdc] sm:$0xf] }
 0x6e0   :  { %v8522_v60 = vadd.f32 %v8521_v11, %v8493_v41  ;;  %v13264_v27 = vld [vmem:[%s22449_s4 + $0xcf8] sm:$0xf0]  ;;  %v8535_v24 = vpop.f32.mrf.mxu0 }
 0x6e1   :  { %8851 = vmatmul.bf16.vlgmr.msra.gmra.mxu3 %v18465_v25  ;;  %8904 = vmatpush.bf16.msrb.mxu1 %v13043_v61  ;;  %v14447_v20 = vld [vmem:[%s22449_s4 + $0x8dc] sm:$0xf]  ;;  %v13267_v17 = vor.u32 %v14575_v13, %v13264_v27 }
 0x6e2   :  { %v14769_v51 = vpop.eup %14768  ;;  %v9275_v26 = vadd.f32 %v9147_v36, %v8522_v60  ;;  %8822 = vmatmul.bf16.vlgmr.msra.gmra.mxu2 %v18457_v9  ;;  %v12752_v9 = vld [vmem:[%s22449_s4 + $0x8f8] sm:$0xf0] }
 0x6e3   :  { %v9413_v63 = vmul.f32 %v14769_v51, %v21951_v5  ;;  %v14639_v25 = vld [vmem:[%s22449_s4 + $0xedc] sm:$0xf]  ;;  %v12755_v34 = vor.u32 %v14447_v20, %v12752_v9  ;;  %v8620_v37 = vpop.f32.mrf.mxu3  ;;  %8934 = vmatpush.bf16.msrb.mxu2 %v13267_v17 }
 0x6e4   :  { %14770 = vtanh.f32 %v9275_v26  ;;  %v13520_v45 = vld [vmem:[%s22449_s4 + $0xef8] sm:$0xf0]  ;;  %v8564_v10 = vpop.f32.mrf.mxu1 }
 0x6e5   :  { %v8591_v21 = vpop.f32.mrf.mxu2  ;;  %v13523_v55 = vor.u32 %v14639_v25, %v13520_v45  ;;  %v22175_v52 = vadd.f32 %v21687_v12, %v9413_v63  ;;  %v8565_v48 = vadd.f32 %v8564_v10, %v8535_v24  ;;  %8876 = vmatpush.bf16.msrb.mxu0 %v12755_v34  ;;  %v14511_v41 = vld [vmem:[%s22449_s4 + $0xadc] sm:$0xf] }
 0x6e6   :  { %v8592_v50 = vadd.f32 %v8591_v21, %v8563_v42  ;;  %v13008_v11 = vld [vmem:[%s22449_s4 + $0xaf8] sm:$0xf0] }
 0x6e7   :  { %8963 = vmatpush.bf16.msrb.mxu3 %v13523_v55  ;;  %v14567_v12 = vld [vmem:[%s22449_s4 + $0xc9c] sm:$0xf]  ;;  %v13011_v47 = vor.u32 %v14511_v41, %v13008_v11 }
 0x6e8   :  { %v22177_v23 = vadd.f32 %v8620_v37, %v8592_v50  ;;  %v13232_v42 = vld [vmem:[%s22449_s4 + $0xcb8] sm:$0xf0]  ;;  %v8538_v63 = vpop.f32.mrf.mxu0 }
 0x6e9   :  { %v14439_v60 = vld [vmem:[%s22449_s4 + $0x89c] sm:$0xf]  ;;  %v13235_v57 = vor.u32 %v14567_v12, %v13232_v42  ;;  %8905 = vmatpush.bf16.msrb.mxu1 %v13011_v47 }
 0x6ea   :  { %v12720_v36 = vld [vmem:[%s22449_s4 + $0x8b8] sm:$0xf0]  ;;  %v14771_v33 = vpop.eup %14770 }
 0x6eb   :  { %v12723_v61 = vor.u32 %v14439_v60, %v12720_v36  ;;  %v14631_v51 = vld [vmem:[%s22449_s4 + $0xe9c] sm:$0xf]  ;;  %v9421_v27 = vmul.f32 %v14771_v33, %v21951_v5  ;;  %8935 = vmatpush.bf16.msrb.mxu2 %v13235_v57  ;;  %v8622_v25 = vpop.f32.mrf.mxu3  ;;  %8769 = vmatmul.bf16.gmra.mxu0 %v22538_v22 }
 0x6ec   :  { %v13488_v26 = vld [vmem:[%s22449_s4 + $0xeb8] sm:$0xf0]  ;;  %v8567_v45 = vpop.f32.mrf.mxu1 }
 0x6ed   :  { %v13491_v13 = vor.u32 %v14631_v51, %v13488_v26  ;;  %8877 = vmatpush.bf16.msrb.mxu0 %v12723_v61  ;;  %v8593_v20 = vpop.f32.mrf.mxu2  ;;  %v22205_v17 = vadd.f32 %v21717_v0, %v9421_v27  ;;  %v8568_v21 = vadd.f32 %v8567_v45, %v8538_v63  ;;  %v14503_v5 = vld [vmem:[%s22449_s4 + $0xa9c] sm:$0xf] }
 0x6ee   :  { %v8594_v9 = vadd.f32 %v8593_v20, %v8565_v48  ;;  %v12976_v34 = vld [vmem:[%s22449_s4 + $0xab8] sm:$0xf0] }
 0x6ef   :  { %8964 = vmatpush.bf16.msrb.mxu3 %v13491_v13  ;;  %8798 = vmatmul.bf16.gmra.mxu1 %v22539_v44  ;;  %v12979_v0 = vor.u32 %v14503_v5, %v12976_v34  ;;  %v22567_v55 = vld [vmem:[#allocation5_spill] sm:$0xff] }
 0x6f0   :  { %v22207_v24 = vadd.f32 %v8622_v25, %v8594_v9  ;;  %v14559_v22 = vld [vmem:[%s22449_s4 + $0xc5c] sm:$0xf]  ;;  %v8540_v11 = vpop.f32.mrf.mxu0 }
 0x6f1   :  { %8856 = vmatmul.bf16.gmra.mxu3 %v22567_v55  ;;  %8906 = vmatpush.bf16.msrb.mxu1 %v12979_v0  ;;  %v13200_v50 = vld [vmem:[%s22449_s4 + $0xc78] sm:$0xf0] }
 0x6f2   :  { %8827 = vmatmul.bf16.gmra.mxu2 %v22548_v35  ;;  %v14431_v37 = vld [vmem:[%s22449_s4 + $0x85c] sm:$0xf]  ;;  %v13203_v10 = vor.u32 %v14559_v22, %v13200_v50 }
 0x6f3   :  { %v12688_v44 = vld [vmem:[%s22449_s4 + $0x878] sm:$0xf0]  ;;  %v8625_v60 = vpop.f32.mrf.mxu3 }
 0x6f4   :  { %v14623_v35 = vld [vmem:[%s22449_s4 + $0xe5c] sm:$0xf]  ;;  %v12691_v12 = vor.u32 %v14431_v37, %v12688_v44  ;;  %v8569_v36 = vpop.f32.mrf.mxu1  ;;  %8936 = vmatpush.bf16.msrb.mxu2 %v13203_v10  ;;  %v22568_v44 = vld [vmem:[#allocation6_spill] sm:$0xff] }
 0x6f5   :  { %v13456_v48 = vld [vmem:[%s22449_s4 + $0xe78] sm:$0xf0]  ;;  %v8596_v41 = vpop.f32.mrf.mxu2  ;;  %v8570_v33 = vadd.f32 %v8569_v36, %v8540_v11 }
 0x6f6   :  { %v13459_v47 = vor.u32 %v14623_v35, %v13456_v48  ;;  %v8597_v42 = vadd.f32 %v8596_v41, %v8568_v21  ;;  %8878 = vmatpush.bf16.msrb.mxu0 %v12691_v12  ;;  %v14495_v61 = vld [vmem:[%s22449_s4 + $0xa5c] sm:$0xf]  ;;  %v22569_v41 = vld [vmem:[#allocation7_spill] sm:$0xff]  ;;  %v22570_v12 = vld [vmem:[#allocation8_spill] sm:$0xff] }
 0x6f7   :  { %v12944_v51 = vld [vmem:[%s22449_s4 + $0xa78] sm:$0xf0] }
 0x6f8   :  { %8965 = vmatpush.bf16.msrb.mxu3 %v13459_v47  ;;  %v22237_v57 = vadd.f32 %v8625_v60, %v8597_v42  ;;  %v14551_v26 = vld [vmem:[%s22449_s4 + $0xc1c] sm:$0xf]  ;;  %v12947_v13 = vor.u32 %v14495_v61, %v12944_v51  ;;  %v8543_v0 = vpop.f32.mrf.mxu0 }
 0x6f9   :  { %v13168_v27 = vld [vmem:[%s22449_s4 + $0xc38] sm:$0xf0] }
 0x6fa   :  { %v14423_v20 = vld [vmem:[%s22449_s4 + $0x81c] sm:$0xf]  ;;  %v13171_v9 = vor.u32 %v14551_v26, %v13168_v27  ;;  %8907 = vmatpush.bf16.msrb.mxu1 %v12947_v13 }
 0x6fb   :  { %v12656_v63 = vld [vmem:[%s22449_s4 + $0x838] sm:$0xf0]  ;;  %v8627_v22 = vpop.f32.mrf.mxu3  ;;  %8774 = vmatmul.bf16.gmra.mxu0 %v22568_v44 }
 0x6fc   :  { %v12659_v25 = vor.u32 %v14423_v20, %v12656_v63  ;;  %v14615_v45 = vld [vmem:[%s22449_s4 + $0xe1c] sm:$0xf]  ;;  %8937 = vmatpush.bf16.msrb.mxu2 %v13171_v9  ;;  %v8572_v50 = vpop.f32.mrf.mxu1 }
 0x6fd   :  { %v13424_v21 = vld [vmem:[%s22449_s4 + $0xe38] sm:$0xf0]  ;;  %v8598_v34 = vpop.f32.mrf.mxu2  ;;  %v8573_v37 = vadd.f32 %v8572_v50, %v8543_v0 }
 0x6fe   :  { %v13427_v5 = vor.u32 %v14615_v45, %v13424_v21  ;;  %8879 = vmatpush.bf16.msrb.mxu0 %v12659_v25  ;;  %v8599_v55 = vadd.f32 %v8598_v34, %v8570_v33  ;;  %v14487_v35 = vld [vmem:[%s22449_s4 + $0xa1c] sm:$0xf]  ;;  %v22572_v21 = vld [vmem:[#allocation10_spill] sm:$0xff]  ;;  %v22574_v34 = vld [vmem:[#allocation12_spill] sm:$0xff] }
 0x6ff   :  { %v12912_v48 = vld [vmem:[%s22449_s4 + $0xa38] sm:$0xf0]  ;;  %8803 = vmatmul.bf16.gmra.mxu1 %v22569_v41 }
 0x700   :  { %8966 = vmatpush.bf16.msrb.mxu3 %v13427_v5  ;;  %v22263_v10 = vadd.f32 %v8627_v22, %v8599_v55  ;;  %v12915_v11 = vor.u32 %v14487_v35, %v12912_v48  ;;  %v22571_v47 = vld [vmem:[#allocation9_spill] sm:$0xff]  ;;  %v8545_v60 = vpop.f32.mrf.mxu0  ;;  %v22573_v5 = vld [vmem:[#allocation11_spill] sm:$0xff] }
 0x701   :  { %8861 = vmatmul.bf16.gmra.mxu3 %v22571_v47  ;;  %v22575_v0 = vld [vmem:[#allocation13_spill] sm:$0xff] }
 0x702   :  { %8832 = vmatmul.bf16.gmra.mxu2 %v22570_v12  ;;  %8908 = vmatpush.bf16.msrb.mxu1 %v12915_v11 }
 0x704   :  { %v8630_v33 = vpop.f32.mrf.mxu3  ;;  %v8574_v61 = vpop.f32.mrf.mxu1 }
 0x705   :  { %v8601_v42 = vpop.f32.mrf.mxu2  ;;  %v8575_v51 = vadd.f32 %v8574_v61, %v8545_v60  ;;  %v22576_v61 = vld [vmem:[#allocation14_spill] sm:$0xff] }
 0x706   :  { %v8602_v36 = vadd.f32 %v8601_v42, %v8573_v37 }
 0x708   :  { %v22275_v26 = vadd.f32 %v8630_v33, %v8602_v36  ;;  %v8548_v27 = vpop.f32.mrf.mxu0 }
 0x70b   :  { %8779 = vmatmul.bf16.gmra.mxu0 %v22572_v21 }
 0x70c   :  { %v8632_v63 = vpop.f32.mrf.mxu3  ;;  %v8577_v9 = vpop.f32.mrf.mxu1 }
 0x70d   :  { %v8603_v13 = vpop.f32.mrf.mxu2  ;;  %v8578_v25 = vadd.f32 %v8577_v9, %v8548_v27 }
 0x70e   :  { %v8604_v20 = vadd.f32 %v8603_v13, %v8575_v51 }
 0x70f   :  { %8808 = vmatmul.bf16.gmra.mxu1 %v22573_v5 }
 0x710   :  { %v22277_v45 = vadd.f32 %v8632_v63, %v8604_v20  ;;  %v8550_v22 = vpop.f32.mrf.mxu0 }
 0x711   :  { %8866 = vmatmul.bf16.gmra.mxu3 %v22575_v0 }
 0x712   :  { %8837 = vmatmul.bf16.gmra.mxu2 %v22574_v34 }
 0x714   :  { %v8635_v37 = vpop.f32.mrf.mxu3  ;;  %v8579_v44 = vpop.f32.mrf.mxu1 }
 0x715   :  { %v8606_v55 = vpop.f32.mrf.mxu2  ;;  %v8580_v35 = vadd.f32 %v8579_v44, %v8550_v22  ;;  %v22296_v22 = vperm.slane %v21948_v18, 6 }
 0x716   :  { %v8607_v50 = vadd.f32 %v8606_v55, %v8578_v25  ;;  %v9092_v25 = vperm.slane %v22555_v53, 6 }
 0x718   :  { %v22283_v48 = vadd.f32 %v8635_v37, %v8607_v50  ;;  %v8649_v11 = vpop.f32.mrf.mxu0 }
 0x719   :  { %v8650_v42 = vadd.f32 %v8649_v11, %v22177_v23 }
 0x71b   :  { %8880 = vmatmul.bf16.vlgmr.msrb.gmra.mxu0 %v18854_v28 }
 0x71c   :  { %v8637_v47 = vpop.f32.mrf.mxu3  ;;  %v8678_v60 = vpop.f32.mrf.mxu1 }
 0x71d   :  { %v8608_v41 = vpop.f32.mrf.mxu2  ;;  %v8679_v33 = vadd.f32 %v8678_v60, %v8650_v42 }
 0x71e   :  { %v8609_v12 = vadd.f32 %v8608_v41, %v8580_v35  ;;  %v22577_v41 = vld [vmem:[#allocation15_spill] sm:$0xff] }
 0x71f   :  { %8909 = vmatmul.bf16.vlgmr.msrb.gmra.mxu1 %v18862_v56 }
 0x720   :  { %v22286_v36 = vadd.f32 %v8637_v47, %v8609_v12  ;;  %v8651_v13 = vpop.f32.mrf.mxu0 }
 0x721   :  { %8967 = vmatmul.bf16.vlgmr.msrb.gmra.mxu3 %v22576_v61  ;;  %v8652_v63 = vadd.f32 %v8651_v13, %v22207_v24  ;;  %v9100_v24 = vperm.slane %v19461_v1, 6 }
 0x722   :  { %8938 = vmatmul.bf16.vlgmr.msrb.gmra.mxu2 %v18864_v32 }
 0x724   :  { %v8736_v20 = vpop.f32.mrf.mxu3  ;;  %v8680_v9 = vpop.f32.mrf.mxu1 }
 0x725   :  { %v8707_v51 = vpop.f32.mrf.mxu2  ;;  %v8681_v21 = vadd.f32 %v8680_v9, %v8652_v63 }
 0x726   :  { %v8708_v27 = vadd.f32 %v8707_v51, %v8679_v33  ;;  %v9108_v33 = vperm.slane %v19495_v43, 6 }
 0x728   :  { %v8737_v23 = vadd.f32 %v8736_v20, %v8708_v27  ;;  %v8654_v34 = vpop.f32.mrf.mxu0 }
 0x729   :  { %v8655_v32 = vadd.f32 %v8654_v34, %v22237_v57 }
 0x72a   :  { %v9220_v5 = vadd.f32 %v9092_v25, %v8737_v23 }
 0x72b   :  { %8885 = vmatmul.bf16.gmra.mxu0 %v18915_v30 }
 0x72c   :  { %14772 = vtanh.f32 %v9220_v5  ;;  %v8738_v0 = vpop.f32.mrf.mxu3  ;;  %v8683_v55 = vpop.f32.mrf.mxu1 }
 0x72d   :  { %v8709_v28 = vpop.f32.mrf.mxu2  ;;  %v8684_v37 = vadd.f32 %v8683_v55, %v8655_v32 }
 0x72e   :  { %v8710_v56 = vadd.f32 %v8709_v28, %v8681_v21  ;;  %v9116_v21 = vperm.slane %v19527_v58, 6 }
 0x72f   :  { %8914 = vmatmul.bf16.gmra.mxu1 %v18923_v46 }
 0x730   :  { %v8739_v50 = vadd.f32 %v8738_v0, %v8710_v56  ;;  %v8656_v18 = vpop.f32.mrf.mxu0 }
 0x731   :  { %8972 = vmatmul.bf16.gmra.mxu3 %v22577_v41  ;;  %v8657_v30 = vadd.f32 %v8656_v18, %v22263_v10 }
 0x732   :  { %v14773_v44 = vpop.eup %14772  ;;  %v9228_v35 = vadd.f32 %v9100_v24, %v8739_v50  ;;  %8943 = vmatmul.bf16.gmra.mxu2 %v18927_v6  ;;  %v9124_v24 = vperm.slane %v19564_v15, 6 }
 0x733   :  { %v9366_v57 = vmul.f32 %v14773_v44, %v22296_v22 }
 0x734   :  { %14774 = vtanh.f32 %v9228_v35  ;;  %v8741_v42 = vpop.f32.mrf.mxu3  ;;  %v8685_v60 = vpop.f32.mrf.mxu1 }
 0x735   :  { %v8712_v11 = vpop.f32.mrf.mxu2  ;;  %v22305_v12 = vadd.f32 %v21978_v19, %v9366_v57  ;;  %v8686_v61 = vadd.f32 %v8685_v60, %v8657_v30 }
 0x736   :  { %v8713_v47 = vadd.f32 %v8712_v11, %v8684_v37 }
 0x738   :  { %v8742_v46 = vadd.f32 %v8741_v42, %v8713_v47  ;;  %v8659_v20 = vpop.f32.mrf.mxu0  ;;  %v9132_v42 = vperm.slane %v19599_v49, 6 }
 0x739   :  { %v8660_v23 = vadd.f32 %v8659_v20, %v22275_v26 }
 0x73a   :  { %v14775_v6 = vpop.eup %14774  ;;  %v9236_v51 = vadd.f32 %v9108_v33, %v8742_v46 }
 0x73b   :  { %v9374_v13 = vmul.f32 %v14775_v6, %v22296_v22  ;;  %8890 = vmatmul.bf16.gmra.mxu0 %v19025_v16 }
 0x73c   :  { %14776 = vtanh.f32 %v9236_v51  ;;  %v8743_v9 = vpop.f32.mrf.mxu3  ;;  %v8688_v10 = vpop.f32.mrf.mxu1 }
 0x73d   :  { %v8714_v27 = vpop.f32.mrf.mxu2  ;;  %v22311_v63 = vadd.f32 %v22008_v2, %v9374_v13  ;;  %v8689_v5 = vadd.f32 %v8688_v10, %v8660_v23 }
 0x73e   :  { %v8715_v19 = vadd.f32 %v8714_v27, %v8686_v61  ;;  %v9140_v27 = vperm.slane %v19657_v4, 6 }
 0x73f   :  { %8919 = vmatmul.bf16.gmra.mxu1 %v22521_v59 }
 0x740   :  { %v8744_v25 = vadd.f32 %v8743_v9, %v8715_v19  ;;  %v8661_v26 = vpop.f32.mrf.mxu0 }
 0x741   :  { %8977 = vmatmul.bf16.gmra.mxu3 %v22524_v54  ;;  %v8662_v16 = vadd.f32 %v8661_v26, %v22277_v45 }
 0x742   :  { %v14777_v28 = vpop.eup %14776  ;;  %v9244_v34 = vadd.f32 %v9116_v21, %v8744_v25  ;;  %8948 = vmatmul.bf16.gmra.mxu2 %v22522_v7 }
 0x743   :  { %v9382_v2 = vmul.f32 %v14777_v28, %v22296_v22 }
 0x744   :  { %14778 = vtanh.f32 %v9244_v34  ;;  %v8746_v55 = vpop.f32.mrf.mxu3  ;;  %v8690_v50 = vpop.f32.mrf.mxu1 }
 0x745   :  { %v8717_v56 = vpop.f32.mrf.mxu2  ;;  %v22321_v0 = vadd.f32 %v22042_v14, %v9382_v2  ;;  %v8691_v37 = vadd.f32 %v8690_v50, %v8662_v16 }
 0x746   :  { %v8718_v32 = vadd.f32 %v8717_v56, %v8689_v5 }
 0x748   :  { %v8747_v59 = vadd.f32 %v8746_v55, %v8718_v32  ;;  %v8664_v41 = vpop.f32.mrf.mxu0 }
 0x749   :  { %v8665_v18 = vadd.f32 %v8664_v41, %v22283_v48 }
 0x74a   :  { %v14779_v7 = vpop.eup %14778  ;;  %v9252_v44 = vadd.f32 %v9124_v24, %v8747_v59 }
 0x74b   :  { %v9390_v54 = vmul.f32 %v14779_v7, %v22296_v22  ;;  %8895 = vmatmul.bf16.gmra.mxu0 %v19111_v62 }
 0x74c   :  { %14780 = vtanh.f32 %v9252_v44  ;;  %v8748_v11 = vpop.f32.mrf.mxu3  ;;  %v8693_v45 = vpop.f32.mrf.mxu1 }
 0x74d   :  { %v8719_v35 = vpop.f32.mrf.mxu2  ;;  %v22327_v57 = vadd.f32 %v22078_v31, %v9390_v54  ;;  %v8694_v30 = vadd.f32 %v8693_v45, %v8665_v18 }
 0x74e   :  { %v8720_v14 = vadd.f32 %v8719_v35, %v8691_v37 }
 0x74f   :  { %8924 = vmatmul.bf16.gmra.mxu1 %v19113_v8 }
 0x750   :  { %v8749_v47 = vadd.f32 %v8748_v11, %v8720_v14  ;;  %v8666_v48 = vpop.f32.mrf.mxu0 }
 0x751   :  { %8982 = vmatmul.bf16.gmra.mxu3 %v22536_v3  ;;  %v8667_v62 = vadd.f32 %v8666_v48, %v22286_v36  ;;  %v9148_v36 = vperm.slane %v19707_v40, 6 }
 0x752   :  { %v14781_v60 = vpop.eup %14780  ;;  %v9260_v46 = vadd.f32 %v9132_v42, %v8749_v47  ;;  %8953 = vmatmul.bf16.gmra.mxu2 %v19115_v38 }
 0x753   :  { %v9398_v31 = vmul.f32 %v14781_v60, %v22296_v22 }
 0x754   :  { %14782 = vtanh.f32 %v9260_v46  ;;  %v8751_v51 = vpop.f32.mrf.mxu3  ;;  %v8695_v13 = vpop.f32.mrf.mxu1 }
 0x755   :  { %v8722_v33 = vpop.f32.mrf.mxu2  ;;  %v22337_v61 = vadd.f32 %v22112_v29, %v9398_v31  ;;  %v8696_v20 = vadd.f32 %v8695_v13, %v8667_v62 }
 0x756   :  { %v8723_v6 = vadd.f32 %v8722_v33, %v8694_v30 }
 0x758   :  { %v8752_v8 = vadd.f32 %v8751_v51, %v8723_v6  ;;  %v8765_v23 = vpop.f32.mrf.mxu0 }
 0x75a   :  { %v14783_v38 = vpop.eup %14782  ;;  %v9268_v19 = vadd.f32 %v9140_v27, %v8752_v8 }
 0x75b   :  { %v9406_v3 = vmul.f32 %v14783_v38, %v22296_v22 }
 0x75c   :  { %14784 = vtanh.f32 %v9268_v19  ;;  %v8753_v25 = vpop.f32.mrf.mxu3  ;;  %v8794_v21 = vpop.f32.mrf.mxu1 }
 0x75d   :  { %v8724_v9 = vpop.f32.mrf.mxu2  ;;  %v22343_v10 = vadd.f32 %v22142_v39, %v9406_v3  ;;  %v8795_v62 = vadd.f32 %v8794_v21, %v8765_v23  ;;  %v9093_v21 = vperm.slane %v22555_v53, 7  ;;  %v9101_v53 = vperm.slane %v19461_v1, 7 }
 0x75e   :  { %v8725_v29 = vadd.f32 %v8724_v9, %v8696_v20 }
 0x760   :  { %v8754_v5 = vadd.f32 %v8753_v25, %v8725_v29  ;;  %v8767_v26 = vpop.f32.mrf.mxu0 }
 0x762   :  { %v14785_v28 = vpop.eup %14784  ;;  %v9276_v34 = vadd.f32 %v9148_v36, %v8754_v5 }
 0x763   :  { %v9414_v2 = vmul.f32 %v14785_v28, %v22296_v22 }
 0x764   :  { %14786 = vtanh.f32 %v9276_v34  ;;  %v8852_v55 = vpop.f32.mrf.mxu3  ;;  %v8796_v16 = vpop.f32.mrf.mxu1 }
 0x765   :  { %v8823_v56 = vpop.f32.mrf.mxu2  ;;  %v22348_v32 = vadd.f32 %v22175_v52, %v9414_v2  ;;  %v8797_v3 = vadd.f32 %v8796_v16, %v8767_v26 }
 0x766   :  { %v8824_v13 = vadd.f32 %v8823_v56, %v8795_v62 }
 0x768   :  { %v8770_v24 = vpop.f32.mrf.mxu0  ;;  %v8853_v20 = vadd.f32 %v8852_v55, %v8824_v13 }
 0x76a   :  { %v14787_v39 = vpop.eup %14786 }
 0x76b   :  { %v9422_v50 = vmul.f32 %v14787_v39, %v22296_v22 }
 0x76c   :  { %v8854_v7 = vpop.f32.mrf.mxu3  ;;  %v8799_v44 = vpop.f32.mrf.mxu1 }
 0x76d   :  { %v8825_v59 = vpop.f32.mrf.mxu2  ;;  %v22352_v37 = vadd.f32 %v22205_v17, %v9422_v50  ;;  %v8800_v50 = vadd.f32 %v8799_v44, %v8770_v24 }
 0x76e   :  { %v8826_v29 = vadd.f32 %v8825_v59, %v8797_v3 }
 0x76f   :  { %22578 = vst [vmem:[#allocation18_spill] sm:$0xff] %v22352_v37 }
 0x770   :  { %v8772_v35 = vpop.f32.mrf.mxu0  ;;  %v8855_v28 = vadd.f32 %v8854_v7, %v8826_v29  ;;  %v14813_v7 = vld [vmem:[%s22451_s6] sm:$0xff] }
 0x774   :  { %v8857_v41 = vpop.f32.mrf.mxu3  ;;  %v8801_v14 = vpop.f32.mrf.mxu1 }
 0x775   :  { %v8828_v54 = vpop.f32.mrf.mxu2  ;;  %v8802_v24 = vadd.f32 %v8801_v14, %v8772_v35  ;;  %v9109_v14 = vperm.slane %v19495_v43, 7 }
 0x776   :  { %v8829_v62 = vadd.f32 %v8828_v54, %v8800_v50 }
 0x778   :  { %v22354_v18 = vpop.f32.mrf.mxu0  ;;  %v8858_v16 = vadd.f32 %v8857_v41, %v8829_v62 }
 0x77c   :  { %v8859_v52 = vpop.f32.mrf.mxu3  ;;  %v22356_v45 = vpop.f32.mrf.mxu1 }
 0x77d   :  { %v8830_v11 = vpop.f32.mrf.mxu2  ;;  %v8805_v1 = vadd.f32 %v22356_v45, %v22354_v18 }
 0x780   :  { %v22360_v22 = vpop.f32.mrf.mxu0 }
 0x784   :  { %v22362_v42 = vpop.f32.mrf.mxu3  ;;  %v22364_v17 = vpop.f32.mrf.mxu1 }
 0x785   :  { %v22358_v47 = vpop.f32.mrf.mxu2  ;;  %v8807_v43 = vadd.f32 %v22364_v17, %v22360_v22 }
 0x788   :  { %v22368_v60 = vpop.f32.mrf.mxu0 }
 0x78c   :  { %v22370_v46 = vpop.f32.mrf.mxu3  ;;  %v22372_v31 = vpop.f32.mrf.mxu1 }
 0x78d   :  { %v22366_v30 = vpop.f32.mrf.mxu2 }
 0x790   :  { %v22376_v48 = vpop.f32.mrf.mxu0 }
 0x794   :  { %v22378_v6 = vpop.f32.mrf.mxu3  ;;  %v22380_v51 = vpop.f32.mrf.mxu1 }
 0x795   :  { %v22374_v33 = vpop.f32.mrf.mxu2 }
 0x798   :  { %v8881_v27 = vpop.f32.mrf.mxu0 }
 0x799   :  { %v8882_v9 = vadd.f32 %v8881_v27, %v8853_v20 }
 0x79c   :  { %v22384_v38 = vpop.f32.mrf.mxu3  ;;  %v8910_v19 = vpop.f32.mrf.mxu1 }
 0x79d   :  { %v22382_v8 = vpop.f32.mrf.mxu2  ;;  %v8911_v25 = vadd.f32 %v8910_v19, %v8882_v9  ;;  %v22390_v19 = vperm.slane %v14813_v7, 7  ;;  %v8831_v9 = vadd.f32 %v8830_v11, %v8802_v24 }
 0x7a0   :  { %v8883_v36 = vpop.f32.mrf.mxu0 }
 0x7a1   :  { %v8884_v56 = vadd.f32 %v8883_v36, %v8855_v28  ;;  %v8860_v28 = vadd.f32 %v8859_v52, %v8831_v9 }
 0x7a4   :  { %v8968_v2 = vpop.f32.mrf.mxu3  ;;  %v8912_v39 = vpop.f32.mrf.mxu1 }
 0x7a5   :  { %v8939_v5 = vpop.f32.mrf.mxu2  ;;  %v8913_v13 = vadd.f32 %v8912_v39, %v8884_v56 }
 0x7a6   :  { %v8940_v34 = vadd.f32 %v8939_v5, %v8911_v25 }
 0x7a8   :  { %v8969_v23 = vadd.f32 %v8968_v2, %v8940_v34  ;;  %v8886_v26 = vpop.f32.mrf.mxu0 }
 0x7a9   :  { %v8887_v54 = vadd.f32 %v8886_v26, %v8858_v16 }
 0x7aa   :  { %v9221_v55 = vadd.f32 %v9093_v21, %v8969_v23  ;;  %v8834_v23 = vadd.f32 %v22358_v47, %v8805_v1  ;;  %v9117_v47 = vperm.slane %v19527_v58, 7  ;;  %v8810_v58 = vadd.f32 %v22372_v31, %v22368_v60 }
 0x7ac   :  { %14788 = vtanh.f32 %v9221_v55  ;;  %v8970_v27 = vpop.f32.mrf.mxu3  ;;  %v8915_v20 = vpop.f32.mrf.mxu1 }
 0x7ad   :  { %v8941_v37 = vpop.f32.mrf.mxu2 }
 0x7ae   :  { %v8942_v59 = vadd.f32 %v8941_v37, %v8913_v13  ;;  %v8916_v37 = vadd.f32 %v8915_v20, %v8887_v54  ;;  %v8863_v13 = vadd.f32 %v22362_v42, %v8834_v23  ;;  %v8836_v20 = vadd.f32 %v22366_v30, %v8807_v43 }
 0x7af   :  { %v9125_v30 = vperm.slane %v19564_v15, 7  ;;  %v8812_v15 = vadd.f32 %v22380_v51, %v22376_v48 }
 0x7b0   :  { %v8971_v44 = vadd.f32 %v8970_v27, %v8942_v59  ;;  %v8888_v5 = vpop.f32.mrf.mxu0  ;;  %v8865_v54 = vadd.f32 %v22370_v46, %v8836_v20 }
 0x7b1   :  { %v8889_v11 = vadd.f32 %v8888_v5, %v8860_v28 }
 0x7b2   :  { %v14789_v3 = vpop.eup %14788  ;;  %v9229_v29 = vadd.f32 %v9101_v53, %v8971_v44 }
 0x7b3   :  { %v9367_v25 = vmul.f32 %v14789_v3, %v22390_v19 }
 0x7b4   :  { %14790 = vtanh.f32 %v9229_v29  ;;  %v8973_v2 = vpop.f32.mrf.mxu3  ;;  %v8917_v39 = vpop.f32.mrf.mxu1 }
 0x7b5   :  { %v8944_v41 = vpop.f32.mrf.mxu2  ;;  %v9430_v36 = vadd.f32 %v22305_v12, %v9367_v25  ;;  %v8918_v12 = vadd.f32 %v8917_v39, %v8889_v11 }
 0x7b6   :  { %v8945_v34 = vadd.f32 %v8944_v41, %v8916_v37  ;;  %v8839_v37 = vadd.f32 %v22374_v33, %v8810_v58  ;;  %v9133_v33 = vperm.slane %v19599_v49, 7 }
 0x7b7   :  { %9431 = vadd.xlane.f32.xlu0 %v9430_v36 }
 0x7b8   :  { %v8974_v35 = vadd.f32 %v8973_v2, %v8945_v34  ;;  %v8891_v62 = vpop.f32.mrf.mxu0  ;;  %v8868_v34 = vadd.f32 %v22378_v6, %v8839_v37 }
 0x7b9   :  { %v8892_v59 = vadd.f32 %v8891_v62, %v8863_v13 }
 0x7ba   :  { %v14791_v50 = vpop.eup %14790  ;;  %v9237_v21 = vadd.f32 %v9109_v14, %v8974_v35  ;;  %v8841_v14 = vadd.f32 %v22382_v8, %v8812_v15 }
 0x7bb   :  { %v9375_v56 = vmul.f32 %v14791_v50, %v22390_v19 }
 0x7bc   :  { %14792 = vtanh.f32 %v9237_v21  ;;  %v8975_v18 = vpop.f32.mrf.mxu3  ;;  %v8920_v45 = vpop.f32.mrf.mxu1 }
 0x7bd   :  { %v8946_v52 = vpop.f32.mrf.mxu2  ;;  %v9439_v55 = vadd.f32 %v22311_v63, %v9375_v56  ;;  %v8921_v63 = vadd.f32 %v8920_v45, %v8892_v59  ;;  %v8870_v56 = vadd.f32 %v22384_v38, %v8841_v14 }
 0x7be   :  { %v8947_v26 = vadd.f32 %v8946_v52, %v8918_v12  ;;  %v9141_v12 = vperm.slane %v19657_v4, 7 }
 0x7bf   :  { %9440 = vadd.xlane.f32.xlu0 %v9439_v55 }
 0x7c0   :  { %v8976_v16 = vadd.f32 %v8975_v18, %v8947_v26  ;;  %v8893_v44 = vpop.f32.mrf.mxu0 }
 0x7c1   :  { %v8894_v29 = vadd.f32 %v8893_v44, %v8865_v54 }
 0x7c2   :  { %v14793_v27 = vpop.eup %14792  ;;  %v9245_v7 = vadd.f32 %v9117_v47, %v8976_v16  ;;  %v9149_v16 = vperm.slane %v19707_v40, 7 }
 0x7c3   :  { %v9383_v24 = vmul.f32 %v14793_v27, %v22390_v19 }
 0x7c4   :  { %14794 = vtanh.f32 %v9245_v7  ;;  %v8978_v22 = vpop.f32.mrf.mxu3  ;;  %v8922_v17 = vpop.f32.mrf.mxu1 }
 0x7c5   :  { %v8949_v42 = vpop.f32.mrf.mxu2  ;;  %v9448_v53 = vadd.f32 %v22321_v0, %v9383_v24  ;;  %v8923_v0 = vadd.f32 %v8922_v17, %v8894_v29  ;;  %v22579_v24 = vld [vmem:[#allocation18_spill] sm:$0xff] }
 0x7c6   :  { %v8950_v3 = vadd.f32 %v8949_v42, %v8921_v63 }
 0x7c7   :  { %9449 = vadd.xlane.f32.xlu1 %v9448_v53  ;;  %v9506_v53 = vlaneseq }
 0x7c8   :  { %v8979_v9 = vadd.f32 %v8978_v22, %v8950_v3  ;;  %v8896_v36 = vpop.f32.mrf.mxu0 }
 0x7c9   :  { %v8897_v39 = vadd.f32 %v8896_v36, %v8868_v34  ;;  %v9507_v40 = vand.u32 127, %v9506_v53 }
 0x7ca   :  { %v14795_v25 = vpop.eup %14794  ;;  %v9253_v41 = vadd.f32 %v9125_v30, %v8979_v9 }
 0x7cb   :  { %v9391_v5 = vmul.f32 %v14795_v25, %v22390_v19 }
 0x7cc   :  { %14796 = vtanh.f32 %v9253_v41  ;;  %v8980_v60 = vpop.f32.mrf.mxu3  ;;  %v8925_v1 = vpop.f32.mrf.mxu1 }
 0x7cd   :  { %v8951_v46 = vpop.f32.mrf.mxu2  ;;  %v9457_v28 = vadd.f32 %v22327_v57, %v9391_v5  ;;  %v8926_v57 = vadd.f32 %v8925_v1, %v8897_v39  ;;  %v9496_v5 = vld [vmem:[%s22452_s2] sm:$0xff] }
 0x7ce   :  { %v8952_v2 = vadd.f32 %v8951_v46, %v8923_v0  ;;  %vm9497_vm11 = vcmp.gt.s32.totalorder %v9496_v5, 0 }
 0x7cf   :  { %9458 = vadd.xlane.f32.xlu1 %v9457_v28 }
 0x7d0   :  { %v8981_v31 = vadd.f32 %v8980_v60, %v8952_v2  ;;  %v8898_v23 = vpop.f32.mrf.mxu0 }
 0x7d1   :  { %v8899_v52 = vadd.f32 %v8898_v23, %v8870_v56 }
 0x7d2   :  { %v14797_v35 = vpop.eup %14796  ;;  %v9261_v11 = vadd.f32 %v9133_v33, %v8981_v31 }
 0x7d3   :  { %v9399_v50 = vmul.f32 %v14797_v35, %v22390_v19 }
 0x7d4   :  { %14798 = vtanh.f32 %v9261_v11  ;;  %v8983_v51 = vpop.f32.mrf.mxu3  ;;  %v8927_v55 = vpop.f32.mrf.mxu1 }
 0x7d5   :  { %v8954_v6 = vpop.f32.mrf.mxu2  ;;  %v9466_v21 = vadd.f32 %v22337_v61, %v9399_v50  ;;  %v8928_v26 = vadd.f32 %v8927_v55, %v8899_v52 }
 0x7d6   :  { %v8955_v48 = vadd.f32 %v8954_v6, %v8926_v57 }
 0x7d7   :  { %9467 = vadd.xlane.f32.xlu2 %v9466_v21 }
 0x7d8   :  { %v8984_v49 = vadd.f32 %v8983_v51, %v8955_v48 }
 0x7da   :  { %v14799_v62 = vpop.eup %14798  ;;  %v9269_v8 = vadd.f32 %v9141_v12, %v8984_v49 }
 0x7db   :  { %v9407_v13 = vmul.f32 %v14799_v62, %v22390_v19 }
 0x7dc   :  { %14800 = vtanh.f32 %v9269_v8  ;;  %v8985_v43 = vpop.f32.mrf.mxu3 }
 0x7dd   :  { %v8956_v18 = vpop.f32.mrf.mxu2  ;;  %v9475_v45 = vadd.f32 %v22343_v10, %v9407_v13 }
 0x7de   :  { %v8957_v61 = vadd.f32 %v8956_v18, %v8928_v26 }
 0x7df   :  { %9476 = vadd.xlane.f32.xlu2 %v9475_v45 }
 0x7e0   :  { %v8986_v38 = vadd.f32 %v8985_v43, %v8957_v61 }
 0x7e2   :  { %v14801_v47 = vpop.eup %14800  ;;  %v9277_v59 = vadd.f32 %v9149_v16, %v8986_v38 }
 0x7e3   :  { %v9415_v4 = vmul.f32 %v14801_v47, %v22390_v19 }
 0x7e4   :  { %14802 = vtanh.f32 %v9277_v59 }
 0x7e5   :  { %v9484_v27 = vadd.f32 %v22348_v32, %v9415_v4 }
 0x7e7   :  { %9485 = vadd.xlane.f32.xlu0 %v9484_v27 }
 0x7ea   :  { %v14803_v20 = vpop.eup %14802 }
 0x7eb   :  { %v9423_v7 = vmul.f32 %v14803_v20, %v22390_v19 }
 0x7ed   :  { %v9493_v63 = vadd.f32 %v22579_v24, %v9423_v7 }
 0x7ef   :  { %9494 = vadd.xlane.f32.xlu1 %v9493_v63 }
 0x82a   :  { %v9432_v10 = vpop.xlane.xlu0 %9431 }
 0x82b   :  { %v9508_v9 = vperm.slane %v9432_v10, %v9507_v40 }
 0x832   :  { %v9441_v54 = vpop.xlane.xlu0 %9440 }
 0x833   :  { %v9509_v22 = vperm.slane %v9441_v54, %v9507_v40 }
 0x835   :  { %v9516_v25 = vsel %vm9017_vm2, %v9509_v22, %v9508_v9  ;;  %vm9526_vm2 = vcmask 64512  }
 0x83a   :  { %v9450_v42 = vpop.xlane.xlu1 %9449 }
 0x83b   :  { %v9510_v17 = vperm.slane %v9450_v42, %v9507_v40 }
 0x83d   :  { %v9517_v37 = vsel %vm22580_vm9, %v9510_v17, %v9516_v25 }
 0x842   :  { %v9459_v3 = vpop.xlane.xlu1 %9458 }
 0x843   :  { %v9511_v30 = vperm.slane %v9459_v3, %v9507_v40 }
 0x845   :  { %v9518_v0 = vsel %vm9019_vm3, %v9511_v30, %v9517_v37 }
 0x84a   :  { %v9468_v44 = vpop.xlane.xlu2 %9467 }
 0x84b   :  { %v9512_v29 = vperm.slane %v9468_v44, %v9507_v40 }
 0x84d   :  { %v9519_v46 = vsel %vm9009_vm7, %v9512_v29, %v9518_v0 }
 0x852   :  { %v9477_v58 = vpop.xlane.xlu2 %9476 }
 0x853   :  { %v9513_v19 = vperm.slane %v9477_v58, %v9507_v40 }
 0x855   :  { %v9520_v28 = vsel %vm9023_vm4, %v9513_v19, %v9519_v46 }
 0x85a   :  { %v9486_v32 = vpop.xlane.xlu0 %9485 }
 0x85b   :  { %v9514_v41 = vperm.slane %v9486_v32, %v9507_v40 }
 0x85d   :  { %v9521_v2 = vsel %vm9011_vm1, %v9514_v41, %v9520_v28 }
 0x862   :  { %v9495_v36 = vpop.xlane.xlu1 %9494 }
 0x863   :  { %v9515_v34 = vperm.slane %v9495_v36, %v9507_v40 }
 0x865   :  { %v9523_v60 = vsel %vm9522_vm10, %v9515_v34, %v9521_v2 }
 0x866   :  { %v9525_v15 = vsel %vm9497_vm11, %v9523_v60, -1e+10 }
 0x867   :  { %v9527_v31 = vsel %vm9526_vm2, %v9525_v15, -inf }
 0x868   :  { %9528 = vmax.xlane.f32.xlu2 %v9527_v31 }
 0x8db   :  { %v9529_v33 = vpop.xlane.xlu2 %9528 }
 0x8dc   :  { %v9530_v39 = vsub.f32 %v9525_v15, %v9529_v33 }
 0x8de   :  { %v9531_v1 = vmul.f32 1.442695, %v9530_v39 }
 0x8e0   :  { %14804 = vpow2.f32 %v9531_v1 }
 0x8e6   :  { %v14805_v35 = vpop.eup %14804 }
 0x8e7   :  { %v9533_v14 = vsel %vm9526_vm2, %v14805_v35, 0.0 }
 0x8e8   :  { %9534 = vadd.xlane.f32.xlu0 %v9533_v14 }
 0x95b   :  { %v9535_v11 = vpop.xlane.xlu0 %9534 }
 0x95c   :  { %14806 = vrcp.f32 %v9535_v11  ;;  %v9547_v23 = vand.u32 2147483648, %v9535_v11  ;;  %v9545_v56 = vand.u32 2147483647, %v9535_v11  ;;  %vm9541_vm3 = vweird.f32 %v9535_v11 }
 0x95e   :  { %v9548_v51 = vor.u32 1.1754944e-38, %v9547_v23  ;;  %vm9546_vm7 = vcmp.eq.f32.partialorder %v9545_v56, 8.507059e+37 }
 0x962   :  { %v14807_v50 = vpop.eup %14806 }
 0x963   :  { %v9537_v57 = vmul.f32 %v14807_v50, %v9535_v11  ;;  %vm9542_vm1 = vweird.f32 %v14807_v50 }
 0x964   :  { %vm9543_vm4 = vmor %vm9541_vm3, %vm9542_vm1 }
 0x965   :  { %v9538_v6 = vsub.f32 1.0, %v9537_v57 }
 0x967   :  { %v9539_v21 = vmul.f32 %v14807_v50, %v9538_v6 }
 0x969   :  { %v9540_v48 = vadd.f32 %v14807_v50, %v9539_v21 }
 0x96b   :  { %v9544_v49 = vsel %vm9543_vm4, %v14807_v50, %v9540_v48 }
 0x96c   :  { %v9549_v12 = vsel %vm9546_vm7, %v9548_v51, %v9544_v49 }
 0x96d   :  { %v9550_v52 = vmul.f32 %v14805_v35, %v9549_v12 }
 0x96f   :  { %9551 = vst.msk [vmem:[%s22453_s7] sm:$0xff] %vm9526_vm2, %v9550_v52 }

</bundles_post_ra>
